<compile_context>
chip_gen: v7x
topology: tpu7x:2x2x1
jax: 0.10.0
libtpu: 0.0.40
codegen_flags: <defaults>
</compile_context>

<pallas_src>
import functools
import math

import jax
import jax.numpy as jnp
from jax.experimental import pallas as pl

# ---- scaled-down synthetic BERT config (lane-dense: H = 128) ----
CLIP_DIM = 128       # clip_dim            (512 in reference)
MLP_HIDDEN = 128     # build_mlp hidden    (512 in reference)
HIDDEN = 128         # projection_dim == BERT hidden (768 in reference)
NUM_HEADS = 4
HEAD_DIM = HIDDEN // NUM_HEADS
INTERMEDIATE = 256   # BERT FFN intermediate (3072 in reference)
NUM_LAYERS = 2       # BERT encoder layers  (12 in reference)
VOCAB = 50
MAX_POS = 64
TYPE_VOCAB = 2
LN_EPS_MLP = 1e-5    # nn.LayerNorm default
LN_EPS_BERT = 1e-12  # HF BERT LayerNorm eps


# ----------------------------- in-kernel helpers -----------------------------
def _layer_norm(x, g, b, eps):
    mu = jnp.mean(x, axis=-1, keepdims=True)
    var = jnp.mean((x - mu) ** 2, axis=-1, keepdims=True)
    return (x - mu) * jax.lax.rsqrt(var + eps) * g + b


def _gelu(x):
    # tanh approximation (jax.nn.gelu default)
    return jax.nn.gelu(x)


# ----------------------------- fused forward kernel --------------------------
def fused_kernel(clip_ref, fpw1_ref, fpb1_ref, fpg_ref, fpbt_ref, fpw2_ref, fpb2_ref,
                 fpos_ref, word_ref, pos_ref, type_ref, eg_ref, ebt_ref, mask_ref,
                 wqkv_ref, bqkv_ref, wo_ref, bo_ref, l1g_ref, l1b_ref,
                 wi_ref, bi_ref, wo2_ref, bo2_ref, l2g_ref, l2b_ref,
                 clsw_ref, clsb_ref,
                 out_ref,
                 *, num_heads, head_dim, text_len, num_layers):
    bf16 = jnp.bfloat16
    B, S, H = word_ref.shape
    M = B * S

    # ---- frame_projection: Linear -> LayerNorm -> GELU -> Linear, then += pos_emb[L] ----
    clip = clip_ref[...]                                                  # (B, CLIP) f32
    h = jnp.dot(clip.astype(bf16), fpw1_ref[...],
                preferred_element_type=jnp.float32) + fpb1_ref[...]
    h = _layer_norm(h, fpg_ref[...], fpbt_ref[...], LN_EPS_MLP)
    h = _gelu(h)
    frame = jnp.dot(h.astype(bf16), fpw2_ref[...],
                    preferred_element_type=jnp.float32) + fpb2_ref[...]
    frame = frame + fpos_ref[...]                                         # (B, H) f32

    # ---- bert.embeddings(input_ids): word + position + token_type -> LayerNorm ----
    emb = word_ref[...] + pos_ref[...][None, :, :] + type_ref[...][None, :, :]
    text = _layer_norm(emb, eg_ref[...], ebt_ref[...], LN_EPS_BERT)       # (B, S, H); row L is padding

    # cat([text_embeddings, frame_embeddings.unsqueeze(1)], dim=1) — full-tile select, no partial stores
    seq_ids = jax.lax.broadcasted_iota(jnp.int32, (B, S, H), 1)
    x = jnp.where(seq_ids < text_len, text, frame[:, None, :])            # (B, S, H) f32

    mask_bias = mask_ref[...]                                             # (B, 1, S) f32
    scale = 1.0 / math.sqrt(head_dim)

    # ---- BERT encoder layers (unrolled; weights resident in VMEM, activation in registers) ----
    # TODO(synk): for large NUM_LAYERS switch to lax.fori_loop with dynamic wqkv_ref[l] indexing.
    for l in range(num_layers):
        x2 = x.reshape(M, H)                                              # (M, H) f32
        x2b = x2.astype(bf16)

        # fused QKV projection on the flattened batch*seq axis
        qkv = jnp.dot(x2b, wqkv_ref[l], preferred_element_type=jnp.float32) + bqkv_ref[l]
        q = qkv[:, :H].reshape(B, S, H)
        k = qkv[:, H:2 * H].reshape(B, S, H)
        v = qkv[:, 2 * H:].reshape(B, S, H)

        wo_l = wo_ref[l]                                                  # (H, H) bf16
        attn = None
        for hh in range(num_heads):
            sl = slice(hh * head_dim, (hh + 1) * head_dim)
            qh = q[:, :, sl].astype(bf16)
            kh = k[:, :, sl].astype(bf16)
            vh = v[:, :, sl].astype(bf16)
            sc = jnp.einsum("bqd,bkd->bqk", qh, kh,
                            preferred_element_type=jnp.float32) * scale + mask_bias
            sc = sc - jnp.max(sc, axis=-1, keepdims=True)
            p = jnp.exp(sc)
            p = p * pl.reciprocal(jnp.sum(p, axis=-1, keepdims=True), approx=True)
            ctx = jnp.einsum("bqk,bkd->bqd", p.astype(bf16), vh,
                             preferred_element_type=jnp.float32)          # (B, S, hd) f32
            # fold head context straight into the output projection (no ctx scratch / lane stores)
            part = jnp.dot(ctx.reshape(M, head_dim).astype(bf16), wo_l[sl, :],
                           preferred_element_type=jnp.float32)
            attn = part if attn is None else attn + part
        attn = attn + bo_ref[l]                                           # (M, H) f32

        h1 = _layer_norm(x2 + attn, l1g_ref[l], l1b_ref[l], LN_EPS_BERT)  # (M, H) f32

        ff = _gelu(jnp.dot(h1.astype(bf16), wi_ref[l],
                           preferred_element_type=jnp.float32) + bi_ref[l])
        ff = jnp.dot(ff.astype(bf16), wo2_ref[l],
                     preferred_element_type=jnp.float32) + bo2_ref[l]
        x = _layer_norm(h1 + ff, l2g_ref[l], l2b_ref[l], LN_EPS_BERT).reshape(B, S, H)

    # ---- classification head on the [CLS] token (VPU multiply + lane reduce, no N=1 MXU dot) ----
    cls = x[:, 0, :]                                                      # (B, H) f32
    logits = jnp.sum(cls * clsw_ref[...], axis=-1, keepdims=True) + clsb_ref[...]
    out_ref[...] = logits                                                 # (B, 1)


# ----------------------------- full forward -----------------------------------
def model_forward(params, clip_embeddings, input_ids, attention_mask):
    B, L = input_ids.shape
    S = L + 1
    H = HIDDEN
    NL = params["wqkv"].shape[0]

    # plain-JAX glue: embedding gather + mask bookkeeping (everything else is inside the kernel)
    word = jnp.take(params["word_emb"], input_ids, axis=0)                # (B, L, H)
    word_pad = jnp.concatenate([word, jnp.zeros((B, 1, H), word.dtype)], axis=1)  # (B, S, H)
    pos_slice = params["pos_emb"][:S]                                     # (S, H) (row L unused)
    type_row = params["type_emb"][0:1]                                    # (1, H)
    frame_pos = params["pos_emb"][L][None, :]                             # (1, H)
    mask = jnp.concatenate(
        [attention_mask.astype(jnp.float32), jnp.ones((B, 1), jnp.float32)], axis=1)
    mask_bias = ((1.0 - mask) * -1e9)[:, None, :]                         # (B, 1, S) f32

    out = pl.pallas_call(
        functools.partial(fused_kernel, num_heads=NUM_HEADS, head_dim=HEAD_DIM,
                          text_len=L, num_layers=NL),
        out_shape=jax.ShapeDtypeStruct((B, 1), jnp.float32),
    )(clip_embeddings,
      params["fp_w1"], params["fp_b1"], params["fp_ln_g"], params["fp_ln_b"],
      params["fp_w2"], params["fp_b2"], frame_pos,
      word_pad, pos_slice, type_row, params["emb_ln_g"], params["emb_ln_b"], mask_bias,
      params["wqkv"], params["bqkv"], params["wo"], params["bo"],
      params["ln1_g"], params["ln1_b"], params["wi"], params["bi"],
      params["wo2"], params["bo2"], params["ln2_g"], params["ln2_b"],
      params["cls_w"], params["cls_b"])
    return out                                                            # (B, 1)


# ----------------------------- deterministic params ---------------------------
def init_params(key):
    keys = iter(jax.random.split(key, 64))
    bf = jnp.bfloat16

    def nrm(shape, dtype=jnp.float32, scale=0.02):
        return (scale * jax.random.normal(next(keys), shape, jnp.float32)).astype(dtype)

    def zeros(shape):
        return jnp.zeros(shape, jnp.float32)

    def ones(shape):
        return jnp.ones(shape, jnp.float32)

    NL = NUM_LAYERS
    return {
        # frame_projection: Linear(clip, mlp_hidden) -> LN -> GELU -> Linear(mlp_hidden, H)
        "fp_w1": nrm((CLIP_DIM, MLP_HIDDEN), bf), "fp_b1": zeros((1, MLP_HIDDEN)),
        "fp_ln_g": ones((1, MLP_HIDDEN)), "fp_ln_b": zeros((1, MLP_HIDDEN)),
        "fp_w2": nrm((MLP_HIDDEN, HIDDEN), bf), "fp_b2": zeros((1, HIDDEN)),
        # bert embeddings
        "word_emb": nrm((VOCAB, HIDDEN)),
        "pos_emb": nrm((MAX_POS, HIDDEN)),
        "type_emb": nrm((TYPE_VOCAB, HIDDEN)),
        "emb_ln_g": ones((1, HIDDEN)), "emb_ln_b": zeros((1, HIDDEN)),
        # classification_head: Linear(H, 1) stored as a (1, H) row for the VPU reduce
        "cls_w": nrm((1, HIDDEN)), "cls_b": zeros((1, 1)),
        # stacked per-layer BERT encoder weights (layer axis first, MXU matrices in bf16)
        "wqkv": nrm((NL, HIDDEN, 3 * HIDDEN), bf), "bqkv": zeros((NL, 1, 3 * HIDDEN)),
        "wo": nrm((NL, HIDDEN, HIDDEN), bf), "bo": zeros((NL, 1, HIDDEN)),
        "ln1_g": ones((NL, 1, HIDDEN)), "ln1_b": zeros((NL, 1, HIDDEN)),
        "wi": nrm((NL, HIDDEN, INTERMEDIATE), bf), "bi": zeros((NL, 1, INTERMEDIATE)),
        "wo2": nrm((NL, INTERMEDIATE, HIDDEN), bf), "bo2": zeros((NL, 1, HIDDEN)),
        "ln2_g": ones((NL, 1, HIDDEN)), "ln2_b": zeros((NL, 1, HIDDEN)),
    }


# ----------------------------- main --------------------------------------------
if __name__ == "__main__":
    key = jax.random.PRNGKey(0)
    pk, ck, ik = jax.random.split(key, 3)
    params = init_params(pk)

    B, L = 4, 15   # S = L + 1 = 16 (multiple of 8 -> sublane-friendly)
    clip_embeddings = jax.random.normal(ck, (B, CLIP_DIM), jnp.float32)
    input_ids = jax.random.randint(ik, (B, L), 0, VOCAB, dtype=jnp.int32)
    # some samples have padded positions (as a tokenizer with padding would produce)
    attention_mask = jnp.array(
        [[1] * L,
         [1] * (L - 3) + [0] * 3,
         [1] * (L - 5) + [0] * 5,
         [1] * L], dtype=jnp.int32)

    fwd = jax.jit(model_forward)
    logits = fwd(params, clip_embeddings, input_ids, attention_mask)
    jax.block_until_ready(logits)
    assert logits.shape == (B, 1) and logits.dtype == jnp.float32
    assert bool(jnp.all(jnp.isfinite(logits)))
    print("KERNEL_OK")
</pallas_src>

<mosaic_0001>
module attributes {stable_mosaic.version = 11 : i64} {
  func.func @fused_kernel(%arg0: memref<4x128xf32, #tpu.memory_space<vmem>>, %arg1: memref<128x128xbf16, #tpu.memory_space<vmem>>, %arg2: memref<1x128xf32, #tpu.memory_space<vmem>>, %arg3: memref<1x128xf32, #tpu.memory_space<vmem>>, %arg4: memref<1x128xf32, #tpu.memory_space<vmem>>, %arg5: memref<128x128xbf16, #tpu.memory_space<vmem>>, %arg6: memref<1x128xf32, #tpu.memory_space<vmem>>, %arg7: memref<1x128xf32, #tpu.memory_space<vmem>>, %arg8: memref<4x16x128xf32, #tpu.memory_space<vmem>>, %arg9: memref<16x128xf32, #tpu.memory_space<vmem>>, %arg10: memref<1x128xf32, #tpu.memory_space<vmem>>, %arg11: memref<1x128xf32, #tpu.memory_space<vmem>>, %arg12: memref<1x128xf32, #tpu.memory_space<vmem>>, %arg13: memref<4x1x16xf32, #tpu.memory_space<vmem>>, %arg14: memref<2x128x384xbf16, #tpu.memory_space<vmem>>, %arg15: memref<2x1x384xf32, #tpu.memory_space<vmem>>, %arg16: memref<2x128x128xbf16, #tpu.memory_space<vmem>>, %arg17: memref<2x1x128xf32, #tpu.memory_space<vmem>>, %arg18: memref<2x1x128xf32, #tpu.memory_space<vmem>>, %arg19: memref<2x1x128xf32, #tpu.memory_space<vmem>>, %arg20: memref<2x128x256xbf16, #tpu.memory_space<vmem>>, %arg21: memref<2x1x256xf32, #tpu.memory_space<vmem>>, %arg22: memref<2x256x128xbf16, #tpu.memory_space<vmem>>, %arg23: memref<2x1x128xf32, #tpu.memory_space<vmem>>, %arg24: memref<2x1x128xf32, #tpu.memory_space<vmem>>, %arg25: memref<2x1x128xf32, #tpu.memory_space<vmem>>, %arg26: memref<1x128xf32, #tpu.memory_space<vmem>>, %arg27: memref<1x1xf32, #tpu.memory_space<vmem>>, %arg28: memref<4x1xf32, #tpu.memory_space<vmem>>) attributes {dimension_semantics = [], scalar_prefetch = 0 : i64, scratch_operands = 0 : i64, tpu.core_type = #tpu.core_type<tc>} {
    %c0 = arith.constant 0 : index
    %c0_0 = arith.constant 0 : index
    %0 = vector.load %arg0[%c0, %c0_0] : memref<4x128xf32, #tpu.memory_space<vmem>>, vector<4x128xf32>
    %1 = arith.truncf %0 : vector<4x128xf32> to vector<4x128xbf16>
    %c0_1 = arith.constant 0 : index
    %c0_2 = arith.constant 0 : index
    %2 = vector.load %arg1[%c0_1, %c0_2] : memref<128x128xbf16, #tpu.memory_space<vmem>>, vector<128x128xbf16>
    %cst = arith.constant dense<0.000000e+00> : vector<4x128xf32>
    %3 = tpu.matmul %1, %2, %cst {dimension_numbers = #tpu.dot_dimension_numbers<[1], [0], [0], [1], [0, 0, 1, 1], [], []>} : vector<4x128xbf16>, vector<128x128xbf16>, vector<4x128xf32> -> vector<4x128xf32>
    %c0_3 = arith.constant 0 : index
    %c0_4 = arith.constant 0 : index
    %4 = vector.load %arg2[%c0_3, %c0_4] : memref<1x128xf32, #tpu.memory_space<vmem>>, vector<1x128xf32>
    %5 = vector.broadcast %4 : vector<1x128xf32> to vector<4x128xf32>
    %6 = arith.addf %3, %5 : vector<4x128xf32>
    %c0_5 = arith.constant 0 : index
    %c0_6 = arith.constant 0 : index
    %7 = vector.load %arg3[%c0_5, %c0_6] : memref<1x128xf32, #tpu.memory_space<vmem>>, vector<1x128xf32>
    %c0_7 = arith.constant 0 : index
    %c0_8 = arith.constant 0 : index
    %8 = vector.load %arg4[%c0_7, %c0_8] : memref<1x128xf32, #tpu.memory_space<vmem>>, vector<1x128xf32>
    %cst_9 = arith.constant dense<0.000000e+00> : vector<4xf32>
    %9 = vector.multi_reduction <add>, %6, %cst_9 [1] : vector<4x128xf32> to vector<4xf32>
    %10 = vector.shape_cast %9 : vector<4xf32> to vector<4x1xf32>
    %cst_10 = arith.constant 1.280000e+02 : f32
    %11 = vector.broadcast %cst_10 : f32 to vector<4x1xf32>
    %12 = arith.divf %10, %11 : vector<4x1xf32>
    %13 = vector.broadcast %12 : vector<4x1xf32> to vector<4x128xf32>
    %14 = arith.subf %6, %13 : vector<4x128xf32>
    %15 = arith.mulf %14, %14 : vector<4x128xf32>
    %cst_11 = arith.constant dense<0.000000e+00> : vector<4xf32>
    %16 = vector.multi_reduction <add>, %15, %cst_11 [1] : vector<4x128xf32> to vector<4xf32>
    %17 = vector.shape_cast %16 : vector<4xf32> to vector<4x1xf32>
    %cst_12 = arith.constant 1.280000e+02 : f32
    %18 = vector.broadcast %cst_12 : f32 to vector<4x1xf32>
    %19 = arith.divf %17, %18 : vector<4x1xf32>
    %20 = vector.broadcast %12 : vector<4x1xf32> to vector<4x128xf32>
    %21 = arith.subf %6, %20 : vector<4x128xf32>
    %cst_13 = arith.constant 9.99999974E-6 : f32
    %22 = vector.broadcast %cst_13 : f32 to vector<4x1xf32>
    %23 = arith.addf %19, %22 : vector<4x1xf32>
    %24 = math.rsqrt %23 : vector<4x1xf32>
    %25 = vector.broadcast %24 : vector<4x1xf32> to vector<4x128xf32>
    %26 = arith.mulf %21, %25 : vector<4x128xf32>
    %27 = vector.broadcast %7 : vector<1x128xf32> to vector<4x128xf32>
    %28 = arith.mulf %26, %27 : vector<4x128xf32>
    %29 = vector.broadcast %8 : vector<1x128xf32> to vector<4x128xf32>
    %30 = arith.addf %28, %29 : vector<4x128xf32>
    %31 = arith.mulf %30, %30 : vector<4x128xf32>
    %32 = arith.mulf %30, %31 : vector<4x128xf32>
    %cst_14 = arith.constant 4.471500e-02 : f32
    %33 = vector.broadcast %cst_14 : f32 to vector<4x128xf32>
    %34 = arith.mulf %33, %32 : vector<4x128xf32>
    %35 = arith.addf %30, %34 : vector<4x128xf32>
    %cst_15 = arith.constant 0.797884583 : f32
    %36 = vector.broadcast %cst_15 : f32 to vector<4x128xf32>
    %37 = arith.mulf %36, %35 : vector<4x128xf32>
    %38 = math.tanh %37 : vector<4x128xf32>
    %cst_16 = arith.constant 1.000000e+00 : f32
    %39 = vector.broadcast %cst_16 : f32 to vector<4x128xf32>
    %40 = arith.addf %39, %38 : vector<4x128xf32>
    %cst_17 = arith.constant 5.000000e-01 : f32
    %41 = vector.broadcast %cst_17 : f32 to vector<4x128xf32>
    %42 = arith.mulf %41, %40 : vector<4x128xf32>
    %43 = arith.mulf %30, %42 : vector<4x128xf32>
    %44 = arith.truncf %43 : vector<4x128xf32> to vector<4x128xbf16>
    %c0_18 = arith.constant 0 : index
    %c0_19 = arith.constant 0 : index
    %45 = vector.load %arg5[%c0_18, %c0_19] : memref<128x128xbf16, #tpu.memory_space<vmem>>, vector<128x128xbf16>
    %cst_20 = arith.constant dense<0.000000e+00> : vector<4x128xf32>
    %46 = tpu.matmul %44, %45, %cst_20 {dimension_numbers = #tpu.dot_dimension_numbers<[1], [0], [0], [1], [0, 0, 1, 1], [], []>} : vector<4x128xbf16>, vector<128x128xbf16>, vector<4x128xf32> -> vector<4x128xf32>
    %c0_21 = arith.constant 0 : index
    %c0_22 = arith.constant 0 : index
    %47 = vector.load %arg6[%c0_21, %c0_22] : memref<1x128xf32, #tpu.memory_space<vmem>>, vector<1x128xf32>
    %48 = vector.broadcast %47 : vector<1x128xf32> to vector<4x128xf32>
    %49 = arith.addf %46, %48 : vector<4x128xf32>
    %c0_23 = arith.constant 0 : index
    %c0_24 = arith.constant 0 : index
    %50 = vector.load %arg7[%c0_23, %c0_24] : memref<1x128xf32, #tpu.memory_space<vmem>>, vector<1x128xf32>
    %51 = vector.broadcast %50 : vector<1x128xf32> to vector<4x128xf32>
    %52 = arith.addf %49, %51 : vector<4x128xf32>
    %c0_25 = arith.constant 0 : index
    %c0_26 = arith.constant 0 : index
    %c0_27 = arith.constant 0 : index
    %53 = vector.load %arg8[%c0_25, %c0_26, %c0_27] : memref<4x16x128xf32, #tpu.memory_space<vmem>>, vector<4x16x128xf32>
    %c0_28 = arith.constant 0 : index
    %c0_29 = arith.constant 0 : index
    %54 = vector.load %arg9[%c0_28, %c0_29] : memref<16x128xf32, #tpu.memory_space<vmem>>, vector<16x128xf32>
    %55 = vector.shape_cast %54 : vector<16x128xf32> to vector<1x16x128xf32>
    %56 = vector.broadcast %55 : vector<1x16x128xf32> to vector<4x16x128xf32>
    %57 = arith.addf %53, %56 : vector<4x16x128xf32>
    %c0_30 = arith.constant 0 : index
    %c0_31 = arith.constant 0 : index
    %58 = vector.load %arg10[%c0_30, %c0_31] : memref<1x128xf32, #tpu.memory_space<vmem>>, vector<1x128xf32>
    %59 = vector.shape_cast %58 : vector<1x128xf32> to vector<1x1x128xf32>
    %60 = vector.broadcast %59 : vector<1x1x128xf32> to vector<4x16x128xf32>
    %61 = arith.addf %57, %60 : vector<4x16x128xf32>
    %c0_32 = arith.constant 0 : index
    %c0_33 = arith.constant 0 : index
    %62 = vector.load %arg11[%c0_32, %c0_33] : memref<1x128xf32, #tpu.memory_space<vmem>>, vector<1x128xf32>
    %c0_34 = arith.constant 0 : index
    %c0_35 = arith.constant 0 : index
    %63 = vector.load %arg12[%c0_34, %c0_35] : memref<1x128xf32, #tpu.memory_space<vmem>>, vector<1x128xf32>
    %cst_36 = arith.constant dense<0.000000e+00> : vector<4x16xf32>
    %64 = vector.multi_reduction <add>, %61, %cst_36 [2] : vector<4x16x128xf32> to vector<4x16xf32>
    %65 = vector.shape_cast %64 : vector<4x16xf32> to vector<4x16x1xf32>
    %cst_37 = arith.constant 1.280000e+02 : f32
    %66 = vector.broadcast %cst_37 : f32 to vector<4x16x1xf32>
    %67 = arith.divf %65, %66 : vector<4x16x1xf32>
    %68 = vector.broadcast %67 : vector<4x16x1xf32> to vector<4x16x128xf32>
    %69 = arith.subf %61, %68 : vector<4x16x128xf32>
    %70 = arith.mulf %69, %69 : vector<4x16x128xf32>
    %cst_38 = arith.constant dense<0.000000e+00> : vector<4x16xf32>
    %71 = vector.multi_reduction <add>, %70, %cst_38 [2] : vector<4x16x128xf32> to vector<4x16xf32>
    %72 = vector.shape_cast %71 : vector<4x16xf32> to vector<4x16x1xf32>
    %cst_39 = arith.constant 1.280000e+02 : f32
    %73 = vector.broadcast %cst_39 : f32 to vector<4x16x1xf32>
    %74 = arith.divf %72, %73 : vector<4x16x1xf32>
    %75 = vector.broadcast %67 : vector<4x16x1xf32> to vector<4x16x128xf32>
    %76 = arith.subf %61, %75 : vector<4x16x128xf32>
    %cst_40 = arith.constant 9.99999996E-13 : f32
    %77 = vector.broadcast %cst_40 : f32 to vector<4x16x1xf32>
    %78 = arith.addf %74, %77 : vector<4x16x1xf32>
    %79 = math.rsqrt %78 : vector<4x16x1xf32>
    %80 = vector.broadcast %79 : vector<4x16x1xf32> to vector<4x16x128xf32>
    %81 = arith.mulf %76, %80 : vector<4x16x128xf32>
    %82 = vector.shape_cast %62 : vector<1x128xf32> to vector<1x1x128xf32>
    %83 = vector.broadcast %82 : vector<1x1x128xf32> to vector<4x16x128xf32>
    %84 = arith.mulf %81, %83 : vector<4x16x128xf32>
    %85 = vector.shape_cast %63 : vector<1x128xf32> to vector<1x1x128xf32>
    %86 = vector.broadcast %85 : vector<1x1x128xf32> to vector<4x16x128xf32>
    %87 = arith.addf %84, %86 : vector<4x16x128xf32>
    %88 = tpu.iota {dimensions = array<i32: 1>} : vector<4x16x128xi32>
    %c15_i32 = arith.constant 15 : i32
    %89 = vector.broadcast %c15_i32 : i32 to vector<4x16x128xi32>
    %90 = arith.cmpi slt, %88, %89 : vector<4x16x128xi32>
    %91 = vector.shape_cast %52 : vector<4x128xf32> to vector<4x1x128xf32>
    %92 = vector.shape_cast %91 : vector<4x1x128xf32> to vector<4x1x128xf32>
    %93 = vector.broadcast %92 : vector<4x1x128xf32> to vector<4x16x128xf32>
    %94 = arith.select %90, %87, %93 : vector<4x16x128xi1>, vector<4x16x128xf32>
    %c0_41 = arith.constant 0 : index
    %c0_42 = arith.constant 0 : index
    %c0_43 = arith.constant 0 : index
    %95 = vector.load %arg13[%c0_41, %c0_42, %c0_43] : memref<4x1x16xf32, #tpu.memory_space<vmem>>, vector<4x1x16xf32>
    %96 = vector.shape_cast %94 : vector<4x16x128xf32> to vector<64x128xf32>
    %97 = arith.truncf %96 : vector<64x128xf32> to vector<64x128xbf16>
    %c0_44 = arith.constant 0 : index
    %c0_45 = arith.constant 0 : index
    %c0_46 = arith.constant 0 : index
    %98 = vector.load %arg14[%c0_44, %c0_45, %c0_46] : memref<2x128x384xbf16, #tpu.memory_space<vmem>>, vector<1x128x384xbf16>
    %99 = vector.shape_cast %98 : vector<1x128x384xbf16> to vector<128x384xbf16>
    %cst_47 = arith.constant dense<0.000000e+00> : vector<64x384xf32>
    %100 = tpu.matmul %97, %99, %cst_47 {dimension_numbers = #tpu.dot_dimension_numbers<[1], [0], [0], [1], [0, 0, 1, 1], [], []>} : vector<64x128xbf16>, vector<128x384xbf16>, vector<64x384xf32> -> vector<64x384xf32>
    %c0_48 = arith.constant 0 : index
    %c0_49 = arith.constant 0 : index
    %c0_50 = arith.constant 0 : index
    %101 = vector.load %arg15[%c0_48, %c0_49, %c0_50] : memref<2x1x384xf32, #tpu.memory_space<vmem>>, vector<1x1x384xf32>
    %102 = vector.shape_cast %101 : vector<1x1x384xf32> to vector<1x384xf32>
    %103 = vector.broadcast %102 : vector<1x384xf32> to vector<64x384xf32>
    %104 = arith.addf %100, %103 : vector<64x384xf32>
    %105 = vector.extract_strided_slice %104 {offsets = [0, 0], sizes = [64, 128], strides = [1, 1]} : vector<64x384xf32> to vector<64x128xf32>
    %106 = vector.shape_cast %105 : vector<64x128xf32> to vector<4x16x128xf32>
    %107 = vector.extract_strided_slice %104 {offsets = [0, 128], sizes = [64, 128], strides = [1, 1]} : vector<64x384xf32> to vector<64x128xf32>
    %108 = vector.shape_cast %107 : vector<64x128xf32> to vector<4x16x128xf32>
    %109 = vector.extract_strided_slice %104 {offsets = [0, 256], sizes = [64, 128], strides = [1, 1]} : vector<64x384xf32> to vector<64x128xf32>
    %110 = vector.shape_cast %109 : vector<64x128xf32> to vector<4x16x128xf32>
    %c0_51 = arith.constant 0 : index
    %c0_52 = arith.constant 0 : index
    %c0_53 = arith.constant 0 : index
    %111 = vector.load %arg16[%c0_51, %c0_52, %c0_53] : memref<2x128x128xbf16, #tpu.memory_space<vmem>>, vector<1x128x128xbf16>
    %112 = vector.shape_cast %111 : vector<1x128x128xbf16> to vector<128x128xbf16>
    %113 = vector.extract_strided_slice %106 {offsets = [0, 0, 0], sizes = [4, 16, 32], strides = [1, 1, 1]} : vector<4x16x128xf32> to vector<4x16x32xf32>
    %114 = arith.truncf %113 : vector<4x16x32xf32> to vector<4x16x32xbf16>
    %115 = vector.extract_strided_slice %108 {offsets = [0, 0, 0], sizes = [4, 16, 32], strides = [1, 1, 1]} : vector<4x16x128xf32> to vector<4x16x32xf32>
    %116 = arith.truncf %115 : vector<4x16x32xf32> to vector<4x16x32xbf16>
    %117 = vector.extract_strided_slice %110 {offsets = [0, 0, 0], sizes = [4, 16, 32], strides = [1, 1, 1]} : vector<4x16x128xf32> to vector<4x16x32xf32>
    %118 = arith.truncf %117 : vector<4x16x32xf32> to vector<4x16x32xbf16>
    "tpu.trace_start"() <{level = 10 : i32, message = "bqd,bkd->bqk"}> : () -> ()
    %cst_54 = arith.constant dense<0.000000e+00> : vector<4x16x16xf32>
    %119 = tpu.matmul %114, %116, %cst_54 {dimension_numbers = #tpu.dot_dimension_numbers<[2], [2], [1], [1], [0, 0, 0, 1, 1, 1], [0], [0]>} : vector<4x16x32xbf16>, vector<4x16x32xbf16>, vector<4x16x16xf32> -> vector<4x16x16xf32>
    "tpu.trace_stop"() : () -> ()
    %cst_55 = arith.constant 0.176776692 : f32
    %120 = vector.broadcast %cst_55 : f32 to vector<4x16x16xf32>
    %121 = arith.mulf %119, %120 : vector<4x16x16xf32>
    %122 = vector.broadcast %95 : vector<4x1x16xf32> to vector<4x16x16xf32>
    %123 = arith.addf %121, %122 : vector<4x16x16xf32>
    %cst_56 = arith.constant dense<0xFF800000> : vector<4x16xf32>
    %124 = vector.multi_reduction <maximumf>, %123, %cst_56 [2] : vector<4x16x16xf32> to vector<4x16xf32>
    %125 = vector.shape_cast %124 : vector<4x16xf32> to vector<4x16x1xf32>
    %126 = vector.broadcast %125 : vector<4x16x1xf32> to vector<4x16x16xf32>
    %127 = arith.subf %123, %126 : vector<4x16x16xf32>
    %128 = math.exp %127 : vector<4x16x16xf32>
    %cst_57 = arith.constant dense<0.000000e+00> : vector<4x16xf32>
    %129 = vector.multi_reduction <add>, %128, %cst_57 [2] : vector<4x16x16xf32> to vector<4x16xf32>
    %130 = vector.shape_cast %129 : vector<4x16xf32> to vector<4x16x1xf32>
    %131 = tpu.reciprocal %130 {approx = true} : vector<4x16x1xf32> -> vector<4x16x1xf32>
    %132 = vector.broadcast %131 : vector<4x16x1xf32> to vector<4x16x16xf32>
    %133 = arith.mulf %128, %132 : vector<4x16x16xf32>
    %134 = arith.truncf %133 : vector<4x16x16xf32> to vector<4x16x16xbf16>
    "tpu.trace_start"() <{level = 10 : i32, message = "bqk,bkd->bqd"}> : () -> ()
    %cst_58 = arith.constant dense<0.000000e+00> : vector<4x16x32xf32>
    %135 = tpu.matmul %134, %118, %cst_58 {dimension_numbers = #tpu.dot_dimension_numbers<[2], [1], [1], [2], [0, 0, 0, 1, 1, 2], [0], [0]>} : vector<4x16x16xbf16>, vector<4x16x32xbf16>, vector<4x16x32xf32> -> vector<4x16x32xf32>
    "tpu.trace_stop"() : () -> ()
    %136 = vector.shape_cast %135 : vector<4x16x32xf32> to vector<64x32xf32>
    %137 = arith.truncf %136 : vector<64x32xf32> to vector<64x32xbf16>
    %138 = vector.extract_strided_slice %112 {offsets = [0, 0], sizes = [32, 128], strides = [1, 1]} : vector<128x128xbf16> to vector<32x128xbf16>
    %cst_59 = arith.constant dense<0.000000e+00> : vector<64x128xf32>
    %139 = tpu.matmul %137, %138, %cst_59 {dimension_numbers = #tpu.dot_dimension_numbers<[1], [0], [0], [1], [0, 0, 1, 1], [], []>} : vector<64x32xbf16>, vector<32x128xbf16>, vector<64x128xf32> -> vector<64x128xf32>
    %140 = vector.extract_strided_slice %106 {offsets = [0, 0, 32], sizes = [4, 16, 32], strides = [1, 1, 1]} : vector<4x16x128xf32> to vector<4x16x32xf32>
    %141 = arith.truncf %140 : vector<4x16x32xf32> to vector<4x16x32xbf16>
    %142 = vector.extract_strided_slice %108 {offsets = [0, 0, 32], sizes = [4, 16, 32], strides = [1, 1, 1]} : vector<4x16x128xf32> to vector<4x16x32xf32>
    %143 = arith.truncf %142 : vector<4x16x32xf32> to vector<4x16x32xbf16>
    %144 = vector.extract_strided_slice %110 {offsets = [0, 0, 32], sizes = [4, 16, 32], strides = [1, 1, 1]} : vector<4x16x128xf32> to vector<4x16x32xf32>
    %145 = arith.truncf %144 : vector<4x16x32xf32> to vector<4x16x32xbf16>
    "tpu.trace_start"() <{level = 10 : i32, message = "bqd,bkd->bqk"}> : () -> ()
    %cst_60 = arith.constant dense<0.000000e+00> : vector<4x16x16xf32>
    %146 = tpu.matmul %141, %143, %cst_60 {dimension_numbers = #tpu.dot_dimension_numbers<[2], [2], [1], [1], [0, 0, 0, 1, 1, 1], [0], [0]>} : vector<4x16x32xbf16>, vector<4x16x32xbf16>, vector<4x16x16xf32> -> vector<4x16x16xf32>
    "tpu.trace_stop"() : () -> ()
    %cst_61 = arith.constant 0.176776692 : f32
    %147 = vector.broadcast %cst_61 : f32 to vector<4x16x16xf32>
    %148 = arith.mulf %146, %147 : vector<4x16x16xf32>
    %149 = vector.broadcast %95 : vector<4x1x16xf32> to vector<4x16x16xf32>
    %150 = arith.addf %148, %149 : vector<4x16x16xf32>
    %cst_62 = arith.constant dense<0xFF800000> : vector<4x16xf32>
    %151 = vector.multi_reduction <maximumf>, %150, %cst_62 [2] : vector<4x16x16xf32> to vector<4x16xf32>
    %152 = vector.shape_cast %151 : vector<4x16xf32> to vector<4x16x1xf32>
    %153 = vector.broadcast %152 : vector<4x16x1xf32> to vector<4x16x16xf32>
    %154 = arith.subf %150, %153 : vector<4x16x16xf32>
    %155 = math.exp %154 : vector<4x16x16xf32>
    %cst_63 = arith.constant dense<0.000000e+00> : vector<4x16xf32>
    %156 = vector.multi_reduction <add>, %155, %cst_63 [2] : vector<4x16x16xf32> to vector<4x16xf32>
    %157 = vector.shape_cast %156 : vector<4x16xf32> to vector<4x16x1xf32>
    %158 = tpu.reciprocal %157 {approx = true} : vector<4x16x1xf32> -> vector<4x16x1xf32>
    %159 = vector.broadcast %158 : vector<4x16x1xf32> to vector<4x16x16xf32>
    %160 = arith.mulf %155, %159 : vector<4x16x16xf32>
    %161 = arith.truncf %160 : vector<4x16x16xf32> to vector<4x16x16xbf16>
    "tpu.trace_start"() <{level = 10 : i32, message = "bqk,bkd->bqd"}> : () -> ()
    %cst_64 = arith.constant dense<0.000000e+00> : vector<4x16x32xf32>
    %162 = tpu.matmul %161, %145, %cst_64 {dimension_numbers = #tpu.dot_dimension_numbers<[2], [1], [1], [2], [0, 0, 0, 1, 1, 2], [0], [0]>} : vector<4x16x16xbf16>, vector<4x16x32xbf16>, vector<4x16x32xf32> -> vector<4x16x32xf32>
    "tpu.trace_stop"() : () -> ()
    %163 = vector.shape_cast %162 : vector<4x16x32xf32> to vector<64x32xf32>
    %164 = arith.truncf %163 : vector<64x32xf32> to vector<64x32xbf16>
    %165 = vector.extract_strided_slice %112 {offsets = [32, 0], sizes = [32, 128], strides = [1, 1]} : vector<128x128xbf16> to vector<32x128xbf16>
    %cst_65 = arith.constant dense<0.000000e+00> : vector<64x128xf32>
    %166 = tpu.matmul %164, %165, %cst_65 {dimension_numbers = #tpu.dot_dimension_numbers<[1], [0], [0], [1], [0, 0, 1, 1], [], []>} : vector<64x32xbf16>, vector<32x128xbf16>, vector<64x128xf32> -> vector<64x128xf32>
    %167 = arith.addf %139, %166 : vector<64x128xf32>
    %168 = vector.extract_strided_slice %106 {offsets = [0, 0, 64], sizes = [4, 16, 32], strides = [1, 1, 1]} : vector<4x16x128xf32> to vector<4x16x32xf32>
    %169 = arith.truncf %168 : vector<4x16x32xf32> to vector<4x16x32xbf16>
    %170 = vector.extract_strided_slice %108 {offsets = [0, 0, 64], sizes = [4, 16, 32], strides = [1, 1, 1]} : vector<4x16x128xf32> to vector<4x16x32xf32>
    %171 = arith.truncf %170 : vector<4x16x32xf32> to vector<4x16x32xbf16>
    %172 = vector.extract_strided_slice %110 {offsets = [0, 0, 64], sizes = [4, 16, 32], strides = [1, 1, 1]} : vector<4x16x128xf32> to vector<4x16x32xf32>
    %173 = arith.truncf %172 : vector<4x16x32xf32> to vector<4x16x32xbf16>
    "tpu.trace_start"() <{level = 10 : i32, message = "bqd,bkd->bqk"}> : () -> ()
    %cst_66 = arith.constant dense<0.000000e+00> : vector<4x16x16xf32>
    %174 = tpu.matmul %169, %171, %cst_66 {dimension_numbers = #tpu.dot_dimension_numbers<[2], [2], [1], [1], [0, 0, 0, 1, 1, 1], [0], [0]>} : vector<4x16x32xbf16>, vector<4x16x32xbf16>, vector<4x16x16xf32> -> vector<4x16x16xf32>
    "tpu.trace_stop"() : () -> ()
    %cst_67 = arith.constant 0.176776692 : f32
    %175 = vector.broadcast %cst_67 : f32 to vector<4x16x16xf32>
    %176 = arith.mulf %174, %175 : vector<4x16x16xf32>
    %177 = vector.broadcast %95 : vector<4x1x16xf32> to vector<4x16x16xf32>
    %178 = arith.addf %176, %177 : vector<4x16x16xf32>
    %cst_68 = arith.constant dense<0xFF800000> : vector<4x16xf32>
    %179 = vector.multi_reduction <maximumf>, %178, %cst_68 [2] : vector<4x16x16xf32> to vector<4x16xf32>
    %180 = vector.shape_cast %179 : vector<4x16xf32> to vector<4x16x1xf32>
    %181 = vector.broadcast %180 : vector<4x16x1xf32> to vector<4x16x16xf32>
    %182 = arith.subf %178, %181 : vector<4x16x16xf32>
    %183 = math.exp %182 : vector<4x16x16xf32>
    %cst_69 = arith.constant dense<0.000000e+00> : vector<4x16xf32>
    %184 = vector.multi_reduction <add>, %183, %cst_69 [2] : vector<4x16x16xf32> to vector<4x16xf32>
    %185 = vector.shape_cast %184 : vector<4x16xf32> to vector<4x16x1xf32>
    %186 = tpu.reciprocal %185 {approx = true} : vector<4x16x1xf32> -> vector<4x16x1xf32>
    %187 = vector.broadcast %186 : vector<4x16x1xf32> to vector<4x16x16xf32>
    %188 = arith.mulf %183, %187 : vector<4x16x16xf32>
    %189 = arith.truncf %188 : vector<4x16x16xf32> to vector<4x16x16xbf16>
    "tpu.trace_start"() <{level = 10 : i32, message = "bqk,bkd->bqd"}> : () -> ()
    %cst_70 = arith.constant dense<0.000000e+00> : vector<4x16x32xf32>
    %190 = tpu.matmul %189, %173, %cst_70 {dimension_numbers = #tpu.dot_dimension_numbers<[2], [1], [1], [2], [0, 0, 0, 1, 1, 2], [0], [0]>} : vector<4x16x16xbf16>, vector<4x16x32xbf16>, vector<4x16x32xf32> -> vector<4x16x32xf32>
    "tpu.trace_stop"() : () -> ()
    %191 = vector.shape_cast %190 : vector<4x16x32xf32> to vector<64x32xf32>
    %192 = arith.truncf %191 : vector<64x32xf32> to vector<64x32xbf16>
    %193 = vector.extract_strided_slice %112 {offsets = [64, 0], sizes = [32, 128], strides = [1, 1]} : vector<128x128xbf16> to vector<32x128xbf16>
    %cst_71 = arith.constant dense<0.000000e+00> : vector<64x128xf32>
    %194 = tpu.matmul %192, %193, %cst_71 {dimension_numbers = #tpu.dot_dimension_numbers<[1], [0], [0], [1], [0, 0, 1, 1], [], []>} : vector<64x32xbf16>, vector<32x128xbf16>, vector<64x128xf32> -> vector<64x128xf32>
    %195 = arith.addf %167, %194 : vector<64x128xf32>
    %196 = vector.extract_strided_slice %106 {offsets = [0, 0, 96], sizes = [4, 16, 32], strides = [1, 1, 1]} : vector<4x16x128xf32> to vector<4x16x32xf32>
    %197 = arith.truncf %196 : vector<4x16x32xf32> to vector<4x16x32xbf16>
    %198 = vector.extract_strided_slice %108 {offsets = [0, 0, 96], sizes = [4, 16, 32], strides = [1, 1, 1]} : vector<4x16x128xf32> to vector<4x16x32xf32>
    %199 = arith.truncf %198 : vector<4x16x32xf32> to vector<4x16x32xbf16>
    %200 = vector.extract_strided_slice %110 {offsets = [0, 0, 96], sizes = [4, 16, 32], strides = [1, 1, 1]} : vector<4x16x128xf32> to vector<4x16x32xf32>
    %201 = arith.truncf %200 : vector<4x16x32xf32> to vector<4x16x32xbf16>
    "tpu.trace_start"() <{level = 10 : i32, message = "bqd,bkd->bqk"}> : () -> ()
    %cst_72 = arith.constant dense<0.000000e+00> : vector<4x16x16xf32>
    %202 = tpu.matmul %197, %199, %cst_72 {dimension_numbers = #tpu.dot_dimension_numbers<[2], [2], [1], [1], [0, 0, 0, 1, 1, 1], [0], [0]>} : vector<4x16x32xbf16>, vector<4x16x32xbf16>, vector<4x16x16xf32> -> vector<4x16x16xf32>
    "tpu.trace_stop"() : () -> ()
    %cst_73 = arith.constant 0.176776692 : f32
    %203 = vector.broadcast %cst_73 : f32 to vector<4x16x16xf32>
    %204 = arith.mulf %202, %203 : vector<4x16x16xf32>
    %205 = vector.broadcast %95 : vector<4x1x16xf32> to vector<4x16x16xf32>
    %206 = arith.addf %204, %205 : vector<4x16x16xf32>
    %cst_74 = arith.constant dense<0xFF800000> : vector<4x16xf32>
    %207 = vector.multi_reduction <maximumf>, %206, %cst_74 [2] : vector<4x16x16xf32> to vector<4x16xf32>
    %208 = vector.shape_cast %207 : vector<4x16xf32> to vector<4x16x1xf32>
    %209 = vector.broadcast %208 : vector<4x16x1xf32> to vector<4x16x16xf32>
    %210 = arith.subf %206, %209 : vector<4x16x16xf32>
    %211 = math.exp %210 : vector<4x16x16xf32>
    %cst_75 = arith.constant dense<0.000000e+00> : vector<4x16xf32>
    %212 = vector.multi_reduction <add>, %211, %cst_75 [2] : vector<4x16x16xf32> to vector<4x16xf32>
    %213 = vector.shape_cast %212 : vector<4x16xf32> to vector<4x16x1xf32>
    %214 = tpu.reciprocal %213 {approx = true} : vector<4x16x1xf32> -> vector<4x16x1xf32>
    %215 = vector.broadcast %214 : vector<4x16x1xf32> to vector<4x16x16xf32>
    %216 = arith.mulf %211, %215 : vector<4x16x16xf32>
    %217 = arith.truncf %216 : vector<4x16x16xf32> to vector<4x16x16xbf16>
    "tpu.trace_start"() <{level = 10 : i32, message = "bqk,bkd->bqd"}> : () -> ()
    %cst_76 = arith.constant dense<0.000000e+00> : vector<4x16x32xf32>
    %218 = tpu.matmul %217, %201, %cst_76 {dimension_numbers = #tpu.dot_dimension_numbers<[2], [1], [1], [2], [0, 0, 0, 1, 1, 2], [0], [0]>} : vector<4x16x16xbf16>, vector<4x16x32xbf16>, vector<4x16x32xf32> -> vector<4x16x32xf32>
    "tpu.trace_stop"() : () -> ()
    %219 = vector.shape_cast %218 : vector<4x16x32xf32> to vector<64x32xf32>
    %220 = arith.truncf %219 : vector<64x32xf32> to vector<64x32xbf16>
    %221 = vector.extract_strided_slice %112 {offsets = [96, 0], sizes = [32, 128], strides = [1, 1]} : vector<128x128xbf16> to vector<32x128xbf16>
    %cst_77 = arith.constant dense<0.000000e+00> : vector<64x128xf32>
    %222 = tpu.matmul %220, %221, %cst_77 {dimension_numbers = #tpu.dot_dimension_numbers<[1], [0], [0], [1], [0, 0, 1, 1], [], []>} : vector<64x32xbf16>, vector<32x128xbf16>, vector<64x128xf32> -> vector<64x128xf32>
    %223 = arith.addf %195, %222 : vector<64x128xf32>
    %c0_78 = arith.constant 0 : index
    %c0_79 = arith.constant 0 : index
    %c0_80 = arith.constant 0 : index
    %224 = vector.load %arg17[%c0_78, %c0_79, %c0_80] : memref<2x1x128xf32, #tpu.memory_space<vmem>>, vector<1x1x128xf32>
    %225 = vector.shape_cast %224 : vector<1x1x128xf32> to vector<1x128xf32>
    %226 = vector.broadcast %225 : vector<1x128xf32> to vector<64x128xf32>
    %227 = arith.addf %223, %226 : vector<64x128xf32>
    %228 = arith.addf %96, %227 : vector<64x128xf32>
    %c0_81 = arith.constant 0 : index
    %c0_82 = arith.constant 0 : index
    %c0_83 = arith.constant 0 : index
    %229 = vector.load %arg18[%c0_81, %c0_82, %c0_83] : memref<2x1x128xf32, #tpu.memory_space<vmem>>, vector<1x1x128xf32>
    %230 = vector.shape_cast %229 : vector<1x1x128xf32> to vector<1x128xf32>
    %c0_84 = arith.constant 0 : index
    %c0_85 = arith.constant 0 : index
    %c0_86 = arith.constant 0 : index
    %231 = vector.load %arg19[%c0_84, %c0_85, %c0_86] : memref<2x1x128xf32, #tpu.memory_space<vmem>>, vector<1x1x128xf32>
    %232 = vector.shape_cast %231 : vector<1x1x128xf32> to vector<1x128xf32>
    %cst_87 = arith.constant dense<0.000000e+00> : vector<64xf32>
    %233 = vector.multi_reduction <add>, %228, %cst_87 [1] : vector<64x128xf32> to vector<64xf32>
    %234 = vector.shape_cast %233 : vector<64xf32> to vector<64x1xf32>
    %cst_88 = arith.constant 1.280000e+02 : f32
    %235 = vector.broadcast %cst_88 : f32 to vector<64x1xf32>
    %236 = arith.divf %234, %235 : vector<64x1xf32>
    %237 = vector.broadcast %236 : vector<64x1xf32> to vector<64x128xf32>
    %238 = arith.subf %228, %237 : vector<64x128xf32>
    %239 = arith.mulf %238, %238 : vector<64x128xf32>
    %cst_89 = arith.constant dense<0.000000e+00> : vector<64xf32>
    %240 = vector.multi_reduction <add>, %239, %cst_89 [1] : vector<64x128xf32> to vector<64xf32>
    %241 = vector.shape_cast %240 : vector<64xf32> to vector<64x1xf32>
    %cst_90 = arith.constant 1.280000e+02 : f32
    %242 = vector.broadcast %cst_90 : f32 to vector<64x1xf32>
    %243 = arith.divf %241, %242 : vector<64x1xf32>
    %244 = vector.broadcast %236 : vector<64x1xf32> to vector<64x128xf32>
    %245 = arith.subf %228, %244 : vector<64x128xf32>
    %cst_91 = arith.constant 9.99999996E-13 : f32
    %246 = vector.broadcast %cst_91 : f32 to vector<64x1xf32>
    %247 = arith.addf %243, %246 : vector<64x1xf32>
    %248 = math.rsqrt %247 : vector<64x1xf32>
    %249 = vector.broadcast %248 : vector<64x1xf32> to vector<64x128xf32>
    %250 = arith.mulf %245, %249 : vector<64x128xf32>
    %251 = vector.broadcast %230 : vector<1x128xf32> to vector<64x128xf32>
    %252 = arith.mulf %250, %251 : vector<64x128xf32>
    %253 = vector.broadcast %232 : vector<1x128xf32> to vector<64x128xf32>
    %254 = arith.addf %252, %253 : vector<64x128xf32>
    %255 = arith.truncf %254 : vector<64x128xf32> to vector<64x128xbf16>
    %c0_92 = arith.constant 0 : index
    %c0_93 = arith.constant 0 : index
    %c0_94 = arith.constant 0 : index
    %256 = vector.load %arg20[%c0_92, %c0_93, %c0_94] : memref<2x128x256xbf16, #tpu.memory_space<vmem>>, vector<1x128x256xbf16>
    %257 = vector.shape_cast %256 : vector<1x128x256xbf16> to vector<128x256xbf16>
    %cst_95 = arith.constant dense<0.000000e+00> : vector<64x256xf32>
    %258 = tpu.matmul %255, %257, %cst_95 {dimension_numbers = #tpu.dot_dimension_numbers<[1], [0], [0], [1], [0, 0, 1, 1], [], []>} : vector<64x128xbf16>, vector<128x256xbf16>, vector<64x256xf32> -> vector<64x256xf32>
    %c0_96 = arith.constant 0 : index
    %c0_97 = arith.constant 0 : index
    %c0_98 = arith.constant 0 : index
    %259 = vector.load %arg21[%c0_96, %c0_97, %c0_98] : memref<2x1x256xf32, #tpu.memory_space<vmem>>, vector<1x1x256xf32>
    %260 = vector.shape_cast %259 : vector<1x1x256xf32> to vector<1x256xf32>
    %261 = vector.broadcast %260 : vector<1x256xf32> to vector<64x256xf32>
    %262 = arith.addf %258, %261 : vector<64x256xf32>
    %263 = arith.mulf %262, %262 : vector<64x256xf32>
    %264 = arith.mulf %262, %263 : vector<64x256xf32>
    %cst_99 = arith.constant 4.471500e-02 : f32
    %265 = vector.broadcast %cst_99 : f32 to vector<64x256xf32>
    %266 = arith.mulf %265, %264 : vector<64x256xf32>
    %267 = arith.addf %262, %266 : vector<64x256xf32>
    %cst_100 = arith.constant 0.797884583 : f32
    %268 = vector.broadcast %cst_100 : f32 to vector<64x256xf32>
    %269 = arith.mulf %268, %267 : vector<64x256xf32>
    %270 = math.tanh %269 : vector<64x256xf32>
    %cst_101 = arith.constant 1.000000e+00 : f32
    %271 = vector.broadcast %cst_101 : f32 to vector<64x256xf32>
    %272 = arith.addf %271, %270 : vector<64x256xf32>
    %cst_102 = arith.constant 5.000000e-01 : f32
    %273 = vector.broadcast %cst_102 : f32 to vector<64x256xf32>
    %274 = arith.mulf %273, %272 : vector<64x256xf32>
    %275 = arith.mulf %262, %274 : vector<64x256xf32>
    %276 = arith.truncf %275 : vector<64x256xf32> to vector<64x256xbf16>
    %c0_103 = arith.constant 0 : index
    %c0_104 = arith.constant 0 : index
    %c0_105 = arith.constant 0 : index
    %277 = vector.load %arg22[%c0_103, %c0_104, %c0_105] : memref<2x256x128xbf16, #tpu.memory_space<vmem>>, vector<1x256x128xbf16>
    %278 = vector.shape_cast %277 : vector<1x256x128xbf16> to vector<256x128xbf16>
    %cst_106 = arith.constant dense<0.000000e+00> : vector<64x128xf32>
    %279 = tpu.matmul %276, %278, %cst_106 {dimension_numbers = #tpu.dot_dimension_numbers<[1], [0], [0], [1], [0, 0, 1, 1], [], []>} : vector<64x256xbf16>, vector<256x128xbf16>, vector<64x128xf32> -> vector<64x128xf32>
    %c0_107 = arith.constant 0 : index
    %c0_108 = arith.constant 0 : index
    %c0_109 = arith.constant 0 : index
    %280 = vector.load %arg23[%c0_107, %c0_108, %c0_109] : memref<2x1x128xf32, #tpu.memory_space<vmem>>, vector<1x1x128xf32>
    %281 = vector.shape_cast %280 : vector<1x1x128xf32> to vector<1x128xf32>
    %282 = vector.broadcast %281 : vector<1x128xf32> to vector<64x128xf32>
    %283 = arith.addf %279, %282 : vector<64x128xf32>
    %284 = arith.addf %254, %283 : vector<64x128xf32>
    %c0_110 = arith.constant 0 : index
    %c0_111 = arith.constant 0 : index
    %c0_112 = arith.constant 0 : index
    %285 = vector.load %arg24[%c0_110, %c0_111, %c0_112] : memref<2x1x128xf32, #tpu.memory_space<vmem>>, vector<1x1x128xf32>
    %286 = vector.shape_cast %285 : vector<1x1x128xf32> to vector<1x128xf32>
    %c0_113 = arith.constant 0 : index
    %c0_114 = arith.constant 0 : index
    %c0_115 = arith.constant 0 : index
    %287 = vector.load %arg25[%c0_113, %c0_114, %c0_115] : memref<2x1x128xf32, #tpu.memory_space<vmem>>, vector<1x1x128xf32>
    %288 = vector.shape_cast %287 : vector<1x1x128xf32> to vector<1x128xf32>
    %cst_116 = arith.constant dense<0.000000e+00> : vector<64xf32>
    %289 = vector.multi_reduction <add>, %284, %cst_116 [1] : vector<64x128xf32> to vector<64xf32>
    %290 = vector.shape_cast %289 : vector<64xf32> to vector<64x1xf32>
    %cst_117 = arith.constant 1.280000e+02 : f32
    %291 = vector.broadcast %cst_117 : f32 to vector<64x1xf32>
    %292 = arith.divf %290, %291 : vector<64x1xf32>
    %293 = vector.broadcast %292 : vector<64x1xf32> to vector<64x128xf32>
    %294 = arith.subf %284, %293 : vector<64x128xf32>
    %295 = arith.mulf %294, %294 : vector<64x128xf32>
    %cst_118 = arith.constant dense<0.000000e+00> : vector<64xf32>
    %296 = vector.multi_reduction <add>, %295, %cst_118 [1] : vector<64x128xf32> to vector<64xf32>
    %297 = vector.shape_cast %296 : vector<64xf32> to vector<64x1xf32>
    %cst_119 = arith.constant 1.280000e+02 : f32
    %298 = vector.broadcast %cst_119 : f32 to vector<64x1xf32>
    %299 = arith.divf %297, %298 : vector<64x1xf32>
    %300 = vector.broadcast %292 : vector<64x1xf32> to vector<64x128xf32>
    %301 = arith.subf %284, %300 : vector<64x128xf32>
    %cst_120 = arith.constant 9.99999996E-13 : f32
    %302 = vector.broadcast %cst_120 : f32 to vector<64x1xf32>
    %303 = arith.addf %299, %302 : vector<64x1xf32>
    %304 = math.rsqrt %303 : vector<64x1xf32>
    %305 = vector.broadcast %304 : vector<64x1xf32> to vector<64x128xf32>
    %306 = arith.mulf %301, %305 : vector<64x128xf32>
    %307 = vector.broadcast %286 : vector<1x128xf32> to vector<64x128xf32>
    %308 = arith.mulf %306, %307 : vector<64x128xf32>
    %309 = vector.broadcast %288 : vector<1x128xf32> to vector<64x128xf32>
    %310 = arith.addf %308, %309 : vector<64x128xf32>
    %311 = vector.shape_cast %310 : vector<64x128xf32> to vector<4x16x128xf32>
    %312 = vector.shape_cast %311 : vector<4x16x128xf32> to vector<64x128xf32>
    %313 = arith.truncf %312 : vector<64x128xf32> to vector<64x128xbf16>
    %c1 = arith.constant 1 : index
    %c0_121 = arith.constant 0 : index
    %c0_122 = arith.constant 0 : index
    %314 = vector.load %arg14[%c1, %c0_121, %c0_122] : memref<2x128x384xbf16, #tpu.memory_space<vmem>>, vector<1x128x384xbf16>
    %315 = vector.shape_cast %314 : vector<1x128x384xbf16> to vector<128x384xbf16>
    %cst_123 = arith.constant dense<0.000000e+00> : vector<64x384xf32>
    %316 = tpu.matmul %313, %315, %cst_123 {dimension_numbers = #tpu.dot_dimension_numbers<[1], [0], [0], [1], [0, 0, 1, 1], [], []>} : vector<64x128xbf16>, vector<128x384xbf16>, vector<64x384xf32> -> vector<64x384xf32>
    %c1_124 = arith.constant 1 : index
    %c0_125 = arith.constant 0 : index
    %c0_126 = arith.constant 0 : index
    %317 = vector.load %arg15[%c1_124, %c0_125, %c0_126] : memref<2x1x384xf32, #tpu.memory_space<vmem>>, vector<1x1x384xf32>
    %318 = vector.shape_cast %317 : vector<1x1x384xf32> to vector<1x384xf32>
    %319 = vector.broadcast %318 : vector<1x384xf32> to vector<64x384xf32>
    %320 = arith.addf %316, %319 : vector<64x384xf32>
    %321 = vector.extract_strided_slice %320 {offsets = [0, 0], sizes = [64, 128], strides = [1, 1]} : vector<64x384xf32> to vector<64x128xf32>
    %322 = vector.shape_cast %321 : vector<64x128xf32> to vector<4x16x128xf32>
    %323 = vector.extract_strided_slice %320 {offsets = [0, 128], sizes = [64, 128], strides = [1, 1]} : vector<64x384xf32> to vector<64x128xf32>
    %324 = vector.shape_cast %323 : vector<64x128xf32> to vector<4x16x128xf32>
    %325 = vector.extract_strided_slice %320 {offsets = [0, 256], sizes = [64, 128], strides = [1, 1]} : vector<64x384xf32> to vector<64x128xf32>
    %326 = vector.shape_cast %325 : vector<64x128xf32> to vector<4x16x128xf32>
    %c1_127 = arith.constant 1 : index
    %c0_128 = arith.constant 0 : index
    %c0_129 = arith.constant 0 : index
    %327 = vector.load %arg16[%c1_127, %c0_128, %c0_129] : memref<2x128x128xbf16, #tpu.memory_space<vmem>>, vector<1x128x128xbf16>
    %328 = vector.shape_cast %327 : vector<1x128x128xbf16> to vector<128x128xbf16>
    %329 = vector.extract_strided_slice %322 {offsets = [0, 0, 0], sizes = [4, 16, 32], strides = [1, 1, 1]} : vector<4x16x128xf32> to vector<4x16x32xf32>
    %330 = arith.truncf %329 : vector<4x16x32xf32> to vector<4x16x32xbf16>
    %331 = vector.extract_strided_slice %324 {offsets = [0, 0, 0], sizes = [4, 16, 32], strides = [1, 1, 1]} : vector<4x16x128xf32> to vector<4x16x32xf32>
    %332 = arith.truncf %331 : vector<4x16x32xf32> to vector<4x16x32xbf16>
    %333 = vector.extract_strided_slice %326 {offsets = [0, 0, 0], sizes = [4, 16, 32], strides = [1, 1, 1]} : vector<4x16x128xf32> to vector<4x16x32xf32>
    %334 = arith.truncf %333 : vector<4x16x32xf32> to vector<4x16x32xbf16>
    "tpu.trace_start"() <{level = 10 : i32, message = "bqd,bkd->bqk"}> : () -> ()
    %cst_130 = arith.constant dense<0.000000e+00> : vector<4x16x16xf32>
    %335 = tpu.matmul %330, %332, %cst_130 {dimension_numbers = #tpu.dot_dimension_numbers<[2], [2], [1], [1], [0, 0, 0, 1, 1, 1], [0], [0]>} : vector<4x16x32xbf16>, vector<4x16x32xbf16>, vector<4x16x16xf32> -> vector<4x16x16xf32>
    "tpu.trace_stop"() : () -> ()
    %cst_131 = arith.constant 0.176776692 : f32
    %336 = vector.broadcast %cst_131 : f32 to vector<4x16x16xf32>
    %337 = arith.mulf %335, %336 : vector<4x16x16xf32>
    %338 = vector.broadcast %95 : vector<4x1x16xf32> to vector<4x16x16xf32>
    %339 = arith.addf %337, %338 : vector<4x16x16xf32>
    %cst_132 = arith.constant dense<0xFF800000> : vector<4x16xf32>
    %340 = vector.multi_reduction <maximumf>, %339, %cst_132 [2] : vector<4x16x16xf32> to vector<4x16xf32>
    %341 = vector.shape_cast %340 : vector<4x16xf32> to vector<4x16x1xf32>
    %342 = vector.broadcast %341 : vector<4x16x1xf32> to vector<4x16x16xf32>
    %343 = arith.subf %339, %342 : vector<4x16x16xf32>
    %344 = math.exp %343 : vector<4x16x16xf32>
    %cst_133 = arith.constant dense<0.000000e+00> : vector<4x16xf32>
    %345 = vector.multi_reduction <add>, %344, %cst_133 [2] : vector<4x16x16xf32> to vector<4x16xf32>
    %346 = vector.shape_cast %345 : vector<4x16xf32> to vector<4x16x1xf32>
    %347 = tpu.reciprocal %346 {approx = true} : vector<4x16x1xf32> -> vector<4x16x1xf32>
    %348 = vector.broadcast %347 : vector<4x16x1xf32> to vector<4x16x16xf32>
    %349 = arith.mulf %344, %348 : vector<4x16x16xf32>
    %350 = arith.truncf %349 : vector<4x16x16xf32> to vector<4x16x16xbf16>
    "tpu.trace_start"() <{level = 10 : i32, message = "bqk,bkd->bqd"}> : () -> ()
    %cst_134 = arith.constant dense<0.000000e+00> : vector<4x16x32xf32>
    %351 = tpu.matmul %350, %334, %cst_134 {dimension_numbers = #tpu.dot_dimension_numbers<[2], [1], [1], [2], [0, 0, 0, 1, 1, 2], [0], [0]>} : vector<4x16x16xbf16>, vector<4x16x32xbf16>, vector<4x16x32xf32> -> vector<4x16x32xf32>
    "tpu.trace_stop"() : () -> ()
    %352 = vector.shape_cast %351 : vector<4x16x32xf32> to vector<64x32xf32>
    %353 = arith.truncf %352 : vector<64x32xf32> to vector<64x32xbf16>
    %354 = vector.extract_strided_slice %328 {offsets = [0, 0], sizes = [32, 128], strides = [1, 1]} : vector<128x128xbf16> to vector<32x128xbf16>
    %cst_135 = arith.constant dense<0.000000e+00> : vector<64x128xf32>
    %355 = tpu.matmul %353, %354, %cst_135 {dimension_numbers = #tpu.dot_dimension_numbers<[1], [0], [0], [1], [0, 0, 1, 1], [], []>} : vector<64x32xbf16>, vector<32x128xbf16>, vector<64x128xf32> -> vector<64x128xf32>
    %356 = vector.extract_strided_slice %322 {offsets = [0, 0, 32], sizes = [4, 16, 32], strides = [1, 1, 1]} : vector<4x16x128xf32> to vector<4x16x32xf32>
    %357 = arith.truncf %356 : vector<4x16x32xf32> to vector<4x16x32xbf16>
    %358 = vector.extract_strided_slice %324 {offsets = [0, 0, 32], sizes = [4, 16, 32], strides = [1, 1, 1]} : vector<4x16x128xf32> to vector<4x16x32xf32>
    %359 = arith.truncf %358 : vector<4x16x32xf32> to vector<4x16x32xbf16>
    %360 = vector.extract_strided_slice %326 {offsets = [0, 0, 32], sizes = [4, 16, 32], strides = [1, 1, 1]} : vector<4x16x128xf32> to vector<4x16x32xf32>
    %361 = arith.truncf %360 : vector<4x16x32xf32> to vector<4x16x32xbf16>
    "tpu.trace_start"() <{level = 10 : i32, message = "bqd,bkd->bqk"}> : () -> ()
    %cst_136 = arith.constant dense<0.000000e+00> : vector<4x16x16xf32>
    %362 = tpu.matmul %357, %359, %cst_136 {dimension_numbers = #tpu.dot_dimension_numbers<[2], [2], [1], [1], [0, 0, 0, 1, 1, 1], [0], [0]>} : vector<4x16x32xbf16>, vector<4x16x32xbf16>, vector<4x16x16xf32> -> vector<4x16x16xf32>
    "tpu.trace_stop"() : () -> ()
    %cst_137 = arith.constant 0.176776692 : f32
    %363 = vector.broadcast %cst_137 : f32 to vector<4x16x16xf32>
    %364 = arith.mulf %362, %363 : vector<4x16x16xf32>
    %365 = vector.broadcast %95 : vector<4x1x16xf32> to vector<4x16x16xf32>
    %366 = arith.addf %364, %365 : vector<4x16x16xf32>
    %cst_138 = arith.constant dense<0xFF800000> : vector<4x16xf32>
    %367 = vector.multi_reduction <maximumf>, %366, %cst_138 [2] : vector<4x16x16xf32> to vector<4x16xf32>
    %368 = vector.shape_cast %367 : vector<4x16xf32> to vector<4x16x1xf32>
    %369 = vector.broadcast %368 : vector<4x16x1xf32> to vector<4x16x16xf32>
    %370 = arith.subf %366, %369 : vector<4x16x16xf32>
    %371 = math.exp %370 : vector<4x16x16xf32>
    %cst_139 = arith.constant dense<0.000000e+00> : vector<4x16xf32>
    %372 = vector.multi_reduction <add>, %371, %cst_139 [2] : vector<4x16x16xf32> to vector<4x16xf32>
    %373 = vector.shape_cast %372 : vector<4x16xf32> to vector<4x16x1xf32>
    %374 = tpu.reciprocal %373 {approx = true} : vector<4x16x1xf32> -> vector<4x16x1xf32>
    %375 = vector.broadcast %374 : vector<4x16x1xf32> to vector<4x16x16xf32>
    %376 = arith.mulf %371, %375 : vector<4x16x16xf32>
    %377 = arith.truncf %376 : vector<4x16x16xf32> to vector<4x16x16xbf16>
    "tpu.trace_start"() <{level = 10 : i32, message = "bqk,bkd->bqd"}> : () -> ()
    %cst_140 = arith.constant dense<0.000000e+00> : vector<4x16x32xf32>
    %378 = tpu.matmul %377, %361, %cst_140 {dimension_numbers = #tpu.dot_dimension_numbers<[2], [1], [1], [2], [0, 0, 0, 1, 1, 2], [0], [0]>} : vector<4x16x16xbf16>, vector<4x16x32xbf16>, vector<4x16x32xf32> -> vector<4x16x32xf32>
    "tpu.trace_stop"() : () -> ()
    %379 = vector.shape_cast %378 : vector<4x16x32xf32> to vector<64x32xf32>
    %380 = arith.truncf %379 : vector<64x32xf32> to vector<64x32xbf16>
    %381 = vector.extract_strided_slice %328 {offsets = [32, 0], sizes = [32, 128], strides = [1, 1]} : vector<128x128xbf16> to vector<32x128xbf16>
    %cst_141 = arith.constant dense<0.000000e+00> : vector<64x128xf32>
    %382 = tpu.matmul %380, %381, %cst_141 {dimension_numbers = #tpu.dot_dimension_numbers<[1], [0], [0], [1], [0, 0, 1, 1], [], []>} : vector<64x32xbf16>, vector<32x128xbf16>, vector<64x128xf32> -> vector<64x128xf32>
    %383 = arith.addf %355, %382 : vector<64x128xf32>
    %384 = vector.extract_strided_slice %322 {offsets = [0, 0, 64], sizes = [4, 16, 32], strides = [1, 1, 1]} : vector<4x16x128xf32> to vector<4x16x32xf32>
    %385 = arith.truncf %384 : vector<4x16x32xf32> to vector<4x16x32xbf16>
    %386 = vector.extract_strided_slice %324 {offsets = [0, 0, 64], sizes = [4, 16, 32], strides = [1, 1, 1]} : vector<4x16x128xf32> to vector<4x16x32xf32>
    %387 = arith.truncf %386 : vector<4x16x32xf32> to vector<4x16x32xbf16>
    %388 = vector.extract_strided_slice %326 {offsets = [0, 0, 64], sizes = [4, 16, 32], strides = [1, 1, 1]} : vector<4x16x128xf32> to vector<4x16x32xf32>
    %389 = arith.truncf %388 : vector<4x16x32xf32> to vector<4x16x32xbf16>
    "tpu.trace_start"() <{level = 10 : i32, message = "bqd,bkd->bqk"}> : () -> ()
    %cst_142 = arith.constant dense<0.000000e+00> : vector<4x16x16xf32>
    %390 = tpu.matmul %385, %387, %cst_142 {dimension_numbers = #tpu.dot_dimension_numbers<[2], [2], [1], [1], [0, 0, 0, 1, 1, 1], [0], [0]>} : vector<4x16x32xbf16>, vector<4x16x32xbf16>, vector<4x16x16xf32> -> vector<4x16x16xf32>
    "tpu.trace_stop"() : () -> ()
    %cst_143 = arith.constant 0.176776692 : f32
    %391 = vector.broadcast %cst_143 : f32 to vector<4x16x16xf32>
    %392 = arith.mulf %390, %391 : vector<4x16x16xf32>
    %393 = vector.broadcast %95 : vector<4x1x16xf32> to vector<4x16x16xf32>
    %394 = arith.addf %392, %393 : vector<4x16x16xf32>
    %cst_144 = arith.constant dense<0xFF800000> : vector<4x16xf32>
    %395 = vector.multi_reduction <maximumf>, %394, %cst_144 [2] : vector<4x16x16xf32> to vector<4x16xf32>
    %396 = vector.shape_cast %395 : vector<4x16xf32> to vector<4x16x1xf32>
    %397 = vector.broadcast %396 : vector<4x16x1xf32> to vector<4x16x16xf32>
    %398 = arith.subf %394, %397 : vector<4x16x16xf32>
    %399 = math.exp %398 : vector<4x16x16xf32>
    %cst_145 = arith.constant dense<0.000000e+00> : vector<4x16xf32>
    %400 = vector.multi_reduction <add>, %399, %cst_145 [2] : vector<4x16x16xf32> to vector<4x16xf32>
    %401 = vector.shape_cast %400 : vector<4x16xf32> to vector<4x16x1xf32>
    %402 = tpu.reciprocal %401 {approx = true} : vector<4x16x1xf32> -> vector<4x16x1xf32>
    %403 = vector.broadcast %402 : vector<4x16x1xf32> to vector<4x16x16xf32>
    %404 = arith.mulf %399, %403 : vector<4x16x16xf32>
    %405 = arith.truncf %404 : vector<4x16x16xf32> to vector<4x16x16xbf16>
    "tpu.trace_start"() <{level = 10 : i32, message = "bqk,bkd->bqd"}> : () -> ()
    %cst_146 = arith.constant dense<0.000000e+00> : vector<4x16x32xf32>
    %406 = tpu.matmul %405, %389, %cst_146 {dimension_numbers = #tpu.dot_dimension_numbers<[2], [1], [1], [2], [0, 0, 0, 1, 1, 2], [0], [0]>} : vector<4x16x16xbf16>, vector<4x16x32xbf16>, vector<4x16x32xf32> -> vector<4x16x32xf32>
    "tpu.trace_stop"() : () -> ()
    %407 = vector.shape_cast %406 : vector<4x16x32xf32> to vector<64x32xf32>
    %408 = arith.truncf %407 : vector<64x32xf32> to vector<64x32xbf16>
    %409 = vector.extract_strided_slice %328 {offsets = [64, 0], sizes = [32, 128], strides = [1, 1]} : vector<128x128xbf16> to vector<32x128xbf16>
    %cst_147 = arith.constant dense<0.000000e+00> : vector<64x128xf32>
    %410 = tpu.matmul %408, %409, %cst_147 {dimension_numbers = #tpu.dot_dimension_numbers<[1], [0], [0], [1], [0, 0, 1, 1], [], []>} : vector<64x32xbf16>, vector<32x128xbf16>, vector<64x128xf32> -> vector<64x128xf32>
    %411 = arith.addf %383, %410 : vector<64x128xf32>
    %412 = vector.extract_strided_slice %322 {offsets = [0, 0, 96], sizes = [4, 16, 32], strides = [1, 1, 1]} : vector<4x16x128xf32> to vector<4x16x32xf32>
    %413 = arith.truncf %412 : vector<4x16x32xf32> to vector<4x16x32xbf16>
    %414 = vector.extract_strided_slice %324 {offsets = [0, 0, 96], sizes = [4, 16, 32], strides = [1, 1, 1]} : vector<4x16x128xf32> to vector<4x16x32xf32>
    %415 = arith.truncf %414 : vector<4x16x32xf32> to vector<4x16x32xbf16>
    %416 = vector.extract_strided_slice %326 {offsets = [0, 0, 96], sizes = [4, 16, 32], strides = [1, 1, 1]} : vector<4x16x128xf32> to vector<4x16x32xf32>
    %417 = arith.truncf %416 : vector<4x16x32xf32> to vector<4x16x32xbf16>
    "tpu.trace_start"() <{level = 10 : i32, message = "bqd,bkd->bqk"}> : () -> ()
    %cst_148 = arith.constant dense<0.000000e+00> : vector<4x16x16xf32>
    %418 = tpu.matmul %413, %415, %cst_148 {dimension_numbers = #tpu.dot_dimension_numbers<[2], [2], [1], [1], [0, 0, 0, 1, 1, 1], [0], [0]>} : vector<4x16x32xbf16>, vector<4x16x32xbf16>, vector<4x16x16xf32> -> vector<4x16x16xf32>
    "tpu.trace_stop"() : () -> ()
    %cst_149 = arith.constant 0.176776692 : f32
    %419 = vector.broadcast %cst_149 : f32 to vector<4x16x16xf32>
    %420 = arith.mulf %418, %419 : vector<4x16x16xf32>
    %421 = vector.broadcast %95 : vector<4x1x16xf32> to vector<4x16x16xf32>
    %422 = arith.addf %420, %421 : vector<4x16x16xf32>
    %cst_150 = arith.constant dense<0xFF800000> : vector<4x16xf32>
    %423 = vector.multi_reduction <maximumf>, %422, %cst_150 [2] : vector<4x16x16xf32> to vector<4x16xf32>
    %424 = vector.shape_cast %423 : vector<4x16xf32> to vector<4x16x1xf32>
    %425 = vector.broadcast %424 : vector<4x16x1xf32> to vector<4x16x16xf32>
    %426 = arith.subf %422, %425 : vector<4x16x16xf32>
    %427 = math.exp %426 : vector<4x16x16xf32>
    %cst_151 = arith.constant dense<0.000000e+00> : vector<4x16xf32>
    %428 = vector.multi_reduction <add>, %427, %cst_151 [2] : vector<4x16x16xf32> to vector<4x16xf32>
    %429 = vector.shape_cast %428 : vector<4x16xf32> to vector<4x16x1xf32>
    %430 = tpu.reciprocal %429 {approx = true} : vector<4x16x1xf32> -> vector<4x16x1xf32>
    %431 = vector.broadcast %430 : vector<4x16x1xf32> to vector<4x16x16xf32>
    %432 = arith.mulf %427, %431 : vector<4x16x16xf32>
    %433 = arith.truncf %432 : vector<4x16x16xf32> to vector<4x16x16xbf16>
    "tpu.trace_start"() <{level = 10 : i32, message = "bqk,bkd->bqd"}> : () -> ()
    %cst_152 = arith.constant dense<0.000000e+00> : vector<4x16x32xf32>
    %434 = tpu.matmul %433, %417, %cst_152 {dimension_numbers = #tpu.dot_dimension_numbers<[2], [1], [1], [2], [0, 0, 0, 1, 1, 2], [0], [0]>} : vector<4x16x16xbf16>, vector<4x16x32xbf16>, vector<4x16x32xf32> -> vector<4x16x32xf32>
    "tpu.trace_stop"() : () -> ()
    %435 = vector.shape_cast %434 : vector<4x16x32xf32> to vector<64x32xf32>
    %436 = arith.truncf %435 : vector<64x32xf32> to vector<64x32xbf16>
    %437 = vector.extract_strided_slice %328 {offsets = [96, 0], sizes = [32, 128], strides = [1, 1]} : vector<128x128xbf16> to vector<32x128xbf16>
    %cst_153 = arith.constant dense<0.000000e+00> : vector<64x128xf32>
    %438 = tpu.matmul %436, %437, %cst_153 {dimension_numbers = #tpu.dot_dimension_numbers<[1], [0], [0], [1], [0, 0, 1, 1], [], []>} : vector<64x32xbf16>, vector<32x128xbf16>, vector<64x128xf32> -> vector<64x128xf32>
    %439 = arith.addf %411, %438 : vector<64x128xf32>
    %c1_154 = arith.constant 1 : index
    %c0_155 = arith.constant 0 : index
    %c0_156 = arith.constant 0 : index
    %440 = vector.load %arg17[%c1_154, %c0_155, %c0_156] : memref<2x1x128xf32, #tpu.memory_space<vmem>>, vector<1x1x128xf32>
    %441 = vector.shape_cast %440 : vector<1x1x128xf32> to vector<1x128xf32>
    %442 = vector.broadcast %441 : vector<1x128xf32> to vector<64x128xf32>
    %443 = arith.addf %439, %442 : vector<64x128xf32>
    %444 = arith.addf %312, %443 : vector<64x128xf32>
    %c1_157 = arith.constant 1 : index
    %c0_158 = arith.constant 0 : index
    %c0_159 = arith.constant 0 : index
    %445 = vector.load %arg18[%c1_157, %c0_158, %c0_159] : memref<2x1x128xf32, #tpu.memory_space<vmem>>, vector<1x1x128xf32>
    %446 = vector.shape_cast %445 : vector<1x1x128xf32> to vector<1x128xf32>
    %c1_160 = arith.constant 1 : index
    %c0_161 = arith.constant 0 : index
    %c0_162 = arith.constant 0 : index
    %447 = vector.load %arg19[%c1_160, %c0_161, %c0_162] : memref<2x1x128xf32, #tpu.memory_space<vmem>>, vector<1x1x128xf32>
    %448 = vector.shape_cast %447 : vector<1x1x128xf32> to vector<1x128xf32>
    %cst_163 = arith.constant dense<0.000000e+00> : vector<64xf32>
    %449 = vector.multi_reduction <add>, %444, %cst_163 [1] : vector<64x128xf32> to vector<64xf32>
    %450 = vector.shape_cast %449 : vector<64xf32> to vector<64x1xf32>
    %cst_164 = arith.constant 1.280000e+02 : f32
    %451 = vector.broadcast %cst_164 : f32 to vector<64x1xf32>
    %452 = arith.divf %450, %451 : vector<64x1xf32>
    %453 = vector.broadcast %452 : vector<64x1xf32> to vector<64x128xf32>
    %454 = arith.subf %444, %453 : vector<64x128xf32>
    %455 = arith.mulf %454, %454 : vector<64x128xf32>
    %cst_165 = arith.constant dense<0.000000e+00> : vector<64xf32>
    %456 = vector.multi_reduction <add>, %455, %cst_165 [1] : vector<64x128xf32> to vector<64xf32>
    %457 = vector.shape_cast %456 : vector<64xf32> to vector<64x1xf32>
    %cst_166 = arith.constant 1.280000e+02 : f32
    %458 = vector.broadcast %cst_166 : f32 to vector<64x1xf32>
    %459 = arith.divf %457, %458 : vector<64x1xf32>
    %460 = vector.broadcast %452 : vector<64x1xf32> to vector<64x128xf32>
    %461 = arith.subf %444, %460 : vector<64x128xf32>
    %cst_167 = arith.constant 9.99999996E-13 : f32
    %462 = vector.broadcast %cst_167 : f32 to vector<64x1xf32>
    %463 = arith.addf %459, %462 : vector<64x1xf32>
    %464 = math.rsqrt %463 : vector<64x1xf32>
    %465 = vector.broadcast %464 : vector<64x1xf32> to vector<64x128xf32>
    %466 = arith.mulf %461, %465 : vector<64x128xf32>
    %467 = vector.broadcast %446 : vector<1x128xf32> to vector<64x128xf32>
    %468 = arith.mulf %466, %467 : vector<64x128xf32>
    %469 = vector.broadcast %448 : vector<1x128xf32> to vector<64x128xf32>
    %470 = arith.addf %468, %469 : vector<64x128xf32>
    %471 = arith.truncf %470 : vector<64x128xf32> to vector<64x128xbf16>
    %c1_168 = arith.constant 1 : index
    %c0_169 = arith.constant 0 : index
    %c0_170 = arith.constant 0 : index
    %472 = vector.load %arg20[%c1_168, %c0_169, %c0_170] : memref<2x128x256xbf16, #tpu.memory_space<vmem>>, vector<1x128x256xbf16>
    %473 = vector.shape_cast %472 : vector<1x128x256xbf16> to vector<128x256xbf16>
    %cst_171 = arith.constant dense<0.000000e+00> : vector<64x256xf32>
    %474 = tpu.matmul %471, %473, %cst_171 {dimension_numbers = #tpu.dot_dimension_numbers<[1], [0], [0], [1], [0, 0, 1, 1], [], []>} : vector<64x128xbf16>, vector<128x256xbf16>, vector<64x256xf32> -> vector<64x256xf32>
    %c1_172 = arith.constant 1 : index
    %c0_173 = arith.constant 0 : index
    %c0_174 = arith.constant 0 : index
    %475 = vector.load %arg21[%c1_172, %c0_173, %c0_174] : memref<2x1x256xf32, #tpu.memory_space<vmem>>, vector<1x1x256xf32>
    %476 = vector.shape_cast %475 : vector<1x1x256xf32> to vector<1x256xf32>
    %477 = vector.broadcast %476 : vector<1x256xf32> to vector<64x256xf32>
    %478 = arith.addf %474, %477 : vector<64x256xf32>
    %479 = arith.mulf %478, %478 : vector<64x256xf32>
    %480 = arith.mulf %478, %479 : vector<64x256xf32>
    %cst_175 = arith.constant 4.471500e-02 : f32
    %481 = vector.broadcast %cst_175 : f32 to vector<64x256xf32>
    %482 = arith.mulf %481, %480 : vector<64x256xf32>
    %483 = arith.addf %478, %482 : vector<64x256xf32>
    %cst_176 = arith.constant 0.797884583 : f32
    %484 = vector.broadcast %cst_176 : f32 to vector<64x256xf32>
    %485 = arith.mulf %484, %483 : vector<64x256xf32>
    %486 = math.tanh %485 : vector<64x256xf32>
    %cst_177 = arith.constant 1.000000e+00 : f32
    %487 = vector.broadcast %cst_177 : f32 to vector<64x256xf32>
    %488 = arith.addf %487, %486 : vector<64x256xf32>
    %cst_178 = arith.constant 5.000000e-01 : f32
    %489 = vector.broadcast %cst_178 : f32 to vector<64x256xf32>
    %490 = arith.mulf %489, %488 : vector<64x256xf32>
    %491 = arith.mulf %478, %490 : vector<64x256xf32>
    %492 = arith.truncf %491 : vector<64x256xf32> to vector<64x256xbf16>
    %c1_179 = arith.constant 1 : index
    %c0_180 = arith.constant 0 : index
    %c0_181 = arith.constant 0 : index
    %493 = vector.load %arg22[%c1_179, %c0_180, %c0_181] : memref<2x256x128xbf16, #tpu.memory_space<vmem>>, vector<1x256x128xbf16>
    %494 = vector.shape_cast %493 : vector<1x256x128xbf16> to vector<256x128xbf16>
    %cst_182 = arith.constant dense<0.000000e+00> : vector<64x128xf32>
    %495 = tpu.matmul %492, %494, %cst_182 {dimension_numbers = #tpu.dot_dimension_numbers<[1], [0], [0], [1], [0, 0, 1, 1], [], []>} : vector<64x256xbf16>, vector<256x128xbf16>, vector<64x128xf32> -> vector<64x128xf32>
    %c1_183 = arith.constant 1 : index
    %c0_184 = arith.constant 0 : index
    %c0_185 = arith.constant 0 : index
    %496 = vector.load %arg23[%c1_183, %c0_184, %c0_185] : memref<2x1x128xf32, #tpu.memory_space<vmem>>, vector<1x1x128xf32>
    %497 = vector.shape_cast %496 : vector<1x1x128xf32> to vector<1x128xf32>
    %498 = vector.broadcast %497 : vector<1x128xf32> to vector<64x128xf32>
    %499 = arith.addf %495, %498 : vector<64x128xf32>
    %500 = arith.addf %470, %499 : vector<64x128xf32>
    %c1_186 = arith.constant 1 : index
    %c0_187 = arith.constant 0 : index
    %c0_188 = arith.constant 0 : index
    %501 = vector.load %arg24[%c1_186, %c0_187, %c0_188] : memref<2x1x128xf32, #tpu.memory_space<vmem>>, vector<1x1x128xf32>
    %502 = vector.shape_cast %501 : vector<1x1x128xf32> to vector<1x128xf32>
    %c1_189 = arith.constant 1 : index
    %c0_190 = arith.constant 0 : index
    %c0_191 = arith.constant 0 : index
    %503 = vector.load %arg25[%c1_189, %c0_190, %c0_191] : memref<2x1x128xf32, #tpu.memory_space<vmem>>, vector<1x1x128xf32>
    %504 = vector.shape_cast %503 : vector<1x1x128xf32> to vector<1x128xf32>
    %cst_192 = arith.constant dense<0.000000e+00> : vector<64xf32>
    %505 = vector.multi_reduction <add>, %500, %cst_192 [1] : vector<64x128xf32> to vector<64xf32>
    %506 = vector.shape_cast %505 : vector<64xf32> to vector<64x1xf32>
    %cst_193 = arith.constant 1.280000e+02 : f32
    %507 = vector.broadcast %cst_193 : f32 to vector<64x1xf32>
    %508 = arith.divf %506, %507 : vector<64x1xf32>
    %509 = vector.broadcast %508 : vector<64x1xf32> to vector<64x128xf32>
    %510 = arith.subf %500, %509 : vector<64x128xf32>
    %511 = arith.mulf %510, %510 : vector<64x128xf32>
    %cst_194 = arith.constant dense<0.000000e+00> : vector<64xf32>
    %512 = vector.multi_reduction <add>, %511, %cst_194 [1] : vector<64x128xf32> to vector<64xf32>
    %513 = vector.shape_cast %512 : vector<64xf32> to vector<64x1xf32>
    %cst_195 = arith.constant 1.280000e+02 : f32
    %514 = vector.broadcast %cst_195 : f32 to vector<64x1xf32>
    %515 = arith.divf %513, %514 : vector<64x1xf32>
    %516 = vector.broadcast %508 : vector<64x1xf32> to vector<64x128xf32>
    %517 = arith.subf %500, %516 : vector<64x128xf32>
    %cst_196 = arith.constant 9.99999996E-13 : f32
    %518 = vector.broadcast %cst_196 : f32 to vector<64x1xf32>
    %519 = arith.addf %515, %518 : vector<64x1xf32>
    %520 = math.rsqrt %519 : vector<64x1xf32>
    %521 = vector.broadcast %520 : vector<64x1xf32> to vector<64x128xf32>
    %522 = arith.mulf %517, %521 : vector<64x128xf32>
    %523 = vector.broadcast %502 : vector<1x128xf32> to vector<64x128xf32>
    %524 = arith.mulf %522, %523 : vector<64x128xf32>
    %525 = vector.broadcast %504 : vector<1x128xf32> to vector<64x128xf32>
    %526 = arith.addf %524, %525 : vector<64x128xf32>
    %527 = vector.shape_cast %526 : vector<64x128xf32> to vector<4x16x128xf32>
    %528 = vector.extract_strided_slice %527 {offsets = [0, 0, 0], sizes = [4, 1, 128], strides = [1, 1, 1]} : vector<4x16x128xf32> to vector<4x1x128xf32>
    %529 = vector.shape_cast %528 : vector<4x1x128xf32> to vector<4x128xf32>
    %c0_197 = arith.constant 0 : index
    %c0_198 = arith.constant 0 : index
    %530 = vector.load %arg26[%c0_197, %c0_198] : memref<1x128xf32, #tpu.memory_space<vmem>>, vector<1x128xf32>
    %531 = vector.broadcast %530 : vector<1x128xf32> to vector<4x128xf32>
    %532 = arith.mulf %529, %531 : vector<4x128xf32>
    %cst_199 = arith.constant dense<0.000000e+00> : vector<4xf32>
    %533 = vector.multi_reduction <add>, %532, %cst_199 [1] : vector<4x128xf32> to vector<4xf32>
    %534 = vector.shape_cast %533 : vector<4xf32> to vector<4x1xf32>
    %c0_200 = arith.constant 0 : index
    %c0_201 = arith.constant 0 : index
    %535 = vector.load %arg27[%c0_200, %c0_201] : memref<1x1xf32, #tpu.memory_space<vmem>>, vector<1x1xf32>
    %536 = vector.broadcast %535 : vector<1x1xf32> to vector<4x1xf32>
    %537 = arith.addf %534, %536 : vector<4x1xf32>
    %c0_202 = arith.constant 0 : index
    %c0_203 = arith.constant 0 : index
    %538 = vector.load %arg28[%c0_202, %c0_203] : memref<4x1xf32, #tpu.memory_space<vmem>>, vector<4x1xf32>
    tpu.vector_store %arg28[%c0_202, %c0_203], %537 {strides = array<i32>} : memref<4x1xf32, #tpu.memory_space<vmem>>, vector<4x1xf32>,
    return
  }
}

</mosaic_0001>

<bundles_post_ra>
// kernel: model_forward.1
= control target key start
LH: loop header
LB: loop body
LE: loop exit
PB: predicated region body
PF: predicated region fallthrough
CT: control target
= control target key end

     0   :  { %s12637_s0 = inlined_call_operand.vmem [shape: f32[4,128], index: 0, kind: input, shape index: {}]   ;;  %s12638_s1 = inlined_call_operand.hbm [shape: bf16[128,128], index: 1, kind: input, shape index: {}]   ;;  %s12639_s2 = inlined_call_operand.hbm [shape: f32[1,128], index: 2, kind: input, shape index: {}]   ;;  %s12640_s3 = inlined_call_operand.hbm [shape: f32[1,128], index: 3, kind: input, shape index: {}]   ;;  %s12641_s4 = inlined_call_operand.hbm [shape: f32[1,128], index: 4, kind: input, shape index: {}]   ;;  %s12642_s5 = inlined_call_operand.hbm [shape: bf16[128,128], index: 5, kind: input, shape index: {}]   ;;  %s12643_s6 = inlined_call_operand.hbm [shape: f32[1,128], index: 6, kind: input, shape index: {}]   ;;  %s12644_s7 = inlined_call_operand.vmem [shape: f32[1,128], index: 7, kind: input, shape index: {}]   ;;  %s12645_s8 = inlined_call_operand.vmem [shape: f32[4,16,128], index: 8, kind: input, shape index: {}]   ;;  %s12646_s9 = inlined_call_operand.vmem [shape: f32[16,128], index: 9, kind: input, shape index: {}]   ;;  %s12647_s10 = inlined_call_operand.vmem [shape: f32[1,128], index: 10, kind: input, shape index: {}]   ;;  %s12648_s11 = inlined_call_operand.hbm [shape: f32[1,128], index: 11, kind: input, shape index: {}]   ;;  %s12649_s12 = inlined_call_operand.hbm [shape: f32[1,128], index: 12, kind: input, shape index: {}]   ;;  %s12650_s13 = inlined_call_operand.vmem [shape: f32[4,1,16], index: 13, kind: input, shape index: {}]   ;;  %s12651_s14 = inlined_call_operand.vmem [shape: bf16[2,128,384], index: 14, kind: input, shape index: {}]   ;;  %s12652_s15 = inlined_call_operand.vmem [shape: f32[2,1,384], index: 15, kind: input, shape index: {}]   ;;  %s12653_s16 = inlined_call_operand.vmem [shape: bf16[2,128,128], index: 16, kind: input, shape index: {}]   ;;  %s12654_s17 = inlined_call_operand.vmem [shape: f32[2,1,128], index: 17, kind: input, shape index: {}]   ;;  %s12655_s18 = inlined_call_operand.hbm [shape: f32[2,1,128], index: 18, kind: input, shape index: {}]   ;;  %s12656_s19 = inlined_call_operand.hbm [shape: f32[2,1,128], index: 19, kind: input, shape index: {}]   ;;  %s12657_s20 = inlined_call_operand.vmem [shape: bf16[2,128,256], index: 20, kind: input, shape index: {}]   ;;  %s12658_s21 = inlined_call_operand.vmem [shape: f32[2,1,256], index: 21, kind: input, shape index: {}]   ;;  %s12659_s22 = inlined_call_operand.vmem [shape: bf16[2,256,128], index: 22, kind: input, shape index: {}]   ;;  %s12660_s23 = inlined_call_operand.hbm [shape: f32[2,1,128], index: 23, kind: input, shape index: {}]   ;;  %s12661_s24 = inlined_call_operand.hbm [shape: f32[2,1,128], index: 24, kind: input, shape index: {}]   ;;  %s12662_s25 = inlined_call_operand.hbm [shape: f32[2,1,128], index: 25, kind: input, shape index: {}]   ;;  %s12663_s26 = inlined_call_operand.hbm [shape: f32[1,128], index: 26, kind: input, shape index: {}]   ;;  %s12664_s27 = inlined_call_operand.<no memory space> [shape: f32[1,1], index: 27, kind: input, shape index: {}]   ;;  %s12665_s28 = inlined_call_operand.vmem [shape: f32[4,1], index: 28, kind: output, shape index: {}]  }
   0x1   :  { %12683 = sst [smem:[#allocation33_spill]] %s12637_s0  ;;  %v33_v0 = vstv %s12664_s27 }
   0x2   :  { %12684 = sst [smem:[#allocation34_spill]] %s12638_s1  ;;  %34 = vst [vmem:[#allocation2] sm:$0x1] %v33_v0 }
   0x3   :  { %12685 = sst [smem:[#allocation35_spill]] %s12639_s2 }
   0x4   :  { %12686 = sst [smem:[#allocation36_spill]] %s12640_s3 }
   0x5   :  { %12687 = sst [smem:[#allocation37_spill]] %s12641_s4 }
   0x6   :  { %12688 = sst [smem:[#allocation38_spill]] %s12642_s5 }
   0x7   :  { %12689 = sst [smem:[#allocation39_spill]] %s12643_s6 }
   0x8   :  { %12690 = sst [smem:[#allocation40_spill]] %s12644_s7 }
   0x9   :  { %12691 = sst [smem:[#allocation41_spill]] %s12645_s8 }
   0xa   :  { %12692 = sst [smem:[#allocation42_spill]] %s12646_s9 }
   0xb   :  { %12693 = sst [smem:[#allocation43_spill]] %s12647_s10 }
   0xc   :  { %12694 = sst [smem:[#allocation44_spill]] %s12648_s11 }
   0xd   :  { %12695 = sst [smem:[#allocation45_spill]] %s12649_s12 }
   0xe   :  { %35 = vsyncpa [#allocation4], 0 }
   0xf   :  { %36 = vsyncpa [#allocation6], 0 }
  0x10   :  { %37 = vsyncpa [#allocation9], 0 }
  0x11   :  { %38 = vsyncpa [#allocation12], 0 }
  0x12   :  { %39 = vsyncpa [#allocation15], 0 }
  0x13   :  { %40 = vsyncpa [#allocation18], 0 }
  0x14   :  { %41 = vsyncpa [#allocation21], 0 }
  0x15   :  { %42 = vsyncpa [#allocation24], 0  ;;  %s10039_s9 = smov [#allocation5]   ;;  %s10040_s3 = smov [#allocation8]  }
  0x16   :  { %s63_s30 = sshll.u32 %s10039_s9, 4  ;;  %s83_s6 = sshll.u32 %s10040_s3, 4  ;;  %s64_s30 = int_to_ptr.vmem [resolvable:$true] %s63_s30  ;;  %s84_s6 = int_to_ptr.vmem [resolvable:$true] %s83_s6 }
  0x17   :  { %s12696_s11 = sld [smem:[#allocation35_spill]] }
  0x1d   :  { %s9715_s29 = scalar_lea.hbm %s12696_s11, 16 }
  0x1e   :  { %p9716_p0 = scmp.ne.s32.totalorder %s12696_s11, %s9715_s29  ;;  %p9719_p1 = scmp.lt.u32.totalorder %s9715_s29, %s12696_s11 }
  0x20   :  { %p9721_p2 = pnand %p9719_p1, %p9716_p0 }
  0x22   :  { %9724 = shalt.err (!%p9721_p2)
}
  0x23   :  { %s9725_s1 = scalar_lea.vmem %s64_s30, 16  ;;  %s9729_s4 = scalar_lea.vmem %s64_s30, 32 }
  0x24   :  { %p9726_p3 = scmp.ne.s32.totalorder %s64_s30, %s9725_s1  ;;  %p9730_p4 = scmp.lt.s32.totalorder %s64_s30, %s64_s30 }
  0x25   :  { %p9731_p5 = scmp.lt.s32.totalorder %s9729_s4, %s9725_s1 }
  0x27   :  { %p9732_p6 = por %p9731_p5, %p9730_p4 }
  0x29   :  { %p9733_p7 = pnand %p9732_p6, %p9726_p3 }
  0x2b   :  { %9736 = shalt.err (!%p9733_p7)
}
  0x2c   :  { %66 = dma.hbm_to_vmem [thread:$0]  %s12696_s11, 16, %s64_s30, [#allocation6]  }
  0x2d   :  { %s12697_s10 = sld [smem:[#allocation37_spill]] }
  0x33   :  { %s9737_s0 = scalar_lea.hbm %s12697_s10, 16 }
  0x34   :  { %p9738_p8 = scmp.ne.s32.totalorder %s12697_s10, %s9737_s0  ;;  %p9741_p9 = scmp.lt.u32.totalorder %s9737_s0, %s12697_s10 }
  0x36   :  { %p9743_p10 = pnand %p9741_p9, %p9738_p8 }
  0x38   :  { %9746 = shalt.err (!%p9743_p10)
}
  0x39   :  { %s9747_s12 = scalar_lea.vmem %s84_s6, 16  ;;  %s9751_s1 = scalar_lea.vmem %s84_s6, 32 }
  0x3a   :  { %p9748_p11 = scmp.ne.s32.totalorder %s84_s6, %s9747_s12  ;;  %p9752_p12 = scmp.lt.s32.totalorder %s84_s6, %s84_s6 }
  0x3b   :  { %p9753_p13 = scmp.lt.s32.totalorder %s9751_s1, %s9747_s12 }
  0x3d   :  { %p9754_p0 = por %p9753_p13, %p9752_p12 }
  0x3f   :  { %p9755_p1 = pnand %p9754_p0, %p9748_p11 }
  0x41   :  { %9758 = shalt.err (!%p9755_p1)
}
  0x42   :  { %86 = dma.hbm_to_vmem [thread:$0]  %s12697_s10, 16, %s84_s6, [#allocation9]  }
  0x43   :  { %s10041_s4 = smov [#allocation11]   ;;  %s10042_s5 = smov [#allocation14]  }
  0x44   :  { %s105_s8 = sshll.u32 %s10041_s4, 4  ;;  %s133_s9 = sshll.u32 %s10042_s5, 4  ;;  %s106_s8 = int_to_ptr.vmem [resolvable:$true] %s105_s8  ;;  %s134_s9 = int_to_ptr.vmem [resolvable:$true] %s133_s9 }
  0x45   :  { %s12698_s27 = sld [smem:[#allocation39_spill]] }
  0x4b   :  { %s9759_s29 = scalar_lea.hbm %s12698_s27, 16 }
  0x4c   :  { %p9760_p2 = scmp.ne.s32.totalorder %s12698_s27, %s9759_s29  ;;  %p9763_p3 = scmp.lt.u32.totalorder %s9759_s29, %s12698_s27 }
  0x4e   :  { %p9765_p4 = pnand %p9763_p3, %p9760_p2 }
  0x50   :  { %9768 = shalt.err (!%p9765_p4)
}
  0x51   :  { %s9769_s6 = scalar_lea.vmem %s106_s8, 16  ;;  %s9773_s10 = scalar_lea.vmem %s106_s8, 32 }
  0x52   :  { %p9770_p5 = scmp.ne.s32.totalorder %s106_s8, %s9769_s6  ;;  %p9774_p6 = scmp.lt.s32.totalorder %s106_s8, %s106_s8 }
  0x53   :  { %p9775_p7 = scmp.lt.s32.totalorder %s9773_s10, %s9769_s6 }
  0x55   :  { %p9776_p8 = por %p9775_p7, %p9774_p6 }
  0x57   :  { %p9777_p9 = pnand %p9776_p8, %p9770_p5 }
  0x59   :  { %9780 = shalt.err (!%p9777_p9)
}
  0x5a   :  { %108 = dma.hbm_to_vmem [thread:$0]  %s12698_s27, 16, %s106_s8, [#allocation12]  }
  0x5b   :  { %s12699_s3 = sld [smem:[#allocation45_spill]] }
  0x61   :  { %s9781_s0 = scalar_lea.hbm %s12699_s3, 16 }
  0x62   :  { %p9782_p10 = scmp.ne.s32.totalorder %s12699_s3, %s9781_s0  ;;  %p9785_p11 = scmp.lt.u32.totalorder %s9781_s0, %s12699_s3 }
  0x64   :  { %p9787_p12 = pnand %p9785_p11, %p9782_p10 }
  0x66   :  { %9790 = shalt.err (!%p9787_p12)
}
  0x67   :  { %s9791_s1 = scalar_lea.vmem %s134_s9, 16  ;;  %s9795_s6 = scalar_lea.vmem %s134_s9, 32 }
  0x68   :  { %p9792_p13 = scmp.ne.s32.totalorder %s134_s9, %s9791_s1  ;;  %p9796_p0 = scmp.lt.s32.totalorder %s134_s9, %s134_s9 }
  0x69   :  { %p9797_p1 = scmp.lt.s32.totalorder %s9795_s6, %s9791_s1 }
  0x6b   :  { %p9798_p2 = por %p9797_p1, %p9796_p0 }
  0x6d   :  { %p9799_p3 = pnand %p9798_p2, %p9792_p13 }
  0x6f   :  { %9802 = shalt.err (!%p9799_p3)
}
  0x70   :  { %136 = dma.hbm_to_vmem [thread:$0]  %s12699_s3, 16, %s134_s9, [#allocation15]  }
  0x71   :  { %s10043_s10 = smov [#allocation17]   ;;  %s10044_s11 = smov [#allocation20]  }
  0x72   :  { %s164_s30 = sshll.u32 %s10043_s10, 4  ;;  %s194_s4 = sshll.u32 %s10044_s11, 4  ;;  %s165_s30 = int_to_ptr.vmem [resolvable:$true] %s164_s30  ;;  %s10259_s4 = int_to_ptr.vmem [resolvable:$true] %s194_s4 }
  0x73   :  { %s9803_s2 = scalar_lea.hbm %s12656_s19, 32 }
  0x74   :  { %p9804_p4 = scmp.ne.s32.totalorder %s12656_s19, %s9803_s2  ;;  %p9807_p5 = scmp.lt.u32.totalorder %s9803_s2, %s12656_s19 }
  0x76   :  { %p9809_p6 = pnand %p9807_p5, %p9804_p4 }
  0x78   :  { %9812 = shalt.err (!%p9809_p6)
}
  0x79   :  { %s9813_s9 = scalar_lea.vmem %s165_s30, 32  ;;  %p9818_p8 = scmp.lt.s32.totalorder %s165_s30, %s165_s30 }
  0x7a   :  { %p9814_p7 = scmp.ne.s32.totalorder %s165_s30, %s9813_s9  ;;  %p9819_p9 = scmp.lt.s32.totalorder %s9813_s9, %s9813_s9 }
  0x7c   :  { %p9820_p10 = por %p9819_p9, %p9818_p8 }
  0x7e   :  { %p9821_p11 = pnand %p9820_p10, %p9814_p7 }
  0x80   :  { %9824 = shalt.err (!%p9821_p11)
}
  0x81   :  { %s12676_s3 = smov 16   ;;  %s12678_s6 = smov 1  }
  0x82   :  { %170 = dma.hbm_to_vmem [thread:$0]  %s12656_s19, 32, %s165_s30, [#allocation18], %s12676_s3, %s12676_s3, %s12678_s6  }
  0x83   :  { %s9825_s5 = scalar_lea.hbm %s12661_s24, 32 }
  0x84   :  { %p9826_p12 = scmp.ne.s32.totalorder %s12661_s24, %s9825_s5  ;;  %p9829_p13 = scmp.lt.u32.totalorder %s9825_s5, %s12661_s24 }
  0x86   :  { %p9831_p0 = pnand %p9829_p13, %p9826_p12 }
  0x88   :  { %9834 = shalt.err (!%p9831_p0)
}
  0x89   :  { %s9835_s12 = scalar_lea.vmem %s10259_s4, 32  ;;  %p9840_p2 = scmp.lt.s32.totalorder %s10259_s4, %s10259_s4 }
  0x8a   :  { %p9836_p1 = scmp.ne.s32.totalorder %s10259_s4, %s9835_s12  ;;  %p9841_p3 = scmp.lt.s32.totalorder %s9835_s12, %s9835_s12 }
  0x8c   :  { %p9842_p4 = por %p9841_p3, %p9840_p2 }
  0x8e   :  { %p9843_p5 = pnand %p9842_p4, %p9836_p1 }
  0x90   :  { %9846 = shalt.err (!%p9843_p5)
}
  0x91   :  { %200 = dma.hbm_to_vmem [thread:$0]  %s12661_s24, 32, %s10259_s4, [#allocation21], %s12676_s3, %s12676_s3, %s12678_s6  }
  0x92   :  { %s10047_s1 = smov [#allocation3]   ;;  %s12700_s10 = sld [smem:[#allocation34_spill]] }
  0x93   :  { %s50_s9 = sshll.u32 %s10047_s1, 4  ;;  %s51_s9 = int_to_ptr.vmem [resolvable:$true] %s50_s9 }
  0x98   :  { %s9847_s11 = scalar_lea.hbm %s12700_s10, 1024 }
  0x99   :  { %p9848_p6 = scmp.ne.s32.totalorder %s12700_s10, %s9847_s11  ;;  %p9851_p7 = scmp.lt.u32.totalorder %s9847_s11, %s12700_s10 }
  0x9b   :  { %p9853_p8 = pnand %p9851_p7, %p9848_p6 }
  0x9d   :  { %9856 = shalt.err (!%p9853_p8)
}
  0x9e   :  { %s9857_s7 = scalar_lea.vmem %s51_s9, 1024  ;;  %p9862_p10 = scmp.lt.s32.totalorder %s51_s9, %s51_s9 }
  0x9f   :  { %p9858_p9 = scmp.ne.s32.totalorder %s51_s9, %s9857_s7  ;;  %p9863_p11 = scmp.lt.s32.totalorder %s9857_s7, %s9857_s7 }
  0xa1   :  { %p9864_p12 = por %p9863_p11, %p9862_p10 }
  0xa3   :  { %p9865_p13 = pnand %p9864_p12, %p9858_p9 }
  0xa5   :  { %9868 = shalt.err (!%p9865_p13)
}
  0xa6   :  { %s10048_s24 = smov 64   ;;  %s10049_s4 = smov 4  }
  0xa7   :  { %56 = dma.hbm_to_vmem [thread:$0]  %s12700_s10, 1024, %s51_s9, [#allocation4], %s10048_s24, %s10048_s24, %s10049_s4  }
  0xa8   :  { %s10050_s30 = smov [#allocation7]   ;;  %s10051_s8 = smov [#allocation10]  }
  0xa9   :  { %s73_s1 = sshll.u32 %s10050_s30, 4  ;;  %s92_s27 = sshll.u32 %s10051_s8, 4  ;;  %s74_s1 = int_to_ptr.vmem [resolvable:$true] %s73_s1  ;;  %s93_s27 = int_to_ptr.vmem [resolvable:$true] %s92_s27 }
  0xaa   :  { %s12701_s0 = sld [smem:[#allocation36_spill]] }
  0xb0   :  { %s9869_s2 = scalar_lea.hbm %s12701_s0, 16 }
  0xb1   :  { %p9870_p0 = scmp.ne.s32.totalorder %s12701_s0, %s9869_s2  ;;  %p9873_p1 = scmp.lt.u32.totalorder %s9869_s2, %s12701_s0 }
  0xb3   :  { %p9875_p2 = pnand %p9873_p1, %p9870_p0 }
  0xb5   :  { %9878 = shalt.err (!%p9875_p2)
}
  0xb6   :  { %s9879_s9 = scalar_lea.vmem %s74_s1, 16  ;;  %s9883_s10 = scalar_lea.vmem %s74_s1, 32 }
  0xb7   :  { %p9880_p3 = scmp.ne.s32.totalorder %s74_s1, %s9879_s9  ;;  %p9884_p4 = scmp.lt.s32.totalorder %s74_s1, %s74_s1 }
  0xb8   :  { %p9885_p5 = scmp.lt.s32.totalorder %s9883_s10, %s9879_s9 }
  0xba   :  { %p9886_p6 = por %p9885_p5, %p9884_p4 }
  0xbc   :  { %p9887_p7 = pnand %p9886_p6, %p9880_p3 }
  0xbe   :  { %9890 = shalt.err (!%p9887_p7)
}
  0xbf   :  { %76 = dma.hbm_to_vmem [thread:$0]  %s12701_s0, 16, %s74_s1, [#allocation6]  }
  0xc0   :  { %s12702_s11 = sld [smem:[#allocation38_spill]] }
  0xc6   :  { %s9891_s3 = scalar_lea.hbm %s12702_s11, 1024 }
  0xc7   :  { %p9892_p8 = scmp.ne.s32.totalorder %s12702_s11, %s9891_s3  ;;  %p9895_p9 = scmp.lt.u32.totalorder %s9891_s3, %s12702_s11 }
  0xc9   :  { %p9897_p10 = pnand %p9895_p9, %p9892_p8 }
  0xcb   :  { %9900 = shalt.err (!%p9897_p10)
}
  0xcc   :  { %s9901_s7 = scalar_lea.vmem %s93_s27, 1024  ;;  %p9906_p12 = scmp.lt.s32.totalorder %s93_s27, %s93_s27 }
  0xcd   :  { %p9902_p11 = scmp.ne.s32.totalorder %s93_s27, %s9901_s7  ;;  %p9907_p13 = scmp.lt.s32.totalorder %s9901_s7, %s9901_s7 }
  0xcf   :  { %p9908_p0 = por %p9907_p13, %p9906_p12 }
  0xd1   :  { %p9909_p1 = pnand %p9908_p0, %p9902_p11 }
  0xd3   :  { %9912 = shalt.err (!%p9909_p1)
}
  0xd4   :  { %98 = dma.hbm_to_vmem [thread:$0]  %s12702_s11, 1024, %s93_s27, [#allocation9], %s10048_s24, %s10048_s24, %s10049_s4  }
  0xd5   :  { %s10052_s9 = smov [#allocation13]   ;;  %s10053_s12 = smov [#allocation16]  }
  0xd6   :  { %s123_s10 = sshll.u32 %s10052_s9, 4  ;;  %s152_s19 = sshll.u32 %s10053_s12, 4  ;;  %s124_s10 = int_to_ptr.vmem [resolvable:$true] %s123_s10  ;;  %s153_s19 = int_to_ptr.vmem [resolvable:$true] %s152_s19 }
  0xd7   :  { %s12703_s3 = sld [smem:[#allocation44_spill]] }
  0xdd   :  { %s9913_s6 = scalar_lea.hbm %s12703_s3, 16 }
  0xde   :  { %p9914_p2 = scmp.ne.s32.totalorder %s12703_s3, %s9913_s6  ;;  %p9917_p3 = scmp.lt.u32.totalorder %s9913_s6, %s12703_s3 }
  0xe0   :  { %p9919_p4 = pnand %p9917_p3, %p9914_p2 }
  0xe2   :  { %9922 = shalt.err (!%p9919_p4)
}
  0xe3   :  { %s9923_s4 = scalar_lea.vmem %s124_s10, 16  ;;  %s9927_s27 = scalar_lea.vmem %s124_s10, 32 }
  0xe4   :  { %p9924_p5 = scmp.ne.s32.totalorder %s124_s10, %s9923_s4  ;;  %p9928_p6 = scmp.lt.s32.totalorder %s124_s10, %s124_s10 }
  0xe5   :  { %p9929_p7 = scmp.lt.s32.totalorder %s9927_s27, %s9923_s4 }
  0xe7   :  { %p9930_p8 = por %p9929_p7, %p9928_p6 }
  0xe9   :  { %p9931_p9 = pnand %p9930_p8, %p9924_p5 }
  0xeb   :  { %9934 = shalt.err (!%p9931_p9)
}
  0xec   :  { %126 = dma.hbm_to_vmem [thread:$0]  %s12703_s3, 16, %s124_s10, [#allocation12]  }
  0xed   :  { %s9935_s12 = scalar_lea.hbm %s12655_s18, 32 }
  0xee   :  { %p9936_p10 = scmp.ne.s32.totalorder %s12655_s18, %s9935_s12  ;;  %p9939_p11 = scmp.lt.u32.totalorder %s9935_s12, %s12655_s18 }
  0xf0   :  { %p9941_p12 = pnand %p9939_p11, %p9936_p10 }
  0xf2   :  { %9944 = shalt.err (!%p9941_p12)
}
  0xf3   :  { %s9945_s2 = scalar_lea.vmem %s153_s19, 32  ;;  %p9950_p0 = scmp.lt.s32.totalorder %s153_s19, %s153_s19 }
  0xf4   :  { %p9946_p13 = scmp.ne.s32.totalorder %s153_s19, %s9945_s2  ;;  %p9951_p1 = scmp.lt.s32.totalorder %s9945_s2, %s9945_s2 }
  0xf6   :  { %p9952_p2 = por %p9951_p1, %p9950_p0 }
  0xf8   :  { %p9953_p3 = pnand %p9952_p2, %p9946_p13 }
  0xfa   :  { %9956 = shalt.err (!%p9953_p3)
}
  0xfb   :  { %s12704_s10 = smov 1   ;;  %s12705_s3 = smov 16  }
  0xfc   :  { %158 = dma.hbm_to_vmem [thread:$0]  %s12655_s18, 32, %s153_s19, [#allocation15], %s12705_s3, %s12705_s3, %s12704_s10  }
  0xfd   :  { %s10054_s4 = smov [#allocation19]   ;;  %s10055_s11 = smov [#allocation22]  }
  0xfe   :  { %s182_s27 = sshll.u32 %s10054_s4, 4  ;;  %s206_s1 = sshll.u32 %s10055_s11, 4  ;;  %s183_s27 = int_to_ptr.vmem [resolvable:$true] %s182_s27  ;;  %s207_s1 = int_to_ptr.vmem [resolvable:$true] %s206_s1 }
  0xff   :  { %s9957_s12 = scalar_lea.hbm %s12660_s23, 32 }
 0x100   :  { %p9958_p4 = scmp.ne.s32.totalorder %s12660_s23, %s9957_s12  ;;  %p9961_p5 = scmp.lt.u32.totalorder %s9957_s12, %s12660_s23 }
 0x102   :  { %p9963_p6 = pnand %p9961_p5, %p9958_p4 }
 0x104   :  { %9966 = shalt.err (!%p9963_p6)
}
 0x105   :  { %s9967_s18 = scalar_lea.vmem %s183_s27, 32  ;;  %p9972_p8 = scmp.lt.s32.totalorder %s183_s27, %s183_s27 }
 0x106   :  { %p9968_p7 = scmp.ne.s32.totalorder %s183_s27, %s9967_s18  ;;  %p9973_p9 = scmp.lt.s32.totalorder %s9967_s18, %s9967_s18 }
 0x108   :  { %p9974_p10 = por %p9973_p9, %p9972_p8 }
 0x10a   :  { %p9975_p11 = pnand %p9974_p10, %p9968_p7 }
 0x10c   :  { %9978 = shalt.err (!%p9975_p11)
}
 0x10d   :  { %188 = dma.hbm_to_vmem [thread:$0]  %s12660_s23, 32, %s183_s27, [#allocation18], %s12705_s3, %s12705_s3, %s12704_s10  }
 0x10e   :  { %s9979_s4 = scalar_lea.hbm %s12662_s25, 32 }
 0x10f   :  { %p9980_p12 = scmp.ne.s32.totalorder %s12662_s25, %s9979_s4  ;;  %p9983_p13 = scmp.lt.u32.totalorder %s9979_s4, %s12662_s25 }
 0x111   :  { %p9985_p0 = pnand %p9983_p13, %p9980_p12 }
 0x113   :  { %9988 = shalt.err (!%p9985_p0)
}
 0x114   :  { %s9989_s30 = scalar_lea.vmem %s207_s1, 32  ;;  %p9994_p2 = scmp.lt.s32.totalorder %s207_s1, %s207_s1 }
 0x115   :  { %p9990_p1 = scmp.ne.s32.totalorder %s207_s1, %s9989_s30  ;;  %p9995_p3 = scmp.lt.s32.totalorder %s9989_s30, %s9989_s30 }
 0x117   :  { %p9996_p4 = por %p9995_p3, %p9994_p2 }
 0x119   :  { %p9997_p5 = pnand %p9996_p4, %p9990_p1 }
 0x11b   :  { %10000 = shalt.err (!%p9997_p5)
}
 0x11c   :  { %212 = dma.hbm_to_vmem [thread:$0]  %s12662_s25, 32, %s207_s1, [#allocation21], %s12705_s3, %s12705_s3, %s12704_s10  }
 0x11d   :  { %s10056_s8 = smov [#allocation23]   ;;  %s10001_s19 = scalar_lea.hbm %s12663_s26, 16 }
 0x11e   :  { %s219_s6 = sshll.u32 %s10056_s8, 4  ;;  %p10002_p6 = scmp.ne.s32.totalorder %s12663_s26, %s10001_s19  ;;  %s220_s6 = int_to_ptr.vmem [resolvable:$true] %s219_s6 }
 0x11f   :  { %p10005_p7 = scmp.lt.u32.totalorder %s10001_s19, %s12663_s26 }
 0x121   :  { %p10007_p8 = pnand %p10005_p7, %p10002_p6 }
 0x123   :  { %10010 = shalt.err (!%p10007_p8)
}
 0x124   :  { %s10011_s11 = scalar_lea.vmem %s220_s6, 16  ;;  %s10015_s25 = scalar_lea.vmem %s220_s6, 32 }
 0x125   :  { %p10012_p9 = scmp.ne.s32.totalorder %s220_s6, %s10011_s11  ;;  %p10016_p10 = scmp.lt.s32.totalorder %s220_s6, %s220_s6 }
 0x126   :  { %p10017_p11 = scmp.lt.s32.totalorder %s10015_s25, %s10011_s11 }
 0x128   :  { %p10018_p12 = por %p10017_p11, %p10016_p10 }
 0x12a   :  { %p10019_p13 = pnand %p10018_p12, %p10012_p9 }
 0x12c   :  { %10022 = shalt.err (!%p10019_p13)
}
 0x12d   :  { %222 = dma.hbm_to_vmem [thread:$0]  %s12663_s26, 16, %s220_s6, [#allocation24]  }
 0x12e   :  { %10023 = dma.done.wait [#allocation4], 1024  }
 0x12f   :  { %10024 = vsyncadd [#allocation4], 4294966272 }
 0x130   :  { %10025 = dma.done.wait [#allocation6], 32  }
 0x131   :  { %10026 = vsyncadd [#allocation6], 4294967264 }
 0x132   :  { %10027 = dma.done.wait [#allocation9], 1040  }
 0x133   :  { %10028 = vsyncadd [#allocation9], 4294966256 }
 0x134   :  { %10029 = dma.done.wait [#allocation12], 32  }
 0x135   :  { %10030 = vsyncadd [#allocation12], 4294967264 }
 0x136   :  { %10031 = dma.done.wait [#allocation15], 48  }
 0x137   :  { %10032 = vsyncadd [#allocation15], 4294967248 }
 0x138   :  { %10033 = dma.done.wait [#allocation18], 64  }
 0x139   :  { %10034 = vsyncadd [#allocation18], 4294967232 }
 0x13a   :  { %10035 = dma.done.wait [#allocation21], 64  }
 0x13b   :  { %10036 = vsyncadd [#allocation21], 4294967232 }
 0x13c   :  { %10037 = dma.done.wait [#allocation24], 16  }
 0x13d   :  { %10038 = vsyncadd [#allocation24], 4294967280  ;;  %v10057_v1 = vmov 0.0   ;;  %vm10058_vm0 = vmmov 0   ;;  %v9131_v2 = vld [vmem:[#allocation3] sm:$0xff]   ;;  %v9132_v3 = vld [vmem:[#allocation3 + $0x8] sm:$0xff]  }
 0x13e   :  { %8491 = vmatprep.subr.bf16.mxu0 %v10057_v1  ;;  %8507 = vmatprep.mubr.msk.bf16.mxu0 %vm10058_vm0, %v10057_v1  ;;  %v9133_v4 = vld [vmem:[#allocation3 + $0x10] sm:$0xff]   ;;  %v9134_v5 = vld [vmem:[#allocation3 + $0x18] sm:$0xff]   ;;  %v9135_v6 = vld [vmem:[#allocation3 + $0x20] sm:$0xff]   ;;  %s12706_s0 = sld [smem:[#allocation33_spill]]  ;;  %s12708_s8 = sld [smem:[#allocation42_spill]]  ;;  %vm383_vm1 = vcmask 1043456  }
 0x13f   :  { %8511 = vmatprep.subr.bf16.mxu1 %v10057_v1  ;;  %8527 = vmatprep.mubr.msk.bf16.mxu1 %vm10058_vm0, %v10057_v1  ;;  %v9136_v7 = vld [vmem:[#allocation3 + $0x28] sm:$0xff]   ;;  %v9137_v8 = vld [vmem:[#allocation3 + $0x30] sm:$0xff]   ;;  %v9138_v9 = vld [vmem:[#allocation3 + $0x38] sm:$0xff]   ;;  %s12707_s30 = sld [smem:[#allocation41_spill]]  ;;  %s12709_s18 = sld [smem:[#allocation43_spill]]  ;;  %vm1101_vm3 = vcmask 261120  }
 0x140   :  { %8492 = vmatpush3.bf16.msra.mxu0 %v9131_v2  ;;  %v7828_v30 = vld [vmem:[#allocation5] ss:$0 sm:$0xff]  ;;  %s12710_s7 = sld [smem:[#allocation40_spill]]  ;;  %vm1330_vm4 = vcmask 130048   ;;  %s10061_s1 = smov 96   ;;  %vm7794_vm5 = vcmask 1041409  }
 0x141   :  { %8493 = vmatprep.subr.bf16.mxu0 %v10057_v1  ;;  %s10062_s19 = smov 32   ;;  %vm7797_vm6 = vcmask 1042434   ;;  %vm7800_vm7 = vcmask 1043459   ;;  %vm7814_vm8 = vcmask 3072  }
 0x144   :  { %8494 = vmatpush3.bf16.msra.mxu0 %v9132_v3  ;;  %v268_v10 = vld [vmem:[%s12706_s0] sm:$0xf]  ;;  %v10429_v13 = vld [vmem:[%s12708_s8 + $0x8] sm:$0xff] }
 0x145   :  { %8495 = vmatprep.subr.bf16.mxu0 %v10057_v1  ;;  %v269_v11 = vpack.c.bf16 %v268_v10, %v268_v10  ;;  %v542_v12 = vld [vmem:[%s12707_s30 + $0x8] sm:$0xff]  ;;  %v10434_v14 = vld [vmem:[%s12709_s18] ss:$0 sm:$0xff]  ;;  %v543_v19 = vld [vmem:[%s12707_s30 + $0x10] sm:$0xff] }
 0x146   :  { %v552_v15 = vadd.f32 %v10429_v13, %v542_v12  ;;  %v541_v16 = vld [vmem:[%s12707_s30] sm:$0xff]  ;;  %v547_v26 = vld [vmem:[%s12707_s30 + $0x30] sm:$0xff]  ;;  %v544_v56 = vld [vmem:[%s12707_s30 + $0x18] sm:$0xff] }
 0x147   :  { %v549_v17 = vld [vmem:[%s12708_s8] sm:$0xff]  ;;  %v554_v58 = vadd.f32 %v10429_v13, %v544_v56  ;;  %v546_v60 = vld [vmem:[%s12707_s30 + $0x28] sm:$0xff]  ;;  %v548_v0 = vld [vmem:[%s12707_s30 + $0x38] sm:$0xff] }
 0x148   :  { %8496 = vmatpush3.bf16.msra.mxu0 %v9133_v4  ;;  %v551_v18 = vadd.f32 %v549_v17, %v541_v16  ;;  %v10447_v20 = vadd.f32 %v10434_v14, %v552_v15  ;;  %v553_v22 = vadd.f32 %v549_v17, %v543_v19  ;;  %v545_v23 = vld [vmem:[%s12707_s30 + $0x20] sm:$0xff]  ;;  %v557_v28 = vadd.f32 %v549_v17, %v547_v26  ;;  %v9141_v10 = vld [vmem:[#allocation10 + $0x10] sm:$0xff]  }
 0x149   :  { %8497 = vmatprep.subr.bf16.mxu0 %v10057_v1  ;;  %v555_v25 = vadd.f32 %v549_v17, %v545_v23  ;;  %v569_v62 = vadd.f32 %v10434_v14, %v554_v58  ;;  %v556_v63 = vadd.f32 %v10429_v13, %v546_v60  ;;  %v558_v3 = vadd.f32 %v10429_v13, %v548_v0  ;;  %v9143_v12 = vld [vmem:[#allocation10 + $0x20] sm:$0xff]   ;;  %v9144_v13 = vld [vmem:[#allocation10 + $0x28] sm:$0xff]   ;;  %v9146_v15 = vld [vmem:[#allocation10 + $0x38] sm:$0xff]  }
 0x14a   :  { %578 = vadd.xlane.f32.xlu1 %v10447_v20  ;;  %v566_v21 = vadd.f32 %v10434_v14, %v551_v18  ;;  %v568_v24 = vadd.f32 %v10434_v14, %v553_v22  ;;  %v572_v29 = vadd.f32 %v10434_v14, %v557_v28  ;;  %v9155_v56 = vld [vmem:[%s12651_s14 + $0x30] ss:$12 sps:$4 sm:$0xff]   ;;  %v9159_v60 = vld [vmem:[%s12651_s14 + $0x48] ss:$12 sps:$4 sm:$0xff]  }
 0x14b   :  { %v570_v27 = vadd.f32 %v10434_v14, %v555_v25  ;;  %v571_v2 = vadd.f32 %v10434_v14, %v556_v63  ;;  %v9163_v63 = vld [vmem:[%s12651_s14 + $0x60] ss:$12 sps:$4 sm:$0xff]   ;;  %v9162_v0 = vld [vmem:[%s12651_s14 + $0x50] ss:$12 sps:$4 sm:$0xff]  }
 0x14c   :  { %8498 = vmatpush3.bf16.msra.mxu0 %v9134_v5  ;;  %v573_v5 = vadd.f32 %v10434_v14, %v558_v3  ;;  %v9145_v14 = vld [vmem:[#allocation10 + $0x30] sm:$0xff]  }
 0x14d   :  { %8499 = vmatprep.subr.bf16.mxu0 %v10057_v1  ;;  %v9169_v3 = vld [vmem:[%s12651_s14 + $0x7c] ss:$12 sps:$4 sm:$0xff]  }
 0x14e   :  { %576 = vadd.xlane.f32.xlu1 %v566_v21 }
 0x150   :  { %8500 = vmatpush3.bf16.msra.mxu0 %v9135_v6 }
 0x151   :  { %8501 = vmatprep.subr.bf16.mxu0 %v10057_v1 }
 0x152   :  { %580 = vadd.xlane.f32.xlu1 %v568_v24 }
 0x154   :  { %8502 = vmatpush3.bf16.msra.mxu0 %v9136_v7 }
 0x155   :  { %8503 = vmatprep.subr.bf16.mxu0 %v10057_v1 }
 0x156   :  { %584 = vadd.xlane.f32.xlu1 %v570_v27 }
 0x158   :  { %8504 = vmatpush3.bf16.msra.mxu0 %v9137_v8  ;;  %v9139_v8 = vld [vmem:[#allocation10] sm:$0xff]  }
 0x159   :  { %8505 = vmatprep.subr.bf16.mxu0 %v10057_v1  ;;  %8512 = vmatpush3.bf16.msra.mxu1 %v9139_v8  ;;  %v9171_v8 = vld [vmem:[%s12651_s14 + $0x90] ss:$12 sps:$4 sm:$0xff]  }
 0x15a   :  { %588 = vadd.xlane.f32.xlu1 %v572_v29  ;;  %8513 = vmatprep.subr.bf16.mxu1 %v10057_v1 }
 0x15c   :  { %8506 = vmatpush3.bf16.msra.mxu0 %v9138_v9  ;;  %v9140_v9 = vld [vmem:[#allocation10 + $0x8] sm:$0xff]  }
 0x15d   :  { %8514 = vmatpush3.bf16.msra.mxu1 %v9140_v9  ;;  %v9174_v9 = vld [vmem:[%s12651_s14 + $0x98] ss:$12 sps:$4 sm:$0xff]  }
 0x15e   :  { %8515 = vmatprep.subr.bf16.mxu1 %v10057_v1 }
 0x15f   :  { %8508 = vmatmul.mubr.bf16.vlgmr.msra.gmra.mrb[0].mxu0 %v269_v11  ;;  %v9142_v11 = vld [vmem:[#allocation10 + $0x18] sm:$0xff]  }
 0x161   :  { %8516 = vmatpush3.bf16.msra.mxu1 %v9141_v10  ;;  %v9177_v10 = vld [vmem:[%s12651_s14 + $0xac] ss:$12 sps:$4 sm:$0xff]  }
 0x162   :  { %8517 = vmatprep.subr.bf16.mxu1 %v10057_v1 }
 0x165   :  { %8518 = vmatpush3.bf16.msra.mxu1 %v9142_v11  ;;  %v9175_v11 = vld [vmem:[%s12651_s14 + $0xa8] ss:$12 sps:$4 sm:$0xff]  }
 0x166   :  { %8519 = vmatprep.subr.bf16.mxu1 %v10057_v1 }
 0x169   :  { %8520 = vmatpush3.bf16.msra.mxu1 %v9143_v12  ;;  %v9178_v12 = vld [vmem:[%s12651_s14 + $0xb0] ss:$12 sps:$4 sm:$0xff]  }
 0x16a   :  { %8521 = vmatprep.subr.bf16.mxu1 %v10057_v1 }
 0x16d   :  { %8522 = vmatpush3.bf16.msra.mxu1 %v9144_v13  ;;  %v12681_v13 = vmov 0  }
 0x16e   :  { %8523 = vmatprep.subr.bf16.mxu1 %v10057_v1  ;;  %967 = vmatprep.mubr.bf16.mxu0 %v12681_v13 }
 0x171   :  { %8524 = vmatpush3.bf16.msra.mxu1 %v9145_v14 }
 0x172   :  { %8525 = vmatprep.subr.bf16.mxu1 %v10057_v1 }
 0x175   :  { %8526 = vmatpush3.bf16.msra.mxu1 %v9146_v15 }
 0x1d7   :  { %v579_v37 = vpop.xlane.xlu1 %578 }
 0x1d8   :  { %v593_v4 = vmul.f32 0.0078125, %v579_v37 }
 0x1da   :  { %v10494_v6 = vsub.f32 %v10447_v20, %v593_v4  ;;  %v9167_v4 = vld [vmem:[%s12651_s14 + $0x78] ss:$12 sps:$4 sm:$0xff]  }
 0x1db   :  { %v577_v38 = vpop.xlane.xlu1 %576 }
 0x1dc   :  { %v592_v39 = vmul.f32 0.0078125, %v577_v38  ;;  %v609_v7 = vmul.f32 %v10494_v6, %v10494_v6 }
 0x1de   :  { %v10461_v40 = vsub.f32 %v566_v21, %v592_v39 }
 0x1df   :  { %v581_v41 = vpop.xlane.xlu1 %580 }
 0x1e0   :  { %v608_v42 = vmul.f32 %v10461_v40, %v10461_v40  ;;  %v594_v43 = vmul.f32 0.0078125, %v581_v41 }
 0x1e2   :  { %616 = vadd.xlane.f32.xlu1 %v608_v42  ;;  %v10465_v44 = vsub.f32 %v568_v24, %v594_v43  ;;  %v9147_v43 = vld [vmem:[%s12651_s14] ss:$12 sps:$4 sm:$0xff]  }
 0x1e3   :  { %v585_v45 = vpop.xlane.xlu1 %584 }
 0x1e4   :  { %v610_v46 = vmul.f32 %v10465_v44, %v10465_v44  ;;  %v596_v47 = vmul.f32 0.0078125, %v585_v45  ;;  %v9149_v45 = vld [vmem:[%s12651_s14 + $0x4] ss:$12 sps:$4 sm:$0xff]  }
 0x1e5   :  { %935 = vmatprep.subr.bf16.mxu0 %v9149_v45 }
 0x1e6   :  { %620 = vadd.xlane.f32.xlu1 %v610_v46  ;;  %v10469_v48 = vsub.f32 %v570_v27, %v596_v47  ;;  %v9150_v46 = vld [vmem:[%s12651_s14 + $0x8] ss:$12 sps:$4 sm:$0xff]   ;;  %936 = vmatpush1.bf16.msra.mxu0 %v9147_v43 }
 0x1e7   :  { %v589_v49 = vpop.xlane.xlu1 %588  ;;  %v9153_v47 = vld [vmem:[%s12651_s14 + $0x1c] ss:$12 sps:$4 sm:$0xff]   ;;  %8531 = vmatprep.subr.bf16.mxu1 %v9150_v46 }
 0x1e8   :  { %v612_v50 = vmul.f32 %v10469_v48, %v10469_v48  ;;  %v598_v51 = vmul.f32 0.0078125, %v589_v49  ;;  %937 = vmatprep.subr.bf16.mxu0 %v9153_v47 }
 0x1ea   :  { %624 = vadd.xlane.f32.xlu1 %v612_v50  ;;  %v10473_v52 = vsub.f32 %v572_v29, %v598_v51  ;;  %v9151_v51 = vld [vmem:[%s12651_s14 + $0x18] ss:$12 sps:$4 sm:$0xff]  }
 0x1eb   :  { %938 = vmatpush1.bf16.msra.mxu0 %v9151_v51 }
 0x1ec   :  { %v614_v53 = vmul.f32 %v10473_v52, %v10473_v52 }
 0x1ee   :  { %628 = vadd.xlane.f32.xlu1 %v614_v53  ;;  %v9157_v53 = vld [vmem:[%s12651_s14 + $0x34] ss:$12 sps:$4 sm:$0xff]  }
 0x1ef   :  { %939 = vmatprep.subr.bf16.mxu0 %v9157_v53  ;;  %v7839_v53 = vld [vmem:[#allocation11] ss:$0 sm:$0xff] }
 0x1f0   :  { %940 = vmatpush1.bf16.msra.mxu0 %v9155_v56 }
 0x232   :  { %v375_v31 = vpop.f32.mrb[0].mxu0 }
 0x233   :  { %v376_v32 = vadd.f32 %v7828_v30, %v375_v31  ;;  %v8509_v33 = vpop.f32.mrb[1].mxu0  ;;  %v7837_v31 = vld [vmem:[#allocation7] ss:$0 sm:$0xff] }
 0x234   :  { %v378_v34 = vpop.f32.mrb[2].mxu0 }
 0x235   :  { %v8510_v35 = vpop.f32.mrb[3].mxu0  ;;  %v384_v36 = vsel %vm383_vm1, %v376_v32, 0.0  ;;  %v7838_v34 = vld [vmem:[#allocation8] ss:$0 sm:$0xff] }
 0x236   :  { %385 = vadd.xlane.f32.xlu0 %v384_v36 }
 0x26f   :  { %v617_v15 = vpop.xlane.xlu1 %616 }
 0x2c3   :  { %v386_v54 = vpop.xlane.xlu0 %385 }
 0x2c4   :  { %v388_v55 = vmul.f32 0.0078125, %v386_v54 }
 0x2c6   :  { %v389_v57 = vsub.f32 %v376_v32, %v388_v55 }
 0x2c8   :  { %v390_v59 = vmul.f32 %v389_v57, %v389_v57 }
 0x2ca   :  { %v391_v61 = vsel %vm383_vm1, %v390_v59, 0.0  ;;  %v9154_v59 = vld [vmem:[%s12651_s14 + $0x20] ss:$12 sps:$4 sm:$0xff]  }
 0x2cb   :  { %392 = vadd.xlane.f32.xlu0 %v391_v61  ;;  %v9165_v61 = vld [vmem:[%s12651_s14 + $0x64] ss:$12 sps:$4 sm:$0xff]  }
 0x2cf   :  { %582 = vadd.xlane.f32.xlu0 %v569_v62 }
 0x2d3   :  { %586 = vadd.xlane.f32.xlu0 %v571_v2 }
 0x2d7   :  { %590 = vadd.xlane.f32.xlu0 %v573_v5 }
 0x2db   :  { %618 = vadd.xlane.f32.xlu0 %v609_v7  ;;  %v9173_v7 = vld [vmem:[%s12651_s14 + $0x94] ss:$12 sps:$4 sm:$0xff]  }
 0x358   :  { %v393_v16 = vpop.xlane.xlu0 %392 }
 0x359   :  { %v394_v17 = vmul.f32 0.0078125, %v393_v16 }
 0x35b   :  { %v395_v18 = vadd.f32 1e-05, %v394_v17  ;;  %v621_v17 = vpop.xlane.xlu1 %620 }
 0x35c   :  { %v583_v19 = vpop.xlane.xlu0 %582 }
 0x35d   :  { %9307 = vrsqrt.f32 %v395_v18  ;;  %v595_v20 = vmul.f32 0.0078125, %v583_v19  ;;  %v632_v18 = vmul.f32 0.0078125, %v617_v15 }
 0x35f   :  { %v10505_v21 = vsub.f32 %v569_v62, %v595_v20  ;;  %v9158_v62 = vld [vmem:[%s12651_s14 + $0x38] ss:$12 sps:$4 sm:$0xff]  }
 0x360   :  { %v587_v22 = vpop.xlane.xlu0 %586 }
 0x361   :  { %v597_v23 = vmul.f32 0.0078125, %v587_v22  ;;  %v611_v24 = vmul.f32 %v10505_v21, %v10505_v21  ;;  %v625_v22 = vpop.xlane.xlu1 %624 }
 0x363   :  { %622 = vadd.xlane.f32.xlu0 %v611_v24  ;;  %v10509_v25 = vsub.f32 %v571_v2, %v597_v23  ;;  %v9166_v2 = vld [vmem:[%s12651_s14 + $0x68] ss:$12 sps:$4 sm:$0xff]  }
 0x364   :  { %v591_v26 = vpop.xlane.xlu0 %590 }
 0x365   :  { %v599_v27 = vmul.f32 0.0078125, %v591_v26  ;;  %v613_v28 = vmul.f32 %v10509_v25, %v10509_v25  ;;  %v640_v26 = vadd.f32 1e-12, %v632_v18 }
 0x367   :  { %v9308_v29 = vpop.eup %9307  ;;  %626 = vadd.xlane.f32.xlu0 %v613_v28  ;;  %v10513_v30 = vsub.f32 %v573_v5, %v599_v27  ;;  %v9170_v5 = vld [vmem:[%s12651_s14 + $0x80] ss:$12 sps:$4 sm:$0xff]   ;;  %v634_v27 = vmul.f32 0.0078125, %v621_v17 }
 0x368   :  { %v397_v32 = vmul.f32 %v9308_v29, %v389_v57  ;;  %v9161_v57 = vld [vmem:[%s12651_s14 + $0x4c] ss:$12 sps:$4 sm:$0xff]   ;;  %v619_v14 = vpop.xlane.xlu0 %618  ;;  %v636_v29 = vmul.f32 0.0078125, %v625_v22 }
 0x369   :  { %v615_v33 = vmul.f32 %v10513_v30, %v10513_v30  ;;  %941 = vmatprep.subr.bf16.mxu0 %v9161_v57  ;;  %v633_v20 = vmul.f32 0.0078125, %v619_v14  ;;  %v7851_v14 = vld [vmem:[#allocation14] ss:$0 sm:$0xff] }
 0x36a   :  { %v404_v35 = vmul.f32 %v7837_v31, %v397_v32  ;;  %942 = vmatpush1.bf16.msra.mxu0 %v9159_v60 }
 0x36b   :  { %630 = vadd.xlane.f32.xlu0 %v615_v33  ;;  %943 = vmatprep.subr.bf16.mxu0 %v9165_v61  ;;  %v641_v28 = vadd.f32 1e-12, %v633_v20 }
 0x36c   :  { %v411_v36 = vadd.f32 %v7838_v34, %v404_v35  ;;  %v642_v34 = vadd.f32 1e-12, %v634_v27  ;;  %v644_v35 = vadd.f32 1e-12, %v636_v29 }
 0x36e   :  { %v412_v37 = vmul.f32 %v411_v36, %v411_v36  ;;  %944 = vmatpush1.bf16.msra.mxu0 %v9163_v63  ;;  %v7850_v63 = vld [vmem:[#allocation13] ss:$0 sm:$0xff] }
 0x36f   :  { %945 = vmatprep.subr.bf16.mxu0 %v9169_v3 }
 0x370   :  { %v413_v38 = vmul.f32 %v412_v37, %v411_v36 }
 0x372   :  { %v414_v39 = vmul.f32 0.044715, %v413_v38  ;;  %946 = vmatpush1.bf16.msra.mxu0 %v9167_v4 }
 0x373   :  { %947 = vmatprep.subr.bf16.mxu0 %v9173_v7 }
 0x374   :  { %v415_v41 = vadd.f32 %v414_v39, %v411_v36 }
 0x376   :  { %v416_v42 = vmul.f32 0.7978846, %v415_v41  ;;  %948 = vmatpush1.bf16.msra.mxu0 %v9171_v8  ;;  %v692_v41 = vlaneseq }
 0x377   :  { %949 = vmatprep.subr.bf16.mxu0 %v9177_v10 }
 0x378   :  { %9309 = vtanh.f32 %v416_v42  ;;  %v10060_v42 = vmov 1966171168  }
 0x379   :  { %9311 = vrsqrt.f32 %v640_v26  ;;  %v699_v43 = vunpack.c.l.s4 %v10060_v42 }
 0x37a   :  { %950 = vmatpush1.bf16.msra.mxu0 %v9175_v11  ;;  %9313 = vrsqrt.f32 %v641_v28 }
 0x37b   :  { %8567 = vmatprep.subr.bf16.mxu0 %v10057_v1 }
 0x382   :  { %v9310_v49 = vpop.eup %9309 }
 0x383   :  { %v418_v50 = vadd.f32 1.0, %v9310_v49  ;;  %v10592_v49 = vshrl.u32 %v692_v41, 7 }
 0x385   :  { %v419_v54 = vmul.f32 0.5, %v418_v50  ;;  %v700_v50 = vunpack.c.0.s8 %v699_v43  ;;  %v694_v8 = vadd.s32 8, %v10592_v49 }
 0x387   :  { %v420_v55 = vmul.f32 %v419_v54, %v411_v36  ;;  %v629_v36 = vpop.xlane.xlu1 %628  ;;  %v703_v61 = vsub.s32 %v700_v50, %v10592_v49  ;;  %vm696_vm2 = vcmp.lt.s32.totalorder %v694_v8, 15 }
 0x388   :  { %v638_v38 = vmul.f32 0.0078125, %v629_v36 }
 0x389   :  { %v421_v58 = vpack.c.bf16 %v420_v55, %v420_v55 }
 0x38a   :  { %v646_v45 = vadd.f32 1e-12, %v638_v38 }
 0x38b   :  { %8528 = vmatmul.mubr.bf16.vlgmr.msra.gmra.mrb[0].mxu1 %v421_v58  ;;  %v7848_v58 = vld [vmem:[%s12710_s7] ss:$0 sm:$0xff] }
 0x38c   :  { %8532 = vmatpush3.bf16.msra.mxu1 %v9150_v46  ;;  %v9312_v46 = vpop.eup %9311 }
 0x38d   :  { %8533 = vmatprep.subr.bf16.mxu1 %v9154_v59  ;;  %v9314_v47 = vpop.eup %9313  ;;  %v656_v3 = vmul.f32 %v9312_v46, %v10461_v40 }
 0x38e   :  { %v657_v56 = vmul.f32 %v9314_v47, %v10494_v6 }
 0x38f   :  { %v670_v15 = vmul.f32 %v7850_v63, %v656_v3 }
 0x390   :  { %8534 = vmatpush3.bf16.msra.mxu1 %v9154_v59  ;;  %v671_v7 = vmul.f32 %v7850_v63, %v657_v56 }
 0x391   :  { %8535 = vmatprep.subr.bf16.mxu1 %v9158_v62  ;;  %v10610_v26 = vadd.f32 %v7851_v14, %v670_v15 }
 0x392   :  { %v685_v18 = vadd.f32 %v7851_v14, %v671_v7 }
 0x394   :  { %8536 = vmatpush3.bf16.msra.mxu1 %v9158_v62 }
 0x395   :  { %8537 = vmatprep.subr.bf16.mxu1 %v9162_v0 }
 0x398   :  { %8538 = vmatpush3.bf16.msra.mxu1 %v9162_v0 }
 0x399   :  { %8539 = vmatprep.subr.bf16.mxu1 %v9166_v2 }
 0x39c   :  { %8540 = vmatpush3.bf16.msra.mxu1 %v9166_v2 }
 0x39d   :  { %8541 = vmatprep.subr.bf16.mxu1 %v9170_v5 }
 0x3a0   :  { %8542 = vmatpush3.bf16.msra.mxu1 %v9170_v5 }
 0x3a1   :  { %8543 = vmatprep.subr.bf16.mxu1 %v9174_v9 }
 0x3a4   :  { %8544 = vmatpush3.bf16.msra.mxu1 %v9174_v9 }
 0x3a5   :  { %8545 = vmatprep.subr.bf16.mxu1 %v9178_v12 }
 0x3a8   :  { %8546 = vmatpush3.bf16.msra.mxu1 %v9178_v12  ;;  %v10606_v12 = vsub.s32 0, %v10592_v49 }
 0x3a9   :  { %8555 = vmatprep.subr.bf16.mxu1 %v10057_v1 }
 0x3f0   :  { %v623_v16 = vpop.xlane.xlu0 %622 }
 0x3f1   :  { %v635_v23 = vmul.f32 0.0078125, %v623_v16 }
 0x3f3   :  { %v643_v31 = vadd.f32 1e-12, %v635_v23 }
 0x3f4   :  { %v627_v19 = vpop.xlane.xlu0 %626 }
 0x3f5   :  { %v637_v24 = vmul.f32 0.0078125, %v627_v19  ;;  %9315 = vrsqrt.f32 %v643_v31 }
 0x3f7   :  { %v645_v32 = vadd.f32 1e-12, %v637_v24 }
 0x3f8   :  { %v631_v33 = vpop.xlane.xlu0 %630 }
 0x3f9   :  { %v639_v37 = vmul.f32 0.0078125, %v631_v33  ;;  %9317 = vrsqrt.f32 %v645_v32 }
 0x3fa   :  { %9319 = vrsqrt.f32 %v642_v34 }
 0x3fb   :  { %9321 = vrsqrt.f32 %v644_v35  ;;  %v647_v39 = vadd.f32 1e-12, %v639_v37 }
 0x3fd   :  { %9323 = vrsqrt.f32 %v647_v39 }
 0x3fe   :  { %9325 = vrsqrt.f32 %v646_v45 }
 0x3ff   :  { %v9316_v51 = vpop.eup %9315 }
 0x400   :  { %v659_v0 = vmul.f32 %v9316_v51, %v10505_v21  ;;  %v10650_v51 = vsub.s32 1, %v10592_v49 }
 0x402   :  { %v673_v16 = vmul.f32 %v7850_v63, %v659_v0 }
 0x403   :  { %v9318_v54 = vpop.eup %9317 }
 0x404   :  { %v9320_v55 = vpop.eup %9319  ;;  %v661_v4 = vmul.f32 %v9318_v54, %v10509_v25  ;;  %v687_v27 = vadd.f32 %v7851_v14, %v673_v16  ;;  %v12680_v54 = vsub.s32 2, %v10592_v49 }
 0x405   :  { %v9322_v59 = vpop.eup %9321  ;;  %v658_v9 = vmul.f32 %v9320_v55, %v10465_v44 }
 0x406   :  { %v660_v10 = vmul.f32 %v9322_v59, %v10469_v48  ;;  %v675_v40 = vmul.f32 %v7850_v63, %v661_v4 }
 0x407   :  { %v9324_v21 = vpop.eup %9323  ;;  %v672_v19 = vmul.f32 %v7850_v63, %v658_v9 }
 0x408   :  { %v674_v20 = vmul.f32 %v7850_v63, %v660_v10  ;;  %v9326_v22 = vpop.eup %9325  ;;  %v663_v24 = vmul.f32 %v9324_v21, %v10513_v30  ;;  %v689_v28 = vadd.f32 %v7851_v14, %v675_v40 }
 0x409   :  { %v10619_v35 = vadd.f32 %v7851_v14, %v672_v19  ;;  %v662_v30 = vmul.f32 %v9326_v22, %v10473_v52 }
 0x40a   :  { %v10621_v36 = vadd.f32 %v7851_v14, %v674_v20  ;;  %v677_v39 = vmul.f32 %v7850_v63, %v663_v24 }
 0x40b   :  { %v676_v52 = vmul.f32 %v7850_v63, %v662_v30 }
 0x40c   :  { %v691_v45 = vadd.f32 %v7851_v14, %v677_v39 }
 0x40d   :  { %v10639_v47 = vadd.f32 %v7851_v14, %v676_v52 }
 0x45e   :  { %v527_v57 = vpop.f32.mrb[0].mxu1 }
 0x45f   :  { %v528_v60 = vadd.f32 %v7839_v53, %v527_v57  ;;  %v8529_v62 = vpop.f32.mrb[1].mxu1  ;;  %v790_v53 = vld [vmem:[%s12652_s15] sm:$0x7] }
 0x460   :  { %v530_v2 = vpop.f32.mrb[2].mxu1  ;;  %v10657_v55 = vrot.slane %v790_v53, %v10606_v12  ;;  %v10660_v57 = vrot.slane %v790_v53, %v10650_v51  ;;  %v803_v59 = vrot.slane %v790_v53, %v12680_v54 }
 0x461   :  { %v540_v5 = vadd.f32 %v7848_v58, %v528_v60  ;;  %v8530_v6 = vpop.f32.mrb[3].mxu1 }
 0x463   :  { %v704_v11 = vrot.slane %v540_v5, %v703_v61 }
 0x465   :  { %v705_v17 = vcombine.high %v704_v11, %v704_v11  ;;  %v712_v25 = vrot.slane %v704_v11, %v703_v61 }
 0x467   :  { %v719_v23 = vrot.slane %v705_v17, %v703_v61  ;;  %v720_v44 = vcombine.high %v712_v25, %v712_v25  ;;  %v725_v48 = vrot.slane %v712_v25, %v10606_v12 }
 0x469   :  { %v721_v29 = vcombine.high %v719_v23, %v719_v23  ;;  %v729_v31 = vrot.slane %v719_v23, %v10606_v12  ;;  %v10614_v32 = vsel %vm696_vm2, %v685_v18, %v725_v48  ;;  %v733_v33 = vrot.slane %v720_v44, %v10606_v12 }
 0x46a   :  { %v754_v34 = vpack.c.bf16 %v10614_v32, %v10610_v26 }
 0x46b   :  { %v10625_v37 = vsel %vm696_vm2, %v687_v27, %v729_v31  ;;  %v10628_v38 = vsel %vm696_vm2, %v689_v28, %v733_v33  ;;  %v737_v43 = vrot.slane %v721_v29, %v10606_v12 }
 0x46c   :  { %968 = vmatmul.mubr.bf16.vlgmr.msra.gmra.mrb[4].mxu0 %v754_v34  ;;  %8547 = vmatprep.mubr.bf16.mxu1 %v754_v34  ;;  %v755_v41 = vpack.c.bf16 %v10625_v37, %v10619_v35  ;;  %v756_v42 = vpack.c.bf16 %v10628_v38, %v10621_v36 }
 0x46d   :  { %977 = vmatprep.mubr.bf16.mxu0 %v12681_v13  ;;  %v10637_v46 = vsel %vm696_vm2, %v691_v45, %v737_v43 }
 0x46e   :  { %8548 = vmatmul.mubr.bf16.vlgmr.msra.gmra.mrb[4].mxu1 %v755_v41  ;;  %v757_v50 = vpack.c.bf16 %v10637_v46, %v10639_v47 }
 0x46f   :  { %8551 = vmatprep.mubr.bf16.mxu1 %v756_v42 }
 0x474   :  { %978 = vmatmul.mubr.bf16.gmra.mrb[8].mxu0 %v755_v41 }
 0x475   :  { %987 = vmatprep.mubr.bf16.mxu0 %v12681_v13 }
 0x476   :  { %8552 = vmatmul.mubr.bf16.gmra.mrb[8].mxu1 %v757_v50 }
 0x477   :  { %8557 = vmatprep.mubr.msk.bf16.mxu1 %vm10058_vm0, %v10057_v1 }
 0x47c   :  { %988 = vmatmul.mubr.bf16.gmra.mrb[12].mxu0 %v756_v42 }
 0x47d   :  { %997 = vmatprep.mubr.bf16.mxu0 %v12681_v13 }
 0x484   :  { %998 = vmatmul.mubr.bf16.gmra.mrb[16].mxu0 %v757_v50 }
 0x485   :  { %8569 = vmatprep.mubr.msk.bf16.mxu0 %vm10058_vm0, %v10057_v1 }
 0x53f   :  { %v969_v56 = vpop.f32.mrb[4].mxu0 }
 0x540   :  { %v971_v58 = vpop.f32.mrb[5].mxu0  ;;  %v970_v62 = vadd.f32 %v969_v56, %v10657_v55 }
 0x541   :  { %v973_v60 = vpop.f32.mrb[6].mxu0  ;;  %v8549_v61 = vpop.f32.mrb[4].mxu1  ;;  %v972_v3 = vadd.f32 %v971_v58, %v10660_v57 }
 0x542   :  { %v974_v63 = vadd.f32 %v973_v60, %v10657_v55  ;;  %v975_v0 = vpop.f32.mrb[7].mxu0  ;;  %v1042_v2 = vpop.f32.mrb[5].mxu1  ;;  %v1051_v7 = vadd.f32 %v8549_v61, %v803_v59 }
 0x543   :  { %v976_v4 = vadd.f32 %v975_v0, %v10660_v57  ;;  %v8550_v5 = vpop.f32.mrb[6].mxu1  ;;  %v1043_v11 = vadd.f32 %v1042_v2, %v803_v59 }
 0x544   :  { %v10668_v6 = vpack.c.bf16 %v974_v63, %v970_v62  ;;  %v1054_v8 = vadd.f32 %v8550_v5, %v803_v59  ;;  %v1045_v9 = vpop.f32.mrb[7].mxu1 }
 0x545   :  { %v10670_v10 = vpack.c.bf16 %v976_v4, %v972_v3  ;;  %v1046_v14 = vadd.f32 %v1045_v9, %v803_v59 }
 0x546   :  { %v10672_v21 = vpack.c.bf16 %v1054_v8, %v1051_v7 }
 0x547   :  { %v10674_v15 = vpack.c.bf16 %v1046_v14, %v1043_v11  ;;  %v979_v16 = vpop.f32.mrb[8].mxu0  ;;  %v1106_v40 = vsel %vm1101_vm3, %v10670_v10, 0 }
 0x548   :  { %v981_v17 = vpop.f32.mrb[9].mxu0  ;;  %8556 = vmatpush3.bf16.xpose.msra.mxu1 %v1106_v40  ;;  %v980_v19 = vadd.f32 %v979_v16, %v10657_v55 }
 0x549   :  { %v983_v25 = vpop.f32.mrb[10].mxu0  ;;  %v8553_v18 = vpop.f32.mrb[8].mxu1  ;;  %8561 = vmatprep.subr.bf16.mxu1 %v10057_v1  ;;  %v982_v48 = vadd.f32 %v981_v17, %v10660_v57 }
 0x54a   :  { %v984_v20 = vadd.f32 %v983_v25, %v10657_v55  ;;  %v1067_v22 = vadd.f32 %v8553_v18, %v803_v59  ;;  %v985_v23 = vpop.f32.mrb[11].mxu0  ;;  %v1058_v44 = vpop.f32.mrb[9].mxu1  ;;  %v10743_v25 = vld [vmem:[%s12650_s13 + $0x1] ss:$0 sm:$0xff] }
 0x54b   :  { %v986_v24 = vadd.f32 %v985_v23, %v10660_v57  ;;  %v1059_v27 = vadd.f32 %v1058_v44, %v803_v59  ;;  %v8554_v28 = vpop.f32.mrb[10].mxu1 }
 0x54c   :  { %v10683_v29 = vpack.c.bf16 %v984_v20, %v980_v19  ;;  %v1070_v31 = vadd.f32 %v8554_v28, %v803_v59  ;;  %v1061_v33 = vpop.f32.mrb[11].mxu1 }
 0x54d   :  { %v10685_v34 = vpack.c.bf16 %v986_v24, %v982_v48  ;;  %v1062_v30 = vadd.f32 %v1061_v33, %v803_v59 }
 0x54e   :  { %v10687_v39 = vpack.c.bf16 %v1070_v31, %v1067_v22 }
 0x54f   :  { %v10689_v41 = vpack.c.bf16 %v1062_v30, %v1059_v27  ;;  %v989_v42 = vpop.f32.mrb[12].mxu0  ;;  %8558 = vmatmul.mubr.msk.bf16.vlgmr.msra.gmra.mrb[12].mxu1 %vm1101_vm3, %v10668_v6  ;;  %v1153_v43 = vsel %vm1101_vm3, %v10685_v34, 0 }
 0x550   :  { %v991_v52 = vpop.f32.mrb[13].mxu0  ;;  %8562 = vmatpush3.bf16.xpose.msra.mxu1 %v1153_v43  ;;  %8563 = vmatprep.mubr.msk.bf16.mxu1 %vm10058_vm0, %v10057_v1  ;;  %v990_v50 = vadd.f32 %v989_v42, %v10657_v55  ;;  %v10752_v43 = vld [vmem:[%s12650_s13 + $0x3] ss:$0 sm:$0xff] }
 0x551   :  { %v993_v45 = vpop.f32.mrb[14].mxu0  ;;  %8573 = vmatprep.subr.bf16.mxu1 %v10057_v1  ;;  %v992_v58 = vadd.f32 %v991_v52, %v10660_v57 }
 0x552   :  { %v994_v53 = vadd.f32 %v993_v45, %v10657_v55  ;;  %v995_v56 = vpop.f32.mrb[15].mxu0 }
 0x553   :  { %v996_v59 = vadd.f32 %v995_v56, %v10660_v57 }
 0x554   :  { %v10702_v60 = vpack.c.bf16 %v994_v53, %v990_v50 }
 0x555   :  { %v10704_v61 = vpack.c.bf16 %v996_v59, %v992_v58 }
 0x557   :  { %v999_v62 = vpop.f32.mrb[16].mxu0  ;;  %8564 = vmatmul.mubr.msk.bf16.vlgmr.msra.gmra.mrb[16].mxu1 %vm1101_vm3, %v10683_v29  ;;  %v1200_v63 = vsel %vm1101_vm3, %v10704_v61, 0 }
 0x558   :  { %v1001_v0 = vpop.f32.mrb[17].mxu0  ;;  %8568 = vmatpush3.bf16.xpose.msra.mxu0 %v1200_v63  ;;  %8575 = vmatprep.mubr.msk.bf16.mxu1 %vm10058_vm0, %v10057_v1  ;;  %v1000_v3 = vadd.f32 %v999_v62, %v10657_v55 }
 0x559   :  { %v1003_v2 = vpop.f32.mrb[18].mxu0  ;;  %8579 = vmatprep.subr.bf16.mxu0 %v10057_v1  ;;  %v1002_v7 = vadd.f32 %v1001_v0, %v10660_v57 }
 0x55a   :  { %v1004_v4 = vadd.f32 %v1003_v2, %v10657_v55  ;;  %v1005_v5 = vpop.f32.mrb[19].mxu0 }
 0x55b   :  { %v1006_v8 = vadd.f32 %v1005_v5, %v10660_v57 }
 0x55c   :  { %v10717_v9 = vpack.c.bf16 %v1004_v4, %v1000_v3 }
 0x55d   :  { %v10719_v11 = vpack.c.bf16 %v1006_v8, %v1002_v7 }
 0x55f   :  { %8570 = vmatmul.mubr.msk.bf16.vlgmr.msra.gmra.mrb[20].mxu0 %vm1101_vm3, %v10702_v60  ;;  %v1247_v14 = vsel %vm1101_vm3, %v10719_v11, 0 }
 0x560   :  { %8574 = vmatpush3.bf16.xpose.msra.mxu1 %v1247_v14  ;;  %8580 = vmatpush3.bf16.msra.mxu0 %v10674_v15 }
 0x561   :  { %8585 = vmatprep.subr.bf16.mxu1 %v10057_v1  ;;  %8581 = vmatprep.mubr.msk.bf16.mxu0 %vm10058_vm0, %v10057_v1 }
 0x562   :  { %8591 = vmatprep.subr.bf16.mxu0 %v10057_v1 }
 0x567   :  { %8576 = vmatmul.mubr.msk.bf16.vlgmr.msra.gmra.mrb[20].mxu1 %vm1101_vm3, %v10717_v9 }
 0x568   :  { %8586 = vmatpush3.bf16.msra.mxu1 %v10672_v21  ;;  %8587 = vmatprep.mubr.msk.bf16.mxu1 %vm10058_vm0, %v10057_v1 }
 0x569   :  { %8597 = vmatprep.subr.bf16.mxu1 %v10057_v1 }
 0x622   :  { %v10736_v55 = vpop.f32.mrb[12].mxu1 }
 0x623   :  { %v8559_v57 = vpop.f32.mrb[13].mxu1 }
 0x624   :  { %v10738_v16 = vpop.f32.mrb[14].mxu1 }
 0x625   :  { %v8560_v40 = vpop.f32.mrb[15].mxu1 }
 0x62a   :  { %v1189_v17 = vpop.f32.mrb[16].mxu1 }
 0x62b   :  { %v1292_v18 = vmul.f32 0.17677669, %v1189_v17  ;;  %v8565_v19 = vpop.f32.mrb[17].mxu1 }
 0x62c   :  { %v1192_v20 = vpop.f32.mrb[18].mxu1 }
 0x62d   :  { %v1293_v22 = vmul.f32 0.17677669, %v1192_v20  ;;  %v8566_v23 = vpop.f32.mrb[19].mxu1  ;;  %v1324_v44 = vadd.f32 %v10743_v25, %v1292_v18 }
 0x62f   :  { %v1337_v48 = vsel %vm1330_vm4, %v1324_v44, -inf  ;;  %v1325_v24 = vadd.f32 %v10743_v25, %v1293_v22 }
 0x630   :  { %1338 = vmax.xlane.f32.xlu0 %v1337_v48 }
 0x631   :  { %v1340_v27 = vsel %vm1330_vm4, %v1325_v24, -inf }
 0x632   :  { %v1236_v28 = vpop.f32.mrb[20].mxu0  ;;  %1341 = vmax.xlane.f32.xlu1 %v1340_v27 }
 0x633   :  { %v8571_v31 = vpop.f32.mrb[21].mxu0 }
 0x634   :  { %v1239_v33 = vpop.f32.mrb[22].mxu0  ;;  %v1290_v31 = vmul.f32 0.17677669, %v10736_v55  ;;  %v1291_v55 = vmul.f32 0.17677669, %v10738_v16 }
 0x635   :  { %v8572_v30 = vpop.f32.mrb[23].mxu0 }
 0x636   :  { %v10774_v30 = vld [vmem:[%s12650_s13] ss:$0 sm:$0xff] }
 0x63a   :  { %v1283_v42 = vpop.f32.mrb[20].mxu1 }
 0x63b   :  { %v1296_v52 = vmul.f32 0.17677669, %v1283_v42  ;;  %v8577_v45 = vpop.f32.mrb[21].mxu1  ;;  %v1294_v42 = vmul.f32 0.17677669, %v1236_v28  ;;  %v1323_v28 = vadd.f32 %v10774_v30, %v1291_v55 }
 0x63c   :  { %v1286_v50 = vpop.f32.mrb[22].mxu1  ;;  %v10780_v45 = vld [vmem:[%s12650_s13 + $0x2] ss:$0 sm:$0xff] }
 0x63d   :  { %v1297_v53 = vmul.f32 0.17677669, %v1286_v50  ;;  %v8578_v56 = vpop.f32.mrb[23].mxu1  ;;  %v1328_v58 = vadd.f32 %v10752_v43, %v1296_v52  ;;  %v1322_v52 = vadd.f32 %v10774_v30, %v1290_v31  ;;  %v1295_v50 = vmul.f32 0.17677669, %v1239_v33 }
 0x63e   :  { %v1326_v56 = vadd.f32 %v10780_v45, %v1294_v42 }
 0x63f   :  { %v1349_v59 = vsel %vm1330_vm4, %v1328_v58, -inf  ;;  %v1329_v62 = vadd.f32 %v10752_v43, %v1297_v53  ;;  %v1331_v53 = vsel %vm1330_vm4, %v1322_v52, -inf }
 0x640   :  { %1350 = vmax.xlane.f32.xlu0 %v1349_v59  ;;  %v1327_v59 = vadd.f32 %v10780_v45, %v1295_v50 }
 0x641   :  { %v1352_v63 = vsel %vm1330_vm4, %v1329_v62, -inf }
 0x642   :  { %1353 = vmax.xlane.f32.xlu1 %v1352_v63  ;;  %v1334_v63 = vsel %vm1330_vm4, %v1323_v28, -inf }
 0x6bd   :  { %v1339_v0 = vpop.xlane.xlu0 %1338 }
 0x6be   :  { %v1357_v2 = vsub.f32 %v1324_v44, %v1339_v0 }
 0x6bf   :  { %v1342_v3 = vpop.xlane.xlu1 %1341 }
 0x6c0   :  { %v1367_v4 = vmul.f32 1.442695, %v1357_v2  ;;  %v1358_v5 = vsub.f32 %v1325_v24, %v1342_v3 }
 0x6c2   :  { %9327 = vpow2.f32 %v1367_v4  ;;  %v1369_v7 = vmul.f32 1.442695, %v1358_v5 }
 0x6c4   :  { %9329 = vpow2.f32 %v1369_v7 }
 0x6cc   :  { %v9328_v8 = vpop.eup %9327 }
 0x6cd   :  { %v1351_v14 = vpop.xlane.xlu0 %1350  ;;  %v1385_v57 = vsel %vm1330_vm4, %v9328_v8, 0.0 }
 0x6ce   :  { %v9330_v40 = vpop.eup %9329  ;;  %v1361_v17 = vsub.f32 %v1328_v58, %v1351_v14  ;;  %1386 = vadd.xlane.f32.xlu0 %v1385_v57  ;;  %v1343_v58 = vsel %vm1330_vm4, %v1326_v56, -inf }
 0x6cf   :  { %v1354_v18 = vpop.xlane.xlu1 %1353  ;;  %v1388_v19 = vsel %vm1330_vm4, %v9330_v40, 0.0 }
 0x6d0   :  { %v1375_v20 = vmul.f32 1.442695, %v1361_v17  ;;  %v1362_v22 = vsub.f32 %v1329_v62, %v1354_v18  ;;  %1389 = vadd.xlane.f32.xlu1 %v1388_v19  ;;  %v1346_v62 = vsel %vm1330_vm4, %v1327_v59, -inf }
 0x6d2   :  { %9331 = vpow2.f32 %v1375_v20  ;;  %v1377_v23 = vmul.f32 1.442695, %v1362_v22 }
 0x6d4   :  { %9333 = vpow2.f32 %v1377_v23 }
 0x6dc   :  { %v9332_v44 = vpop.eup %9331 }
 0x6dd   :  { %v1397_v48 = vsel %vm1330_vm4, %v9332_v44, 0.0 }
 0x6de   :  { %v9334_v24 = vpop.eup %9333  ;;  %1398 = vadd.xlane.f32.xlu0 %v1397_v48 }
 0x6df   :  { %v1400_v27 = vsel %vm1330_vm4, %v9334_v24, 0.0 }
 0x6e0   :  { %1401 = vadd.xlane.f32.xlu1 %v1400_v27 }
 0x6f1   :  { %1657 = vrot.lane.b32.xlu1 %v10683_v29, %s10061_s1 }
 0x6f4   :  { %1660 = vrot.lane.b32.xlu0 %v10685_v34, %s10061_s1 }
 0x6f5   :  { %1766 = vrot.lane.b32.xlu1 %v10719_v11, %s10061_s1 }
 0x6f9   :  { %1763 = vrot.lane.b32.xlu1 %v10717_v9, %s10061_s1 }
 0x713   :  { %1332 = vmax.xlane.f32.xlu0 %v1331_v53 }
 0x717   :  { %1344 = vmax.xlane.f32.xlu0 %v1343_v58 }
 0x71b   :  { %1347 = vmax.xlane.f32.xlu0 %v1346_v62 }
 0x71d   :  { %1335 = vmax.xlane.f32.xlu1 %v1334_v63 }
 0x75b   :  { %v1387_v33 = vpop.xlane.xlu0 %1386 }
 0x75c   :  { %9335 = vrcp.f32 %v1387_v33 }
 0x75d   :  { %v1390_v0 = vpop.xlane.xlu1 %1389 }
 0x75e   :  { %9337 = vrcp.f32 %v1390_v0 }
 0x766   :  { %v9336_v2 = vpop.eup %9335 }
 0x767   :  { %v1413_v16 = vmul.f32 %v9336_v2, %v9328_v8 }
 0x768   :  { %v9338_v3 = vpop.eup %9337 }
 0x769   :  { %v1414_v4 = vmul.f32 %v9338_v3, %v9330_v40 }
 0x76b   :  { %v1399_v5 = vpop.xlane.xlu0 %1398  ;;  %v1420_v7 = vpack.c.bf16 %v1414_v4, %v1413_v16 }
 0x76c   :  { %9339 = vrcp.f32 %v1399_v5 }
 0x76d   :  { %8588 = vmatmul.mubr.msk.bf16.vlgmr.msra.gmra.mrb[24].mxu1 %vm1330_vm4, %v1420_v7  ;;  %v1402_v14 = vpop.xlane.xlu1 %1401 }
 0x76e   :  { %8598 = vmatpush3.bf16.msra.mxu1 %v10687_v39  ;;  %9341 = vrcp.f32 %v1402_v14  ;;  %8599 = vmatprep.mubr.msk.bf16.mxu1 %vm10058_vm0, %v10057_v1 }
 0x76f   :  { %8609 = vmatprep.subr.bf16.mxu1 %v10057_v1  ;;  %v1661_v8 = vpop.permute.xlu0 %1660 }
 0x770   :  { %v1666_v22 = vsel %vm1101_vm3, %v1661_v8, 0 }
 0x771   :  { %v1658_v20 = vpop.permute.xlu1 %1657 }
 0x775   :  { %v1767_v23 = vpop.permute.xlu1 %1766 }
 0x776   :  { %v9340_v57 = vpop.eup %9339  ;;  %v1772_v48 = vsel %vm1101_vm3, %v1767_v23, 0 }
 0x777   :  { %v1417_v18 = vmul.f32 %v9340_v57, %v9332_v44 }
 0x778   :  { %v9342_v17 = vpop.eup %9341 }
 0x779   :  { %v1418_v19 = vmul.f32 %v9342_v17, %v9334_v24  ;;  %v1764_v44 = vpop.permute.xlu1 %1763 }
 0x77b   :  { %v1422_v40 = vpack.c.bf16 %v1418_v19, %v1417_v18 }
 0x77d   :  { %8600 = vmatmul.mubr.msk.bf16.vlgmr.msra.gmra.mrb[28].mxu1 %vm1330_vm4, %v1422_v40 }
 0x77e   :  { %8610 = vmatpush3.bf16.xpose.msra.mxu1 %v1666_v22  ;;  %8611 = vmatprep.mubr.msk.bf16.mxu1 %vm10058_vm0, %v10057_v1 }
 0x77f   :  { %8621 = vmatprep.subr.bf16.mxu1 %v10057_v1 }
 0x785   :  { %8612 = vmatmul.mubr.msk.bf16.vlgmr.msra.gmra.mrb[32].mxu1 %vm1101_vm3, %v1658_v20 }
 0x786   :  { %8622 = vmatpush3.bf16.xpose.msra.mxu1 %v1772_v48  ;;  %8623 = vmatprep.mubr.msk.bf16.mxu1 %vm10058_vm0, %v10057_v1 }
 0x787   :  { %8633 = vmatprep.subr.bf16.mxu1 %v10057_v1 }
 0x78d   :  { %8624 = vmatmul.mubr.msk.bf16.vlgmr.msra.gmra.mrb[36].mxu1 %vm1101_vm3, %v1764_v44 }
 0x78e   :  { %8635 = vmatprep.mubr.msk.bf16.mxu1 %vm10058_vm0, %v10057_v1 }
 0x7a0   :  { %v1333_v24 = vpop.xlane.xlu0 %1332 }
 0x7a1   :  { %v1355_v27 = vsub.f32 %v1322_v52, %v1333_v24 }
 0x7a3   :  { %v1363_v31 = vmul.f32 1.442695, %v1355_v27 }
 0x7a4   :  { %v1345_v42 = vpop.xlane.xlu0 %1344 }
 0x7a5   :  { %9343 = vpow2.f32 %v1363_v31  ;;  %v1359_v50 = vsub.f32 %v1326_v56, %v1345_v42 }
 0x7a7   :  { %v1371_v53 = vmul.f32 1.442695, %v1359_v50 }
 0x7a8   :  { %v1348_v55 = vpop.xlane.xlu0 %1347 }
 0x7a9   :  { %9345 = vpow2.f32 %v1371_v53  ;;  %v1360_v58 = vsub.f32 %v1327_v59, %v1348_v55 }
 0x7aa   :  { %v1336_v62 = vpop.xlane.xlu1 %1335 }
 0x7ab   :  { %v1356_v63 = vsub.f32 %v1323_v28, %v1336_v62  ;;  %v1373_v33 = vmul.f32 1.442695, %v1360_v58 }
 0x7ad   :  { %v1365_v0 = vmul.f32 1.442695, %v1356_v63 }
 0x7af   :  { %v9344_v2 = vpop.eup %9343  ;;  %9347 = vpow2.f32 %v1365_v0 }
 0x7b0   :  { %v1379_v3 = vsel %vm1330_vm4, %v9344_v2, 0.0  ;;  %9349 = vpow2.f32 %v1373_v33 }
 0x7b1   :  { %1380 = vadd.xlane.f32.xlu0 %v1379_v3 }
 0x7b3   :  { %v9346_v16 = vpop.eup %9345 }
 0x7b4   :  { %v1391_v52 = vsel %vm1330_vm4, %v9346_v16, 0.0 }
 0x7b5   :  { %1392 = vadd.xlane.f32.xlu0 %v1391_v52 }
 0x7b9   :  { %v9348_v4 = vpop.eup %9347 }
 0x7ba   :  { %v1382_v56 = vsel %vm1330_vm4, %v9348_v4, 0.0  ;;  %v9350_v5 = vpop.eup %9349 }
 0x7bb   :  { %1383 = vadd.xlane.f32.xlu1 %v1382_v56  ;;  %v1394_v59 = vsel %vm1330_vm4, %v9350_v5, 0.0 }
 0x7bf   :  { %1395 = vadd.xlane.f32.xlu1 %v1394_v59 }
 0x7cb   :  { %1607 = vrot.lane.b32.xlu0 %v10670_v10, %s10061_s1 }
 0x7d0   :  { %1604 = vrot.lane.b32.xlu1 %v10668_v6, %s10061_s1 }
 0x7d4   :  { %1713 = vrot.lane.b32.xlu1 %v10704_v61, %s10061_s1 }
 0x7d8   :  { %1710 = vrot.lane.b32.xlu1 %v10702_v60, %s10061_s1 }
 0x83e   :  { %v1381_v18 = vpop.xlane.xlu0 %1380 }
 0x83f   :  { %9351 = vrcp.f32 %v1381_v18 }
 0x840   :  { %v10820_v28 = vpop.f32.mrb[24].mxu1 }
 0x841   :  { %v8589_v7 = vpop.f32.mrb[25].mxu1 }
 0x842   :  { %v10822_v14 = vpop.f32.mrb[26].mxu1  ;;  %v1393_v8 = vpop.xlane.xlu0 %1392 }
 0x843   :  { %v1600_v57 = vpack.c.bf16 %v10822_v14, %v10820_v28  ;;  %v8590_v17 = vpop.f32.mrb[27].mxu1 }
 0x846   :  { %v1608_v7 = vpop.permute.xlu0 %1607 }
 0x848   :  { %v1384_v19 = vpop.xlane.xlu1 %1383 }
 0x849   :  { %9353 = vrcp.f32 %v1384_v19  ;;  %v9352_v22 = vpop.eup %9351 }
 0x84a   :  { %v1411_v31 = vmul.f32 %v9352_v22, %v9344_v2 }
 0x84c   :  { %v1396_v40 = vpop.xlane.xlu1 %1395 }
 0x84d   :  { %9355 = vrcp.f32 %v1396_v40 }
 0x84e   :  { %9357 = vrcp.f32 %v1393_v8  ;;  %v1613_v8 = vsel %vm1101_vm3, %v1608_v7, 0 }
 0x850   :  { %v10826_v20 = vpop.f32.mrb[28].mxu1  ;;  %v1605_v19 = vpop.permute.xlu1 %1604 }
 0x851   :  { %v8601_v23 = vpop.f32.mrb[29].mxu1 }
 0x852   :  { %v10828_v48 = vpop.f32.mrb[30].mxu1 }
 0x853   :  { %v9354_v44 = vpop.eup %9353  ;;  %v8602_v27 = vpop.f32.mrb[31].mxu1 }
 0x854   :  { %v1412_v42 = vmul.f32 %v9354_v44, %v9348_v4 }
 0x856   :  { %v1419_v50 = vpack.c.bf16 %v1412_v42, %v1411_v31 }
 0x857   :  { %v9356_v53 = vpop.eup %9355 }
 0x858   :  { %8582 = vmatmul.mubr.msk.bf16.vlgmr.msra.gmra.mrb[24].mxu0 %vm1330_vm4, %v1419_v50  ;;  %v1702_v55 = vpop.f32.mrb[32].mxu1  ;;  %v9358_v58 = vpop.eup %9357  ;;  %v1416_v33 = vmul.f32 %v9356_v53, %v9350_v5 }
 0x859   :  { %8592 = vmatpush3.bf16.msra.mxu0 %v10689_v41  ;;  %v1817_v62 = vmul.f32 0.17677669, %v1702_v55  ;;  %v8613_v63 = vpop.f32.mrb[33].mxu1  ;;  %8593 = vmatprep.mubr.msk.bf16.mxu0 %vm10058_vm0, %v10057_v1  ;;  %v1415_v4 = vmul.f32 %v9358_v58, %v9346_v16  ;;  %v1714_v50 = vpop.permute.xlu1 %1713 }
 0x85a   :  { %v1705_v0 = vpop.f32.mrb[34].mxu1  ;;  %8603 = vmatprep.subr.bf16.mxu0 %v10057_v1  ;;  %v1719_v53 = vsel %vm1101_vm3, %v1714_v50, 0 }
 0x85b   :  { %v1818_v3 = vmul.f32 0.17677669, %v1705_v0  ;;  %v8614_v2 = vpop.f32.mrb[35].mxu1  ;;  %v1825_v52 = vadd.f32 %v10743_v25, %v1817_v62  ;;  %v1421_v17 = vpack.c.bf16 %v1416_v33, %v1415_v4 }
 0x85d   :  { %v1837_v56 = vsel %vm1330_vm4, %v1825_v52, -inf  ;;  %v1826_v59 = vadd.f32 %v10743_v25, %v1818_v3  ;;  %v1711_v58 = vpop.permute.xlu1 %1710 }
 0x85e   :  { %1838 = vmax.xlane.f32.xlu0 %v1837_v56 }
 0x85f   :  { %v1840_v18 = vsel %vm1330_vm4, %v1826_v59, -inf }
 0x860   :  { %8594 = vmatmul.mubr.msk.bf16.vlgmr.msra.gmra.mrb[28].mxu0 %vm1330_vm4, %v1421_v17  ;;  %1841 = vmax.xlane.f32.xlu1 %v1840_v18  ;;  %v1808_v5 = vpop.f32.mrb[36].mxu1 }
 0x861   :  { %v1821_v40 = vmul.f32 0.17677669, %v1808_v5  ;;  %v8625_v22 = vpop.f32.mrb[37].mxu1  ;;  %8605 = vmatprep.mubr.msk.bf16.mxu0 %vm10058_vm0, %v10057_v1 }
 0x862   :  { %8604 = vmatpush3.bf16.xpose.msra.mxu0 %v1613_v8  ;;  %v1811_v16 = vpop.f32.mrb[38].mxu1 }
 0x863   :  { %v1822_v23 = vmul.f32 0.17677669, %v1811_v16  ;;  %v8626_v44 = vpop.f32.mrb[39].mxu1  ;;  %v1829_v27 = vadd.f32 %v10752_v43, %v1821_v40  ;;  %8615 = vmatprep.subr.bf16.mxu0 %v10057_v1 }
 0x865   :  { %v1849_v31 = vsel %vm1330_vm4, %v1829_v27, -inf  ;;  %v1830_v42 = vadd.f32 %v10752_v43, %v1822_v23 }
 0x866   :  { %1850 = vmax.xlane.f32.xlu0 %v1849_v31 }
 0x867   :  { %v1852_v55 = vsel %vm1330_vm4, %v1830_v42, -inf }
 0x869   :  { %8606 = vmatmul.mubr.msk.bf16.vlgmr.msra.gmra.mrb[32].mxu0 %vm1101_vm3, %v1605_v19 }
 0x86a   :  { %8616 = vmatpush3.bf16.xpose.msra.mxu0 %v1719_v53  ;;  %1853 = vmax.xlane.f32.xlu0 %v1852_v55 }
 0x86b   :  { %8617 = vmatprep.mubr.msk.bf16.mxu0 %vm10058_vm0, %v10057_v1  ;;  %8627 = vmatprep.subr.bf16.mxu0 %v10057_v1 }
 0x871   :  { %8618 = vmatmul.mubr.msk.bf16.vlgmr.msra.gmra.mrb[36].mxu0 %vm1101_vm3, %v1711_v58 }
 0x872   :  { %8629 = vmatprep.mubr.msk.bf16.mxu0 %vm10058_vm0, %v10057_v1 }
 0x8eb   :  { %v1839_v62 = vpop.xlane.xlu0 %1838 }
 0x8ec   :  { %v1857_v63 = vsub.f32 %v1825_v52, %v1839_v62 }
 0x8ed   :  { %v1842_v33 = vpop.xlane.xlu1 %1841 }
 0x8ee   :  { %v1867_v0 = vmul.f32 1.442695, %v1857_v63  ;;  %v1858_v3 = vsub.f32 %v1826_v59, %v1842_v33 }
 0x8f0   :  { %9359 = vpow2.f32 %v1867_v0  ;;  %v1869_v2 = vmul.f32 1.442695, %v1858_v3 }
 0x8f2   :  { %9361 = vpow2.f32 %v1869_v2 }
 0x8f3   :  { %v1851_v4 = vpop.xlane.xlu0 %1850 }
 0x8f4   :  { %v1861_v56 = vsub.f32 %v1829_v27, %v1851_v4 }
 0x8f6   :  { %v1875_v7 = vmul.f32 1.442695, %v1861_v56 }
 0x8f7   :  { %v1854_v8 = vpop.xlane.xlu0 %1853 }
 0x8f8   :  { %9363 = vpow2.f32 %v1875_v7  ;;  %v1862_v40 = vsub.f32 %v1830_v42, %v1854_v8 }
 0x8fa   :  { %v10858_v17 = vpop.eup %9359  ;;  %v1877_v22 = vmul.f32 1.442695, %v1862_v40 }
 0x8fb   :  { %v1885_v18 = vsel %vm1330_vm4, %v10858_v17, 0.0 }
 0x8fc   :  { %v10862_v19 = vpop.eup %9361  ;;  %1886 = vadd.xlane.f32.xlu0 %v1885_v18  ;;  %9365 = vpow2.f32 %v1877_v22 }
 0x8fd   :  { %v1888_v52 = vsel %vm1330_vm4, %v10862_v19, 0.0 }
 0x8fe   :  { %1889 = vadd.xlane.f32.xlu1 %v1888_v52 }
 0x902   :  { %v10866_v59 = vpop.eup %9363 }
 0x903   :  { %v1897_v5 = vsel %vm1330_vm4, %v10866_v59, 0.0 }
 0x904   :  { %1898 = vadd.xlane.f32.xlu0 %v1897_v5 }
 0x906   :  { %v10886_v42 = vpop.eup %9365 }
 0x907   :  { %v1900_v50 = vsel %vm1330_vm4, %v10886_v42, 0.0 }
 0x90f   :  { %2068 = vrot.lane.b32.xlu1 %v10687_v39, %s10061_s1 }
 0x91a   :  { %1972 = vrot.lane.b32.xlu0 %v10672_v21, %s10061_s1 }
 0x91e   :  { %2350 = vrot.lane.b32.xlu0 %v10685_v34, %s10048_s24 }
 0x922   :  { %2401 = vrot.lane.b32.xlu0 %v10704_v61, %s10048_s24 }
 0x926   :  { %2452 = vrot.lane.b32.xlu0 %v10719_v11, %s10048_s24 }
 0x92b   :  { %v10880_v16 = vpop.f32.mrb[24].mxu0 }
 0x92c   :  { %v8583_v23 = vpop.f32.mrb[25].mxu0 }
 0x92d   :  { %v10882_v44 = vpop.f32.mrb[26].mxu0 }
 0x92e   :  { %v1599_v27 = vpack.c.bf16 %v10882_v44, %v10880_v16  ;;  %v8584_v31 = vpop.f32.mrb[27].mxu0  ;;  %v12711_v16 = vpack.c.bf16 %v10828_v48, %v10826_v20 }
 0x933   :  { %v10890_v53 = vpop.f32.mrb[28].mxu0  ;;  %1901 = vadd.xlane.f32.xlu1 %v1900_v50 }
 0x934   :  { %v8595_v55 = vpop.f32.mrb[29].mxu0 }
 0x935   :  { %v10892_v58 = vpop.f32.mrb[30].mxu0 }
 0x936   :  { %v1601_v62 = vpack.c.bf16 %v10892_v58, %v10890_v53  ;;  %v8596_v63 = vpop.f32.mrb[31].mxu0 }
 0x93c   :  { %v1649_v33 = vpop.f32.mrb[32].mxu0 }
 0x93d   :  { %v1815_v0 = vmul.f32 0.17677669, %v1649_v33  ;;  %v8607_v3 = vpop.f32.mrb[33].mxu0 }
 0x93e   :  { %v1652_v2 = vpop.f32.mrb[34].mxu0 }
 0x93f   :  { %v8608_v4 = vpop.f32.mrb[35].mxu0  ;;  %v1823_v56 = vadd.f32 %v10774_v30, %v1815_v0  ;;  %v1816_v63 = vmul.f32 0.17677669, %v1652_v2 }
 0x941   :  { %v1831_v18 = vsel %vm1330_vm4, %v1823_v56, -inf  ;;  %v10916_v33 = vadd.f32 %v10774_v30, %v1816_v63 }
 0x943   :  { %v1834_v0 = vsel %vm1330_vm4, %v10916_v33, -inf }
 0x944   :  { %v1755_v7 = vpop.f32.mrb[36].mxu0  ;;  %2299 = vrot.lane.b32.xlu1 %v10670_v10, %s10048_s24 }
 0x945   :  { %v1819_v52 = vmul.f32 0.17677669, %v1755_v7  ;;  %v8619_v5 = vpop.f32.mrb[37].mxu0  ;;  %1832 = vmax.xlane.f32.xlu0 %v1831_v18 }
 0x946   :  { %v1758_v8 = vpop.f32.mrb[38].mxu0 }
 0x947   :  { %v1820_v40 = vmul.f32 0.17677669, %v1758_v8  ;;  %v8620_v22 = vpop.f32.mrb[39].mxu0  ;;  %v1827_v23 = vadd.f32 %v10780_v45, %v1819_v52 }
 0x948   :  { %2297 = vrot.lane.b32.xlu1 %v10668_v6, %s10048_s24 }
 0x949   :  { %v1843_v31 = vsel %vm1330_vm4, %v1827_v23, -inf  ;;  %v10905_v50 = vadd.f32 %v10780_v45, %v1820_v40 }
 0x94a   :  { %1844 = vmax.xlane.f32.xlu0 %v1843_v31 }
 0x94b   :  { %v1846_v55 = vsel %vm1330_vm4, %v10905_v50, -inf }
 0x94c   :  { %2348 = vrot.lane.b32.xlu1 %v10683_v29, %s10048_s24 }
 0x94e   :  { %1847 = vmax.xlane.f32.xlu0 %v1846_v55 }
 0x950   :  { %2399 = vrot.lane.b32.xlu1 %v10702_v60, %s10048_s24 }
 0x954   :  { %2450 = vrot.lane.b32.xlu1 %v10717_v9, %s10048_s24 }
 0x978   :  { %1835 = vmax.xlane.f32.xlu1 %v1834_v0 }
 0x989   :  { %v1887_v3 = vpop.xlane.xlu0 %1886 }
 0x98a   :  { %9367 = vrcp.f32 %v1887_v3 }
 0x98b   :  { %v1890_v4 = vpop.xlane.xlu1 %1889 }
 0x98c   :  { %9369 = vrcp.f32 %v1890_v4 }
 0x98f   :  { %v2069_v22 = vpop.permute.xlu1 %2068 }
 0x991   :  { %v1899_v7 = vpop.xlane.xlu0 %1898 }
 0x992   :  { %9371 = vrcp.f32 %v1899_v7 }
 0x994   :  { %v9368_v18 = vpop.eup %9367 }
 0x995   :  { %v1973_v52 = vpop.permute.xlu0 %1972  ;;  %v1913_v8 = vmul.f32 %v9368_v18, %v10858_v17 }
 0x996   :  { %v9370_v5 = vpop.eup %9369  ;;  %8634 = vmatpush3.bf16.msra.mxu1 %v1973_v52 }
 0x997   :  { %v1914_v2 = vmul.f32 %v9370_v5, %v10862_v19  ;;  %8645 = vmatprep.subr.bf16.mxu1 %v10057_v1 }
 0x999   :  { %v1920_v40 = vpack.c.bf16 %v1914_v2, %v1913_v8  ;;  %v2351_v55 = vpop.permute.xlu0 %2350 }
 0x99b   :  { %8636 = vmatmul.mubr.msk.bf16.vlgmr.msra.gmra.mrb[40].mxu1 %vm1330_vm4, %v1920_v40 }
 0x99c   :  { %8646 = vmatpush3.bf16.msra.mxu1 %v2069_v22  ;;  %8647 = vmatprep.mubr.msk.bf16.mxu1 %vm10058_vm0, %v10057_v1  ;;  %v9372_v17 = vpop.eup %9371 }
 0x99d   :  { %8675 = vmatprep.subr.bf16.mxu1 %v10057_v1  ;;  %v2402_v63 = vpop.permute.xlu0 %2401  ;;  %v1917_v19 = vmul.f32 %v9372_v17, %v10866_v59 }
 0x9a1   :  { %v2453_v18 = vpop.permute.xlu0 %2452 }
 0x9c0   :  { %v1902_v31 = vpop.xlane.xlu1 %1901 }
 0x9c1   :  { %9373 = vrcp.f32 %v1902_v31 }
 0x9c4   :  { %v2300_v4 = vpop.permute.xlu1 %2299 }
 0x9c5   :  { %v2305_v5 = vsel %vm1101_vm3, %v2300_v4, 0 }
 0x9c8   :  { %v2298_v40 = vpop.permute.xlu1 %2297 }
 0x9cb   :  { %v9374_v0 = vpop.eup %9373 }
 0x9cc   :  { %v1918_v3 = vmul.f32 %v9374_v0, %v10886_v42  ;;  %v2356_v42 = vsel %vm1101_vm3, %v2351_v55, 0  ;;  %v2349_v17 = vpop.permute.xlu1 %2348 }
 0x9ce   :  { %v1922_v52 = vpack.c.bf16 %v1918_v3, %v1917_v19  ;;  %v2458_v3 = vsel %vm1101_vm3, %v2453_v18, 0 }
 0x9d0   :  { %8648 = vmatmul.mubr.msk.bf16.vlgmr.msra.gmra.mrb[44].mxu1 %vm1330_vm4, %v1922_v52  ;;  %v2400_v19 = vpop.permute.xlu1 %2399 }
 0x9d1   :  { %8676 = vmatpush3.bf16.xpose.msra.mxu1 %v2305_v5  ;;  %8677 = vmatprep.mubr.msk.bf16.mxu1 %vm10058_vm0, %v10057_v1 }
 0x9d2   :  { %v1833_v7 = vpop.xlane.xlu0 %1832  ;;  %8681 = vmatprep.subr.bf16.mxu1 %v10057_v1 }
 0x9d3   :  { %v1855_v8 = vsub.f32 %v1823_v56, %v1833_v7  ;;  %v2407_v56 = vsel %vm1101_vm3, %v2402_v63, 0 }
 0x9d4   :  { %v2451_v4 = vpop.permute.xlu1 %2450 }
 0x9d5   :  { %v1863_v2 = vmul.f32 1.442695, %v1855_v8 }
 0x9d7   :  { %9375 = vpow2.f32 %v1863_v2  ;;  %v1845_v59 = vpop.xlane.xlu0 %1844 }
 0x9d8   :  { %v1859_v22 = vsub.f32 %v1827_v23, %v1845_v59  ;;  %8678 = vmatmul.mubr.msk.bf16.vlgmr.msra.gmra.mrb[48].mxu1 %vm1101_vm3, %v2298_v40 }
 0x9d9   :  { %8682 = vmatpush3.bf16.xpose.msra.mxu1 %v2356_v42  ;;  %8683 = vmatprep.mubr.msk.bf16.mxu1 %vm10058_vm0, %v10057_v1 }
 0x9da   :  { %v1871_v31 = vmul.f32 1.442695, %v1859_v22  ;;  %8687 = vmatprep.subr.bf16.mxu1 %v10057_v1 }
 0x9db   :  { %v1848_v52 = vpop.xlane.xlu0 %1847 }
 0x9dc   :  { %9377 = vpow2.f32 %v1871_v31  ;;  %v1860_v18 = vsub.f32 %v10905_v50, %v1848_v52 }
 0x9de   :  { %v1873_v8 = vmul.f32 1.442695, %v1860_v18 }
 0x9e0   :  { %8684 = vmatmul.mubr.msk.bf16.vlgmr.msra.gmra.mrb[52].mxu1 %vm1101_vm3, %v2349_v17 }
 0x9e1   :  { %v10941_v0 = vpop.eup %9375  ;;  %8688 = vmatpush3.bf16.xpose.msra.mxu1 %v2407_v56  ;;  %8689 = vmatprep.mubr.msk.bf16.mxu1 %vm10058_vm0, %v10057_v1 }
 0x9e2   :  { %v1879_v23 = vsel %vm1330_vm4, %v10941_v0, 0.0  ;;  %8693 = vmatprep.subr.bf16.mxu1 %v10057_v1 }
 0x9e3   :  { %1880 = vadd.xlane.f32.xlu0 %v1879_v23 }
 0x9e6   :  { %v10948_v55 = vpop.eup %9377 }
 0x9e7   :  { %v1891_v63 = vsel %vm1330_vm4, %v10948_v55, 0.0 }
 0x9e8   :  { %1892 = vadd.xlane.f32.xlu0 %v1891_v63  ;;  %8690 = vmatmul.mubr.msk.bf16.vlgmr.msra.gmra.mrb[56].mxu1 %vm1101_vm3, %v2400_v19 }
 0x9e9   :  { %8694 = vmatpush3.bf16.xpose.msra.mxu1 %v2458_v3  ;;  %8695 = vmatprep.mubr.msk.bf16.mxu1 %vm10058_vm0, %v10057_v1 }
 0x9ea   :  { %8705 = vmatprep.subr.bf16.mxu1 %v10057_v1 }
 0x9f0   :  { %8696 = vmatmul.mubr.msk.bf16.vlgmr.msra.gmra.mrb[60].mxu1 %vm1101_vm3, %v2451_v4 }
 0x9f1   :  { %8707 = vmatprep.mubr.msk.bf16.mxu1 %vm10058_vm0, %v10057_v1 }
 0x9fe   :  { %1924 = vrot.lane.b32.xlu0 %v10674_v15, %s10061_s1 }
 0xa05   :  { %v1836_v5 = vpop.xlane.xlu1 %1835 }
 0xa06   :  { %v1856_v7 = vsub.f32 %v10916_v33, %v1836_v5 }
 0xa08   :  { %v1865_v2 = vmul.f32 1.442695, %v1856_v7 }
 0xa0a   :  { %9379 = vpow2.f32 %v1865_v2 }
 0xa0b   :  { %9381 = vpow2.f32 %v1873_v8 }
 0xa14   :  { %v9380_v40 = vpop.eup %9379 }
 0xa15   :  { %v1882_v59 = vsel %vm1330_vm4, %v9380_v40, 0.0  ;;  %v9382_v42 = vpop.eup %9381 }
 0xa16   :  { %1883 = vadd.xlane.f32.xlu1 %v1882_v59  ;;  %v1894_v22 = vsel %vm1330_vm4, %v9382_v42, 0.0 }
 0xa1a   :  { %1895 = vadd.xlane.f32.xlu1 %v1894_v22 }
 0xa2b   :  { %2020 = vrot.lane.b32.xlu1 %v10689_v41, %s10061_s1 }
 0xa6e   :  { %v10968_v31 = vpop.f32.mrb[40].mxu1 }
 0xa6f   :  { %v8637_v50 = vpop.f32.mrb[41].mxu1 }
 0xa70   :  { %v1881_v17 = vpop.xlane.xlu0 %1880  ;;  %v10970_v33 = vpop.f32.mrb[42].mxu1 }
 0xa71   :  { %v2116_v56 = vpack.c.bf16 %v10970_v33, %v10968_v31  ;;  %v8638_v23 = vpop.f32.mrb[43].mxu1  ;;  %9383 = vrcp.f32 %v1881_v17 }
 0xa75   :  { %v1893_v19 = vpop.xlane.xlu0 %1892 }
 0xa79   :  { %v1925_v63 = vpop.permute.xlu0 %1924 }
 0xa7a   :  { %8628 = vmatpush3.bf16.msra.mxu0 %v1925_v63 }
 0xa7b   :  { %8639 = vmatprep.subr.bf16.mxu0 %v10057_v1  ;;  %v9384_v59 = vpop.eup %9383 }
 0xaa3   :  { %v1884_v3 = vpop.xlane.xlu1 %1883  ;;  %v10975_v4 = vpop.f32.mrb[44].mxu1 }
 0xaa4   :  { %9385 = vrcp.f32 %v1884_v3  ;;  %v8649_v52 = vpop.f32.mrb[45].mxu1 }
 0xaa5   :  { %v10977_v18 = vpop.f32.mrb[46].mxu1  ;;  %v1911_v52 = vmul.f32 %v9384_v59, %v10941_v0 }
 0xaa6   :  { %v2118_v5 = vpack.c.bf16 %v10977_v18, %v10975_v4  ;;  %v8650_v7 = vpop.f32.mrb[47].mxu1 }
 0xaa7   :  { %v1896_v8 = vpop.xlane.xlu1 %1895 }
 0xaa8   :  { %9387 = vrcp.f32 %v1896_v8 }
 0xaa9   :  { %9389 = vrcp.f32 %v1893_v19 }
 0xaab   :  { %v2341_v2 = vpop.f32.mrb[48].mxu1 }
 0xaac   :  { %v2501_v22 = vmul.f32 0.17677669, %v2341_v2  ;;  %v8679_v50 = vpop.f32.mrb[49].mxu1 }
 0xaad   :  { %v2344_v23 = vpop.f32.mrb[50].mxu1 }
 0xaae   :  { %v9386_v17 = vpop.eup %9385  ;;  %v2502_v63 = vmul.f32 0.17677669, %v2344_v23  ;;  %v8680_v54 = vpop.f32.mrb[51].mxu1  ;;  %v10982_v3 = vadd.f32 %v10774_v30, %v2501_v22 }
 0xaaf   :  { %v1912_v13 = vmul.f32 %v9386_v17, %v9380_v40  ;;  %v2021_v23 = vpop.permute.xlu1 %2020 }
 0xab0   :  { %v2517_v7 = vsel %vm1330_vm4, %v10982_v3, -inf  ;;  %v10988_v8 = vadd.f32 %v10774_v30, %v2502_v63 }
 0xab1   :  { %2518 = vmax.xlane.f32.xlu1 %v2517_v7  ;;  %v1919_v19 = vpack.c.bf16 %v1912_v13, %v1911_v52 }
 0xab2   :  { %v9388_v2 = vpop.eup %9387  ;;  %v2520_v50 = vsel %vm1330_vm4, %v10988_v8, -inf }
 0xab3   :  { %8630 = vmatmul.mubr.msk.bf16.vlgmr.msra.gmra.mrb[40].mxu0 %vm1330_vm4, %v1919_v19  ;;  %2521 = vmax.xlane.f32.xlu0 %v2520_v50  ;;  %v2392_v54 = vpop.f32.mrb[52].mxu1  ;;  %v9390_v22 = vpop.eup %9389  ;;  %v1916_v30 = vmul.f32 %v9388_v2, %v9382_v42 }
 0xab4   :  { %8640 = vmatpush3.bf16.msra.mxu0 %v2021_v23  ;;  %v2503_v0 = vmul.f32 0.17677669, %v2392_v54  ;;  %v8685_v40 = vpop.f32.mrb[53].mxu1  ;;  %8641 = vmatprep.mubr.msk.bf16.mxu0 %vm10058_vm0, %v10057_v1  ;;  %v1915_v52 = vmul.f32 %v9390_v22, %v10948_v55 }
 0xab5   :  { %v2395_v59 = vpop.f32.mrb[54].mxu1 }
 0xab6   :  { %v2504_v17 = vmul.f32 0.17677669, %v2395_v59  ;;  %v8686_v13 = vpop.f32.mrb[55].mxu1  ;;  %v2511_v63 = vadd.f32 %v10743_v25, %v2503_v0  ;;  %v1921_v50 = vpack.c.bf16 %v1916_v30, %v1915_v52 }
 0xab8   :  { %v2523_v7 = vsel %vm1330_vm4, %v2511_v63, -inf  ;;  %v2512_v19 = vadd.f32 %v10743_v25, %v2504_v17 }
 0xab9   :  { %2524 = vmax.xlane.f32.xlu0 %v2523_v7 }
 0xaba   :  { %v2526_v23 = vsel %vm1330_vm4, %v2512_v19, -inf }
 0xabb   :  { %8642 = vmatmul.mubr.msk.bf16.vlgmr.msra.gmra.mrb[44].mxu0 %vm1330_vm4, %v1921_v50  ;;  %2527 = vmax.xlane.f32.xlu1 %v2526_v23  ;;  %v2443_v54 = vpop.f32.mrb[56].mxu1 }
 0xabc   :  { %v2505_v42 = vmul.f32 0.17677669, %v2443_v54  ;;  %v8691_v2 = vpop.f32.mrb[57].mxu1 }
 0xabd   :  { %v2446_v40 = vpop.f32.mrb[58].mxu1 }
 0xabe   :  { %v2506_v59 = vmul.f32 0.17677669, %v2446_v40  ;;  %v8692_v13 = vpop.f32.mrb[59].mxu1  ;;  %v2513_v0 = vadd.f32 %v10780_v45, %v2505_v42  ;;  %v9179_v40 = vld [vmem:[%s12653_s16 + $0x10] sm:$0xff]  }
 0xabf   :  { %8651 = vmatprep.subr.bf16.mxu0 %v9179_v40 }
 0xac0   :  { %v2529_v55 = vsel %vm1330_vm4, %v2513_v0, -inf  ;;  %v2514_v22 = vadd.f32 %v10780_v45, %v2506_v59  ;;  %8652 = vmatpush3.bf16.msra.mxu0 %v9179_v40  ;;  %v9180_v59 = vld [vmem:[%s12653_s16 + $0x18] sm:$0xff]  }
 0xac1   :  { %2530 = vmax.xlane.f32.xlu0 %v2529_v55  ;;  %8653 = vmatprep.subr.bf16.mxu0 %v9180_v59 }
 0xac2   :  { %v2532_v25 = vsel %vm1330_vm4, %v2514_v22, -inf }
 0xac3   :  { %2533 = vmax.xlane.f32.xlu1 %v2532_v25  ;;  %v2494_v30 = vpop.f32.mrb[60].mxu1 }
 0xac4   :  { %v2507_v17 = vmul.f32 0.17677669, %v2494_v30  ;;  %v8697_v52 = vpop.f32.mrb[61].mxu1  ;;  %8654 = vmatpush3.bf16.msra.mxu0 %v9180_v59 }
 0xac5   :  { %v2497_v7 = vpop.f32.mrb[62].mxu1 }
 0xac6   :  { %v2508_v50 = vmul.f32 0.17677669, %v2497_v7  ;;  %v8698_v23 = vpop.f32.mrb[63].mxu1  ;;  %v2515_v54 = vadd.f32 %v10752_v43, %v2507_v17 }
 0xac8   :  { %v2535_v2 = vsel %vm1330_vm4, %v2515_v54, -inf  ;;  %v11008_v42 = vadd.f32 %v10752_v43, %v2508_v50  ;;  %v11021_v43 = vld [vmem:[%s12653_s16] sm:$0xff]  }
 0xac9   :  { %2536 = vmax.xlane.f32.xlu0 %v2535_v2  ;;  %8663 = vmatprep.subr.bf16.mxu0 %v11021_v43 }
 0xaca   :  { %v2538_v45 = vsel %vm1330_vm4, %v11008_v42, -inf }
 0xacb   :  { %2539 = vmax.xlane.f32.xlu1 %v2538_v45 }
 0xb3e   :  { %v2519_v13 = vpop.xlane.xlu1 %2518 }
 0xb3f   :  { %v2541_v55 = vsub.f32 %v10982_v3, %v2519_v13 }
 0xb40   :  { %v2522_v25 = vpop.xlane.xlu0 %2521 }
 0xb41   :  { %v2549_v30 = vmul.f32 1.442695, %v2541_v55  ;;  %v2542_v17 = vsub.f32 %v10988_v8, %v2522_v25 }
 0xb43   :  { %9391 = vpow2.f32 %v2549_v30  ;;  %v2551_v52 = vmul.f32 1.442695, %v2542_v17 }
 0xb45   :  { %9393 = vpow2.f32 %v2551_v52 }
 0xb46   :  { %v2525_v7 = vpop.xlane.xlu0 %2524 }
 0xb47   :  { %v2543_v50 = vsub.f32 %v2511_v63, %v2525_v7 }
 0xb48   :  { %v2528_v23 = vpop.xlane.xlu1 %2527 }
 0xb49   :  { %v2553_v2 = vmul.f32 1.442695, %v2543_v50  ;;  %v2544_v45 = vsub.f32 %v2512_v19, %v2528_v23 }
 0xb4b   :  { %9395 = vpow2.f32 %v2553_v2  ;;  %v2555_v40 = vmul.f32 1.442695, %v2544_v45 }
 0xb4d   :  { %v11026_v59 = vpop.eup %9391  ;;  %9397 = vpow2.f32 %v2555_v40 }
 0xb4e   :  { %v2531_v24 = vpop.xlane.xlu0 %2530  ;;  %v2565_v3 = vsel %vm1330_vm4, %v11026_v59, 0.0 }
 0xb4f   :  { %v11030_v13 = vpop.eup %9393  ;;  %v2545_v8 = vsub.f32 %v2513_v0, %v2531_v24  ;;  %2566 = vadd.xlane.f32.xlu0 %v2565_v3 }
 0xb50   :  { %v2534_v55 = vpop.xlane.xlu1 %2533  ;;  %v2568_v63 = vsel %vm1330_vm4, %v11030_v13, 0.0 }
 0xb51   :  { %v2557_v25 = vmul.f32 1.442695, %v2545_v8  ;;  %v2546_v30 = vsub.f32 %v2514_v22, %v2534_v55  ;;  %2569 = vadd.xlane.f32.xlu1 %v2568_v63 }
 0xb53   :  { %9399 = vpow2.f32 %v2557_v25  ;;  %v2559_v19 = vmul.f32 1.442695, %v2546_v30 }
 0xb55   :  { %v11034_v17 = vpop.eup %9395  ;;  %9401 = vpow2.f32 %v2559_v19 }
 0xb56   :  { %v2537_v52 = vpop.xlane.xlu0 %2536  ;;  %v2571_v7 = vsel %vm1330_vm4, %v11034_v17, 0.0 }
 0xb57   :  { %v11038_v50 = vpop.eup %9397  ;;  %v2547_v24 = vsub.f32 %v2515_v54, %v2537_v52  ;;  %2572 = vadd.xlane.f32.xlu0 %v2571_v7 }
 0xb58   :  { %v2574_v0 = vsel %vm1330_vm4, %v11038_v50, 0.0  ;;  %v2540_v8 = vpop.xlane.xlu1 %2539 }
 0xb59   :  { %v2561_v23 = vmul.f32 1.442695, %v2547_v24  ;;  %2575 = vadd.xlane.f32.xlu1 %v2574_v0  ;;  %v2548_v55 = vsub.f32 %v11008_v42, %v2540_v8  ;;  %v9182_v24 = vld [vmem:[%s12653_s16 + $0x8] sm:$0xff]  }
 0xb5b   :  { %9403 = vpow2.f32 %v2561_v23  ;;  %v2563_v30 = vmul.f32 1.442695, %v2548_v55 }
 0xb5d   :  { %v11042_v22 = vpop.eup %9399  ;;  %9405 = vpow2.f32 %v2563_v30 }
 0xb5e   :  { %v2577_v2 = vsel %vm1330_vm4, %v11042_v22, 0.0 }
 0xb5f   :  { %v11046_v45 = vpop.eup %9401  ;;  %2578 = vadd.xlane.f32.xlu0 %v2577_v2 }
 0xb60   :  { %v2580_v40 = vsel %vm1330_vm4, %v11046_v45, 0.0 }
 0xb61   :  { %2581 = vadd.xlane.f32.xlu1 %v2580_v40 }
 0xb65   :  { %v11050_v54 = vpop.eup %9403 }
 0xb66   :  { %v2583_v3 = vsel %vm1330_vm4, %v11050_v54, 0.0 }
 0xb67   :  { %2584 = vadd.xlane.f32.xlu0 %v2583_v3 }
 0xb72   :  { %2656 = vrot.lane.b32.xlu1 %v10672_v21, %s10048_s24 }
 0xb76   :  { %2703 = vrot.lane.b32.xlu1 %v10689_v41, %s10048_s24 }
 0xb7d   :  { %2609 = vrot.lane.b32.xlu0 %v10674_v15, %s10048_s24 }
 0xb81   :  { %2900 = vrot.lane.b32.xlu0 %v10670_v10, %s10062_s19 }
 0xb85   :  { %2951 = vrot.lane.b32.xlu0 %v10685_v34, %s10062_s19 }
 0xb86   :  { %v1964_v63 = vpop.f32.mrb[40].mxu0 }
 0xb87   :  { %v8631_v25 = vpop.f32.mrb[41].mxu0 }
 0xb88   :  { %v1967_v19 = vpop.f32.mrb[42].mxu0 }
 0xb89   :  { %v2115_v52 = vpack.c.bf16 %v1967_v19, %v1964_v63  ;;  %v8632_v7 = vpop.f32.mrb[43].mxu0  ;;  %3002 = vrot.lane.b32.xlu0 %v10704_v61, %s10062_s19 }
 0xb8b   :  { %8655 = vmatprep.mubr.msk.bf16.mxu0 %vm1101_vm3, %v2115_v52 }
 0xb8c   :  { %8656 = vmatmul.mubr.msk.bf16.vlgmr.msra.gmra.mrb[48].mxu0 %vm1101_vm3, %v2116_v56 }
 0xb8d   :  { %3000 = vrot.lane.b32.xlu0 %v10702_v60, %s10062_s19  ;;  %8664 = vmatpush3.bf16.msra.mxu0 %v11021_v43  ;;  %v11088_v60 = vpop.eup %9405  ;;  %v9183_v43 = vld [vmem:[%s12653_s16 + $0x20] sm:$0xff]  }
 0xb8e   :  { %v2060_v10 = vpop.f32.mrb[44].mxu0  ;;  %8665 = vmatprep.subr.bf16.mxu0 %v9182_v24  ;;  %v2586_v31 = vsel %vm1330_vm4, %v11088_v60, 0.0 }
 0xb8f   :  { %v8643_v34 = vpop.f32.mrb[45].mxu0 }
 0xb90   :  { %v2063_v61 = vpop.f32.mrb[46].mxu0  ;;  %v9184_v34 = vld [vmem:[%s12653_s16 + $0x28] sm:$0xff]  }
 0xb91   :  { %v2117_v42 = vpack.c.bf16 %v2063_v61, %v2060_v10  ;;  %v8644_v0 = vpop.f32.mrb[47].mxu0  ;;  %8666 = vmatpush3.bf16.msra.mxu0 %v9182_v24 }
 0xb92   :  { %8699 = vmatprep.subr.bf16.mxu0 %v10057_v1 }
 0xb93   :  { %8659 = vmatprep.mubr.msk.bf16.mxu0 %vm1101_vm3, %v2117_v42 }
 0xb94   :  { %8660 = vmatmul.mubr.msk.bf16.gmra.mrb[52].mxu0 %vm1101_vm3, %v2118_v5 }
 0xb95   :  { %8667 = vmatprep.mubr.msk.bf16.mxu0 %vm1101_vm3, %v1599_v27 }
 0xb9a   :  { %2587 = vadd.xlane.f32.xlu1 %v2586_v31 }
 0xb9c   :  { %8668 = vmatmul.mubr.msk.bf16.vlgmr.msra.gmra.mrb[48].mxu0 %vm1101_vm3, %v1600_v57 }
 0xb9d   :  { %8671 = vmatprep.mubr.msk.bf16.mxu0 %vm1101_vm3, %v1601_v62 }
 0xba4   :  { %8672 = vmatmul.mubr.msk.bf16.gmra.mrb[52].mxu0 %vm1101_vm3, %v12711_v16 }
 0xba5   :  { %8701 = vmatprep.mubr.msk.bf16.mxu0 %vm10058_vm0, %v10057_v1 }
 0xbab   :  { %2750 = vrot.lane.b32.xlu1 %v10687_v39, %s10048_s24 }
 0xbaf   :  { %2898 = vrot.lane.b32.xlu1 %v10668_v6, %s10062_s19 }
 0xbb3   :  { %2949 = vrot.lane.b32.xlu1 %v10683_v29, %s10062_s19 }
 0xbb7   :  { %3053 = vrot.lane.b32.xlu1 %v10719_v11, %s10062_s19 }
 0xbbb   :  { %3051 = vrot.lane.b32.xlu1 %v10717_v9, %s10062_s19 }
 0xbdc   :  { %v2567_v28 = vpop.xlane.xlu0 %2566 }
 0xbde   :  { %v2570_v14 = vpop.xlane.xlu1 %2569 }
 0xbe4   :  { %v2573_v57 = vpop.xlane.xlu0 %2572 }
 0xbe5   :  { %9407 = vrcp.f32 %v2573_v57 }
 0xbe6   :  { %v2576_v20 = vpop.xlane.xlu1 %2575 }
 0xbe7   :  { %9409 = vrcp.f32 %v2576_v20 }
 0xbe8   :  { %9411 = vrcp.f32 %v2570_v14 }
 0xbe9   :  { %9413 = vrcp.f32 %v2567_v28 }
 0xbec   :  { %v2579_v6 = vpop.xlane.xlu0 %2578 }
 0xbee   :  { %v2582_v48 = vpop.xlane.xlu1 %2581 }
 0xbef   :  { %v9408_v44 = vpop.eup %9407  ;;  %9415 = vrcp.f32 %v2582_v48 }
 0xbf0   :  { %v2599_v29 = vmul.f32 %v9408_v44, %v11034_v17  ;;  %9417 = vrcp.f32 %v2579_v6 }
 0xbf1   :  { %v9410_v27 = vpop.eup %9409 }
 0xbf2   :  { %v2600_v11 = vmul.f32 %v9410_v27, %v11038_v50  ;;  %v2657_v53 = vpop.permute.xlu1 %2656  ;;  %v9412_v58 = vpop.eup %9411 }
 0xbf3   :  { %8706 = vmatpush3.bf16.msra.mxu1 %v2657_v53  ;;  %v9414_v33 = vpop.eup %9413  ;;  %v2598_v56 = vmul.f32 %v9412_v58, %v11030_v13 }
 0xbf4   :  { %v2585_v9 = vpop.xlane.xlu0 %2584  ;;  %v2606_v62 = vpack.c.bf16 %v2600_v11, %v2599_v29  ;;  %8717 = vmatprep.subr.bf16.mxu1 %v10057_v1  ;;  %v2597_v4 = vmul.f32 %v9414_v33, %v11026_v59 }
 0xbf5   :  { %9419 = vrcp.f32 %v2585_v9 }
 0xbf6   :  { %8708 = vmatmul.mubr.msk.bf16.vlgmr.msra.gmra.mrb[64].mxu1 %vm1330_vm4, %v2606_v62  ;;  %v2605_v5 = vpack.c.bf16 %v2598_v56, %v2597_v4  ;;  %v2704_v50 = vpop.permute.xlu1 %2703 }
 0xbf7   :  { %8719 = vmatprep.mubr.msk.bf16.mxu1 %vm10058_vm0, %v10057_v1 }
 0xbf8   :  { %v2610_v18 = vpop.permute.xlu0 %2609 }
 0xbf9   :  { %8700 = vmatpush3.bf16.msra.mxu0 %v2610_v18  ;;  %v9416_v17 = vpop.eup %9415 }
 0xbfa   :  { %8711 = vmatprep.subr.bf16.mxu0 %v10057_v1  ;;  %v9418_v13 = vpop.eup %9417  ;;  %v2602_v59 = vmul.f32 %v9416_v17, %v11046_v45 }
 0xbfb   :  { %v2601_v23 = vmul.f32 %v9418_v13, %v11042_v22 }
 0xbfc   :  { %8702 = vmatmul.mubr.msk.bf16.vlgmr.msra.gmra.mrb[56].mxu0 %vm1330_vm4, %v2605_v5  ;;  %v2901_v25 = vpop.permute.xlu0 %2900 }
 0xbfd   :  { %8712 = vmatpush3.bf16.msra.mxu0 %v2704_v50  ;;  %8713 = vmatprep.mubr.msk.bf16.mxu0 %vm10058_vm0, %v10057_v1  ;;  %v2607_v2 = vpack.c.bf16 %v2602_v59, %v2601_v23  ;;  %v2906_v22 = vsel %vm1101_vm3, %v2901_v25, 0  ;;  %v9703_v59 = vld [vmem:[%s12650_s13] ss:$0 sm:$0xff] }
 0xbfe   :  { %8723 = vmatprep.subr.bf16.mxu0 %v9183_v43 }
 0xbff   :  { %v9420_v8 = vpop.eup %9419 }
 0xc00   :  { %v2603_v63 = vmul.f32 %v9420_v8, %v11050_v54  ;;  %v2952_v52 = vpop.permute.xlu0 %2951 }
 0xc01   :  { %v2957_v24 = vsel %vm1101_vm3, %v2952_v52, 0 }
 0xc04   :  { %8714 = vmatmul.mubr.msk.bf16.vlgmr.msra.gmra.mrb[60].mxu0 %vm1330_vm4, %v2607_v2  ;;  %v3003_v20 = vpop.permute.xlu0 %3002 }
 0xc05   :  { %8724 = vmatpush3.bf16.msra.mxu0 %v9183_v43  ;;  %v3008_v6 = vsel %vm1101_vm3, %v3003_v20, 0 }
 0xc06   :  { %8725 = vmatprep.subr.bf16.mxu0 %v9184_v34 }
 0xc08   :  { %v3001_v2 = vpop.permute.xlu0 %3000 }
 0xc09   :  { %8726 = vmatpush3.bf16.msra.mxu0 %v9184_v34 }
 0xc0a   :  { %8747 = vmatprep.subr.bf16.mxu0 %v10057_v1 }
 0xc27   :  { %v2588_v40 = vpop.xlane.xlu1 %2587 }
 0xc28   :  { %9421 = vrcp.f32 %v2588_v40 }
 0xc2b   :  { %v2751_v3 = vpop.permute.xlu1 %2750 }
 0xc2c   :  { %8718 = vmatpush3.bf16.msra.mxu1 %v2751_v3 }
 0xc2d   :  { %8735 = vmatprep.subr.bf16.mxu1 %v10057_v1 }
 0xc2f   :  { %v2899_v19 = vpop.permute.xlu1 %2898 }
 0xc32   :  { %v9422_v55 = vpop.eup %9421 }
 0xc33   :  { %v2604_v45 = vmul.f32 %v9422_v55, %v11088_v60  ;;  %v2950_v7 = vpop.permute.xlu1 %2949 }
 0xc35   :  { %v2608_v30 = vpack.c.bf16 %v2604_v45, %v2603_v63 }
 0xc37   :  { %8720 = vmatmul.mubr.msk.bf16.vlgmr.msra.gmra.mrb[68].mxu1 %vm1330_vm4, %v2608_v30  ;;  %v3054_v54 = vpop.permute.xlu1 %3053  ;;  %v9704_v30 = vld [vmem:[%s12650_s13 + $0x1] ss:$0 sm:$0xff] }
 0xc38   :  { %8736 = vmatpush3.bf16.xpose.msra.mxu1 %v2906_v22  ;;  %8737 = vmatprep.mubr.msk.bf16.mxu1 %vm10058_vm0, %v10057_v1  ;;  %v3059_v10 = vsel %vm1101_vm3, %v3054_v54, 0 }
 0xc39   :  { %8741 = vmatprep.subr.bf16.mxu1 %v10057_v1 }
 0xc3b   :  { %v3052_v61 = vpop.permute.xlu1 %3051 }
 0xc3f   :  { %8738 = vmatmul.mubr.msk.bf16.vlgmr.msra.gmra.mrb[72].mxu1 %vm1101_vm3, %v2899_v19 }
 0xc40   :  { %8742 = vmatpush3.bf16.xpose.msra.mxu1 %v2957_v24  ;;  %8743 = vmatprep.mubr.msk.bf16.mxu1 %vm10058_vm0, %v10057_v1 }
 0xc41   :  { %8753 = vmatprep.subr.bf16.mxu1 %v10057_v1 }
 0xc47   :  { %8744 = vmatmul.mubr.msk.bf16.vlgmr.msra.gmra.mrb[76].mxu1 %vm1101_vm3, %v2950_v7 }
 0xc48   :  { %8754 = vmatpush3.bf16.xpose.msra.mxu1 %v3059_v10  ;;  %8755 = vmatprep.mubr.msk.bf16.mxu1 %vm10058_vm0, %v10057_v1 }
 0xc49   :  { %8765 = vmatprep.subr.bf16.mxu1 %v10057_v1 }
 0xc4f   :  { %8756 = vmatmul.mubr.msk.bf16.vlgmr.msra.gmra.mrb[80].mxu1 %vm1101_vm3, %v3052_v61 }
 0xc50   :  { %8767 = vmatprep.mubr.msk.bf16.mxu1 %vm10058_vm0, %v10057_v1 }
 0xcc9   :  { %v2696_v42 = vpop.f32.mrb[64].mxu1 }
 0xcca   :  { %v8709_v0 = vpop.f32.mrb[65].mxu1 }
 0xccb   :  { %v2699_v60 = vpop.f32.mrb[66].mxu1 }
 0xccc   :  { %v2798_v31 = vpack.c.bf16 %v2699_v60, %v2696_v42  ;;  %v8710_v16 = vpop.f32.mrb[67].mxu1 }
 0xccf   :  { %v2649_v28 = vpop.f32.mrb[56].mxu0 }
 0xcd0   :  { %v8703_v14 = vpop.f32.mrb[57].mxu0 }
 0xcd1   :  { %v2652_v57 = vpop.f32.mrb[58].mxu0 }
 0xcd2   :  { %v2797_v48 = vpack.c.bf16 %v2652_v57, %v2649_v28  ;;  %v8704_v44 = vpop.f32.mrb[59].mxu0 }
 0xcd4   :  { %8727 = vmatprep.mubr.msk.bf16.mxu0 %vm1101_vm3, %v2797_v48 }
 0xcd5   :  { %8728 = vmatmul.mubr.msk.bf16.vlgmr.msra.gmra.mrb[48].mxu0 %vm1101_vm3, %v2798_v31 }
 0xcd6   :  { %8748 = vmatpush3.bf16.xpose.msra.mxu0 %v3008_v6 }
 0xcd7   :  { %v2743_v27 = vpop.f32.mrb[60].mxu0  ;;  %8759 = vmatprep.subr.bf16.mxu0 %v10057_v1 }
 0xcd8   :  { %v8715_v29 = vpop.f32.mrb[61].mxu0 }
 0xcd9   :  { %v2746_v11 = vpop.f32.mrb[62].mxu0 }
 0xcda   :  { %v2799_v53 = vpack.c.bf16 %v2746_v11, %v2743_v27  ;;  %v8716_v58 = vpop.f32.mrb[63].mxu0 }
 0xcdc   :  { %8731 = vmatprep.mubr.msk.bf16.mxu0 %vm1101_vm3, %v2799_v53 }
 0xd0a   :  { %v2790_v9 = vpop.f32.mrb[68].mxu1 }
 0xd0b   :  { %v8721_v62 = vpop.f32.mrb[69].mxu1 }
 0xd0c   :  { %v2793_v33 = vpop.f32.mrb[70].mxu1 }
 0xd0d   :  { %v2800_v56 = vpack.c.bf16 %v2793_v33, %v2790_v9  ;;  %v8722_v4 = vpop.f32.mrb[71].mxu1  ;;  %v9705_v33 = vld [vmem:[%s12650_s13 + $0x2] ss:$0 sm:$0xff] }
 0xd0f   :  { %8732 = vmatmul.mubr.msk.bf16.gmra.mrb[52].mxu0 %vm1101_vm3, %v2800_v56 }
 0xd10   :  { %8749 = vmatprep.mubr.msk.bf16.mxu0 %vm10058_vm0, %v10057_v1 }
 0xd12   :  { %v2942_v18 = vpop.f32.mrb[72].mxu1 }
 0xd13   :  { %v3102_v5 = vmul.f32 0.17677669, %v2942_v18  ;;  %v8739_v43 = vpop.f32.mrb[73].mxu1 }
 0xd14   :  { %v2945_v17 = vpop.f32.mrb[74].mxu1 }
 0xd15   :  { %v3103_v50 = vmul.f32 0.17677669, %v2945_v17  ;;  %v8740_v13 = vpop.f32.mrb[75].mxu1  ;;  %v3110_v23 = vadd.f32 %v9703_v59, %v3102_v5  ;;  %v9706_v5 = vld [vmem:[%s12650_s13 + $0x3] ss:$0 sm:$0xff] }
 0xd17   :  { %v3111_v40 = vadd.f32 %v9703_v59, %v3103_v50  ;;  %8750 = vmatmul.mubr.msk.bf16.vlgmr.msra.gmra.mrb[64].mxu0 %vm1101_vm3, %v3001_v2  ;;  %v3118_v3 = vsel %vm1330_vm4, %v3110_v23, -inf }
 0xd18   :  { %3119 = vmax.xlane.f32.xlu0 %v3118_v3  ;;  %8761 = vmatprep.mubr.msk.bf16.mxu0 %vm10058_vm0, %v10057_v1 }
 0xd19   :  { %v3121_v8 = vsel %vm1330_vm4, %v3111_v40, -inf }
 0xd1a   :  { %3122 = vmax.xlane.f32.xlu1 %v3121_v8  ;;  %v2993_v55 = vpop.f32.mrb[76].mxu1 }
 0xd1b   :  { %v3104_v63 = vmul.f32 0.17677669, %v2993_v55  ;;  %v8745_v45 = vpop.f32.mrb[77].mxu1 }
 0xd1c   :  { %v2996_v25 = vpop.f32.mrb[78].mxu1 }
 0xd1d   :  { %v3112_v22 = vadd.f32 %v9704_v30, %v3104_v63  ;;  %v3105_v19 = vmul.f32 0.17677669, %v2996_v25  ;;  %v8746_v52 = vpop.f32.mrb[79].mxu1 }
 0xd1f   :  { %v3113_v7 = vadd.f32 %v9704_v30, %v3105_v19  ;;  %v3124_v24 = vsel %vm1330_vm4, %v3112_v22, -inf }
 0xd20   :  { %3125 = vmax.xlane.f32.xlu0 %v3124_v24 }
 0xd21   :  { %v3127_v34 = vsel %vm1330_vm4, %v3113_v7, -inf }
 0xd22   :  { %v3095_v54 = vpop.f32.mrb[80].mxu1 }
 0xd23   :  { %v8757_v10 = vpop.f32.mrb[81].mxu1  ;;  %v3108_v29 = vmul.f32 0.17677669, %v3095_v54 }
 0xd24   :  { %3128 = vmax.xlane.f32.xlu0 %v3127_v34  ;;  %v3098_v61 = vpop.f32.mrb[82].mxu1 }
 0xd25   :  { %v8758_v42 = vpop.f32.mrb[83].mxu1  ;;  %v3109_v62 = vmul.f32 0.17677669, %v3098_v61  ;;  %v3116_v43 = vadd.f32 %v9706_v5, %v3108_v29 }
 0xd27   :  { %v3117_v13 = vadd.f32 %v9706_v5, %v3109_v62 }
 0xda5   :  { %v3120_v0 = vpop.xlane.xlu0 %3119 }
 0xda6   :  { %v3142_v16 = vsub.f32 %v3110_v23, %v3120_v0  ;;  %v3136_v23 = vsel %vm1330_vm4, %v3116_v43, -inf }
 0xda7   :  { %v3123_v31 = vpop.xlane.xlu1 %3122 }
 0xda8   :  { %v3143_v28 = vsub.f32 %v3111_v40, %v3123_v31  ;;  %v3150_v57 = vmul.f32 1.442695, %v3142_v16  ;;  %v3139_v40 = vsel %vm1330_vm4, %v3117_v13, -inf }
 0xdaa   :  { %v3152_v48 = vmul.f32 1.442695, %v3143_v28  ;;  %9423 = vpow2.f32 %v3150_v57 }
 0xdac   :  { %9425 = vpow2.f32 %v3152_v48 }
 0xdad   :  { %v3126_v60 = vpop.xlane.xlu0 %3125 }
 0xdae   :  { %v3144_v20 = vsub.f32 %v3112_v22, %v3126_v60 }
 0xdb0   :  { %v3154_v6 = vmul.f32 1.442695, %v3144_v20 }
 0xdb1   :  { %v3129_v14 = vpop.xlane.xlu0 %3128 }
 0xdb2   :  { %v3145_v44 = vsub.f32 %v3113_v7, %v3129_v14  ;;  %9427 = vpow2.f32 %v3154_v6 }
 0xdb4   :  { %v3156_v58 = vmul.f32 1.442695, %v3145_v44  ;;  %v11189_v2 = vpop.eup %9423 }
 0xdb5   :  { %v3166_v8 = vsel %vm1330_vm4, %v11189_v2, 0.0 }
 0xdb6   :  { %9429 = vpow2.f32 %v3156_v58  ;;  %v9426_v3 = vpop.eup %9425 }
 0xdb7   :  { %v3169_v63 = vsel %vm1330_vm4, %v9426_v3, 0.0 }
 0xdbc   :  { %v9428_v55 = vpop.eup %9427 }
 0xdbd   :  { %v3172_v25 = vsel %vm1330_vm4, %v9428_v55, 0.0 }
 0xdc0   :  { %v9430_v45 = vpop.eup %9429 }
 0xdc1   :  { %v3175_v30 = vsel %vm1330_vm4, %v9430_v45, 0.0 }
 0xdea   :  { %v3044_v27 = vpop.f32.mrb[64].mxu0 }
 0xdeb   :  { %v3106_v11 = vmul.f32 0.17677669, %v3044_v27  ;;  %v8751_v53 = vpop.f32.mrb[65].mxu0 }
 0xdec   :  { %v3047_v9 = vpop.f32.mrb[66].mxu0 }
 0xded   :  { %v3114_v56 = vadd.f32 %v9705_v33, %v3106_v11  ;;  %v3107_v4 = vmul.f32 0.17677669, %v3047_v9  ;;  %v8752_v18 = vpop.f32.mrb[67].mxu0 }
 0xdef   :  { %v3115_v17 = vadd.f32 %v9705_v33, %v3107_v4  ;;  %v3130_v50 = vsel %vm1330_vm4, %v3114_v56, -inf }
 0xdf0   :  { %3131 = vmax.xlane.f32.xlu0 %v3130_v50 }
 0xdf1   :  { %v3133_v59 = vsel %vm1330_vm4, %v3115_v17, -inf }
 0xdf2   :  { %3134 = vmax.xlane.f32.xlu1 %v3133_v59 }
 0xdf4   :  { %3137 = vmax.xlane.f32.xlu0 %v3136_v23 }
 0xdf6   :  { %3140 = vmax.xlane.f32.xlu1 %v3139_v40 }
 0xdf8   :  { %3167 = vadd.xlane.f32.xlu0 %v3166_v8 }
 0xdfa   :  { %3170 = vadd.xlane.f32.xlu1 %v3169_v63  ;;  %v12712_v63 = vmov 0  }
 0xdfc   :  { %3173 = vadd.xlane.f32.xlu0 %v3172_v25 }
 0xdfe   :  { %3176 = vadd.xlane.f32.xlu1 %v3175_v30 }
 0xe7d   :  { %v3132_v22 = vpop.xlane.xlu0 %3131 }
 0xe7e   :  { %v3146_v19 = vsub.f32 %v3114_v56, %v3132_v22 }
 0xe7f   :  { %v3135_v52 = vpop.xlane.xlu1 %3134 }
 0xe80   :  { %v3158_v54 = vmul.f32 1.442695, %v3146_v19  ;;  %v3147_v57 = vsub.f32 %v3115_v17, %v3135_v52  ;;  %v9185_v19 = vld [vmem:[%s12653_s16 + $0x30] sm:$0xff]   ;;  %v9186_v52 = vld [vmem:[%s12653_s16 + $0x38] sm:$0xff]  }
 0xe81   :  { %v3138_v7 = vpop.xlane.xlu0 %3137 }
 0xe82   :  { %v3148_v24 = vsub.f32 %v3116_v43, %v3138_v7  ;;  %v3160_v20 = vmul.f32 1.442695, %v3147_v57 }
 0xe83   :  { %v3141_v10 = vpop.xlane.xlu1 %3140 }
 0xe84   :  { %v3162_v34 = vmul.f32 1.442695, %v3148_v24  ;;  %v3149_v61 = vsub.f32 %v3117_v13, %v3141_v10 }
 0xe85   :  { %v3168_v27 = vpop.xlane.xlu0 %3167 }
 0xe86   :  { %9431 = vpow2.f32 %v3162_v34  ;;  %v3164_v42 = vmul.f32 1.442695, %v3149_v61 }
 0xe87   :  { %9433 = vpow2.f32 %v3158_v54  ;;  %v3171_v6 = vpop.xlane.xlu1 %3170 }
 0xe88   :  { %9435 = vpow2.f32 %v3164_v42 }
 0xe89   :  { %9437 = vpow2.f32 %v3160_v20 }
 0xe8b   :  { %v3177_v29 = vpop.xlane.xlu1 %3176 }
 0xe8c   :  { %9439 = vrcp.f32 %v3177_v29 }
 0xe8d   :  { %9441 = vrcp.f32 %v3171_v6 }
 0xe90   :  { %v9432_v0 = vpop.eup %9431 }
 0xe91   :  { %v11197_v60 = vpop.eup %9433  ;;  %v3184_v31 = vsel %vm1330_vm4, %v9432_v0, 0.0 }
 0xe92   :  { %v9436_v16 = vpop.eup %9435  ;;  %3185 = vadd.xlane.f32.xlu0 %v3184_v31  ;;  %v3178_v14 = vsel %vm1330_vm4, %v11197_v60, 0.0 }
 0xe93   :  { %v3187_v28 = vsel %vm1330_vm4, %v9436_v16, 0.0  ;;  %v9438_v48 = vpop.eup %9437 }
 0xe94   :  { %3188 = vadd.xlane.f32.xlu1 %v3187_v28  ;;  %v3181_v44 = vsel %vm1330_vm4, %v9438_v48, 0.0 }
 0xe96   :  { %3179 = vadd.xlane.f32.xlu0 %v3178_v14 }
 0xea5   :  { %3257 = vrot.lane.b32.xlu1 %v10672_v21, %s10062_s19  ;;  %v3174_v21 = vpop.xlane.xlu0 %3173 }
 0xea6   :  { %9443 = vrcp.f32 %v3174_v21  ;;  %v7936_v21 = vld [vmem:[%s12654_s17] ss:$0 sm:$0xff] }
 0xea7   :  { %9445 = vrcp.f32 %v3168_v27 }
 0xea9   :  { %3304 = vrot.lane.b32.xlu1 %v10689_v41, %s10062_s19 }
 0xeac   :  { %3210 = vrot.lane.b32.xlu0 %v10674_v15, %s10062_s19  ;;  %v9440_v15 = vpop.eup %9439 }
 0xead   :  { %v9442_v11 = vpop.eup %9441  ;;  %v3201_v9 = vmul.f32 %v9440_v15, %v9430_v45 }
 0xeae   :  { %v3199_v56 = vmul.f32 %v9442_v11, %v9426_v3 }
 0xeb0   :  { %v9444_v58 = vpop.eup %9443 }
 0xeb1   :  { %v9446_v33 = vpop.eup %9445  ;;  %v3200_v4 = vmul.f32 %v9444_v58, %v9428_v55 }
 0xeb3   :  { %v3207_v43 = vpack.c.bf16 %v3201_v9, %v3200_v4 }
 0xecd   :  { %3182 = vadd.xlane.f32.xlu1 %v3181_v44 }
 0xede   :  { %3351 = vrot.lane.b32.xlu1 %v10687_v39, %s10062_s19  ;;  %v3198_v39 = vmul.f32 %v9446_v33, %v11189_v2 }
 0xee0   :  { %v3206_v17 = vpack.c.bf16 %v3199_v56, %v3198_v39 }
 0xf1f   :  { %v3186_v41 = vpop.xlane.xlu0 %3185 }
 0xf21   :  { %v3189_v53 = vpop.xlane.xlu1 %3188 }
 0xf22   :  { %9447 = vrcp.f32 %v3189_v53 }
 0xf23   :  { %v3180_v62 = vpop.xlane.xlu0 %3179  ;;  %9449 = vrcp.f32 %v3186_v41 }
 0xf24   :  { %9451 = vrcp.f32 %v3180_v62 }
 0xf25   :  { %v3258_v18 = vpop.permute.xlu1 %3257 }
 0xf26   :  { %8766 = vmatpush3.bf16.msra.mxu1 %v3258_v18 }
 0xf27   :  { %v3211_v5 = vpop.permute.xlu0 %3210  ;;  %8777 = vmatprep.subr.bf16.mxu1 %v10057_v1 }
 0xf28   :  { %8760 = vmatpush3.bf16.msra.mxu0 %v3211_v5 }
 0xf29   :  { %8768 = vmatmul.mubr.msk.bf16.vlgmr.msra.gmra.mrb[84].mxu1 %vm1330_vm4, %v3207_v43  ;;  %8771 = vmatprep.subr.bf16.mxu0 %v10057_v1  ;;  %v3305_v50 = vpop.permute.xlu1 %3304 }
 0xf2a   :  { %8779 = vmatprep.mubr.msk.bf16.mxu1 %vm10058_vm0, %v10057_v1 }
 0xf2b   :  { %8762 = vmatmul.mubr.msk.bf16.vlgmr.msra.gmra.mrb[68].mxu0 %vm1330_vm4, %v3206_v17 }
 0xf2c   :  { %8772 = vmatpush3.bf16.msra.mxu0 %v3305_v50  ;;  %8773 = vmatprep.mubr.msk.bf16.mxu0 %vm10058_vm0, %v10057_v1  ;;  %v9448_v13 = vpop.eup %9447 }
 0xf2d   :  { %v9450_v23 = vpop.eup %9449  ;;  %v3205_v2 = vmul.f32 %v9448_v13, %v9436_v16  ;;  %8783 = vmatprep.subr.bf16.mxu0 %v9185_v19 }
 0xf2e   :  { %v3204_v40 = vmul.f32 %v9450_v23, %v9432_v0  ;;  %v9452_v55 = vpop.eup %9451 }
 0xf2f   :  { %v3202_v25 = vmul.f32 %v9452_v55, %v11197_v60 }
 0xf30   :  { %v3209_v8 = vpack.c.bf16 %v3205_v2, %v3204_v40 }
 0xf5a   :  { %v3183_v59 = vpop.xlane.xlu1 %3182 }
 0xf5b   :  { %9453 = vrcp.f32 %v3183_v59 }
 0xf5e   :  { %v3352_v3 = vpop.permute.xlu1 %3351 }
 0xf5f   :  { %8778 = vmatpush3.bf16.msra.mxu1 %v3352_v3 }
 0xf62   :  { %8780 = vmatmul.mubr.msk.bf16.vlgmr.msra.gmra.mrb[88].mxu1 %vm1330_vm4, %v3209_v8 }
 0xf63   :  { %3784 = vmatprep.mubr.bf16.mxu1 %v12712_v63 }
 0xf65   :  { %v9454_v45 = vpop.eup %9453 }
 0xf66   :  { %v3203_v30 = vmul.f32 %v9454_v45, %v9438_v48 }
 0xf68   :  { %v3208_v22 = vpack.c.bf16 %v3203_v30, %v3202_v25 }
 0xf6a   :  { %8774 = vmatmul.mubr.msk.bf16.vlgmr.msra.gmra.mrb[72].mxu0 %vm1330_vm4, %v3208_v22 }
 0xf6b   :  { %8784 = vmatpush3.bf16.msra.mxu0 %v9185_v19 }
 0xf6c   :  { %8785 = vmatprep.subr.bf16.mxu0 %v9186_v52 }
 0xf6f   :  { %8786 = vmatpush3.bf16.msra.mxu0 %v9186_v52 }
 0xffc   :  { %v3297_v7 = vpop.f32.mrb[84].mxu1 }
 0xffd   :  { %v8769_v24 = vpop.f32.mrb[85].mxu1 }
 0xffe   :  { %v3250_v54 = vpop.f32.mrb[68].mxu0  ;;  %v3300_v10 = vpop.f32.mrb[86].mxu1 }
 0xfff   :  { %v3399_v34 = vpack.c.bf16 %v3300_v10, %v3297_v7  ;;  %v8763_v61 = vpop.f32.mrb[69].mxu0  ;;  %v8770_v42 = vpop.f32.mrb[87].mxu1 }
0x1000   :  { %v3253_v0 = vpop.f32.mrb[70].mxu0  ;;  %v9195_v42 = vld [vmem:[%s12657_s20 + $0x24] ss:$8 sps:$4 sm:$0xff]  }
0x1001   :  { %v3398_v60 = vpack.c.bf16 %v3253_v0, %v3250_v54  ;;  %v8764_v31 = vpop.f32.mrb[71].mxu0  ;;  %v9193_v0 = vld [vmem:[%s12657_s20 + $0x20] ss:$8 sps:$4 sm:$0xff]  }
0x1002   :  { %v9196_v31 = vld [vmem:[%s12657_s20 + $0x30] ss:$8 sps:$4 sm:$0xff]  }
0x1003   :  { %8787 = vmatprep.mubr.msk.bf16.mxu0 %vm1101_vm3, %v3398_v60  ;;  %v9198_v60 = vld [vmem:[%s12657_s20 + $0x34] ss:$8 sps:$4 sm:$0xff]  }
0x1004   :  { %8788 = vmatmul.mubr.msk.bf16.vlgmr.msra.gmra.mrb[48].mxu0 %vm1101_vm3, %v3399_v34 }
0x1035   :  { %v3391_v16 = vpop.f32.mrb[88].mxu1 }
0x1036   :  { %v8781_v28 = vpop.f32.mrb[89].mxu1 }
0x1037   :  { %v3394_v14 = vpop.f32.mrb[90].mxu1  ;;  %v9199_v28 = vld [vmem:[%s12657_s20 + $0x40] ss:$8 sps:$4 sm:$0xff]  }
0x1038   :  { %v3401_v57 = vpack.c.bf16 %v3394_v14, %v3391_v16  ;;  %v8782_v20 = vpop.f32.mrb[91].mxu1  ;;  %v9201_v16 = vld [vmem:[%s12657_s20 + $0x44] ss:$8 sps:$4 sm:$0xff]   ;;  %v9202_v14 = vld [vmem:[%s12657_s20 + $0x50] ss:$8 sps:$4 sm:$0xff]  }
0x1039   :  { %v9207_v20 = vld [vmem:[%s12657_s20 + $0x64] ss:$8 sps:$4 sm:$0xff]  }
0x103d   :  { %v3344_v48 = vpop.f32.mrb[72].mxu0 }
0x103e   :  { %v8775_v44 = vpop.f32.mrb[73].mxu0 }
0x103f   :  { %v3347_v6 = vpop.f32.mrb[74].mxu0  ;;  %v9210_v44 = vld [vmem:[%s12657_s20 + $0x74] ss:$8 sps:$4 sm:$0xff]  }
0x1040   :  { %v3400_v27 = vpack.c.bf16 %v3347_v6, %v3344_v48  ;;  %v8776_v29 = vpop.f32.mrb[75].mxu0  ;;  %v9205_v48 = vld [vmem:[%s12657_s20 + $0x60] ss:$8 sps:$4 sm:$0xff]   ;;  %v9208_v6 = vld [vmem:[%s12657_s20 + $0x70] ss:$8 sps:$4 sm:$0xff]  }
0x1042   :  { %8791 = vmatprep.mubr.msk.bf16.mxu0 %vm1101_vm3, %v3400_v27 }
0x1043   :  { %8792 = vmatmul.mubr.msk.bf16.gmra.mrb[52].mxu0 %vm1101_vm3, %v3401_v57  ;;  %v9204_v57 = vld [vmem:[%s12657_s20 + $0x54] ss:$8 sps:$4 sm:$0xff]  }
0x10d7   :  { %v8789_v41 = vpop.f32.mrb[48].mxu0 }
0x10d8   :  { %v3460_v15 = vpop.f32.mrb[49].mxu0  ;;  %v3508_v9 = vadd.f32 %v8789_v41, %v7936_v21 }
0x10d9   :  { %v3506_v11 = vadd.f32 %v7936_v21, %v3460_v15  ;;  %v8790_v53 = vpop.f32.mrb[50].mxu0 }
0x10da   :  { %v3463_v58 = vpop.f32.mrb[51].mxu0  ;;  %v3516_v4 = vadd.f32 %v3508_v9, %v10619_v35  ;;  %v3509_v18 = vadd.f32 %v8790_v53, %v7936_v21 }
0x10db   :  { %v3514_v62 = vadd.f32 %v3506_v11, %v10610_v26  ;;  %v3507_v33 = vadd.f32 %v7936_v21, %v3463_v58 }
0x10dc   :  { %v3517_v39 = vadd.f32 %v3509_v18, %v10625_v37 }
0x10dd   :  { %v3515_v56 = vadd.f32 %v3507_v33, %v10614_v32  ;;  %3524 = vadd.xlane.f32.xlu0 %v3514_v62 }
0x10df   :  { %3526 = vadd.xlane.f32.xlu1 %v3515_v56 }
0x10e1   :  { %3528 = vadd.xlane.f32.xlu0 %v3516_v4 }
0x10e5   :  { %3530 = vadd.xlane.f32.xlu0 %v3517_v39 }
0x1116   :  { %v8793_v5 = vpop.f32.mrb[52].mxu0 }
0x1117   :  { %v3476_v43 = vpop.f32.mrb[53].mxu0  ;;  %v3512_v59 = vadd.f32 %v8793_v5, %v7936_v21 }
0x1118   :  { %v3510_v17 = vadd.f32 %v7936_v21, %v3476_v43  ;;  %v8794_v50 = vpop.f32.mrb[54].mxu0 }
0x1119   :  { %v3479_v13 = vpop.f32.mrb[55].mxu0  ;;  %v3513_v32 = vadd.f32 %v8794_v50, %v7936_v21  ;;  %v11250_v35 = vadd.f32 %v3512_v59, %v10639_v47  ;;  %v9192_v47 = vld [vmem:[%s12657_s20 + $0x14] ss:$8 sps:$4 sm:$0xff]  }
0x111a   :  { %v11243_v26 = vadd.f32 %v3510_v17, %v10621_v36  ;;  %v3511_v23 = vadd.f32 %v7936_v21, %v3479_v13  ;;  %v9187_v36 = vld [vmem:[%s12657_s20] ss:$8 sps:$4 sm:$0xff]  }
0x111b   :  { %v11254_v37 = vadd.f32 %v3513_v32, %v10637_v46  ;;  %v9190_v46 = vld [vmem:[%s12657_s20 + $0x10] ss:$8 sps:$4 sm:$0xff]  }
0x111c   :  { %v11246_v2 = vadd.f32 %v3511_v23, %v10628_v38  ;;  %3532 = vadd.xlane.f32.xlu0 %v11243_v26  ;;  %v9189_v38 = vld [vmem:[%s12657_s20 + $0x4] ss:$8 sps:$4 sm:$0xff]  }
0x111d   :  { %3752 = vmatprep.subr.bf16.mxu1 %v9189_v38 }
0x111e   :  { %3534 = vadd.xlane.f32.xlu1 %v11246_v2  ;;  %3753 = vmatpush1.bf16.msra.mxu1 %v9187_v36 }
0x111f   :  { %3754 = vmatprep.subr.bf16.mxu1 %v9192_v47  ;;  %v7937_v47 = vld [vmem:[#allocation16] ss:$0 sm:$0xff] }
0x1120   :  { %3536 = vadd.xlane.f32.xlu0 %v11250_v35 }
0x1122   :  { %3538 = vadd.xlane.f32.xlu1 %v11254_v37  ;;  %3755 = vmatpush1.bf16.msra.mxu1 %v9190_v46 }
0x1123   :  { %3756 = vmatprep.subr.bf16.mxu1 %v9195_v42 }
0x1126   :  { %3757 = vmatpush1.bf16.msra.mxu1 %v9193_v0 }
0x1127   :  { %3758 = vmatprep.subr.bf16.mxu1 %v9198_v60 }
0x112a   :  { %3759 = vmatpush1.bf16.msra.mxu1 %v9196_v31 }
0x112b   :  { %3760 = vmatprep.subr.bf16.mxu1 %v9201_v16 }
0x112e   :  { %3761 = vmatpush1.bf16.msra.mxu1 %v9199_v28 }
0x112f   :  { %3762 = vmatprep.subr.bf16.mxu1 %v9204_v57 }
0x1132   :  { %3763 = vmatpush1.bf16.msra.mxu1 %v9202_v14 }
0x1133   :  { %3764 = vmatprep.subr.bf16.mxu1 %v9207_v20 }
0x1136   :  { %3765 = vmatpush1.bf16.msra.mxu1 %v9205_v48 }
0x1137   :  { %3766 = vmatprep.subr.bf16.mxu1 %v9210_v44 }
0x113a   :  { %3767 = vmatpush1.bf16.msra.mxu1 %v9208_v6 }
0x116a   :  { %v3525_v40 = vpop.xlane.xlu0 %3524 }
0x116b   :  { %v3540_v3 = vmul.f32 0.0078125, %v3525_v40 }
0x116c   :  { %v3527_v8 = vpop.xlane.xlu1 %3526 }
0x116d   :  { %v11270_v55 = vsub.f32 %v3514_v62, %v3540_v3  ;;  %v3541_v45 = vmul.f32 0.0078125, %v3527_v8 }
0x116e   :  { %v3529_v25 = vpop.xlane.xlu0 %3528 }
0x116f   :  { %v11272_v30 = vsub.f32 %v3515_v56, %v3541_v45  ;;  %v3542_v22 = vmul.f32 0.0078125, %v3529_v25  ;;  %v3556_v19 = vmul.f32 %v11270_v55, %v11270_v55  ;;  %v7938_v25 = vld [vmem:[#allocation17] ss:$0 sm:$0xff] }
0x1171   :  { %v11276_v52 = vsub.f32 %v3516_v4, %v3542_v22  ;;  %3564 = vadd.xlane.f32.xlu0 %v3556_v19  ;;  %v3557_v7 = vmul.f32 %v11272_v30, %v11272_v30 }
0x1172   :  { %v3531_v24 = vpop.xlane.xlu0 %3530 }
0x1173   :  { %v3543_v54 = vmul.f32 0.0078125, %v3531_v24  ;;  %3566 = vadd.xlane.f32.xlu1 %v3557_v7  ;;  %v3558_v10 = vmul.f32 %v11276_v52, %v11276_v52 }
0x1175   :  { %v11282_v34 = vsub.f32 %v3517_v39, %v3543_v54  ;;  %3568 = vadd.xlane.f32.xlu0 %v3558_v10 }
0x1177   :  { %v3559_v61 = vmul.f32 %v11282_v34, %v11282_v34 }
0x1179   :  { %3570 = vadd.xlane.f32.xlu1 %v3559_v61 }
0x11a9   :  { %v3533_v27 = vpop.xlane.xlu0 %3532 }
0x11aa   :  { %v3544_v29 = vmul.f32 0.0078125, %v3533_v27 }
0x11ab   :  { %v3535_v21 = vpop.xlane.xlu1 %3534 }
0x11ac   :  { %v11323_v41 = vsub.f32 %v11243_v26, %v3544_v29  ;;  %v3545_v15 = vmul.f32 0.0078125, %v3535_v21 }
0x11ad   :  { %v3537_v11 = vpop.xlane.xlu0 %3536 }
0x11ae   :  { %v11326_v53 = vsub.f32 %v11246_v2, %v3545_v15  ;;  %v3546_v58 = vmul.f32 0.0078125, %v3537_v11  ;;  %v3560_v9 = vmul.f32 %v11323_v41, %v11323_v41 }
0x11af   :  { %v3539_v62 = vpop.xlane.xlu1 %3538 }
0x11b0   :  { %v11331_v33 = vsub.f32 %v11250_v35, %v3546_v58  ;;  %v3547_v56 = vmul.f32 0.0078125, %v3539_v62  ;;  %3572 = vadd.xlane.f32.xlu0 %v3560_v9  ;;  %v3561_v4 = vmul.f32 %v11326_v53, %v11326_v53 }
0x11b2   :  { %v11336_v18 = vsub.f32 %v11254_v37, %v3547_v56  ;;  %3574 = vadd.xlane.f32.xlu1 %v3561_v4  ;;  %v3562_v39 = vmul.f32 %v11331_v33, %v11331_v33 }
0x11b4   :  { %3576 = vadd.xlane.f32.xlu0 %v3562_v39  ;;  %v3563_v5 = vmul.f32 %v11336_v18, %v11336_v18 }
0x11b6   :  { %3578 = vadd.xlane.f32.xlu1 %v3563_v5 }
0x11fe   :  { %v3565_v43 = vpop.xlane.xlu0 %3564 }
0x11ff   :  { %v3580_v17 = vmul.f32 0.0078125, %v3565_v43 }
0x1200   :  { %v3567_v50 = vpop.xlane.xlu1 %3566 }
0x1201   :  { %v3588_v13 = vadd.f32 1e-12, %v3580_v17  ;;  %v3581_v59 = vmul.f32 0.0078125, %v3567_v50 }
0x1202   :  { %v3569_v26 = vpop.xlane.xlu0 %3568 }
0x1203   :  { %9455 = vrsqrt.f32 %v3588_v13  ;;  %v3589_v23 = vadd.f32 1e-12, %v3581_v59  ;;  %v3582_v32 = vmul.f32 0.0078125, %v3569_v26  ;;  %v9213_v26 = vld [vmem:[%s12659_s22 + $0x48] sm:$0xff]  }
0x1205   :  { %9457 = vrsqrt.f32 %v3589_v23  ;;  %v3590_v2 = vadd.f32 1e-12, %v3582_v32  ;;  %v9214_v23 = vld [vmem:[%s12659_s22 + $0x8] sm:$0xff]   ;;  %v9215_v32 = vld [vmem:[%s12659_s22 + $0x50] sm:$0xff]  }
0x1206   :  { %v3571_v35 = vpop.xlane.xlu1 %3570 }
0x1207   :  { %9459 = vrsqrt.f32 %v3590_v2  ;;  %v3583_v37 = vmul.f32 0.0078125, %v3571_v35  ;;  %v9216_v2 = vld [vmem:[%s12659_s22 + $0x10] sm:$0xff]   ;;  %v9217_v35 = vld [vmem:[%s12659_s22 + $0x58] sm:$0xff]  }
0x1209   :  { %v3591_v36 = vadd.f32 1e-12, %v3583_v37  ;;  %v9218_v37 = vld [vmem:[%s12659_s22 + $0x18] sm:$0xff]  }
0x120b   :  { %9461 = vrsqrt.f32 %v3591_v36  ;;  %v9219_v36 = vld [vmem:[%s12659_s22 + $0x60] sm:$0xff]  }
0x120d   :  { %v9456_v38 = vpop.eup %9455 }
0x120e   :  { %v3604_v46 = vmul.f32 %v9456_v38, %v11270_v55  ;;  %v9220_v38 = vld [vmem:[%s12659_s22 + $0x20] sm:$0xff]  }
0x120f   :  { %v9458_v40 = vpop.eup %9457 }
0x1210   :  { %v3605_v3 = vmul.f32 %v9458_v40, %v11272_v30  ;;  %v3618_v8 = vmul.f32 %v7937_v47, %v3604_v46  ;;  %v9222_v46 = vld [vmem:[%s12659_s22 + $0x28] sm:$0xff]   ;;  %v9223_v40 = vld [vmem:[%s12659_s22 + $0x70] sm:$0xff]  }
0x1211   :  { %v9460_v45 = vpop.eup %9459 }
0x1212   :  { %v3619_v22 = vmul.f32 %v7937_v47, %v3605_v3  ;;  %v11344_v19 = vadd.f32 %v7938_v25, %v3618_v8  ;;  %v3606_v24 = vmul.f32 %v9460_v45, %v11276_v52  ;;  %v9224_v3 = vld [vmem:[%s12659_s22 + $0x30] sm:$0xff]   ;;  %v9225_v8 = vld [vmem:[%s12659_s22 + $0x78] sm:$0xff]  }
0x1213   :  { %v9226_v45 = vld [vmem:[%s12659_s22 + $0x38] sm:$0xff]  }
0x1214   :  { %v11346_v7 = vadd.f32 %v7938_v25, %v3619_v22  ;;  %v3620_v55 = vmul.f32 %v7937_v47, %v3606_v24 }
0x1215   :  { %v9462_v54 = vpop.eup %9461 }
0x1216   :  { %v3640_v10 = vpack.c.bf16 %v11346_v7, %v11344_v19  ;;  %v3607_v61 = vmul.f32 %v9462_v54, %v11282_v34  ;;  %v11355_v0 = vadd.f32 %v7938_v25, %v3620_v55 }
0x1218   :  { %3785 = vmatmul.mubr.bf16.vlgmr.msra.gmra.mrb[92].mxu1 %v3640_v10  ;;  %v3621_v42 = vmul.f32 %v7937_v47, %v3607_v61 }
0x1219   :  { %3794 = vmatprep.mubr.bf16.mxu1 %v12712_v63 }
0x121a   :  { %v11353_v30 = vadd.f32 %v7938_v25, %v3621_v42 }
0x121c   :  { %v3641_v60 = vpack.c.bf16 %v11353_v30, %v11355_v0 }
0x1220   :  { %3795 = vmatmul.mubr.bf16.gmra.mrb[96].mxu1 %v3641_v60 }
0x1221   :  { %3804 = vmatprep.mubr.bf16.mxu1 %v12712_v63 }
0x123d   :  { %v3573_v52 = vpop.xlane.xlu0 %3572 }
0x123e   :  { %v3584_v31 = vmul.f32 0.0078125, %v3573_v52 }
0x123f   :  { %v3575_v16 = vpop.xlane.xlu1 %3574 }
0x1240   :  { %v3592_v28 = vadd.f32 1e-12, %v3584_v31  ;;  %v3585_v34 = vmul.f32 0.0078125, %v3575_v16 }
0x1241   :  { %v3577_v14 = vpop.xlane.xlu0 %3576 }
0x1242   :  { %9463 = vrsqrt.f32 %v3592_v28  ;;  %v3593_v57 = vadd.f32 1e-12, %v3585_v34  ;;  %v3586_v20 = vmul.f32 0.0078125, %v3577_v14 }
0x1243   :  { %v3579_v48 = vpop.xlane.xlu1 %3578 }
0x1244   :  { %9465 = vrsqrt.f32 %v3593_v57  ;;  %v3594_v44 = vadd.f32 1e-12, %v3586_v20  ;;  %v3587_v6 = vmul.f32 0.0078125, %v3579_v48 }
0x1246   :  { %9467 = vrsqrt.f32 %v3594_v44  ;;  %v3595_v27 = vadd.f32 1e-12, %v3587_v6 }
0x1248   :  { %9469 = vrsqrt.f32 %v3595_v27 }
0x124c   :  { %v9464_v29 = vpop.eup %9463 }
0x124d   :  { %v3608_v21 = vmul.f32 %v9464_v29, %v11323_v41 }
0x124e   :  { %v9466_v15 = vpop.eup %9465 }
0x124f   :  { %v3609_v11 = vmul.f32 %v9466_v15, %v11326_v53  ;;  %v3622_v58 = vmul.f32 %v7937_v47, %v3608_v21 }
0x1250   :  { %v9468_v9 = vpop.eup %9467 }
0x1251   :  { %v3623_v62 = vmul.f32 %v7937_v47, %v3609_v11  ;;  %v11362_v4 = vadd.f32 %v7938_v25, %v3622_v58  ;;  %v3610_v5 = vmul.f32 %v9468_v9, %v11331_v33  ;;  %v9211_v33 = vld [vmem:[%s12659_s22 + $0x40] sm:$0xff]  }
0x1252   :  { %v9470_v56 = vpop.eup %9469  ;;  %8311 = vmatprep.subr.bf16.mxu0 %v9211_v33 }
0x1253   :  { %v11364_v39 = vadd.f32 %v7938_v25, %v3623_v62  ;;  %v3611_v43 = vmul.f32 %v9470_v56, %v11336_v18  ;;  %v3624_v41 = vmul.f32 %v7937_v47, %v3610_v5  ;;  %v9212_v18 = vld [vmem:[%s12659_s22] sm:$0xff]  }
0x1254   :  { %8312 = vmatpush3.bf16.msra.mxu0 %v9212_v18 }
0x1255   :  { %v3642_v17 = vpack.c.bf16 %v11364_v39, %v11362_v4  ;;  %v3625_v50 = vmul.f32 %v7937_v47, %v3611_v43  ;;  %v11373_v13 = vadd.f32 %v7938_v25, %v3624_v41  ;;  %8313 = vmatprep.subr.bf16.mxu0 %v9213_v26  ;;  %v9221_v47 = vld [vmem:[%s12659_s22 + $0x68] sm:$0xff]  }
0x1257   :  { %3805 = vmatmul.mubr.bf16.gmra.mrb[100].mxu1 %v3642_v17  ;;  %v11371_v53 = vadd.f32 %v7938_v25, %v3625_v50  ;;  %v3660_v25 = vld [vmem:[%s12658_s21] sm:$0x3] }
0x1258   :  { %3814 = vmatprep.mubr.bf16.mxu1 %v12712_v63  ;;  %8314 = vmatpush3.bf16.msra.mxu0 %v9214_v23  ;;  %v11430_v22 = vrot.slane %v3660_v25, %v10606_v12  ;;  %v11433_v24 = vrot.slane %v3660_v25, %v10650_v51 }
0x1259   :  { %v3643_v59 = vpack.c.bf16 %v11371_v53, %v11373_v13  ;;  %8315 = vmatprep.subr.bf16.mxu0 %v9215_v32 }
0x125c   :  { %8316 = vmatpush3.bf16.msra.mxu0 %v9216_v2 }
0x125d   :  { %8317 = vmatprep.subr.bf16.mxu0 %v9217_v35 }
0x125f   :  { %3815 = vmatmul.mubr.bf16.gmra.mrb[104].mxu1 %v3643_v59 }
0x1260   :  { %4518 = vmatprep.mubr.bf16.mxu1 %v12712_v63  ;;  %8318 = vmatpush3.bf16.msra.mxu0 %v9218_v37 }
0x1261   :  { %8319 = vmatprep.subr.bf16.mxu0 %v9219_v36 }
0x1264   :  { %8320 = vmatpush3.bf16.msra.mxu0 %v9220_v38 }
0x1265   :  { %8321 = vmatprep.subr.bf16.mxu0 %v9221_v47 }
0x1268   :  { %8322 = vmatpush3.bf16.msra.mxu0 %v9222_v46 }
0x1269   :  { %8323 = vmatprep.subr.bf16.mxu0 %v9223_v40 }
0x126c   :  { %8324 = vmatpush3.bf16.msra.mxu0 %v9224_v3 }
0x126d   :  { %8325 = vmatprep.subr.bf16.mxu0 %v9225_v8 }
0x1270   :  { %8326 = vmatpush3.bf16.msra.mxu0 %v9226_v45 }
0x12eb   :  { %v3786_v54 = vpop.f32.mrb[92].mxu1 }
0x12ec   :  { %v11436_v10 = vadd.f32 %v3786_v54, %v11430_v22  ;;  %v3788_v61 = vpop.f32.mrb[93].mxu1 }
0x12ed   :  { %v11439_v55 = vadd.f32 %v3788_v61, %v11433_v24  ;;  %v3790_v42 = vpop.f32.mrb[94].mxu1 }
0x12ee   :  { %v3825_v60 = vmul.f32 %v11436_v10, %v11436_v10  ;;  %v11444_v52 = vadd.f32 %v3790_v42, %v11430_v22  ;;  %v3792_v31 = vpop.f32.mrb[95].mxu1 }
0x12ef   :  { %v3826_v16 = vmul.f32 %v11439_v55, %v11439_v55  ;;  %v11449_v28 = vadd.f32 %v3792_v31, %v11433_v24 }
0x12f0   :  { %v3841_v34 = vmul.f32 %v3825_v60, %v11436_v10  ;;  %v3827_v14 = vmul.f32 %v11444_v52, %v11444_v52 }
0x12f1   :  { %v3842_v57 = vmul.f32 %v3826_v16, %v11439_v55  ;;  %v3828_v20 = vmul.f32 %v11449_v28, %v11449_v28 }
0x12f2   :  { %v3857_v48 = vmul.f32 0.044715, %v3841_v34  ;;  %v3843_v44 = vmul.f32 %v3827_v14, %v11444_v52 }
0x12f3   :  { %v3858_v6 = vmul.f32 0.044715, %v3842_v57  ;;  %v3844_v27 = vmul.f32 %v3828_v20, %v11449_v28  ;;  %v3796_v29 = vpop.f32.mrb[96].mxu1 }
0x12f4   :  { %v3873_v21 = vadd.f32 %v3857_v48, %v11436_v10  ;;  %v3859_v15 = vmul.f32 0.044715, %v3843_v44  ;;  %v11461_v11 = vadd.f32 %v3796_v29, %v11430_v22  ;;  %v3798_v58 = vpop.f32.mrb[97].mxu1 }
0x12f5   :  { %v3874_v9 = vadd.f32 %v3858_v6, %v11439_v55  ;;  %v3860_v62 = vmul.f32 0.044715, %v3844_v27  ;;  %v11465_v56 = vadd.f32 %v3798_v58, %v11433_v24  ;;  %v3800_v5 = vpop.f32.mrb[98].mxu1 }
0x12f6   :  { %v3889_v43 = vmul.f32 0.7978846, %v3873_v21  ;;  %v3875_v17 = vadd.f32 %v3859_v15, %v11444_v52  ;;  %v3829_v50 = vmul.f32 %v11461_v11, %v11461_v11  ;;  %v11471_v41 = vadd.f32 %v3800_v5, %v11430_v22  ;;  %v3802_v59 = vpop.f32.mrb[99].mxu1 }
0x12f7   :  { %v3890_v33 = vmul.f32 0.7978846, %v3874_v9  ;;  %v3876_v18 = vadd.f32 %v3860_v62, %v11449_v28  ;;  %v3830_v26 = vmul.f32 %v11465_v56, %v11465_v56  ;;  %v11477_v23 = vadd.f32 %v3802_v59, %v11433_v24 }
0x12f8   :  { %9471 = vtanh.f32 %v3889_v43  ;;  %v3891_v32 = vmul.f32 0.7978846, %v3875_v17  ;;  %v3845_v2 = vmul.f32 %v3829_v50, %v11461_v11  ;;  %v3831_v35 = vmul.f32 %v11471_v41, %v11471_v41 }
0x12f9   :  { %9473 = vtanh.f32 %v3890_v33  ;;  %v3892_v37 = vmul.f32 0.7978846, %v3876_v18  ;;  %v3846_v36 = vmul.f32 %v3830_v26, %v11465_v56  ;;  %v3832_v38 = vmul.f32 %v11477_v23, %v11477_v23 }
0x12fa   :  { %9475 = vtanh.f32 %v3891_v32  ;;  %v3861_v47 = vmul.f32 0.044715, %v3845_v2  ;;  %v3847_v46 = vmul.f32 %v3831_v35, %v11471_v41 }
0x12fb   :  { %9477 = vtanh.f32 %v3892_v37  ;;  %v3862_v40 = vmul.f32 0.044715, %v3846_v36  ;;  %v3848_v3 = vmul.f32 %v3832_v38, %v11477_v23 }
0x12fc   :  { %v3877_v8 = vadd.f32 %v3861_v47, %v11461_v11  ;;  %v3863_v45 = vmul.f32 0.044715, %v3847_v46 }
0x12fd   :  { %v3878_v25 = vadd.f32 %v3862_v40, %v11465_v56  ;;  %v3864_v54 = vmul.f32 0.044715, %v3848_v3 }
0x12fe   :  { %v3893_v61 = vmul.f32 0.7978846, %v3877_v8  ;;  %v3879_v42 = vadd.f32 %v3863_v45, %v11471_v41 }
0x12ff   :  { %v3894_v60 = vmul.f32 0.7978846, %v3878_v25  ;;  %v3880_v31 = vadd.f32 %v3864_v54, %v11477_v23 }
0x1300   :  { %9479 = vtanh.f32 %v3893_v61  ;;  %v3895_v16 = vmul.f32 0.7978846, %v3879_v42 }
0x1301   :  { %9481 = vtanh.f32 %v3894_v60  ;;  %v3896_v34 = vmul.f32 0.7978846, %v3880_v31 }
0x1302   :  { %v9472_v14 = vpop.eup %9471  ;;  %9483 = vtanh.f32 %v3895_v16 }
0x1303   :  { %v9474_v57 = vpop.eup %9473  ;;  %v3921_v20 = vadd.f32 1.0, %v9472_v14  ;;  %9485 = vtanh.f32 %v3896_v34 }
0x1304   :  { %v9476_v48 = vpop.eup %9475  ;;  %v3922_v44 = vadd.f32 1.0, %v9474_v57 }
0x1305   :  { %v9478_v6 = vpop.eup %9477  ;;  %v3937_v27 = vmul.f32 0.5, %v3921_v20  ;;  %v3923_v29 = vadd.f32 1.0, %v9476_v48 }
0x1306   :  { %v3924_v21 = vadd.f32 1.0, %v9478_v6  ;;  %v3938_v15 = vmul.f32 0.5, %v3922_v44 }
0x1307   :  { %v3939_v58 = vmul.f32 0.5, %v3923_v29  ;;  %v3953_v62 = vmul.f32 %v3937_v27, %v11436_v10 }
0x1308   :  { %v3940_v9 = vmul.f32 0.5, %v3924_v21  ;;  %v3954_v17 = vmul.f32 %v3938_v15, %v11439_v55 }
0x1309   :  { %v3955_v5 = vmul.f32 %v3939_v58, %v11444_v52 }
0x130a   :  { %v9480_v43 = vpop.eup %9479  ;;  %v3956_v50 = vmul.f32 %v3940_v9, %v11449_v28 }
0x130b   :  { %v9482_v59 = vpop.eup %9481  ;;  %v3969_v33 = vpack.c.bf16 %v3955_v5, %v3953_v62  ;;  %v3925_v18 = vadd.f32 1.0, %v9480_v43 }
0x130c   :  { %v9484_v26 = vpop.eup %9483  ;;  %v3970_v32 = vpack.c.bf16 %v3956_v50, %v3954_v17  ;;  %v3926_v2 = vadd.f32 1.0, %v9482_v59 }
0x130d   :  { %v9486_v35 = vpop.eup %9485  ;;  %v3927_v37 = vadd.f32 1.0, %v9484_v26  ;;  %v3941_v36 = vmul.f32 0.5, %v3925_v18 }
0x130e   :  { %4144 = vmatprep.mubr.bf16.mxu0 %v3970_v32  ;;  %v3928_v38 = vadd.f32 1.0, %v9486_v35  ;;  %v3942_v47 = vmul.f32 0.5, %v3926_v2 }
0x130f   :  { %4145 = vmatmul.mubr.bf16.vlgmr.msra.gmra.mrb[76].mxu0 %v3969_v33  ;;  %v3943_v10 = vmul.f32 0.5, %v3927_v37  ;;  %v3957_v46 = vmul.f32 %v3941_v36, %v11461_v11 }
0x1310   :  { %v3944_v52 = vmul.f32 0.5, %v3928_v38  ;;  %v3958_v28 = vmul.f32 %v3942_v47, %v11465_v56 }
0x1311   :  { %v3959_v55 = vmul.f32 %v3943_v10, %v11471_v41 }
0x1312   :  { %v3960_v40 = vmul.f32 %v3944_v52, %v11477_v23 }
0x1313   :  { %v3971_v3 = vpack.c.bf16 %v3959_v55, %v3957_v46 }
0x1314   :  { %v3972_v8 = vpack.c.bf16 %v3960_v40, %v3958_v28 }
0x1316   :  { %4152 = vmatprep.mubr.bf16.mxu0 %v3972_v8 }
0x1317   :  { %4153 = vmatmul.mubr.bf16.gmra.mrb[80].mxu0 %v3971_v3 }
0x132a   :  { %v3806_v45 = vpop.f32.mrb[100].mxu1 }
0x132b   :  { %v11500_v25 = vadd.f32 %v3806_v45, %v11430_v22  ;;  %v3808_v54 = vpop.f32.mrb[101].mxu1 }
0x132c   :  { %v11503_v61 = vadd.f32 %v3808_v54, %v11433_v24  ;;  %v3810_v42 = vpop.f32.mrb[102].mxu1 }
0x132d   :  { %v3833_v11 = vmul.f32 %v11500_v25, %v11500_v25  ;;  %v11508_v56 = vadd.f32 %v3810_v42, %v11430_v22  ;;  %v3812_v41 = vpop.f32.mrb[103].mxu1 }
0x132e   :  { %v3834_v23 = vmul.f32 %v11503_v61, %v11503_v61  ;;  %v11513_v60 = vadd.f32 %v3812_v41, %v11433_v24 }
0x132f   :  { %v3849_v31 = vmul.f32 %v3833_v11, %v11500_v25  ;;  %v3835_v16 = vmul.f32 %v11508_v56, %v11508_v56 }
0x1330   :  { %v3850_v34 = vmul.f32 %v3834_v23, %v11503_v61  ;;  %v3836_v14 = vmul.f32 %v11513_v60, %v11513_v60 }
0x1331   :  { %v3865_v57 = vmul.f32 0.044715, %v3849_v31  ;;  %v3851_v20 = vmul.f32 %v3835_v16, %v11508_v56 }
0x1332   :  { %v3866_v48 = vmul.f32 0.044715, %v3850_v34  ;;  %v3852_v44 = vmul.f32 %v3836_v14, %v11513_v60  ;;  %v3816_v6 = vpop.f32.mrb[104].mxu1 }
0x1333   :  { %v3881_v27 = vadd.f32 %v3865_v57, %v11500_v25  ;;  %v3867_v29 = vmul.f32 0.044715, %v3851_v20  ;;  %v11525_v21 = vadd.f32 %v3816_v6, %v11430_v22  ;;  %v3818_v15 = vpop.f32.mrb[105].mxu1 }
0x1334   :  { %v3882_v58 = vadd.f32 %v3866_v48, %v11503_v61  ;;  %v3868_v9 = vmul.f32 0.044715, %v3852_v44  ;;  %v11529_v62 = vadd.f32 %v3818_v15, %v11433_v24  ;;  %v3820_v5 = vpop.f32.mrb[106].mxu1 }
0x1335   :  { %v3897_v43 = vmul.f32 0.7978846, %v3881_v27  ;;  %v3883_v17 = vadd.f32 %v3867_v29, %v11508_v56  ;;  %v3837_v50 = vmul.f32 %v11525_v21, %v11525_v21  ;;  %v11535_v59 = vadd.f32 %v3820_v5, %v11430_v22  ;;  %v3822_v33 = vpop.f32.mrb[107].mxu1 }
0x1336   :  { %v3898_v18 = vmul.f32 0.7978846, %v3882_v58  ;;  %v3884_v26 = vadd.f32 %v3868_v9, %v11513_v60  ;;  %v3838_v32 = vmul.f32 %v11529_v62, %v11529_v62  ;;  %v11541_v2 = vadd.f32 %v3822_v33, %v11433_v24 }
0x1337   :  { %9487 = vtanh.f32 %v3897_v43  ;;  %v3899_v35 = vmul.f32 0.7978846, %v3883_v17  ;;  %v3853_v37 = vmul.f32 %v3837_v50, %v11525_v21  ;;  %v3839_v36 = vmul.f32 %v11535_v59, %v11535_v59 }
0x1338   :  { %9489 = vtanh.f32 %v3898_v18  ;;  %v3900_v22 = vmul.f32 0.7978846, %v3884_v26  ;;  %v3854_v38 = vmul.f32 %v3838_v32, %v11529_v62  ;;  %v3840_v47 = vmul.f32 %v11541_v2, %v11541_v2 }
0x1339   :  { %9491 = vtanh.f32 %v3899_v35  ;;  %v3869_v10 = vmul.f32 0.044715, %v3853_v37  ;;  %v3855_v52 = vmul.f32 %v3839_v36, %v11535_v59 }
0x133a   :  { %9493 = vtanh.f32 %v3900_v22  ;;  %v3870_v24 = vmul.f32 0.044715, %v3854_v38  ;;  %v3856_v46 = vmul.f32 %v3840_v47, %v11541_v2 }
0x133b   :  { %v3885_v55 = vadd.f32 %v3869_v10, %v11525_v21  ;;  %v3871_v28 = vmul.f32 0.044715, %v3855_v52 }
0x133c   :  { %v3886_v40 = vadd.f32 %v3870_v24, %v11529_v62  ;;  %v3872_v3 = vmul.f32 0.044715, %v3856_v46 }
0x133d   :  { %v3901_v8 = vmul.f32 0.7978846, %v3885_v55  ;;  %v3887_v45 = vadd.f32 %v3871_v28, %v11535_v59  ;;  %v7955_v55 = vld [vmem:[#allocation19] ss:$0 sm:$0xff] }
0x133e   :  { %v3902_v54 = vmul.f32 0.7978846, %v3886_v40  ;;  %v3888_v42 = vadd.f32 %v3872_v3, %v11541_v2 }
0x133f   :  { %9495 = vtanh.f32 %v3901_v8  ;;  %v3903_v11 = vmul.f32 0.7978846, %v3887_v45 }
0x1340   :  { %9497 = vtanh.f32 %v3902_v54  ;;  %v3904_v41 = vmul.f32 0.7978846, %v3888_v42 }
0x1341   :  { %v9488_v23 = vpop.eup %9487  ;;  %9499 = vtanh.f32 %v3903_v11 }
0x1342   :  { %v9490_v31 = vpop.eup %9489  ;;  %9501 = vtanh.f32 %v3904_v41  ;;  %v3929_v16 = vadd.f32 1.0, %v9488_v23 }
0x1343   :  { %v9492_v34 = vpop.eup %9491  ;;  %v3930_v14 = vadd.f32 1.0, %v9490_v31 }
0x1344   :  { %v9494_v57 = vpop.eup %9493  ;;  %v3931_v20 = vadd.f32 1.0, %v9492_v34  ;;  %v3945_v48 = vmul.f32 0.5, %v3929_v16 }
0x1345   :  { %v3932_v44 = vadd.f32 1.0, %v9494_v57  ;;  %v3946_v6 = vmul.f32 0.5, %v3930_v14 }
0x1346   :  { %v3947_v27 = vmul.f32 0.5, %v3931_v20  ;;  %v3961_v15 = vmul.f32 %v3945_v48, %v11500_v25 }
0x1347   :  { %v3948_v29 = vmul.f32 0.5, %v3932_v44  ;;  %v3962_v5 = vmul.f32 %v3946_v6, %v11503_v61 }
0x1348   :  { %v3963_v58 = vmul.f32 %v3947_v27, %v11508_v56 }
0x1349   :  { %v9496_v9 = vpop.eup %9495  ;;  %v3964_v43 = vmul.f32 %v3948_v29, %v11513_v60 }
0x134a   :  { %v9498_v17 = vpop.eup %9497  ;;  %v3973_v50 = vpack.c.bf16 %v3963_v58, %v3961_v15  ;;  %v3933_v33 = vadd.f32 1.0, %v9496_v9 }
0x134b   :  { %v9500_v18 = vpop.eup %9499  ;;  %v3974_v26 = vpack.c.bf16 %v3964_v43, %v3962_v5  ;;  %v3934_v32 = vadd.f32 1.0, %v9498_v17 }
0x134c   :  { %v9502_v35 = vpop.eup %9501  ;;  %v3935_v37 = vadd.f32 1.0, %v9500_v18  ;;  %v3949_v36 = vmul.f32 0.5, %v3933_v33 }
0x134d   :  { %4160 = vmatprep.mubr.bf16.mxu0 %v3974_v26  ;;  %v3936_v22 = vadd.f32 1.0, %v9502_v35  ;;  %v3950_v38 = vmul.f32 0.5, %v3934_v32  ;;  %v9229_v26 = vld [vmem:[%s12651_s14 + $0xc4] ss:$12 sps:$4 sm:$0xff]  }
0x134e   :  { %4161 = vmatmul.mubr.bf16.gmra.mrb[84].mxu0 %v3973_v50  ;;  %v3951_v25 = vmul.f32 0.5, %v3935_v37  ;;  %v3965_v47 = vmul.f32 %v3949_v36, %v11525_v21  ;;  %4486 = vmatprep.subr.bf16.mxu1 %v9229_v26 }
0x134f   :  { %v3952_v56 = vmul.f32 0.5, %v3936_v22  ;;  %v3966_v60 = vmul.f32 %v3950_v38, %v11529_v62 }
0x1350   :  { %v3967_v61 = vmul.f32 %v3951_v25, %v11535_v59 }
0x1351   :  { %v3968_v10 = vmul.f32 %v3952_v56, %v11541_v2 }
0x1352   :  { %v3975_v52 = vpack.c.bf16 %v3967_v61, %v3965_v47 }
0x1353   :  { %v3976_v24 = vpack.c.bf16 %v3968_v10, %v3966_v60 }
0x1355   :  { %4168 = vmatprep.mubr.bf16.mxu0 %v3976_v24 }
0x1356   :  { %4169 = vmatmul.mubr.bf16.gmra.mrb[88].mxu0 %v3975_v52 }
0x13e2   :  { %v8327_v46 = vpop.f32.mrb[76].mxu0 }
0x13e3   :  { %v8328_v28 = vpop.f32.mrb[77].mxu0 }
0x13e4   :  { %v8329_v40 = vadd.f32 %v8328_v28, %v8327_v46  ;;  %v8330_v3 = vpop.f32.mrb[78].mxu0  ;;  %v9235_v28 = vld [vmem:[%s12651_s14 + $0xf4] ss:$12 sps:$4 sm:$0xff]  }
0x13e5   :  { %v8331_v8 = vpop.f32.mrb[79].mxu0 }
0x13e6   :  { %v4147_v45 = vadd.f32 %v8329_v40, %v7955_v55  ;;  %v8332_v54 = vadd.f32 %v8331_v8, %v8330_v3  ;;  %v9236_v40 = vld [vmem:[%s12651_s14 + $0xc8] ss:$12 sps:$4 sm:$0xff]   ;;  %v9233_v3 = vld [vmem:[%s12651_s14 + $0xf0] ss:$12 sps:$4 sm:$0xff]   ;;  %v9239_v8 = vld [vmem:[%s12651_s14 + $0x10c] ss:$12 sps:$4 sm:$0xff]  }
0x13e7   :  { %8795 = vmatprep.subr.bf16.mxu0 %v9236_v40 }
0x13e8   :  { %v4150_v42 = vadd.f32 %v8332_v54, %v7955_v55  ;;  %v4177_v21 = vadd.f32 %v4147_v45, %v11344_v19  ;;  %8796 = vmatpush3.bf16.msra.mxu0 %v9236_v40  ;;  %v9240_v45 = vld [vmem:[%s12651_s14 + $0xe0] ss:$12 sps:$4 sm:$0xff]   ;;  %v9237_v54 = vld [vmem:[%s12651_s14 + $0x108] ss:$12 sps:$4 sm:$0xff]  }
0x13e9   :  { %8797 = vmatprep.subr.bf16.mxu0 %v9240_v45 }
0x13ea   :  { %v8333_v59 = vpop.f32.mrb[80].mxu0  ;;  %4187 = vadd.xlane.f32.xlu0 %v4177_v21  ;;  %v4178_v62 = vadd.f32 %v4150_v42, %v11346_v7  ;;  %v9243_v42 = vld [vmem:[%s12651_s14 + $0x124] ss:$12 sps:$4 sm:$0xff]  }
0x13eb   :  { %v8334_v2 = vpop.f32.mrb[81].mxu0 }
0x13ec   :  { %v8335_v11 = vadd.f32 %v8334_v2, %v8333_v59  ;;  %v8336_v41 = vpop.f32.mrb[82].mxu0  ;;  %4189 = vadd.xlane.f32.xlu1 %v4178_v62  ;;  %8798 = vmatpush3.bf16.msra.mxu0 %v9240_v45  ;;  %v9241_v59 = vld [vmem:[%s12651_s14 + $0x120] ss:$12 sps:$4 sm:$0xff]   ;;  %v9248_v2 = vld [vmem:[%s12651_s14 + $0x110] ss:$12 sps:$4 sm:$0xff]  }
0x13ed   :  { %v8337_v23 = vpop.f32.mrb[83].mxu0 }
0x13ee   :  { %v4155_v31 = vadd.f32 %v8335_v11, %v7955_v55  ;;  %v8338_v16 = vadd.f32 %v8337_v23, %v8336_v41  ;;  %v9245_v11 = vld [vmem:[%s12651_s14 + $0x138] ss:$12 sps:$4 sm:$0xff]   ;;  %v9251_v41 = vld [vmem:[%s12651_s14 + $0x154] ss:$12 sps:$4 sm:$0xff]  }
0x13ef   :  { %v9252_v23 = vld [vmem:[%s12651_s14 + $0x128] ss:$12 sps:$4 sm:$0xff]  }
0x13f0   :  { %v4158_v34 = vadd.f32 %v8338_v16, %v7955_v55  ;;  %v4179_v14 = vadd.f32 %v4155_v31, %v11355_v0  ;;  %v9249_v31 = vld [vmem:[%s12651_s14 + $0x150] ss:$12 sps:$4 sm:$0xff]   ;;  %v9253_v16 = vld [vmem:[%s12651_s14 + $0x168] ss:$12 sps:$4 sm:$0xff]  }
0x13f2   :  { %4191 = vadd.xlane.f32.xlu0 %v4179_v14  ;;  %v4180_v57 = vadd.f32 %v4158_v34, %v11353_v30  ;;  %v9255_v34 = vld [vmem:[%s12651_s14 + $0x16c] ss:$12 sps:$4 sm:$0xff]  }
0x13f4   :  { %4193 = vadd.xlane.f32.xlu1 %v4180_v57 }
0x1421   :  { %v8339_v20 = vpop.f32.mrb[84].mxu0 }
0x1422   :  { %v8340_v19 = vpop.f32.mrb[85].mxu0 }
0x1423   :  { %v8341_v48 = vadd.f32 %v8340_v19, %v8339_v20  ;;  %v8342_v44 = vpop.f32.mrb[86].mxu0  ;;  %v9258_v20 = vld [vmem:[%s12651_s14 + $0x170] ss:$12 sps:$4 sm:$0xff]  }
0x1424   :  { %v8343_v6 = vpop.f32.mrb[87].mxu0 }
0x1425   :  { %v4163_v7 = vadd.f32 %v8341_v48, %v7955_v55  ;;  %v8344_v27 = vadd.f32 %v8343_v6, %v8342_v44 }
0x1427   :  { %v4166_v29 = vadd.f32 %v8344_v27, %v7955_v55  ;;  %v11568_v15 = vadd.f32 %v4163_v7, %v11362_v4 }
0x1429   :  { %v8345_v58 = vpop.f32.mrb[88].mxu0  ;;  %4195 = vadd.xlane.f32.xlu0 %v11568_v15  ;;  %v11572_v0 = vadd.f32 %v4166_v29, %v11364_v39  ;;  %v9227_v39 = vld [vmem:[%s12651_s14 + $0xc0] ss:$12 sps:$4 sm:$0xff]  }
0x142a   :  { %v8346_v9 = vpop.f32.mrb[89].mxu0  ;;  %4487 = vmatpush1.bf16.msra.mxu1 %v9227_v39 }
0x142b   :  { %v8347_v30 = vadd.f32 %v8346_v9, %v8345_v58  ;;  %v8348_v5 = vpop.f32.mrb[90].mxu0  ;;  %4197 = vadd.xlane.f32.xlu1 %v11572_v0 }
0x142c   :  { %v8349_v43 = vpop.f32.mrb[91].mxu0 }
0x142d   :  { %v4171_v17 = vadd.f32 %v8347_v30, %v7955_v55  ;;  %v8350_v50 = vadd.f32 %v8349_v43, %v8348_v5 }
0x142f   :  { %v4174_v33 = vadd.f32 %v8350_v50, %v7955_v55  ;;  %v11576_v18 = vadd.f32 %v4171_v17, %v11373_v13  ;;  %v9232_v13 = vld [vmem:[%s12651_s14 + $0xdc] ss:$12 sps:$4 sm:$0xff]  }
0x1430   :  { %4488 = vmatprep.subr.bf16.mxu1 %v9232_v13 }
0x1431   :  { %4199 = vadd.xlane.f32.xlu0 %v11576_v18  ;;  %v11580_v4 = vadd.f32 %v4174_v33, %v11371_v53  ;;  %v9230_v53 = vld [vmem:[%s12651_s14 + $0xd8] ss:$12 sps:$4 sm:$0xff]  }
0x1432   :  { %4489 = vmatpush1.bf16.msra.mxu1 %v9230_v53 }
0x1433   :  { %4201 = vadd.xlane.f32.xlu1 %v11580_v4  ;;  %4490 = vmatprep.subr.bf16.mxu1 %v9235_v28 }
0x1436   :  { %4491 = vmatpush1.bf16.msra.mxu1 %v9233_v3 }
0x1437   :  { %4492 = vmatprep.subr.bf16.mxu1 %v9239_v8 }
0x143a   :  { %4493 = vmatpush1.bf16.msra.mxu1 %v9237_v54 }
0x143b   :  { %4494 = vmatprep.subr.bf16.mxu1 %v9243_v42 }
0x143e   :  { %4495 = vmatpush1.bf16.msra.mxu1 %v9241_v59 }
0x1477   :  { %v4188_v32 = vpop.xlane.xlu0 %4187 }
0x1478   :  { %v4203_v35 = vmul.f32 0.0078125, %v4188_v32 }
0x1479   :  { %v4190_v37 = vpop.xlane.xlu1 %4189 }
0x147a   :  { %v11595_v36 = vsub.f32 %v4177_v21, %v4203_v35  ;;  %v4204_v22 = vmul.f32 0.0078125, %v4190_v37  ;;  %v9244_v21 = vld [vmem:[%s12651_s14 + $0xf8] ss:$12 sps:$4 sm:$0xff]  }
0x147b   :  { %8799 = vmatprep.subr.bf16.mxu0 %v9244_v21 }
0x147c   :  { %v11597_v38 = vsub.f32 %v4178_v62, %v4204_v22  ;;  %v4219_v25 = vmul.f32 %v11595_v36, %v11595_v36  ;;  %8800 = vmatpush3.bf16.msra.mxu0 %v9244_v21  ;;  %v9247_v62 = vld [vmem:[%s12651_s14 + $0x13c] ss:$12 sps:$4 sm:$0xff]  }
0x147d   :  { %4496 = vmatprep.subr.bf16.mxu1 %v9247_v62  ;;  %8801 = vmatprep.subr.bf16.mxu0 %v9248_v2 }
0x147e   :  { %4227 = vadd.xlane.f32.xlu0 %v4219_v25  ;;  %v4220_v56 = vmul.f32 %v11597_v38, %v11597_v38  ;;  %4497 = vmatpush1.bf16.msra.mxu1 %v9245_v11 }
0x147f   :  { %v4192_v47 = vpop.xlane.xlu0 %4191  ;;  %4498 = vmatprep.subr.bf16.mxu1 %v9251_v41 }
0x1480   :  { %v4205_v61 = vmul.f32 0.0078125, %v4192_v47  ;;  %4229 = vadd.xlane.f32.xlu1 %v4220_v56  ;;  %8802 = vmatpush3.bf16.msra.mxu0 %v9248_v2  ;;  %v7972_v47 = vld [vmem:[#allocation20] ss:$0 sm:$0xff] }
0x1481   :  { %v4194_v60 = vpop.xlane.xlu1 %4193  ;;  %8803 = vmatprep.subr.bf16.mxu0 %v9252_v23 }
0x1482   :  { %v11603_v10 = vsub.f32 %v4179_v14, %v4205_v61  ;;  %v4206_v52 = vmul.f32 0.0078125, %v4194_v60  ;;  %4499 = vmatpush1.bf16.msra.mxu1 %v9249_v31  ;;  %v9256_v14 = vld [vmem:[%s12651_s14 + $0x140] ss:$12 sps:$4 sm:$0xff]  }
0x1483   :  { %4500 = vmatprep.subr.bf16.mxu1 %v9255_v34 }
0x1484   :  { %v11605_v24 = vsub.f32 %v4180_v57, %v4206_v52  ;;  %v4221_v46 = vmul.f32 %v11603_v10, %v11603_v10  ;;  %8804 = vmatpush3.bf16.msra.mxu0 %v9252_v23  ;;  %v9257_v57 = vld [vmem:[%s12651_s14 + $0x158] ss:$12 sps:$4 sm:$0xff]  }
0x1485   :  { %8805 = vmatprep.subr.bf16.mxu0 %v9256_v14 }
0x1486   :  { %4231 = vadd.xlane.f32.xlu0 %v4221_v46  ;;  %v4222_v55 = vmul.f32 %v11605_v24, %v11605_v24  ;;  %4501 = vmatpush1.bf16.msra.mxu1 %v9253_v16 }
0x1487   :  { %8831 = vmatprep.subr.bf16.mxu1 %v10057_v1 }
0x1488   :  { %4233 = vadd.xlane.f32.xlu1 %v4222_v55  ;;  %8806 = vmatpush3.bf16.msra.mxu0 %v9256_v14  ;;  %v7973_v55 = vld [vmem:[#allocation22] ss:$0 sm:$0xff] }
0x1489   :  { %8807 = vmatprep.subr.bf16.mxu0 %v9257_v57 }
0x148c   :  { %8808 = vmatpush3.bf16.msra.mxu0 %v9257_v57 }
0x148d   :  { %8809 = vmatprep.subr.bf16.mxu0 %v9258_v20 }
0x1490   :  { %8810 = vmatpush3.bf16.msra.mxu0 %v9258_v20 }
0x1491   :  { %8819 = vmatprep.subr.bf16.mxu0 %v10057_v1 }
0x14b6   :  { %v4196_v19 = vpop.xlane.xlu0 %4195 }
0x14b7   :  { %v4207_v48 = vmul.f32 0.0078125, %v4196_v19 }
0x14b8   :  { %v4198_v44 = vpop.xlane.xlu1 %4197 }
0x14b9   :  { %v11674_v6 = vsub.f32 %v11568_v15, %v4207_v48  ;;  %v4208_v7 = vmul.f32 0.0078125, %v4198_v44 }
0x14bb   :  { %v11677_v27 = vsub.f32 %v11572_v0, %v4208_v7  ;;  %v4223_v29 = vmul.f32 %v11674_v6, %v11674_v6 }
0x14bd   :  { %4235 = vadd.xlane.f32.xlu0 %v4223_v29  ;;  %v4224_v58 = vmul.f32 %v11677_v27, %v11677_v27 }
0x14be   :  { %v4200_v9 = vpop.xlane.xlu0 %4199 }
0x14bf   :  { %v4209_v30 = vmul.f32 0.0078125, %v4200_v9  ;;  %4237 = vadd.xlane.f32.xlu1 %v4224_v58 }
0x14c0   :  { %v4202_v5 = vpop.xlane.xlu1 %4201 }
0x14c1   :  { %v11684_v43 = vsub.f32 %v11576_v18, %v4209_v30  ;;  %v4210_v15 = vmul.f32 0.0078125, %v4202_v5 }
0x14c3   :  { %v11687_v17 = vsub.f32 %v11580_v4, %v4210_v15  ;;  %v4225_v0 = vmul.f32 %v11684_v43, %v11684_v43 }
0x14c5   :  { %4239 = vadd.xlane.f32.xlu0 %v4225_v0  ;;  %v4226_v50 = vmul.f32 %v11687_v17, %v11687_v17 }
0x14c7   :  { %4241 = vadd.xlane.f32.xlu1 %v4226_v50 }
0x150b   :  { %v4228_v33 = vpop.xlane.xlu0 %4227 }
0x150c   :  { %v4243_v39 = vmul.f32 0.0078125, %v4228_v33 }
0x150d   :  { %v4230_v26 = vpop.xlane.xlu1 %4229 }
0x150e   :  { %v4251_v13 = vadd.f32 1e-12, %v4243_v39  ;;  %v4244_v53 = vmul.f32 0.0078125, %v4230_v26 }
0x1510   :  { %9503 = vrsqrt.f32 %v4251_v13  ;;  %v4252_v18 = vadd.f32 1e-12, %v4244_v53 }
0x1512   :  { %9505 = vrsqrt.f32 %v4252_v18 }
0x1513   :  { %v4232_v32 = vpop.xlane.xlu0 %4231 }
0x1514   :  { %v4245_v35 = vmul.f32 0.0078125, %v4232_v32 }
0x1515   :  { %v4234_v4 = vpop.xlane.xlu1 %4233 }
0x1516   :  { %v4253_v37 = vadd.f32 1e-12, %v4245_v35  ;;  %v4246_v22 = vmul.f32 0.0078125, %v4234_v4 }
0x1518   :  { %9507 = vrsqrt.f32 %v4253_v37  ;;  %v4254_v25 = vadd.f32 1e-12, %v4246_v22 }
0x151a   :  { %v9504_v56 = vpop.eup %9503  ;;  %9509 = vrsqrt.f32 %v4254_v25 }
0x151b   :  { %v4267_v61 = vmul.f32 %v9504_v56, %v11595_v36 }
0x151c   :  { %v9506_v60 = vpop.eup %9505 }
0x151d   :  { %v4281_v52 = vmul.f32 %v7972_v47, %v4267_v61  ;;  %v4268_v46 = vmul.f32 %v9506_v60, %v11597_v38 }
0x151f   :  { %v4282_v28 = vmul.f32 %v7972_v47, %v4268_v46  ;;  %v11695_v40 = vadd.f32 %v7973_v55, %v4281_v52  ;;  %v12713_v52 = vsub.s32 2, %v10592_v49 }
0x1521   :  { %v11697_v3 = vadd.f32 %v7973_v55, %v4282_v28 }
0x1522   :  { %v9508_v8 = vpop.eup %9507 }
0x1523   :  { %v4303_v45 = vpack.c.bf16 %v11697_v3, %v11695_v40  ;;  %v4269_v54 = vmul.f32 %v9508_v8, %v11603_v10 }
0x1524   :  { %v9510_v42 = vpop.eup %9509 }
0x1525   :  { %4519 = vmatmul.mubr.bf16.vlgmr.msra.gmra.mrb[108].mxu1 %v4303_v45  ;;  %8811 = vmatprep.mubr.bf16.mxu0 %v4303_v45  ;;  %v4270_v36 = vmul.f32 %v9510_v42, %v11605_v24  ;;  %v4283_v21 = vmul.f32 %v7972_v47, %v4269_v54 }
0x1526   :  { %4528 = vmatprep.mubr.bf16.mxu1 %v12712_v63 }
0x1527   :  { %v4284_v38 = vmul.f32 %v7972_v47, %v4270_v36  ;;  %v11704_v59 = vadd.f32 %v7973_v55, %v4283_v21 }
0x1529   :  { %v11706_v62 = vadd.f32 %v7973_v55, %v4284_v38 }
0x152b   :  { %v4304_v2 = vpack.c.bf16 %v11706_v62, %v11704_v59 }
0x152d   :  { %4529 = vmatmul.mubr.bf16.gmra.mrb[112].mxu1 %v4304_v2  ;;  %8812 = vmatmul.mubr.bf16.vlgmr.msra.gmra.mrb[92].mxu0 %v4304_v2 }
0x152e   :  { %4538 = vmatprep.mubr.bf16.mxu1 %v12712_v63 }
0x154a   :  { %v4236_v10 = vpop.xlane.xlu0 %4235 }
0x154b   :  { %v4247_v11 = vmul.f32 0.0078125, %v4236_v10 }
0x154c   :  { %v4238_v41 = vpop.xlane.xlu1 %4237 }
0x154d   :  { %v4255_v23 = vadd.f32 1e-12, %v4247_v11  ;;  %v4248_v24 = vmul.f32 0.0078125, %v4238_v41 }
0x154f   :  { %9511 = vrsqrt.f32 %v4255_v23  ;;  %v4256_v31 = vadd.f32 1e-12, %v4248_v24 }
0x1551   :  { %9513 = vrsqrt.f32 %v4256_v31 }
0x1552   :  { %v4240_v16 = vpop.xlane.xlu0 %4239 }
0x1553   :  { %v4249_v34 = vmul.f32 0.0078125, %v4240_v16 }
0x1554   :  { %v4242_v14 = vpop.xlane.xlu1 %4241 }
0x1555   :  { %v4257_v57 = vadd.f32 1e-12, %v4249_v34  ;;  %v4250_v20 = vmul.f32 0.0078125, %v4242_v14 }
0x1557   :  { %9515 = vrsqrt.f32 %v4257_v57  ;;  %v4258_v19 = vadd.f32 1e-12, %v4250_v20 }
0x1559   :  { %v9512_v48 = vpop.eup %9511  ;;  %9517 = vrsqrt.f32 %v4258_v19 }
0x155a   :  { %v4271_v44 = vmul.f32 %v9512_v48, %v11674_v6 }
0x155b   :  { %v9514_v7 = vpop.eup %9513 }
0x155c   :  { %v4272_v29 = vmul.f32 %v9514_v7, %v11677_v27  ;;  %v4285_v58 = vmul.f32 %v7972_v47, %v4271_v44 }
0x155e   :  { %v4286_v9 = vmul.f32 %v7972_v47, %v4272_v29  ;;  %v11713_v30 = vadd.f32 %v7973_v55, %v4285_v58 }
0x1560   :  { %v11715_v5 = vadd.f32 %v7973_v55, %v4286_v9 }
0x1561   :  { %v9516_v15 = vpop.eup %9515 }
0x1562   :  { %v4305_v0 = vpack.c.bf16 %v11715_v5, %v11713_v30  ;;  %v4273_v50 = vmul.f32 %v9516_v15, %v11684_v43  ;;  %v8006_v43 = vld [vmem:[%s12652_s15 + $0x3] sm:$0x7] }
0x1563   :  { %v9518_v33 = vpop.eup %9517  ;;  %v11739_v32 = vrot.slane %v8006_v43, %v10650_v51  ;;  %v4354_v46 = vrot.slane %v8006_v43, %v12713_v52 }
0x1564   :  { %4539 = vmatmul.mubr.bf16.gmra.mrb[116].mxu1 %v4305_v0  ;;  %8815 = vmatprep.mubr.bf16.mxu0 %v4305_v0  ;;  %v4274_v6 = vmul.f32 %v9518_v33, %v11687_v17  ;;  %v4287_v39 = vmul.f32 %v7972_v47, %v4273_v50  ;;  %v11736_v17 = vrot.slane %v8006_v43, %v10606_v12 }
0x1565   :  { %4548 = vmatprep.mubr.bf16.mxu1 %v12712_v63 }
0x1566   :  { %v4288_v27 = vmul.f32 %v7972_v47, %v4274_v6  ;;  %v11722_v26 = vadd.f32 %v7973_v55, %v4287_v39 }
0x1568   :  { %v11724_v13 = vadd.f32 %v7973_v55, %v4288_v27 }
0x156a   :  { %v4306_v53 = vpack.c.bf16 %v11724_v13, %v11722_v26 }
0x156c   :  { %4549 = vmatmul.mubr.bf16.gmra.mrb[120].mxu1 %v4306_v53  ;;  %8816 = vmatmul.mubr.bf16.gmra.mrb[96].mxu0 %v4306_v53 }
0x156d   :  { %8821 = vmatprep.mubr.msk.bf16.mxu0 %vm10058_vm0, %v10057_v1  ;;  %8833 = vmatprep.mubr.msk.bf16.mxu1 %vm10058_vm0, %v10057_v1 }
0x15f8   :  { %v4520_v18 = vpop.f32.mrb[108].mxu1 }
0x15f9   :  { %v4522_v35 = vpop.f32.mrb[109].mxu1  ;;  %v4521_v37 = vadd.f32 %v4520_v18, %v11736_v17 }
0x15fa   :  { %v4524_v4 = vpop.f32.mrb[110].mxu1  ;;  %v4523_v56 = vadd.f32 %v4522_v35, %v11739_v32 }
0x15fb   :  { %v4525_v22 = vadd.f32 %v4524_v4, %v11736_v17  ;;  %v4526_v25 = vpop.f32.mrb[111].mxu1 }
0x15fc   :  { %v4527_v47 = vadd.f32 %v4526_v25, %v11739_v32 }
0x15fd   :  { %v11745_v61 = vpack.c.bf16 %v4525_v22, %v4521_v37 }
0x15fe   :  { %v11747_v60 = vpack.c.bf16 %v4527_v47, %v4523_v56 }
0x1600   :  { %v4530_v55 = vpop.f32.mrb[112].mxu1  ;;  %v8813_v28 = vpop.f32.mrb[92].mxu0  ;;  %v4657_v8 = vsel %vm1101_vm3, %v11747_v60, 0 }
0x1601   :  { %v4532_v45 = vpop.f32.mrb[113].mxu1  ;;  %v4593_v54 = vpop.f32.mrb[93].mxu0  ;;  %8820 = vmatpush3.bf16.xpose.msra.mxu0 %v4657_v8  ;;  %v4531_v21 = vadd.f32 %v4530_v55, %v11736_v17  ;;  %v4602_v38 = vadd.f32 %v8813_v28, %v4354_v46 }
0x1602   :  { %v4534_v42 = vpop.f32.mrb[114].mxu1  ;;  %v8814_v36 = vpop.f32.mrb[94].mxu0  ;;  %8825 = vmatprep.subr.bf16.mxu0 %v10057_v1  ;;  %v4533_v41 = vadd.f32 %v4532_v45, %v11739_v32  ;;  %v4594_v23 = vadd.f32 %v4593_v54, %v4354_v46 }
0x1603   :  { %v4535_v2 = vadd.f32 %v4534_v42, %v11736_v17  ;;  %v4605_v10 = vadd.f32 %v8814_v36, %v4354_v46  ;;  %v4536_v49 = vpop.f32.mrb[115].mxu1  ;;  %v4596_v11 = vpop.f32.mrb[95].mxu0 }
0x1604   :  { %v4537_v24 = vadd.f32 %v4536_v49, %v11739_v32  ;;  %v4597_v31 = vadd.f32 %v4596_v11, %v4354_v46  ;;  %v11822_v11 = vld [vmem:[%s12650_s13 + $0x1] ss:$0 sm:$0xff] }
0x1605   :  { %v11758_v16 = vpack.c.bf16 %v4535_v2, %v4531_v21  ;;  %v11760_v34 = vpack.c.bf16 %v4605_v10, %v4602_v38 }
0x1606   :  { %v11762_v14 = vpack.c.bf16 %v4537_v24, %v4533_v41  ;;  %v11764_v57 = vpack.c.bf16 %v4597_v31, %v4594_v23 }
0x1608   :  { %8822 = vmatmul.mubr.msk.bf16.vlgmr.msra.gmra.mrb[100].mxu0 %vm1101_vm3, %v11745_v61  ;;  %v4704_v20 = vsel %vm1101_vm3, %v11762_v14, 0 }
0x1609   :  { %8826 = vmatpush3.bf16.xpose.msra.mxu0 %v4704_v20  ;;  %8827 = vmatprep.mubr.msk.bf16.mxu0 %vm10058_vm0, %v10057_v1 }
0x160a   :  { %8837 = vmatprep.subr.bf16.mxu0 %v10057_v1 }
0x1610   :  { %8828 = vmatmul.mubr.msk.bf16.vlgmr.msra.gmra.mrb[104].mxu0 %vm1101_vm3, %v11758_v16 }
0x1611   :  { %8839 = vmatprep.mubr.msk.bf16.mxu0 %vm10058_vm0, %v10057_v1 }
0x1637   :  { %v4540_v19 = vpop.f32.mrb[116].mxu1 }
0x1638   :  { %v4542_v48 = vpop.f32.mrb[117].mxu1  ;;  %v4541_v7 = vadd.f32 %v4540_v19, %v11736_v17 }
0x1639   :  { %v4544_v44 = vpop.f32.mrb[118].mxu1  ;;  %v4543_v9 = vadd.f32 %v4542_v48, %v11739_v32 }
0x163a   :  { %v4545_v29 = vadd.f32 %v4544_v44, %v11736_v17  ;;  %v4546_v58 = vpop.f32.mrb[119].mxu1 }
0x163b   :  { %v4547_v15 = vadd.f32 %v4546_v58, %v11739_v32 }
0x163c   :  { %v11781_v0 = vpack.c.bf16 %v4545_v29, %v4541_v7 }
0x163d   :  { %v11783_v50 = vpack.c.bf16 %v4547_v15, %v4543_v9 }
0x163f   :  { %v4550_v33 = vpop.f32.mrb[120].mxu1  ;;  %v8817_v6 = vpop.f32.mrb[96].mxu0  ;;  %v4751_v39 = vsel %vm1101_vm3, %v11783_v50, 0 }
0x1640   :  { %v4552_v27 = vpop.f32.mrb[121].mxu1  ;;  %v4609_v53 = vpop.f32.mrb[97].mxu0  ;;  %8832 = vmatpush3.bf16.xpose.msra.mxu1 %v4751_v39  ;;  %v4551_v35 = vadd.f32 %v4550_v33, %v11736_v17  ;;  %v4618_v4 = vadd.f32 %v8817_v6, %v4354_v46  ;;  %v11831_v6 = vld [vmem:[%s12650_s13 + $0x3] ss:$0 sm:$0xff] }
0x1641   :  { %v4554_v43 = vpop.f32.mrb[122].mxu1  ;;  %v8818_v18 = vpop.f32.mrb[98].mxu0  ;;  %8843 = vmatprep.subr.bf16.mxu1 %v10057_v1  ;;  %v4553_v47 = vadd.f32 %v4552_v27, %v11739_v32  ;;  %v4610_v52 = vadd.f32 %v4609_v53, %v4354_v46 }
0x1642   :  { %v4555_v37 = vadd.f32 %v4554_v43, %v11736_v17  ;;  %v4621_v22 = vadd.f32 %v8818_v18, %v4354_v46  ;;  %v4556_v25 = vpop.f32.mrb[123].mxu1  ;;  %v4612_v56 = vpop.f32.mrb[99].mxu0 }
0x1643   :  { %v4557_v55 = vadd.f32 %v4556_v25, %v11739_v32  ;;  %v4613_v28 = vadd.f32 %v4612_v56, %v4354_v46 }
0x1644   :  { %v11792_v8 = vpack.c.bf16 %v4555_v37, %v4551_v35  ;;  %v11794_v45 = vpack.c.bf16 %v4621_v22, %v4618_v4 }
0x1645   :  { %v11796_v54 = vpack.c.bf16 %v4557_v55, %v4553_v47  ;;  %v11798_v42 = vpack.c.bf16 %v4613_v28, %v4610_v52 }
0x1647   :  { %8834 = vmatmul.mubr.msk.bf16.vlgmr.msra.gmra.mrb[124].mxu1 %vm1101_vm3, %v11781_v0  ;;  %v4798_v17 = vsel %vm1101_vm3, %v11796_v54, 0 }
0x1648   :  { %8838 = vmatpush3.bf16.xpose.msra.mxu0 %v4798_v17  ;;  %8844 = vmatpush3.bf16.msra.mxu1 %v11764_v57 }
0x1649   :  { %8849 = vmatprep.subr.bf16.mxu0 %v10057_v1  ;;  %8845 = vmatprep.mubr.msk.bf16.mxu1 %vm10058_vm0, %v10057_v1 }
0x164a   :  { %8855 = vmatprep.subr.bf16.mxu1 %v10057_v1 }
0x164f   :  { %8840 = vmatmul.mubr.msk.bf16.vlgmr.msra.gmra.mrb[108].mxu0 %vm1101_vm3, %v11792_v8 }
0x1650   :  { %8850 = vmatpush3.bf16.msra.mxu0 %v11760_v34  ;;  %8851 = vmatprep.mubr.msk.bf16.mxu0 %vm10058_vm0, %v10057_v1 }
0x1651   :  { %8861 = vmatprep.subr.bf16.mxu0 %v10057_v1 }
0x16db   :  { %v11815_v32 = vpop.f32.mrb[100].mxu0 }
0x16dc   :  { %v8823_v46 = vpop.f32.mrb[101].mxu0 }
0x16dd   :  { %v11817_v36 = vpop.f32.mrb[102].mxu0 }
0x16de   :  { %v8824_v21 = vpop.f32.mrb[103].mxu0 }
0x16e3   :  { %v4740_v38 = vpop.f32.mrb[104].mxu0 }
0x16e4   :  { %v4843_v2 = vmul.f32 0.17677669, %v4740_v38  ;;  %v8829_v10 = vpop.f32.mrb[105].mxu0 }
0x16e5   :  { %v4743_v49 = vpop.f32.mrb[106].mxu0 }
0x16e6   :  { %v4851_v41 = vadd.f32 %v11822_v11, %v4843_v2  ;;  %v4844_v23 = vmul.f32 0.17677669, %v4743_v49  ;;  %v8830_v24 = vpop.f32.mrb[107].mxu0 }
0x16e8   :  { %v4852_v31 = vadd.f32 %v11822_v11, %v4844_v23  ;;  %v4863_v20 = vsel %vm1330_vm4, %v4851_v41, -inf }
0x16e9   :  { %4864 = vmax.xlane.f32.xlu0 %v4863_v20  ;;  %v4841_v20 = vmul.f32 0.17677669, %v11815_v32  ;;  %v4842_v32 = vmul.f32 0.17677669, %v11817_v36 }
0x16ea   :  { %v4866_v19 = vsel %vm1330_vm4, %v4852_v31, -inf }
0x16eb   :  { %4867 = vmax.xlane.f32.xlu1 %v4866_v19  ;;  %v11853_v19 = vld [vmem:[%s12650_s13] ss:$0 sm:$0xff] }
0x171a   :  { %v4787_v48 = vpop.f32.mrb[124].mxu1 }
0x171b   :  { %v8835_v44 = vpop.f32.mrb[125].mxu1 }
0x171c   :  { %v4790_v7 = vpop.f32.mrb[126].mxu1  ;;  %v4849_v44 = vadd.f32 %v11853_v19, %v4841_v20 }
0x171d   :  { %v8836_v29 = vpop.f32.mrb[127].mxu1 }
0x171e   :  { %v4845_v29 = vmul.f32 0.17677669, %v4787_v48  ;;  %v4850_v48 = vadd.f32 %v11853_v19, %v4842_v32 }
0x1722   :  { %v4834_v58 = vpop.f32.mrb[108].mxu0 }
0x1723   :  { %v4847_v9 = vmul.f32 0.17677669, %v4834_v58  ;;  %v8841_v15 = vpop.f32.mrb[109].mxu0  ;;  %v11859_v58 = vld [vmem:[%s12650_s13 + $0x2] ss:$0 sm:$0xff] }
0x1724   :  { %v4837_v33 = vpop.f32.mrb[110].mxu0  ;;  %v4846_v15 = vmul.f32 0.17677669, %v4790_v7 }
0x1725   :  { %v4855_v39 = vadd.f32 %v11831_v6, %v4847_v9  ;;  %v4848_v27 = vmul.f32 0.17677669, %v4837_v33  ;;  %v8842_v53 = vpop.f32.mrb[111].mxu0  ;;  %v4853_v9 = vadd.f32 %v11859_v58, %v4845_v29  ;;  %v4857_v33 = vsel %vm1330_vm4, %v4849_v44, -inf }
0x1727   :  { %v4856_v43 = vadd.f32 %v11831_v6, %v4848_v27  ;;  %v4875_v18 = vsel %vm1330_vm4, %v4855_v39, -inf  ;;  %v4869_v27 = vsel %vm1330_vm4, %v4853_v9, -inf }
0x1728   :  { %4876 = vmax.xlane.f32.xlu0 %v4875_v18 }
0x1729   :  { %v4878_v35 = vsel %vm1330_vm4, %v4856_v43, -inf }
0x172a   :  { %4879 = vmax.xlane.f32.xlu1 %v4878_v35 }
0x1776   :  { %v4865_v4 = vpop.xlane.xlu0 %4864 }
0x1777   :  { %v4883_v37 = vsub.f32 %v4851_v41, %v4865_v4 }
0x1778   :  { %v4868_v22 = vpop.xlane.xlu1 %4867 }
0x1779   :  { %v4893_v25 = vmul.f32 1.442695, %v4883_v37  ;;  %v4884_v56 = vsub.f32 %v4852_v31, %v4868_v22 }
0x177b   :  { %9519 = vpow2.f32 %v4893_v25  ;;  %v4895_v47 = vmul.f32 1.442695, %v4884_v56 }
0x177d   :  { %9521 = vpow2.f32 %v4895_v47 }
0x1785   :  { %v9520_v52 = vpop.eup %9519 }
0x1786   :  { %v4911_v55 = vsel %vm1330_vm4, %v9520_v52, 0.0 }
0x1787   :  { %v9522_v28 = vpop.eup %9521  ;;  %4912 = vadd.xlane.f32.xlu0 %v4911_v55 }
0x1788   :  { %v4914_v17 = vsel %vm1330_vm4, %v9522_v28, 0.0 }
0x1789   :  { %4915 = vadd.xlane.f32.xlu1 %v4914_v17 }
0x17b5   :  { %v4877_v46 = vpop.xlane.xlu0 %4876 }
0x17b6   :  { %v4887_v21 = vsub.f32 %v4855_v39, %v4877_v46  ;;  %v4854_v39 = vadd.f32 %v11859_v58, %v4846_v15 }
0x17b7   :  { %v4880_v38 = vpop.xlane.xlu1 %4879 }
0x17b8   :  { %v4901_v2 = vmul.f32 1.442695, %v4887_v21  ;;  %v4888_v10 = vsub.f32 %v4856_v43, %v4880_v38  ;;  %v4872_v53 = vsel %vm1330_vm4, %v4854_v39, -inf  ;;  %v4860_v43 = vsel %vm1330_vm4, %v4850_v48, -inf }
0x17ba   :  { %9523 = vpow2.f32 %v4901_v2  ;;  %v4903_v49 = vmul.f32 1.442695, %v4888_v10 }
0x17bc   :  { %9525 = vpow2.f32 %v4903_v49 }
0x17c4   :  { %v9524_v41 = vpop.eup %9523 }
0x17c5   :  { %v4923_v23 = vsel %vm1330_vm4, %v9524_v41, 0.0 }
0x17c6   :  { %v9526_v24 = vpop.eup %9525  ;;  %4924 = vadd.xlane.f32.xlu0 %v4923_v23 }
0x17c7   :  { %v4926_v31 = vsel %vm1330_vm4, %v9526_v24, 0.0 }
0x17c8   :  { %4927 = vadd.xlane.f32.xlu1 %v4926_v31 }
0x17d9   :  { %5183 = vrot.lane.b32.xlu1 %v11758_v16, %s10061_s1 }
0x17dc   :  { %5186 = vrot.lane.b32.xlu0 %v11762_v14, %s10061_s1 }
0x17dd   :  { %5292 = vrot.lane.b32.xlu1 %v11796_v54, %s10061_s1 }
0x17e1   :  { %5289 = vrot.lane.b32.xlu1 %v11792_v8, %s10061_s1 }
0x17fb   :  { %4858 = vmax.xlane.f32.xlu0 %v4857_v33 }
0x17ff   :  { %4870 = vmax.xlane.f32.xlu0 %v4869_v27 }
0x1803   :  { %4873 = vmax.xlane.f32.xlu0 %v4872_v53 }
0x1805   :  { %4861 = vmax.xlane.f32.xlu1 %v4860_v43 }
0x1814   :  { %v4913_v18 = vpop.xlane.xlu0 %4912 }
0x1815   :  { %9527 = vrcp.f32 %v4913_v18 }
0x1816   :  { %v4916_v7 = vpop.xlane.xlu1 %4915 }
0x1817   :  { %9529 = vrcp.f32 %v4916_v7 }
0x181f   :  { %v9528_v35 = vpop.eup %9527 }
0x1820   :  { %v4939_v36 = vmul.f32 %v9528_v35, %v9520_v52 }
0x1821   :  { %v9530_v4 = vpop.eup %9529 }
0x1822   :  { %v4940_v37 = vmul.f32 %v9530_v4, %v9522_v28 }
0x1824   :  { %v4946_v22 = vpack.c.bf16 %v4940_v37, %v4939_v36 }
0x1826   :  { %8852 = vmatmul.mubr.msk.bf16.vlgmr.msra.gmra.mrb[112].mxu0 %vm1330_vm4, %v4946_v22 }
0x1827   :  { %8862 = vmatpush3.bf16.msra.mxu0 %v11794_v45  ;;  %8863 = vmatprep.mubr.msk.bf16.mxu0 %vm10058_vm0, %v10057_v1 }
0x1828   :  { %8873 = vmatprep.subr.bf16.mxu0 %v10057_v1 }
0x1853   :  { %v4925_v25 = vpop.xlane.xlu0 %4924 }
0x1854   :  { %9531 = vrcp.f32 %v4925_v25 }
0x1855   :  { %v4928_v56 = vpop.xlane.xlu1 %4927 }
0x1856   :  { %9533 = vrcp.f32 %v4928_v56 }
0x1857   :  { %v5187_v52 = vpop.permute.xlu0 %5186 }
0x1858   :  { %v5192_v38 = vsel %vm1101_vm3, %v5187_v52, 0 }
0x1859   :  { %v5184_v21 = vpop.permute.xlu1 %5183 }
0x185d   :  { %v5293_v2 = vpop.permute.xlu1 %5292 }
0x185e   :  { %v9532_v47 = vpop.eup %9531  ;;  %v5298_v10 = vsel %vm1101_vm3, %v5293_v2, 0 }
0x185f   :  { %v4943_v17 = vmul.f32 %v9532_v47, %v9524_v41 }
0x1860   :  { %v9534_v55 = vpop.eup %9533 }
0x1861   :  { %v4944_v46 = vmul.f32 %v9534_v55, %v9526_v24  ;;  %v5290_v49 = vpop.permute.xlu1 %5289 }
0x1863   :  { %v4948_v28 = vpack.c.bf16 %v4944_v46, %v4943_v17 }
0x1865   :  { %8864 = vmatmul.mubr.msk.bf16.vlgmr.msra.gmra.mrb[116].mxu0 %vm1330_vm4, %v4948_v28 }
0x1866   :  { %8874 = vmatpush3.bf16.xpose.msra.mxu0 %v5192_v38  ;;  %8875 = vmatprep.mubr.msk.bf16.mxu0 %vm10058_vm0, %v10057_v1 }
0x1867   :  { %8885 = vmatprep.subr.bf16.mxu0 %v10057_v1 }
0x186d   :  { %8876 = vmatmul.mubr.msk.bf16.vlgmr.msra.gmra.mrb[120].mxu0 %vm1101_vm3, %v5184_v21 }
0x186e   :  { %8886 = vmatpush3.bf16.xpose.msra.mxu0 %v5298_v10  ;;  %8887 = vmatprep.mubr.msk.bf16.mxu0 %vm10058_vm0, %v10057_v1 }
0x186f   :  { %8897 = vmatprep.subr.bf16.mxu0 %v10057_v1 }
0x1875   :  { %8888 = vmatmul.mubr.msk.bf16.vlgmr.msra.gmra.mrb[124].mxu0 %vm1101_vm3, %v5290_v49 }
0x1876   :  { %8899 = vmatprep.mubr.msk.bf16.mxu0 %vm10058_vm0, %v10057_v1 }
0x1888   :  { %v4859_v41 = vpop.xlane.xlu0 %4858 }
0x1889   :  { %v4881_v23 = vsub.f32 %v4849_v44, %v4859_v41 }
0x188b   :  { %v4889_v24 = vmul.f32 1.442695, %v4881_v23 }
0x188c   :  { %v4871_v31 = vpop.xlane.xlu0 %4870 }
0x188d   :  { %9535 = vpow2.f32 %v4889_v24  ;;  %v4885_v20 = vsub.f32 %v4853_v9, %v4871_v31 }
0x188f   :  { %v4897_v29 = vmul.f32 1.442695, %v4885_v20 }
0x1890   :  { %v4874_v15 = vpop.xlane.xlu0 %4873 }
0x1891   :  { %9537 = vpow2.f32 %v4897_v29  ;;  %v4886_v33 = vsub.f32 %v4854_v39, %v4874_v15 }
0x1892   :  { %v4862_v32 = vpop.xlane.xlu1 %4861 }
0x1893   :  { %v4882_v27 = vsub.f32 %v4850_v48, %v4862_v32  ;;  %v4899_v53 = vmul.f32 1.442695, %v4886_v33 }
0x1895   :  { %v4891_v43 = vmul.f32 1.442695, %v4882_v27 }
0x1897   :  { %v9536_v18 = vpop.eup %9535  ;;  %9539 = vpow2.f32 %v4891_v43 }
0x1898   :  { %v4905_v7 = vsel %vm1330_vm4, %v9536_v18, 0.0  ;;  %9541 = vpow2.f32 %v4899_v53 }
0x1899   :  { %4906 = vadd.xlane.f32.xlu0 %v4905_v7 }
0x189b   :  { %v9538_v35 = vpop.eup %9537 }
0x189c   :  { %v4917_v44 = vsel %vm1330_vm4, %v9538_v35, 0.0 }
0x189d   :  { %4918 = vadd.xlane.f32.xlu0 %v4917_v44 }
0x18a1   :  { %v9540_v4 = vpop.eup %9539 }
0x18a2   :  { %v4908_v9 = vsel %vm1330_vm4, %v9540_v4, 0.0  ;;  %v9542_v36 = vpop.eup %9541 }
0x18a3   :  { %4909 = vadd.xlane.f32.xlu1 %v4908_v9  ;;  %v4920_v39 = vsel %vm1330_vm4, %v9542_v36, 0.0 }
0x18a7   :  { %4921 = vadd.xlane.f32.xlu1 %v4920_v39 }
0x18b3   :  { %5133 = vrot.lane.b32.xlu0 %v11747_v60, %s10061_s1 }
0x18b8   :  { %5130 = vrot.lane.b32.xlu1 %v11745_v61, %s10061_s1 }
0x18bc   :  { %5239 = vrot.lane.b32.xlu1 %v11783_v50, %s10061_s1 }
0x18c0   :  { %5236 = vrot.lane.b32.xlu1 %v11781_v0, %s10061_s1 }
0x18f9   :  { %v11899_v48 = vpop.f32.mrb[112].mxu0 }
0x18fa   :  { %v8853_v37 = vpop.f32.mrb[113].mxu0 }
0x18fb   :  { %v11901_v22 = vpop.f32.mrb[114].mxu0 }
0x18fc   :  { %v5126_v25 = vpack.c.bf16 %v11901_v22, %v11899_v48  ;;  %v8854_v56 = vpop.f32.mrb[115].mxu0 }
0x1926   :  { %v4907_v47 = vpop.xlane.xlu0 %4906 }
0x1927   :  { %9543 = vrcp.f32 %v4907_v47 }
0x192a   :  { %v4919_v17 = vpop.xlane.xlu0 %4918 }
0x192e   :  { %v5134_v9 = vpop.permute.xlu0 %5133 }
0x192f   :  { %v5139_v47 = vsel %vm1101_vm3, %v5134_v9, 0 }
0x1930   :  { %v4910_v55 = vpop.xlane.xlu1 %4909 }
0x1931   :  { %9545 = vrcp.f32 %v4910_v55  ;;  %v9544_v28 = vpop.eup %9543 }
0x1932   :  { %v4937_v41 = vmul.f32 %v9544_v28, %v9536_v18 }
0x1934   :  { %v4922_v46 = vpop.xlane.xlu1 %4921 }
0x1935   :  { %9547 = vrcp.f32 %v4922_v46 }
0x1936   :  { %9549 = vrcp.f32 %v4919_v17 }
0x1938   :  { %v11905_v52 = vpop.f32.mrb[116].mxu0  ;;  %v5131_v56 = vpop.permute.xlu1 %5130 }
0x1939   :  { %v8865_v21 = vpop.f32.mrb[117].mxu0 }
0x193a   :  { %v11907_v38 = vpop.f32.mrb[118].mxu0 }
0x193b   :  { %v9546_v2 = vpop.eup %9545  ;;  %v8866_v49 = vpop.f32.mrb[119].mxu0 }
0x193c   :  { %v4938_v23 = vmul.f32 %v9546_v2, %v9540_v4 }
0x193e   :  { %v4945_v24 = vpack.c.bf16 %v4938_v23, %v4937_v41  ;;  %v5240_v41 = vpop.permute.xlu1 %5239 }
0x193f   :  { %v9548_v31 = vpop.eup %9547  ;;  %v5245_v23 = vsel %vm1101_vm3, %v5240_v41, 0 }
0x1940   :  { %8846 = vmatmul.mubr.msk.bf16.vlgmr.msra.gmra.mrb[128].mxu1 %vm1330_vm4, %v4945_v24  ;;  %v5228_v20 = vpop.f32.mrb[120].mxu0  ;;  %v9550_v29 = vpop.eup %9549  ;;  %v4942_v32 = vmul.f32 %v9548_v31, %v9542_v36 }
0x1941   :  { %8856 = vmatpush3.bf16.msra.mxu1 %v11798_v42  ;;  %v5343_v15 = vmul.f32 0.17677669, %v5228_v20  ;;  %v8877_v33 = vpop.f32.mrb[121].mxu0  ;;  %8857 = vmatprep.mubr.msk.bf16.mxu1 %vm10058_vm0, %v10057_v1  ;;  %v4941_v7 = vmul.f32 %v9550_v29, %v9538_v35 }
0x1942   :  { %v5231_v27 = vpop.f32.mrb[122].mxu0  ;;  %8867 = vmatprep.subr.bf16.mxu1 %v10057_v1  ;;  %v5237_v31 = vpop.permute.xlu1 %5236 }
0x1943   :  { %v5351_v53 = vadd.f32 %v11822_v11, %v5343_v15  ;;  %v5344_v43 = vmul.f32 0.17677669, %v5231_v27  ;;  %v8878_v18 = vpop.f32.mrb[123].mxu0  ;;  %v4947_v39 = vpack.c.bf16 %v4942_v32, %v4941_v7 }
0x1945   :  { %v5352_v44 = vadd.f32 %v11822_v11, %v5344_v43  ;;  %v5363_v4 = vsel %vm1330_vm4, %v5351_v53, -inf }
0x1946   :  { %5364 = vmax.xlane.f32.xlu0 %v5363_v4 }
0x1947   :  { %v5366_v37 = vsel %vm1330_vm4, %v5352_v44, -inf }
0x1948   :  { %8858 = vmatmul.mubr.msk.bf16.vlgmr.msra.gmra.mrb[132].mxu1 %vm1330_vm4, %v4947_v39  ;;  %5367 = vmax.xlane.f32.xlu1 %v5366_v37  ;;  %v5334_v36 = vpop.f32.mrb[124].mxu0 }
0x1949   :  { %v5347_v55 = vmul.f32 0.17677669, %v5334_v36  ;;  %v8889_v17 = vpop.f32.mrb[125].mxu0  ;;  %8869 = vmatprep.mubr.msk.bf16.mxu1 %vm10058_vm0, %v10057_v1 }
0x194a   :  { %8868 = vmatpush3.bf16.xpose.msra.mxu1 %v5139_v47  ;;  %v5337_v35 = vpop.f32.mrb[126].mxu0 }
0x194b   :  { %v5355_v46 = vadd.f32 %v11831_v6, %v5347_v55  ;;  %v5348_v28 = vmul.f32 0.17677669, %v5337_v35  ;;  %v8890_v21 = vpop.f32.mrb[127].mxu0  ;;  %8879 = vmatprep.subr.bf16.mxu1 %v10057_v1 }
0x194d   :  { %v5356_v2 = vadd.f32 %v11831_v6, %v5348_v28  ;;  %v5375_v49 = vsel %vm1330_vm4, %v5355_v46, -inf }
0x194e   :  { %5376 = vmax.xlane.f32.xlu0 %v5375_v49 }
0x194f   :  { %v5378_v24 = vsel %vm1330_vm4, %v5356_v2, -inf }
0x1951   :  { %8870 = vmatmul.mubr.msk.bf16.vlgmr.msra.gmra.mrb[136].mxu1 %vm1101_vm3, %v5131_v56 }
0x1952   :  { %8880 = vmatpush3.bf16.xpose.msra.mxu1 %v5245_v23  ;;  %5379 = vmax.xlane.f32.xlu0 %v5378_v24 }
0x1953   :  { %8881 = vmatprep.mubr.msk.bf16.mxu1 %vm10058_vm0, %v10057_v1  ;;  %8891 = vmatprep.subr.bf16.mxu1 %v10057_v1 }
0x1959   :  { %8882 = vmatmul.mubr.msk.bf16.vlgmr.msra.gmra.mrb[140].mxu1 %vm1101_vm3, %v5237_v31 }
0x195a   :  { %8893 = vmatprep.mubr.msk.bf16.mxu1 %vm10058_vm0, %v10057_v1 }
0x19d3   :  { %v5365_v20 = vpop.xlane.xlu0 %5364 }
0x19d4   :  { %v5383_v29 = vsub.f32 %v5351_v53, %v5365_v20 }
0x19d5   :  { %v5368_v15 = vpop.xlane.xlu1 %5367 }
0x19d6   :  { %v5393_v33 = vmul.f32 1.442695, %v5383_v29  ;;  %v5384_v32 = vsub.f32 %v5352_v44, %v5368_v15 }
0x19d8   :  { %9551 = vpow2.f32 %v5393_v33  ;;  %v5395_v27 = vmul.f32 1.442695, %v5384_v32 }
0x19da   :  { %9553 = vpow2.f32 %v5395_v27 }
0x19db   :  { %v5377_v43 = vpop.xlane.xlu0 %5376 }
0x19dc   :  { %v5387_v18 = vsub.f32 %v5355_v46, %v5377_v43 }
0x19de   :  { %v5401_v7 = vmul.f32 1.442695, %v5387_v18 }
0x19df   :  { %v5380_v56 = vpop.xlane.xlu0 %5379 }
0x19e0   :  { %9555 = vpow2.f32 %v5401_v7  ;;  %v5388_v36 = vsub.f32 %v5356_v2, %v5380_v56 }
0x19e2   :  { %v11937_v4 = vpop.eup %9551  ;;  %v5403_v47 = vmul.f32 1.442695, %v5388_v36 }
0x19e3   :  { %v5411_v9 = vsel %vm1330_vm4, %v11937_v4, 0.0 }
0x19e4   :  { %v11941_v39 = vpop.eup %9553  ;;  %5412 = vadd.xlane.f32.xlu0 %v5411_v9  ;;  %9557 = vpow2.f32 %v5403_v47 }
0x19e5   :  { %v5414_v53 = vsel %vm1330_vm4, %v11941_v39, 0.0 }
0x19e6   :  { %5415 = vadd.xlane.f32.xlu1 %v5414_v53 }
0x19ea   :  { %v11945_v44 = vpop.eup %9555 }
0x19eb   :  { %v5423_v37 = vsel %vm1330_vm4, %v11945_v44, 0.0 }
0x19ec   :  { %5424 = vadd.xlane.f32.xlu0 %v5423_v37 }
0x19ee   :  { %v11965_v21 = vpop.eup %9557 }
0x19ef   :  { %v5426_v2 = vsel %vm1330_vm4, %v11965_v21, 0.0 }
0x19f7   :  { %5594 = vrot.lane.b32.xlu1 %v11794_v45, %s10061_s1 }
0x1a02   :  { %5498 = vrot.lane.b32.xlu0 %v11760_v34, %s10061_s1 }
0x1a06   :  { %5876 = vrot.lane.b32.xlu0 %v11762_v14, %s10048_s24 }
0x1a0a   :  { %5927 = vrot.lane.b32.xlu0 %v11783_v50, %s10048_s24 }
0x1a0e   :  { %5978 = vrot.lane.b32.xlu0 %v11796_v54, %s10048_s24 }
0x1a13   :  { %v11959_v55 = vpop.f32.mrb[128].mxu1 }
0x1a14   :  { %v8847_v17 = vpop.f32.mrb[129].mxu1 }
0x1a15   :  { %v11961_v35 = vpop.f32.mrb[130].mxu1 }
0x1a16   :  { %v5125_v46 = vpack.c.bf16 %v11961_v35, %v11959_v55  ;;  %v8848_v28 = vpop.f32.mrb[131].mxu1  ;;  %v12714_v55 = vpack.c.bf16 %v11907_v38, %v11905_v52 }
0x1a1b   :  { %v11969_v49 = vpop.f32.mrb[132].mxu1  ;;  %5427 = vadd.xlane.f32.xlu1 %v5426_v2 }
0x1a1c   :  { %v8859_v41 = vpop.f32.mrb[133].mxu1 }
0x1a1d   :  { %v11971_v23 = vpop.f32.mrb[134].mxu1 }
0x1a1e   :  { %v5127_v24 = vpack.c.bf16 %v11971_v23, %v11969_v49  ;;  %v8860_v31 = vpop.f32.mrb[135].mxu1 }
0x1a24   :  { %v5175_v20 = vpop.f32.mrb[136].mxu1 }
0x1a25   :  { %v5341_v29 = vmul.f32 0.17677669, %v5175_v20  ;;  %v8871_v15 = vpop.f32.mrb[137].mxu1 }
0x1a26   :  { %v5178_v33 = vpop.f32.mrb[138].mxu1 }
0x1a27   :  { %v8872_v32 = vpop.f32.mrb[139].mxu1  ;;  %v5349_v27 = vadd.f32 %v11853_v19, %v5341_v29  ;;  %v5342_v2 = vmul.f32 0.17677669, %v5178_v33 }
0x1a29   :  { %v5357_v18 = vsel %vm1330_vm4, %v5349_v27, -inf  ;;  %v11995_v41 = vadd.f32 %v11853_v19, %v5342_v2 }
0x1a2b   :  { %v5360_v31 = vsel %vm1330_vm4, %v11995_v41, -inf }
0x1a2c   :  { %v5281_v43 = vpop.f32.mrb[140].mxu1  ;;  %5825 = vrot.lane.b32.xlu1 %v11747_v60, %s10048_s24 }
0x1a2d   :  { %v5345_v7 = vmul.f32 0.17677669, %v5281_v43  ;;  %v8883_v9 = vpop.f32.mrb[141].mxu1  ;;  %5358 = vmax.xlane.f32.xlu0 %v5357_v18 }
0x1a2e   :  { %v5284_v53 = vpop.f32.mrb[142].mxu1 }
0x1a2f   :  { %v5353_v37 = vadd.f32 %v11859_v58, %v5345_v7  ;;  %v5346_v56 = vmul.f32 0.17677669, %v5284_v53  ;;  %v8884_v36 = vpop.f32.mrb[143].mxu1 }
0x1a30   :  { %5823 = vrot.lane.b32.xlu1 %v11745_v61, %s10048_s24 }
0x1a31   :  { %v11983_v47 = vadd.f32 %v11859_v58, %v5346_v56  ;;  %v5369_v17 = vsel %vm1330_vm4, %v5353_v37, -inf }
0x1a32   :  { %5370 = vmax.xlane.f32.xlu0 %v5369_v17 }
0x1a33   :  { %v5372_v28 = vsel %vm1330_vm4, %v11983_v47, -inf }
0x1a34   :  { %5874 = vrot.lane.b32.xlu1 %v11758_v16, %s10048_s24 }
0x1a36   :  { %5373 = vmax.xlane.f32.xlu0 %v5372_v28 }
0x1a38   :  { %5925 = vrot.lane.b32.xlu1 %v11781_v0, %s10048_s24 }
0x1a3c   :  { %5976 = vrot.lane.b32.xlu1 %v11792_v8, %s10048_s24 }
0x1a60   :  { %5361 = vmax.xlane.f32.xlu1 %v5360_v31 }
0x1a71   :  { %v5413_v20 = vpop.xlane.xlu0 %5412 }
0x1a72   :  { %9559 = vrcp.f32 %v5413_v20 }
0x1a73   :  { %v5416_v29 = vpop.xlane.xlu1 %5415 }
0x1a74   :  { %9561 = vrcp.f32 %v5416_v29 }
0x1a77   :  { %v5595_v53 = vpop.permute.xlu1 %5594 }
0x1a79   :  { %v5425_v15 = vpop.xlane.xlu0 %5424 }
0x1a7a   :  { %9563 = vrcp.f32 %v5425_v15 }
0x1a7c   :  { %v9560_v32 = vpop.eup %9559 }
0x1a7d   :  { %v5499_v43 = vpop.permute.xlu0 %5498  ;;  %v5439_v7 = vmul.f32 %v9560_v32, %v11937_v4 }
0x1a7e   :  { %v9562_v18 = vpop.eup %9561  ;;  %8898 = vmatpush3.bf16.msra.mxu0 %v5499_v43 }
0x1a7f   :  { %v5440_v33 = vmul.f32 %v9562_v18, %v11941_v39  ;;  %8909 = vmatprep.subr.bf16.mxu0 %v10057_v1 }
0x1a81   :  { %v5446_v9 = vpack.c.bf16 %v5440_v33, %v5439_v7  ;;  %v5877_v36 = vpop.permute.xlu0 %5876 }
0x1a83   :  { %8900 = vmatmul.mubr.msk.bf16.vlgmr.msra.gmra.mrb[128].mxu0 %vm1330_vm4, %v5446_v9 }
0x1a84   :  { %8910 = vmatpush3.bf16.msra.mxu0 %v5595_v53  ;;  %8911 = vmatprep.mubr.msk.bf16.mxu0 %vm10058_vm0, %v10057_v1  ;;  %v9564_v4 = vpop.eup %9563 }
0x1a85   :  { %8939 = vmatprep.subr.bf16.mxu0 %v10057_v1  ;;  %v5928_v17 = vpop.permute.xlu0 %5927  ;;  %v5443_v39 = vmul.f32 %v9564_v4, %v11945_v44 }
0x1a89   :  { %v5979_v20 = vpop.permute.xlu0 %5978 }
0x1aa8   :  { %v5428_v56 = vpop.xlane.xlu1 %5427 }
0x1aa9   :  { %9565 = vrcp.f32 %v5428_v56 }
0x1aac   :  { %v5826_v31 = vpop.permute.xlu1 %5825 }
0x1aad   :  { %v5831_v32 = vsel %vm1101_vm3, %v5826_v31, 0 }
0x1ab0   :  { %v5824_v7 = vpop.permute.xlu1 %5823 }
0x1ab3   :  { %v9566_v28 = vpop.eup %9565 }
0x1ab4   :  { %v5444_v2 = vmul.f32 %v9566_v28, %v11965_v21  ;;  %v5882_v21 = vsel %vm1101_vm3, %v5877_v36, 0  ;;  %v5875_v53 = vpop.permute.xlu1 %5874  ;;  %v5984_v28 = vsel %vm1101_vm3, %v5979_v20, 0 }
0x1ab6   :  { %v5448_v29 = vpack.c.bf16 %v5444_v2, %v5443_v39 }
0x1ab8   :  { %8912 = vmatmul.mubr.msk.bf16.vlgmr.msra.gmra.mrb[132].mxu0 %vm1330_vm4, %v5448_v29  ;;  %v5926_v4 = vpop.permute.xlu1 %5925 }
0x1ab9   :  { %8940 = vmatpush3.bf16.xpose.msra.mxu0 %v5831_v32  ;;  %8941 = vmatprep.mubr.msk.bf16.mxu0 %vm10058_vm0, %v10057_v1 }
0x1aba   :  { %v5359_v15 = vpop.xlane.xlu0 %5358  ;;  %8945 = vmatprep.subr.bf16.mxu0 %v10057_v1 }
0x1abb   :  { %v5381_v43 = vsub.f32 %v5349_v27, %v5359_v15  ;;  %v5933_v27 = vsel %vm1101_vm3, %v5928_v17, 0 }
0x1abc   :  { %v5977_v39 = vpop.permute.xlu1 %5976 }
0x1abd   :  { %v5389_v18 = vmul.f32 1.442695, %v5381_v43 }
0x1abf   :  { %9567 = vpow2.f32 %v5389_v18  ;;  %v5371_v44 = vpop.xlane.xlu0 %5370 }
0x1ac0   :  { %v5385_v33 = vsub.f32 %v5353_v37, %v5371_v44  ;;  %8942 = vmatmul.mubr.msk.bf16.vlgmr.msra.gmra.mrb[136].mxu0 %vm1101_vm3, %v5824_v7 }
0x1ac1   :  { %8946 = vmatpush3.bf16.xpose.msra.mxu0 %v5882_v21  ;;  %8947 = vmatprep.mubr.msk.bf16.mxu0 %vm10058_vm0, %v10057_v1 }
0x1ac2   :  { %v5397_v9 = vmul.f32 1.442695, %v5385_v33  ;;  %8951 = vmatprep.subr.bf16.mxu0 %v10057_v1 }
0x1ac3   :  { %v5374_v2 = vpop.xlane.xlu0 %5373 }
0x1ac4   :  { %9569 = vpow2.f32 %v5397_v9  ;;  %v5386_v31 = vsub.f32 %v11983_v47, %v5374_v2 }
0x1ac6   :  { %v5399_v32 = vmul.f32 1.442695, %v5386_v31 }
0x1ac8   :  { %8948 = vmatmul.mubr.msk.bf16.vlgmr.msra.gmra.mrb[140].mxu0 %vm1101_vm3, %v5875_v53 }
0x1ac9   :  { %v12020_v56 = vpop.eup %9567  ;;  %8952 = vmatpush3.bf16.xpose.msra.mxu0 %v5933_v27  ;;  %8953 = vmatprep.mubr.msk.bf16.mxu0 %vm10058_vm0, %v10057_v1 }
0x1aca   :  { %v5405_v37 = vsel %vm1330_vm4, %v12020_v56, 0.0  ;;  %8957 = vmatprep.subr.bf16.mxu0 %v10057_v1 }
0x1acb   :  { %5406 = vadd.xlane.f32.xlu0 %v5405_v37 }
0x1ace   :  { %v12027_v36 = vpop.eup %9569 }
0x1acf   :  { %v5417_v17 = vsel %vm1330_vm4, %v12027_v36, 0.0 }
0x1ad0   :  { %5418 = vadd.xlane.f32.xlu0 %v5417_v17  ;;  %8954 = vmatmul.mubr.msk.bf16.vlgmr.msra.gmra.mrb[144].mxu0 %vm1101_vm3, %v5926_v4 }
0x1ad1   :  { %8958 = vmatpush3.bf16.xpose.msra.mxu0 %v5984_v28  ;;  %8959 = vmatprep.mubr.msk.bf16.mxu0 %vm10058_vm0, %v10057_v1 }
0x1ad2   :  { %8969 = vmatprep.subr.bf16.mxu0 %v10057_v1 }
0x1ad8   :  { %8960 = vmatmul.mubr.msk.bf16.vlgmr.msra.gmra.mrb[148].mxu0 %vm1101_vm3, %v5977_v39 }
0x1ad9   :  { %8971 = vmatprep.mubr.msk.bf16.mxu0 %vm10058_vm0, %v10057_v1 }
0x1ae6   :  { %5450 = vrot.lane.b32.xlu0 %v11764_v57, %s10061_s1 }
0x1aed   :  { %v5362_v20 = vpop.xlane.xlu1 %5361 }
0x1aee   :  { %v5382_v29 = vsub.f32 %v11995_v41, %v5362_v20 }
0x1af0   :  { %v5391_v15 = vmul.f32 1.442695, %v5382_v29 }
0x1af2   :  { %9571 = vpow2.f32 %v5391_v15 }
0x1af3   :  { %9573 = vpow2.f32 %v5399_v32 }
0x1afc   :  { %v9572_v43 = vpop.eup %9571 }
0x1afd   :  { %v5408_v18 = vsel %vm1330_vm4, %v9572_v43, 0.0  ;;  %v9574_v7 = vpop.eup %9573 }
0x1afe   :  { %5409 = vadd.xlane.f32.xlu1 %v5408_v18  ;;  %v5420_v44 = vsel %vm1330_vm4, %v9574_v7, 0.0 }
0x1b02   :  { %5421 = vadd.xlane.f32.xlu1 %v5420_v44 }
0x1b13   :  { %5546 = vrot.lane.b32.xlu1 %v11798_v42, %s10061_s1 }
0x1b56   :  { %v12047_v21 = vpop.f32.mrb[128].mxu0 }
0x1b57   :  { %v8901_v47 = vpop.f32.mrb[129].mxu0 }
0x1b58   :  { %v5407_v33 = vpop.xlane.xlu0 %5406  ;;  %v12049_v41 = vpop.f32.mrb[130].mxu0 }
0x1b59   :  { %v5642_v9 = vpack.c.bf16 %v12049_v41, %v12047_v21  ;;  %v8902_v53 = vpop.f32.mrb[131].mxu0  ;;  %9575 = vrcp.f32 %v5407_v33 }
0x1b5d   :  { %v5419_v27 = vpop.xlane.xlu0 %5418 }
0x1b61   :  { %v5451_v37 = vpop.permute.xlu0 %5450 }
0x1b62   :  { %8892 = vmatpush3.bf16.msra.mxu1 %v5451_v37 }
0x1b63   :  { %8903 = vmatprep.subr.bf16.mxu1 %v10057_v1  ;;  %v9576_v32 = vpop.eup %9575 }
0x1b8b   :  { %v5410_v4 = vpop.xlane.xlu1 %5409  ;;  %v12054_v17 = vpop.f32.mrb[132].mxu0 }
0x1b8c   :  { %9577 = vrcp.f32 %v5410_v4  ;;  %v8913_v28 = vpop.f32.mrb[133].mxu0  ;;  %v5437_v4 = vmul.f32 %v9576_v32, %v12020_v56 }
0x1b8d   :  { %v12056_v39 = vpop.f32.mrb[134].mxu0 }
0x1b8e   :  { %v5644_v2 = vpack.c.bf16 %v12056_v39, %v12054_v17  ;;  %v8914_v31 = vpop.f32.mrb[135].mxu0 }
0x1b8f   :  { %v5422_v20 = vpop.xlane.xlu1 %5421 }
0x1b90   :  { %9579 = vrcp.f32 %v5422_v20 }
0x1b91   :  { %9581 = vrcp.f32 %v5419_v27 }
0x1b93   :  { %v5867_v29 = vpop.f32.mrb[136].mxu0 }
0x1b94   :  { %v6027_v15 = vmul.f32 0.17677669, %v5867_v29  ;;  %v8943_v18 = vpop.f32.mrb[137].mxu0 }
0x1b95   :  { %v5870_v44 = vpop.f32.mrb[138].mxu0  ;;  %v5547_v18 = vpop.permute.xlu1 %5546 }
0x1b96   :  { %v9578_v47 = vpop.eup %9577  ;;  %v12061_v33 = vadd.f32 %v11853_v19, %v6027_v15  ;;  %v6028_v53 = vmul.f32 0.17677669, %v5870_v44  ;;  %v8944_v37 = vpop.f32.mrb[139].mxu0 }
0x1b97   :  { %v5438_v28 = vmul.f32 %v9578_v47, %v9572_v43 }
0x1b98   :  { %v12065_v10 = vadd.f32 %v11853_v19, %v6028_v53  ;;  %v6043_v27 = vsel %vm1330_vm4, %v12061_v33, -inf }
0x1b99   :  { %6044 = vmax.xlane.f32.xlu1 %v6043_v27  ;;  %v5445_v31 = vpack.c.bf16 %v5438_v28, %v5437_v4 }
0x1b9a   :  { %v9580_v20 = vpop.eup %9579  ;;  %v6046_v29 = vsel %vm1330_vm4, %v12065_v10, -inf }
0x1b9b   :  { %8894 = vmatmul.mubr.msk.bf16.vlgmr.msra.gmra.mrb[144].mxu1 %vm1330_vm4, %v5445_v31  ;;  %6047 = vmax.xlane.f32.xlu0 %v6046_v29  ;;  %v5918_v15 = vpop.f32.mrb[140].mxu0  ;;  %v9582_v44 = vpop.eup %9581  ;;  %v5442_v19 = vmul.f32 %v9580_v20, %v9574_v7 }
0x1b9c   :  { %8904 = vmatpush3.bf16.msra.mxu1 %v5547_v18  ;;  %v6029_v56 = vmul.f32 0.17677669, %v5918_v15  ;;  %v8949_v43 = vpop.f32.mrb[141].mxu0  ;;  %8905 = vmatprep.mubr.msk.bf16.mxu1 %vm10058_vm0, %v10057_v1  ;;  %v5441_v4 = vmul.f32 %v9582_v44, %v12027_v36 }
0x1b9d   :  { %v5921_v32 = vpop.f32.mrb[142].mxu0 }
0x1b9e   :  { %v6037_v47 = vadd.f32 %v11822_v11, %v6029_v56  ;;  %v6030_v53 = vmul.f32 0.17677669, %v5921_v32  ;;  %v8950_v37 = vpop.f32.mrb[143].mxu0  ;;  %v5447_v31 = vpack.c.bf16 %v5442_v19, %v5441_v4 }
0x1ba0   :  { %v6038_v28 = vadd.f32 %v11822_v11, %v6030_v53  ;;  %v6049_v27 = vsel %vm1330_vm4, %v6037_v47, -inf }
0x1ba1   :  { %6050 = vmax.xlane.f32.xlu0 %v6049_v27 }
0x1ba2   :  { %v6052_v29 = vsel %vm1330_vm4, %v6038_v28, -inf }
0x1ba3   :  { %8906 = vmatmul.mubr.msk.bf16.vlgmr.msra.gmra.mrb[148].mxu1 %vm1330_vm4, %v5447_v31  ;;  %6053 = vmax.xlane.f32.xlu1 %v6052_v29  ;;  %v5969_v18 = vpop.f32.mrb[144].mxu0 }
0x1ba4   :  { %v6031_v7 = vmul.f32 0.17677669, %v5969_v18  ;;  %v8955_v20 = vpop.f32.mrb[145].mxu0 }
0x1ba5   :  { %v5972_v15 = vpop.f32.mrb[146].mxu0  ;;  %v9259_v20 = vld [vmem:[%s12653_s16 + $0x50] sm:$0xff]  }
0x1ba6   :  { %v6039_v56 = vadd.f32 %v11859_v58, %v6031_v7  ;;  %v6032_v43 = vmul.f32 0.17677669, %v5972_v15  ;;  %v8956_v32 = vpop.f32.mrb[147].mxu0  ;;  %8915 = vmatprep.subr.bf16.mxu1 %v9259_v20  ;;  %v9260_v15 = vld [vmem:[%s12653_s16 + $0x58] sm:$0xff]  }
0x1ba7   :  { %8916 = vmatpush3.bf16.msra.mxu1 %v9259_v20 }
0x1ba8   :  { %v6040_v36 = vadd.f32 %v11859_v58, %v6032_v43  ;;  %v6055_v11 = vsel %vm1330_vm4, %v6039_v56, -inf  ;;  %8917 = vmatprep.subr.bf16.mxu1 %v9260_v15 }
0x1ba9   :  { %6056 = vmax.xlane.f32.xlu0 %v6055_v11 }
0x1baa   :  { %v6058_v44 = vsel %vm1330_vm4, %v6040_v36, -inf }
0x1bab   :  { %6059 = vmax.xlane.f32.xlu1 %v6058_v44  ;;  %v6020_v19 = vpop.f32.mrb[148].mxu0  ;;  %8918 = vmatpush3.bf16.msra.mxu1 %v9260_v15 }
0x1bac   :  { %v6033_v53 = vmul.f32 0.17677669, %v6020_v19  ;;  %v8961_v37 = vpop.f32.mrb[149].mxu0 }
0x1bad   :  { %v6023_v4 = vpop.f32.mrb[150].mxu0 }
0x1bae   :  { %v6041_v27 = vadd.f32 %v11831_v6, %v6033_v53  ;;  %v6034_v31 = vmul.f32 0.17677669, %v6023_v4  ;;  %v8962_v29 = vpop.f32.mrb[151].mxu0 }
0x1bb0   :  { %v12086_v18 = vadd.f32 %v11831_v6, %v6034_v31  ;;  %v6061_v7 = vsel %vm1330_vm4, %v6041_v27, -inf  ;;  %v12100_v6 = vld [vmem:[%s12653_s16 + $0x40] sm:$0xff]  }
0x1bb1   :  { %6062 = vmax.xlane.f32.xlu0 %v6061_v7  ;;  %8927 = vmatprep.subr.bf16.mxu1 %v12100_v6 }
0x1bb2   :  { %v6064_v58 = vsel %vm1330_vm4, %v12086_v18, -inf }
0x1bb3   :  { %6065 = vmax.xlane.f32.xlu1 %v6064_v58 }
0x1c26   :  { %v6045_v43 = vpop.xlane.xlu1 %6044 }
0x1c27   :  { %v6067_v32 = vsub.f32 %v12061_v33, %v6045_v43 }
0x1c28   :  { %v6048_v11 = vpop.xlane.xlu0 %6047 }
0x1c29   :  { %v6075_v44 = vmul.f32 1.442695, %v6067_v32  ;;  %v6068_v19 = vsub.f32 %v12065_v10, %v6048_v11 }
0x1c2b   :  { %9583 = vpow2.f32 %v6075_v44  ;;  %v6077_v53 = vmul.f32 1.442695, %v6068_v19 }
0x1c2d   :  { %9585 = vpow2.f32 %v6077_v53 }
0x1c2e   :  { %v6051_v37 = vpop.xlane.xlu0 %6050 }
0x1c2f   :  { %v6069_v4 = vsub.f32 %v6037_v47, %v6051_v37 }
0x1c30   :  { %v6054_v31 = vpop.xlane.xlu1 %6053 }
0x1c31   :  { %v6079_v29 = vmul.f32 1.442695, %v6069_v4  ;;  %v6070_v7 = vsub.f32 %v6038_v28, %v6054_v31 }
0x1c33   :  { %9587 = vpow2.f32 %v6079_v29  ;;  %v6081_v58 = vmul.f32 1.442695, %v6070_v7 }
0x1c35   :  { %v12105_v20 = vpop.eup %9583  ;;  %9589 = vpow2.f32 %v6081_v58 }
0x1c36   :  { %v6057_v15 = vpop.xlane.xlu0 %6056  ;;  %v6091_v33 = vsel %vm1330_vm4, %v12105_v20, 0.0 }
0x1c37   :  { %v12109_v43 = vpop.eup %9585  ;;  %v6071_v10 = vsub.f32 %v6039_v56, %v6057_v15  ;;  %6092 = vadd.xlane.f32.xlu0 %v6091_v33 }
0x1c38   :  { %v6060_v32 = vpop.xlane.xlu1 %6059  ;;  %v6094_v47 = vsel %vm1330_vm4, %v12109_v43, 0.0 }
0x1c39   :  { %v6083_v11 = vmul.f32 1.442695, %v6071_v10  ;;  %v6072_v44 = vsub.f32 %v6040_v36, %v6060_v32  ;;  %6095 = vadd.xlane.f32.xlu1 %v6094_v47 }
0x1c3b   :  { %9591 = vpow2.f32 %v6083_v11  ;;  %v6085_v28 = vmul.f32 1.442695, %v6072_v44 }
0x1c3d   :  { %v12113_v19 = vpop.eup %9587  ;;  %9593 = vpow2.f32 %v6085_v28 }
0x1c3e   :  { %v6063_v53 = vpop.xlane.xlu0 %6062  ;;  %v6097_v37 = vsel %vm1330_vm4, %v12113_v19, 0.0 }
0x1c3f   :  { %v12117_v4 = vpop.eup %9589  ;;  %v6073_v56 = vsub.f32 %v6041_v27, %v6063_v53  ;;  %6098 = vadd.xlane.f32.xlu0 %v6097_v37 }
0x1c40   :  { %v6100_v31 = vsel %vm1330_vm4, %v12117_v4, 0.0  ;;  %v6066_v10 = vpop.xlane.xlu1 %6065 }
0x1c41   :  { %v6087_v29 = vmul.f32 1.442695, %v6073_v56  ;;  %6101 = vadd.xlane.f32.xlu1 %v6100_v31  ;;  %v6074_v32 = vsub.f32 %v12086_v18, %v6066_v10  ;;  %v9262_v56 = vld [vmem:[%s12653_s16 + $0x48] sm:$0xff]  }
0x1c43   :  { %9595 = vpow2.f32 %v6087_v29  ;;  %v6089_v44 = vmul.f32 1.442695, %v6074_v32 }
0x1c45   :  { %v12121_v36 = vpop.eup %9591  ;;  %9597 = vpow2.f32 %v6089_v44 }
0x1c46   :  { %v6103_v7 = vsel %vm1330_vm4, %v12121_v36, 0.0 }
0x1c47   :  { %v12125_v58 = vpop.eup %9593  ;;  %6104 = vadd.xlane.f32.xlu0 %v6103_v7 }
0x1c48   :  { %v6106_v15 = vsel %vm1330_vm4, %v12125_v58, 0.0 }
0x1c49   :  { %6107 = vadd.xlane.f32.xlu1 %v6106_v15 }
0x1c4d   :  { %v12129_v27 = vpop.eup %9595 }
0x1c4e   :  { %v6109_v33 = vsel %vm1330_vm4, %v12129_v27, 0.0 }
0x1c4f   :  { %6110 = vadd.xlane.f32.xlu0 %v6109_v33 }
0x1c5a   :  { %6182 = vrot.lane.b32.xlu1 %v11760_v34, %s10048_s24 }
0x1c5e   :  { %6229 = vrot.lane.b32.xlu1 %v11798_v42, %s10048_s24 }
0x1c65   :  { %6135 = vrot.lane.b32.xlu0 %v11764_v57, %s10048_s24 }
0x1c69   :  { %6426 = vrot.lane.b32.xlu0 %v11747_v60, %s10062_s19 }
0x1c6d   :  { %6477 = vrot.lane.b32.xlu0 %v11762_v14, %s10062_s19 }
0x1c6e   :  { %v5490_v47 = vpop.f32.mrb[144].mxu1 }
0x1c6f   :  { %v8895_v11 = vpop.f32.mrb[145].mxu1 }
0x1c70   :  { %v5493_v28 = vpop.f32.mrb[146].mxu1 }
0x1c71   :  { %v5641_v53 = vpack.c.bf16 %v5493_v28, %v5490_v47  ;;  %v8896_v37 = vpop.f32.mrb[147].mxu1  ;;  %6528 = vrot.lane.b32.xlu0 %v11783_v50, %s10062_s19 }
0x1c73   :  { %8919 = vmatprep.mubr.msk.bf16.mxu1 %vm1101_vm3, %v5641_v53 }
0x1c74   :  { %8920 = vmatmul.mubr.msk.bf16.vlgmr.msra.gmra.mrb[152].mxu1 %vm1101_vm3, %v5642_v9 }
0x1c75   :  { %6526 = vrot.lane.b32.xlu0 %v11781_v0, %s10062_s19  ;;  %8928 = vmatpush3.bf16.msra.mxu1 %v12100_v6  ;;  %v12167_v0 = vpop.eup %9597  ;;  %v9263_v6 = vld [vmem:[%s12653_s16 + $0x60] sm:$0xff]  }
0x1c76   :  { %v5586_v60 = vpop.f32.mrb[148].mxu1  ;;  %8929 = vmatprep.subr.bf16.mxu1 %v9262_v56  ;;  %v6112_v21 = vsel %vm1330_vm4, %v12167_v0, 0.0 }
0x1c77   :  { %v8907_v14 = vpop.f32.mrb[149].mxu1 }
0x1c78   :  { %v5589_v50 = vpop.f32.mrb[150].mxu1  ;;  %v9264_v14 = vld [vmem:[%s12653_s16 + $0x68] sm:$0xff]  }
0x1c79   :  { %v5643_v18 = vpack.c.bf16 %v5589_v50, %v5586_v60  ;;  %v8908_v31 = vpop.f32.mrb[151].mxu1  ;;  %8930 = vmatpush3.bf16.msra.mxu1 %v9262_v56 }
0x1c7a   :  { %8963 = vmatprep.subr.bf16.mxu1 %v10057_v1 }
0x1c7b   :  { %8923 = vmatprep.mubr.msk.bf16.mxu1 %vm1101_vm3, %v5643_v18 }
0x1c7c   :  { %8924 = vmatmul.mubr.msk.bf16.gmra.mrb[156].mxu1 %vm1101_vm3, %v5644_v2 }
0x1c7d   :  { %8931 = vmatprep.mubr.msk.bf16.mxu1 %vm1101_vm3, %v5125_v46 }
0x1c82   :  { %6113 = vadd.xlane.f32.xlu1 %v6112_v21 }
0x1c84   :  { %8932 = vmatmul.mubr.msk.bf16.vlgmr.msra.gmra.mrb[152].mxu1 %vm1101_vm3, %v5126_v25 }
0x1c85   :  { %8935 = vmatprep.mubr.msk.bf16.mxu1 %vm1101_vm3, %v5127_v24 }
0x1c8c   :  { %8936 = vmatmul.mubr.msk.bf16.gmra.mrb[156].mxu1 %vm1101_vm3, %v12714_v55 }
0x1c8d   :  { %8965 = vmatprep.mubr.msk.bf16.mxu1 %vm10058_vm0, %v10057_v1 }
0x1c93   :  { %6276 = vrot.lane.b32.xlu1 %v11794_v45, %s10048_s24 }
0x1c97   :  { %6424 = vrot.lane.b32.xlu1 %v11745_v61, %s10062_s19 }
0x1c9b   :  { %6475 = vrot.lane.b32.xlu1 %v11758_v16, %s10062_s19 }
0x1c9f   :  { %6579 = vrot.lane.b32.xlu1 %v11796_v54, %s10062_s19 }
0x1ca3   :  { %6577 = vrot.lane.b32.xlu1 %v11792_v8, %s10062_s19 }
0x1cc4   :  { %v6093_v48 = vpop.xlane.xlu0 %6092 }
0x1cc6   :  { %v6096_v22 = vpop.xlane.xlu1 %6095 }
0x1ccc   :  { %v6099_v25 = vpop.xlane.xlu0 %6098 }
0x1ccd   :  { %9599 = vrcp.f32 %v6099_v25 }
0x1cce   :  { %v6102_v52 = vpop.xlane.xlu1 %6101 }
0x1ccf   :  { %9601 = vrcp.f32 %v6102_v52 }
0x1cd0   :  { %9603 = vrcp.f32 %v6096_v22 }
0x1cd1   :  { %9605 = vrcp.f32 %v6093_v48 }
0x1cd4   :  { %v6105_v61 = vpop.xlane.xlu0 %6104 }
0x1cd6   :  { %v6108_v38 = vpop.xlane.xlu1 %6107 }
0x1cd7   :  { %v9600_v35 = vpop.eup %9599  ;;  %9607 = vrcp.f32 %v6108_v38 }
0x1cd8   :  { %v6125_v16 = vmul.f32 %v9600_v35, %v12113_v19  ;;  %9609 = vrcp.f32 %v6105_v61 }
0x1cd9   :  { %v9602_v46 = vpop.eup %9601 }
0x1cda   :  { %v6126_v54 = vmul.f32 %v9602_v46, %v12117_v4  ;;  %v6183_v49 = vpop.permute.xlu1 %6182  ;;  %v9604_v23 = vpop.eup %9603 }
0x1cdb   :  { %8970 = vmatpush3.bf16.msra.mxu0 %v6183_v49  ;;  %v9606_v41 = vpop.eup %9605  ;;  %v6124_v9 = vmul.f32 %v9604_v23, %v12109_v43 }
0x1cdc   :  { %v6111_v8 = vpop.xlane.xlu0 %6110  ;;  %v6132_v24 = vpack.c.bf16 %v6126_v54, %v6125_v16  ;;  %8981 = vmatprep.subr.bf16.mxu0 %v10057_v1  ;;  %v6123_v17 = vmul.f32 %v9606_v41, %v12105_v20 }
0x1cdd   :  { %9611 = vrcp.f32 %v6111_v8 }
0x1cde   :  { %8972 = vmatmul.mubr.msk.bf16.vlgmr.msra.gmra.mrb[152].mxu0 %vm1330_vm4, %v6132_v24  ;;  %v6131_v2 = vpack.c.bf16 %v6124_v9, %v6123_v17  ;;  %v6230_v4 = vpop.permute.xlu1 %6229 }
0x1cdf   :  { %8983 = vmatprep.mubr.msk.bf16.mxu0 %vm10058_vm0, %v10057_v1 }
0x1ce0   :  { %v6136_v39 = vpop.permute.xlu0 %6135 }
0x1ce1   :  { %8964 = vmatpush3.bf16.msra.mxu1 %v6136_v39  ;;  %v9608_v19 = vpop.eup %9607 }
0x1ce2   :  { %8975 = vmatprep.subr.bf16.mxu1 %v10057_v1  ;;  %v9610_v43 = vpop.eup %9609  ;;  %v6128_v20 = vmul.f32 %v9608_v19, %v12125_v58 }
0x1ce3   :  { %v6127_v29 = vmul.f32 %v9610_v43, %v12121_v36 }
0x1ce4   :  { %8966 = vmatmul.mubr.msk.bf16.vlgmr.msra.gmra.mrb[160].mxu1 %vm1330_vm4, %v6131_v2  ;;  %v6427_v11 = vpop.permute.xlu0 %6426 }
0x1ce5   :  { %8976 = vmatpush3.bf16.msra.mxu1 %v6230_v4  ;;  %8977 = vmatprep.mubr.msk.bf16.mxu1 %vm10058_vm0, %v10057_v1  ;;  %v6133_v7 = vpack.c.bf16 %v6128_v20, %v6127_v29  ;;  %v6432_v36 = vsel %vm1101_vm3, %v6427_v11, 0  ;;  %v9711_v4 = vld [vmem:[%s12650_s13] ss:$0 sm:$0xff] }
0x1ce6   :  { %8987 = vmatprep.subr.bf16.mxu1 %v9263_v6 }
0x1ce7   :  { %v9612_v10 = vpop.eup %9611 }
0x1ce8   :  { %v6129_v47 = vmul.f32 %v9612_v10, %v12129_v27  ;;  %v6478_v53 = vpop.permute.xlu0 %6477 }
0x1ce9   :  { %v6483_v56 = vsel %vm1101_vm3, %v6478_v53, 0 }
0x1cec   :  { %8978 = vmatmul.mubr.msk.bf16.vlgmr.msra.gmra.mrb[164].mxu1 %vm1330_vm4, %v6133_v7  ;;  %v6529_v52 = vpop.permute.xlu0 %6528 }
0x1ced   :  { %8988 = vmatpush3.bf16.msra.mxu1 %v9263_v6  ;;  %v6534_v61 = vsel %vm1101_vm3, %v6529_v52, 0 }
0x1cee   :  { %8989 = vmatprep.subr.bf16.mxu1 %v9264_v14 }
0x1cf0   :  { %v6527_v7 = vpop.permute.xlu0 %6526 }
0x1cf1   :  { %8990 = vmatpush3.bf16.msra.mxu1 %v9264_v14 }
0x1cf2   :  { %9011 = vmatprep.subr.bf16.mxu1 %v10057_v1 }
0x1d0f   :  { %v6114_v15 = vpop.xlane.xlu1 %6113 }
0x1d10   :  { %9613 = vrcp.f32 %v6114_v15 }
0x1d13   :  { %v6277_v33 = vpop.permute.xlu1 %6276 }
0x1d14   :  { %8982 = vmatpush3.bf16.msra.mxu0 %v6277_v33 }
0x1d15   :  { %8999 = vmatprep.subr.bf16.mxu0 %v10057_v1 }
0x1d17   :  { %v6425_v28 = vpop.permute.xlu1 %6424 }
0x1d1a   :  { %v9614_v32 = vpop.eup %9613 }
0x1d1b   :  { %v6130_v58 = vmul.f32 %v9614_v32, %v12167_v0  ;;  %v6476_v37 = vpop.permute.xlu1 %6475 }
0x1d1d   :  { %v6134_v44 = vpack.c.bf16 %v6130_v58, %v6129_v47 }
0x1d1f   :  { %8984 = vmatmul.mubr.msk.bf16.vlgmr.msra.gmra.mrb[156].mxu0 %vm1330_vm4, %v6134_v44  ;;  %v6580_v27 = vpop.permute.xlu1 %6579  ;;  %v9712_v44 = vld [vmem:[%s12650_s13 + $0x1] ss:$0 sm:$0xff] }
0x1d20   :  { %9000 = vmatpush3.bf16.xpose.msra.mxu0 %v6432_v36  ;;  %9001 = vmatprep.mubr.msk.bf16.mxu0 %vm10058_vm0, %v10057_v1  ;;  %v6585_v60 = vsel %vm1101_vm3, %v6580_v27, 0 }
0x1d21   :  { %9005 = vmatprep.subr.bf16.mxu0 %v10057_v1 }
0x1d23   :  { %v6578_v50 = vpop.permute.xlu1 %6577 }
0x1d27   :  { %9002 = vmatmul.mubr.msk.bf16.vlgmr.msra.gmra.mrb[160].mxu0 %vm1101_vm3, %v6425_v28 }
0x1d28   :  { %9006 = vmatpush3.bf16.xpose.msra.mxu0 %v6483_v56  ;;  %9007 = vmatprep.mubr.msk.bf16.mxu0 %vm10058_vm0, %v10057_v1 }
0x1d29   :  { %9017 = vmatprep.subr.bf16.mxu0 %v10057_v1 }
0x1d2f   :  { %9008 = vmatmul.mubr.msk.bf16.vlgmr.msra.gmra.mrb[164].mxu0 %vm1101_vm3, %v6476_v37 }
0x1d30   :  { %9018 = vmatpush3.bf16.xpose.msra.mxu0 %v6585_v60  ;;  %9019 = vmatprep.mubr.msk.bf16.mxu0 %vm10058_vm0, %v10057_v1 }
0x1d31   :  { %9029 = vmatprep.subr.bf16.mxu0 %v10057_v1 }
0x1d37   :  { %9020 = vmatmul.mubr.msk.bf16.vlgmr.msra.gmra.mrb[168].mxu0 %vm1101_vm3, %v6578_v50 }
0x1d38   :  { %9031 = vmatprep.mubr.msk.bf16.mxu0 %vm10058_vm0, %v10057_v1 }
0x1db1   :  { %v6222_v18 = vpop.f32.mrb[152].mxu0 }
0x1db2   :  { %v8973_v31 = vpop.f32.mrb[153].mxu0 }
0x1db3   :  { %v6225_v0 = vpop.f32.mrb[154].mxu0 }
0x1db4   :  { %v6324_v21 = vpack.c.bf16 %v6225_v0, %v6222_v18  ;;  %v8974_v55 = vpop.f32.mrb[155].mxu0 }
0x1db7   :  { %v6175_v48 = vpop.f32.mrb[160].mxu1 }
0x1db8   :  { %v8967_v22 = vpop.f32.mrb[161].mxu1 }
0x1db9   :  { %v6178_v25 = vpop.f32.mrb[162].mxu1 }
0x1dba   :  { %v6323_v38 = vpack.c.bf16 %v6178_v25, %v6175_v48  ;;  %v8968_v35 = vpop.f32.mrb[163].mxu1 }
0x1dbc   :  { %8991 = vmatprep.mubr.msk.bf16.mxu1 %vm1101_vm3, %v6323_v38 }
0x1dbd   :  { %8992 = vmatmul.mubr.msk.bf16.vlgmr.msra.gmra.mrb[152].mxu1 %vm1101_vm3, %v6324_v21 }
0x1dbe   :  { %9012 = vmatpush3.bf16.xpose.msra.mxu1 %v6534_v61 }
0x1dbf   :  { %v6269_v46 = vpop.f32.mrb[164].mxu1  ;;  %9023 = vmatprep.subr.bf16.mxu1 %v10057_v1 }
0x1dc0   :  { %v8979_v16 = vpop.f32.mrb[165].mxu1 }
0x1dc1   :  { %v6272_v54 = vpop.f32.mrb[166].mxu1 }
0x1dc2   :  { %v6325_v49 = vpack.c.bf16 %v6272_v54, %v6269_v46  ;;  %v8980_v23 = vpop.f32.mrb[167].mxu1 }
0x1dc4   :  { %8995 = vmatprep.mubr.msk.bf16.mxu1 %vm1101_vm3, %v6325_v49 }
0x1df2   :  { %v6316_v8 = vpop.f32.mrb[156].mxu0 }
0x1df3   :  { %v8985_v24 = vpop.f32.mrb[157].mxu0 }
0x1df4   :  { %v6319_v41 = vpop.f32.mrb[158].mxu0 }
0x1df5   :  { %v6326_v9 = vpack.c.bf16 %v6319_v41, %v6316_v8  ;;  %v8986_v17 = vpop.f32.mrb[159].mxu0  ;;  %v9713_v41 = vld [vmem:[%s12650_s13 + $0x2] ss:$0 sm:$0xff] }
0x1df7   :  { %8996 = vmatmul.mubr.msk.bf16.gmra.mrb[156].mxu1 %vm1101_vm3, %v6326_v9 }
0x1df8   :  { %9013 = vmatprep.mubr.msk.bf16.mxu1 %vm10058_vm0, %v10057_v1 }
0x1dfa   :  { %v6468_v39 = vpop.f32.mrb[160].mxu0 }
0x1dfb   :  { %v6628_v2 = vmul.f32 0.17677669, %v6468_v39  ;;  %v9003_v6 = vpop.f32.mrb[161].mxu0 }
0x1dfc   :  { %v6471_v19 = vpop.f32.mrb[162].mxu0 }
0x1dfd   :  { %v6636_v43 = vadd.f32 %v9711_v4, %v6628_v2  ;;  %v6629_v20 = vmul.f32 0.17677669, %v6471_v19  ;;  %v9004_v29 = vpop.f32.mrb[163].mxu0  ;;  %v9714_v2 = vld [vmem:[%s12650_s13 + $0x3] ss:$0 sm:$0xff] }
0x1dff   :  { %v6637_v15 = vadd.f32 %v9711_v4, %v6629_v20  ;;  %9014 = vmatmul.mubr.msk.bf16.vlgmr.msra.gmra.mrb[168].mxu1 %vm1101_vm3, %v6527_v7  ;;  %v6644_v33 = vsel %vm1330_vm4, %v6636_v43, -inf }
0x1e00   :  { %6645 = vmax.xlane.f32.xlu0 %v6644_v33  ;;  %9025 = vmatprep.mubr.msk.bf16.mxu1 %vm10058_vm0, %v10057_v1 }
0x1e01   :  { %v6647_v10 = vsel %vm1330_vm4, %v6637_v15, -inf }
0x1e02   :  { %6648 = vmax.xlane.f32.xlu1 %v6647_v10  ;;  %v6519_v32 = vpop.f32.mrb[164].mxu0 }
0x1e03   :  { %v6630_v47 = vmul.f32 0.17677669, %v6519_v32  ;;  %v9009_v58 = vpop.f32.mrb[165].mxu0 }
0x1e04   :  { %v6522_v11 = vpop.f32.mrb[166].mxu0 }
0x1e05   :  { %v6638_v36 = vadd.f32 %v9712_v44, %v6630_v47  ;;  %v6631_v28 = vmul.f32 0.17677669, %v6522_v11  ;;  %v9010_v53 = vpop.f32.mrb[167].mxu0 }
0x1e07   :  { %v6639_v37 = vadd.f32 %v9712_v44, %v6631_v28  ;;  %v6650_v56 = vsel %vm1330_vm4, %v6638_v36, -inf }
0x1e08   :  { %6651 = vmax.xlane.f32.xlu0 %v6650_v56 }
0x1e09   :  { %v6653_v14 = vsel %vm1330_vm4, %v6639_v37, -inf }
0x1e0a   :  { %v6621_v27 = vpop.f32.mrb[168].mxu0 }
0x1e0b   :  { %v9021_v60 = vpop.f32.mrb[169].mxu0  ;;  %v6634_v16 = vmul.f32 0.17677669, %v6621_v27 }
0x1e0c   :  { %6654 = vmax.xlane.f32.xlu0 %v6653_v14  ;;  %v6624_v50 = vpop.f32.mrb[170].mxu0 }
0x1e0d   :  { %v9022_v18 = vpop.f32.mrb[171].mxu0  ;;  %v6635_v24 = vmul.f32 0.17677669, %v6624_v50  ;;  %v6642_v6 = vadd.f32 %v9714_v2, %v6634_v16 }
0x1e0f   :  { %v6662_v29 = vsel %vm1330_vm4, %v6642_v6, -inf }
0x1e8d   :  { %v6646_v31 = vpop.xlane.xlu0 %6645 }
0x1e8e   :  { %v6668_v55 = vsub.f32 %v6636_v43, %v6646_v31  ;;  %v6643_v43 = vadd.f32 %v9714_v2, %v6635_v24 }
0x1e8f   :  { %v6649_v21 = vpop.xlane.xlu1 %6648 }
0x1e90   :  { %v6669_v48 = vsub.f32 %v6637_v15, %v6649_v21  ;;  %v6676_v25 = vmul.f32 1.442695, %v6668_v55  ;;  %v6665_v15 = vsel %vm1330_vm4, %v6643_v43, -inf }
0x1e92   :  { %v6678_v38 = vmul.f32 1.442695, %v6669_v48  ;;  %9615 = vpow2.f32 %v6676_v25 }
0x1e94   :  { %9617 = vpow2.f32 %v6678_v38 }
0x1e95   :  { %v6652_v0 = vpop.xlane.xlu0 %6651 }
0x1e96   :  { %v6670_v52 = vsub.f32 %v6638_v36, %v6652_v0 }
0x1e98   :  { %v6680_v61 = vmul.f32 1.442695, %v6670_v52 }
0x1e99   :  { %v6655_v22 = vpop.xlane.xlu0 %6654 }
0x1e9a   :  { %v6671_v35 = vsub.f32 %v6639_v37, %v6655_v22  ;;  %9619 = vpow2.f32 %v6680_v61 }
0x1e9c   :  { %v6682_v23 = vmul.f32 1.442695, %v6671_v35  ;;  %v12268_v7 = vpop.eup %9615 }
0x1e9d   :  { %v6692_v10 = vsel %vm1330_vm4, %v12268_v7, 0.0 }
0x1e9e   :  { %9621 = vpow2.f32 %v6682_v23  ;;  %v9618_v33 = vpop.eup %9617 }
0x1e9f   :  { %v6695_v47 = vsel %vm1330_vm4, %v9618_v33, 0.0 }
0x1ea4   :  { %v9620_v32 = vpop.eup %9619 }
0x1ea5   :  { %v6698_v11 = vsel %vm1330_vm4, %v9620_v32, 0.0 }
0x1ea8   :  { %v9622_v58 = vpop.eup %9621 }
0x1ea9   :  { %v6701_v44 = vsel %vm1330_vm4, %v9622_v58, 0.0 }
0x1ed2   :  { %v6570_v46 = vpop.f32.mrb[168].mxu1 }
0x1ed3   :  { %v6632_v54 = vmul.f32 0.17677669, %v6570_v46  ;;  %v9015_v49 = vpop.f32.mrb[169].mxu1 }
0x1ed4   :  { %v6573_v8 = vpop.f32.mrb[170].mxu1 }
0x1ed5   :  { %v6640_v9 = vadd.f32 %v9713_v41, %v6632_v54  ;;  %v6633_v17 = vmul.f32 0.17677669, %v6573_v8  ;;  %v9016_v39 = vpop.f32.mrb[171].mxu1 }
0x1ed7   :  { %v6641_v19 = vadd.f32 %v9713_v41, %v6633_v17  ;;  %v6656_v4 = vsel %vm1330_vm4, %v6640_v9, -inf }
0x1ed8   :  { %6657 = vmax.xlane.f32.xlu0 %v6656_v4 }
0x1ed9   :  { %v6659_v20 = vsel %vm1330_vm4, %v6641_v19, -inf }
0x1eda   :  { %6660 = vmax.xlane.f32.xlu1 %v6659_v20 }
0x1edc   :  { %6663 = vmax.xlane.f32.xlu0 %v6662_v29 }
0x1ede   :  { %6666 = vmax.xlane.f32.xlu1 %v6665_v15 }
0x1ee0   :  { %6693 = vadd.xlane.f32.xlu0 %v6692_v10 }
0x1ee2   :  { %6696 = vadd.xlane.f32.xlu1 %v6695_v47 }
0x1ee4   :  { %6699 = vadd.xlane.f32.xlu0 %v6698_v11 }
0x1ee6   :  { %6702 = vadd.xlane.f32.xlu1 %v6701_v44  ;;  %v9265_v44 = vld [vmem:[%s12653_s16 + $0x70] sm:$0xff]  }
0x1f65   :  { %v6658_v36 = vpop.xlane.xlu0 %6657 }
0x1f66   :  { %v6672_v28 = vsub.f32 %v6640_v9, %v6658_v36  ;;  %v9266_v36 = vld [vmem:[%s12653_s16 + $0x78] sm:$0xff]  }
0x1f67   :  { %v6661_v53 = vpop.xlane.xlu1 %6660 }
0x1f68   :  { %v6684_v27 = vmul.f32 1.442695, %v6672_v28  ;;  %v6673_v25 = vsub.f32 %v6641_v19, %v6661_v53 }
0x1f69   :  { %v6664_v37 = vpop.xlane.xlu0 %6663 }
0x1f6a   :  { %v6674_v56 = vsub.f32 %v6642_v6, %v6664_v37  ;;  %v6686_v52 = vmul.f32 1.442695, %v6673_v25 }
0x1f6b   :  { %v6667_v60 = vpop.xlane.xlu1 %6666 }
0x1f6c   :  { %v6688_v14 = vmul.f32 1.442695, %v6674_v56  ;;  %v6675_v50 = vsub.f32 %v6643_v43, %v6667_v60 }
0x1f6d   :  { %v6694_v46 = vpop.xlane.xlu0 %6693 }
0x1f6e   :  { %9623 = vpow2.f32 %v6688_v14  ;;  %v6690_v18 = vmul.f32 1.442695, %v6675_v50 }
0x1f6f   :  { %9625 = vpow2.f32 %v6684_v27  ;;  %v6697_v61 = vpop.xlane.xlu1 %6696 }
0x1f70   :  { %9627 = vpow2.f32 %v6690_v18 }
0x1f71   :  { %9629 = vpow2.f32 %v6686_v52 }
0x1f73   :  { %v6703_v16 = vpop.xlane.xlu1 %6702 }
0x1f74   :  { %9631 = vrcp.f32 %v6703_v16 }
0x1f75   :  { %9633 = vrcp.f32 %v6697_v61 }
0x1f78   :  { %v9624_v31 = vpop.eup %9623 }
0x1f79   :  { %v12276_v0 = vpop.eup %9625  ;;  %v6710_v21 = vsel %vm1330_vm4, %v9624_v31, 0.0 }
0x1f7a   :  { %v9628_v55 = vpop.eup %9627  ;;  %6711 = vadd.xlane.f32.xlu0 %v6710_v21  ;;  %v6704_v22 = vsel %vm1330_vm4, %v12276_v0, 0.0 }
0x1f7b   :  { %v6713_v48 = vsel %vm1330_vm4, %v9628_v55, 0.0  ;;  %v9630_v38 = vpop.eup %9629 }
0x1f7c   :  { %6714 = vadd.xlane.f32.xlu1 %v6713_v48  ;;  %v6707_v35 = vsel %vm1330_vm4, %v9630_v38, 0.0 }
0x1f7e   :  { %6705 = vadd.xlane.f32.xlu0 %v6704_v22 }
0x1f8d   :  { %6783 = vrot.lane.b32.xlu1 %v11760_v34, %s10062_s19  ;;  %v6700_v34 = vpop.xlane.xlu0 %6699 }
0x1f8e   :  { %9635 = vrcp.f32 %v6700_v34 }
0x1f8f   :  { %9637 = vrcp.f32 %v6694_v46  ;;  %v8104_v46 = vld [vmem:[%s12654_s17 + $0x1] ss:$0 sm:$0xff] }
0x1f91   :  { %6830 = vrot.lane.b32.xlu1 %v11798_v42, %s10062_s19 }
0x1f94   :  { %6736 = vrot.lane.b32.xlu0 %v11764_v57, %s10062_s19  ;;  %v9632_v57 = vpop.eup %9631 }
0x1f95   :  { %v9634_v54 = vpop.eup %9633  ;;  %v6727_v8 = vmul.f32 %v9632_v57, %v9622_v58 }
0x1f96   :  { %v6725_v9 = vmul.f32 %v9634_v54, %v9618_v33 }
0x1f98   :  { %v9636_v23 = vpop.eup %9635 }
0x1f99   :  { %v9638_v41 = vpop.eup %9637  ;;  %v6726_v17 = vmul.f32 %v9636_v23, %v9620_v32 }
0x1f9b   :  { %v6733_v6 = vpack.c.bf16 %v6727_v8, %v6726_v17 }
0x1fb5   :  { %6708 = vadd.xlane.f32.xlu1 %v6707_v35 }
0x1fc6   :  { %6877 = vrot.lane.b32.xlu1 %v11794_v45, %s10062_s19  ;;  %v6724_v45 = vmul.f32 %v9638_v41, %v12268_v7 }
0x1fc8   :  { %v6732_v19 = vpack.c.bf16 %v6725_v9, %v6724_v45 }
0x2007   :  { %v6712_v42 = vpop.xlane.xlu0 %6711 }
0x2009   :  { %v6715_v49 = vpop.xlane.xlu1 %6714 }
0x200a   :  { %9639 = vrcp.f32 %v6715_v49 }
0x200b   :  { %v6706_v24 = vpop.xlane.xlu0 %6705  ;;  %9641 = vrcp.f32 %v6712_v42 }
0x200c   :  { %9643 = vrcp.f32 %v6706_v24 }
0x200d   :  { %v6784_v39 = vpop.permute.xlu1 %6783 }
0x200e   :  { %9030 = vmatpush3.bf16.msra.mxu0 %v6784_v39 }
0x200f   :  { %v6737_v2 = vpop.permute.xlu0 %6736  ;;  %9041 = vmatprep.subr.bf16.mxu0 %v10057_v1 }
0x2010   :  { %9024 = vmatpush3.bf16.msra.mxu1 %v6737_v2 }
0x2011   :  { %9032 = vmatmul.mubr.msk.bf16.vlgmr.msra.gmra.mrb[172].mxu0 %vm1330_vm4, %v6733_v6  ;;  %9035 = vmatprep.subr.bf16.mxu1 %v10057_v1  ;;  %v6831_v4 = vpop.permute.xlu1 %6830 }
0x2012   :  { %9043 = vmatprep.mubr.msk.bf16.mxu0 %vm10058_vm0, %v10057_v1 }
0x2013   :  { %9026 = vmatmul.mubr.msk.bf16.vlgmr.msra.gmra.mrb[172].mxu1 %vm1330_vm4, %v6732_v19 }
0x2014   :  { %9036 = vmatpush3.bf16.msra.mxu1 %v6831_v4  ;;  %9037 = vmatprep.mubr.msk.bf16.mxu1 %vm10058_vm0, %v10057_v1  ;;  %v9640_v43 = vpop.eup %9639 }
0x2015   :  { %v9642_v29 = vpop.eup %9641  ;;  %v6731_v7 = vmul.f32 %v9640_v43, %v9628_v55  ;;  %9047 = vmatprep.subr.bf16.mxu1 %v9265_v44 }
0x2016   :  { %v6730_v15 = vmul.f32 %v9642_v29, %v9624_v31  ;;  %v9644_v32 = vpop.eup %9643 }
0x2017   :  { %v6728_v1 = vmul.f32 %v9644_v32, %v12276_v0 }
0x2018   :  { %v6735_v10 = vpack.c.bf16 %v6731_v7, %v6730_v15 }
0x2042   :  { %v6709_v20 = vpop.xlane.xlu1 %6708 }
0x2043   :  { %9645 = vrcp.f32 %v6709_v20 }
0x2046   :  { %v6878_v33 = vpop.permute.xlu1 %6877 }
0x2047   :  { %9042 = vmatpush3.bf16.msra.mxu0 %v6878_v33 }
0x204a   :  { %9044 = vmatmul.mubr.msk.bf16.vlgmr.msra.gmra.mrb[176].mxu0 %vm1330_vm4, %v6735_v10 }
0x204b   :  { %7315 = vmatprep.mubr.bf16.mxu0 %v12712_v63 }
0x204d   :  { %v9646_v47 = vpop.eup %9645 }
0x204e   :  { %v6729_v58 = vmul.f32 %v9646_v47, %v9630_v38 }
0x2050   :  { %v6734_v11 = vpack.c.bf16 %v6729_v58, %v6728_v1 }
0x2052   :  { %9038 = vmatmul.mubr.msk.bf16.vlgmr.msra.gmra.mrb[176].mxu1 %vm1330_vm4, %v6734_v11 }
0x2053   :  { %9048 = vmatpush3.bf16.msra.mxu1 %v9265_v44 }
0x2054   :  { %9049 = vmatprep.subr.bf16.mxu1 %v9266_v36 }
0x2057   :  { %9050 = vmatpush3.bf16.msra.mxu1 %v9266_v36 }
0x20e4   :  { %v6823_v28 = vpop.f32.mrb[172].mxu0 }
0x20e5   :  { %v9033_v53 = vpop.f32.mrb[173].mxu0 }
0x20e6   :  { %v6776_v37 = vpop.f32.mrb[172].mxu1  ;;  %v6826_v56 = vpop.f32.mrb[174].mxu0 }
0x20e7   :  { %v6925_v27 = vpack.c.bf16 %v6826_v56, %v6823_v28  ;;  %v9027_v60 = vpop.f32.mrb[173].mxu1  ;;  %v9034_v14 = vpop.f32.mrb[175].mxu0 }
0x20e8   :  { %v6779_v50 = vpop.f32.mrb[174].mxu1  ;;  %v9273_v60 = vld [vmem:[%s12657_s20 + $0xa0] ss:$8 sps:$4 sm:$0xff]   ;;  %v9278_v14 = vld [vmem:[%s12657_s20 + $0xb4] ss:$8 sps:$4 sm:$0xff]  }
0x20e9   :  { %v6924_v18 = vpack.c.bf16 %v6779_v50, %v6776_v37  ;;  %v9028_v31 = vpop.f32.mrb[175].mxu1  ;;  %v9276_v50 = vld [vmem:[%s12657_s20 + $0xb0] ss:$8 sps:$4 sm:$0xff]  }
0x20ea   :  { %v9279_v31 = vld [vmem:[%s12657_s20 + $0xc0] ss:$8 sps:$4 sm:$0xff]  }
0x20eb   :  { %9051 = vmatprep.mubr.msk.bf16.mxu1 %vm1101_vm3, %v6924_v18  ;;  %v9281_v18 = vld [vmem:[%s12657_s20 + $0xc4] ss:$8 sps:$4 sm:$0xff]  }
0x20ec   :  { %9052 = vmatmul.mubr.msk.bf16.vlgmr.msra.gmra.mrb[152].mxu1 %vm1101_vm3, %v6925_v27  ;;  %v9275_v27 = vld [vmem:[%s12657_s20 + $0xa4] ss:$8 sps:$4 sm:$0xff]  }
0x211d   :  { %v6917_v0 = vpop.f32.mrb[176].mxu0 }
0x211e   :  { %v9045_v21 = vpop.f32.mrb[177].mxu0 }
0x211f   :  { %v6920_v55 = vpop.f32.mrb[178].mxu0  ;;  %v9282_v21 = vld [vmem:[%s12657_s20 + $0xd0] ss:$8 sps:$4 sm:$0xff]  }
0x2120   :  { %v6927_v48 = vpack.c.bf16 %v6920_v55, %v6917_v0  ;;  %v9046_v22 = vpop.f32.mrb[179].mxu0  ;;  %v9284_v0 = vld [vmem:[%s12657_s20 + $0xd4] ss:$8 sps:$4 sm:$0xff]   ;;  %v9287_v55 = vld [vmem:[%s12657_s20 + $0xe4] ss:$8 sps:$4 sm:$0xff]  }
0x2121   :  { %v9290_v22 = vld [vmem:[%s12657_s20 + $0xf4] ss:$8 sps:$4 sm:$0xff]  }
0x2125   :  { %v6870_v25 = vpop.f32.mrb[176].mxu1 }
0x2126   :  { %v9039_v52 = vpop.f32.mrb[177].mxu1 }
0x2127   :  { %v6873_v38 = vpop.f32.mrb[178].mxu1 }
0x2128   :  { %v6926_v35 = vpack.c.bf16 %v6873_v38, %v6870_v25  ;;  %v9040_v61 = vpop.f32.mrb[179].mxu1  ;;  %v9288_v25 = vld [vmem:[%s12657_s20 + $0xf0] ss:$8 sps:$4 sm:$0xff]  }
0x212a   :  { %9055 = vmatprep.mubr.msk.bf16.mxu1 %vm1101_vm3, %v6926_v35 }
0x212b   :  { %9056 = vmatmul.mubr.msk.bf16.gmra.mrb[156].mxu1 %vm1101_vm3, %v6927_v48  ;;  %v9285_v48 = vld [vmem:[%s12657_s20 + $0xe0] ss:$8 sps:$4 sm:$0xff]  }
0x21bf   :  { %v9053_v16 = vpop.f32.mrb[152].mxu1 }
0x21c0   :  { %v6986_v34 = vpop.f32.mrb[153].mxu1  ;;  %v7035_v49 = vadd.f32 %v9053_v16, %v8104_v46 }
0x21c1   :  { %v7033_v42 = vadd.f32 %v8104_v46, %v6986_v34  ;;  %v9054_v57 = vpop.f32.mrb[154].mxu1 }
0x21c2   :  { %v6989_v54 = vpop.f32.mrb[155].mxu1  ;;  %v7043_v41 = vadd.f32 %v7035_v49, %v11704_v59  ;;  %v7036_v9 = vadd.f32 %v9054_v57, %v8104_v46 }
0x21c3   :  { %v7041_v23 = vadd.f32 %v7033_v42, %v11695_v40  ;;  %v7034_v8 = vadd.f32 %v8104_v46, %v6989_v54 }
0x21c4   :  { %v7044_v17 = vadd.f32 %v7036_v9, %v11706_v62 }
0x21c5   :  { %v7042_v24 = vadd.f32 %v7034_v8, %v11697_v3  ;;  %7053 = vadd.xlane.f32.xlu0 %v7041_v23 }
0x21c7   :  { %7055 = vadd.xlane.f32.xlu1 %v7042_v24 }
0x21c9   :  { %7057 = vadd.xlane.f32.xlu0 %v7043_v41 }
0x21cd   :  { %7059 = vadd.xlane.f32.xlu0 %v7044_v17 }
0x21fe   :  { %v9057_v39 = vpop.f32.mrb[156].mxu1 }
0x21ff   :  { %v7002_v45 = vpop.f32.mrb[157].mxu1  ;;  %v7039_v4 = vadd.f32 %v9057_v39, %v8104_v46 }
0x2200   :  { %v7037_v2 = vadd.f32 %v8104_v46, %v7002_v45  ;;  %v9058_v6 = vpop.f32.mrb[158].mxu1 }
0x2201   :  { %v7005_v19 = vpop.f32.mrb[159].mxu1  ;;  %v7040_v3 = vadd.f32 %v9058_v6, %v8104_v46  ;;  %v12329_v59 = vadd.f32 %v7039_v4, %v11722_v26  ;;  %v9272_v26 = vld [vmem:[%s12657_s20 + $0x94] ss:$8 sps:$4 sm:$0xff]  }
0x2202   :  { %v12322_v40 = vadd.f32 %v7037_v2, %v11713_v30  ;;  %v7038_v43 = vadd.f32 %v8104_v46, %v7005_v19  ;;  %v9267_v30 = vld [vmem:[%s12657_s20 + $0x80] ss:$8 sps:$4 sm:$0xff]  }
0x2203   :  { %v12333_v62 = vadd.f32 %v7040_v3, %v11724_v13  ;;  %v9270_v13 = vld [vmem:[%s12657_s20 + $0x90] ss:$8 sps:$4 sm:$0xff]  }
0x2204   :  { %v12325_v20 = vadd.f32 %v7038_v43, %v11715_v5  ;;  %7061 = vadd.xlane.f32.xlu0 %v12322_v40  ;;  %v9269_v5 = vld [vmem:[%s12657_s20 + $0x84] ss:$8 sps:$4 sm:$0xff]  }
0x2205   :  { %7283 = vmatprep.subr.bf16.mxu0 %v9269_v5 }
0x2206   :  { %7063 = vadd.xlane.f32.xlu1 %v12325_v20  ;;  %7284 = vmatpush1.bf16.msra.mxu0 %v9267_v30  ;;  %v8105_v30 = vld [vmem:[#allocation16 + $0x1] ss:$0 sm:$0xff] }
0x2207   :  { %7285 = vmatprep.subr.bf16.mxu0 %v9272_v26 }
0x2208   :  { %7065 = vadd.xlane.f32.xlu0 %v12329_v59 }
0x220a   :  { %7067 = vadd.xlane.f32.xlu1 %v12333_v62  ;;  %7286 = vmatpush1.bf16.msra.mxu0 %v9270_v13 }
0x220b   :  { %7287 = vmatprep.subr.bf16.mxu0 %v9275_v27 }
0x220e   :  { %7288 = vmatpush1.bf16.msra.mxu0 %v9273_v60 }
0x220f   :  { %7289 = vmatprep.subr.bf16.mxu0 %v9278_v14 }
0x2212   :  { %7290 = vmatpush1.bf16.msra.mxu0 %v9276_v50 }
0x2213   :  { %7291 = vmatprep.subr.bf16.mxu0 %v9281_v18 }
0x2216   :  { %7292 = vmatpush1.bf16.msra.mxu0 %v9279_v31 }
0x2217   :  { %7293 = vmatprep.subr.bf16.mxu0 %v9284_v0 }
0x221a   :  { %7294 = vmatpush1.bf16.msra.mxu0 %v9282_v21 }
0x221b   :  { %7295 = vmatprep.subr.bf16.mxu0 %v9287_v55 }
0x221e   :  { %7296 = vmatpush1.bf16.msra.mxu0 %v9285_v48 }
0x221f   :  { %7297 = vmatprep.subr.bf16.mxu0 %v9290_v22 }
0x2222   :  { %7298 = vmatpush1.bf16.msra.mxu0 %v9288_v25 }
0x2252   :  { %v7054_v29 = vpop.xlane.xlu0 %7053 }
0x2253   :  { %v7069_v7 = vmul.f32 0.0078125, %v7054_v29 }
0x2254   :  { %v7056_v15 = vpop.xlane.xlu1 %7055 }
0x2255   :  { %v12349_v33 = vsub.f32 %v7041_v23, %v7069_v7  ;;  %v7070_v10 = vmul.f32 0.0078125, %v7056_v15  ;;  %v8106_v15 = vld [vmem:[#allocation17 + $0x1] ss:$0 sm:$0xff] }
0x2256   :  { %v7058_v32 = vpop.xlane.xlu0 %7057 }
0x2257   :  { %v12351_v47 = vsub.f32 %v7042_v24, %v7070_v10  ;;  %v7071_v1 = vmul.f32 0.0078125, %v7058_v32  ;;  %v7085_v58 = vmul.f32 %v12349_v33, %v12349_v33 }
0x2259   :  { %v12355_v11 = vsub.f32 %v7043_v41, %v7071_v1  ;;  %7093 = vadd.xlane.f32.xlu0 %v7085_v58  ;;  %v7086_v44 = vmul.f32 %v12351_v47, %v12351_v47 }
0x225a   :  { %v7060_v36 = vpop.xlane.xlu0 %7059 }
0x225b   :  { %v7072_v28 = vmul.f32 0.0078125, %v7060_v36  ;;  %7095 = vadd.xlane.f32.xlu1 %v7086_v44  ;;  %v7087_v53 = vmul.f32 %v12355_v11, %v12355_v11 }
0x225d   :  { %v12361_v37 = vsub.f32 %v7044_v17, %v7072_v28  ;;  %7097 = vadd.xlane.f32.xlu0 %v7087_v53 }
0x225f   :  { %v7088_v56 = vmul.f32 %v12361_v37, %v12361_v37 }
0x2261   :  { %7099 = vadd.xlane.f32.xlu1 %v7088_v56 }
0x2291   :  { %v7062_v52 = vpop.xlane.xlu0 %7061 }
0x2292   :  { %v7073_v38 = vmul.f32 0.0078125, %v7062_v52 }
0x2293   :  { %v7064_v35 = vpop.xlane.xlu1 %7063 }
0x2294   :  { %v12402_v61 = vsub.f32 %v12322_v40, %v7073_v38  ;;  %v7074_v46 = vmul.f32 0.0078125, %v7064_v35 }
0x2295   :  { %v7066_v16 = vpop.xlane.xlu0 %7065 }
0x2296   :  { %v12405_v34 = vsub.f32 %v12325_v20, %v7074_v46  ;;  %v7075_v42 = vmul.f32 0.0078125, %v7066_v16  ;;  %v7089_v57 = vmul.f32 %v12402_v61, %v12402_v61 }
0x2297   :  { %v7068_v54 = vpop.xlane.xlu1 %7067 }
0x2298   :  { %v12410_v49 = vsub.f32 %v12329_v59, %v7075_v42  ;;  %v7076_v23 = vmul.f32 0.0078125, %v7068_v54  ;;  %7101 = vadd.xlane.f32.xlu0 %v7089_v57  ;;  %v7090_v8 = vmul.f32 %v12405_v34, %v12405_v34 }
0x229a   :  { %v12415_v24 = vsub.f32 %v12333_v62, %v7076_v23  ;;  %7103 = vadd.xlane.f32.xlu1 %v7090_v8  ;;  %v7091_v41 = vmul.f32 %v12410_v49, %v12410_v49 }
0x229c   :  { %7105 = vadd.xlane.f32.xlu0 %v7091_v41  ;;  %v7092_v9 = vmul.f32 %v12415_v24, %v12415_v24 }
0x229e   :  { %7107 = vadd.xlane.f32.xlu1 %v7092_v9 }
0x22e6   :  { %v7094_v17 = vpop.xlane.xlu0 %7093 }
0x22e7   :  { %v7109_v39 = vmul.f32 0.0078125, %v7094_v17 }
0x22e8   :  { %v7096_v45 = vpop.xlane.xlu1 %7095 }
0x22e9   :  { %v7117_v2 = vadd.f32 1e-12, %v7109_v39  ;;  %v7110_v6 = vmul.f32 0.0078125, %v7096_v45 }
0x22ea   :  { %v7098_v19 = vpop.xlane.xlu0 %7097 }
0x22eb   :  { %9647 = vrsqrt.f32 %v7117_v2  ;;  %v7118_v4 = vadd.f32 1e-12, %v7110_v6  ;;  %v7111_v40 = vmul.f32 0.0078125, %v7098_v19  ;;  %v9291_v2 = vld [vmem:[%s12659_s22 + $0xc0] sm:$0xff]   ;;  %v9295_v6 = vld [vmem:[%s12659_s22 + $0xd0] sm:$0xff]  }
0x22ec   :  { %8451 = vmatprep.subr.bf16.mxu1 %v9291_v2  ;;  %v9296_v19 = vld [vmem:[%s12659_s22 + $0x90] sm:$0xff]  }
0x22ed   :  { %9649 = vrsqrt.f32 %v7118_v4  ;;  %v7119_v43 = vadd.f32 1e-12, %v7111_v40  ;;  %v9297_v4 = vld [vmem:[%s12659_s22 + $0xd8] sm:$0xff]  }
0x22ee   :  { %v7100_v3 = vpop.xlane.xlu1 %7099  ;;  %v9298_v40 = vld [vmem:[%s12659_s22 + $0x98] sm:$0xff]  }
0x22ef   :  { %9651 = vrsqrt.f32 %v7119_v43  ;;  %v7112_v20 = vmul.f32 0.0078125, %v7100_v3  ;;  %v9299_v43 = vld [vmem:[%s12659_s22 + $0xe0] sm:$0xff]  }
0x22f0   :  { %v9300_v3 = vld [vmem:[%s12659_s22 + $0xa0] sm:$0xff]  }
0x22f1   :  { %v7120_v59 = vadd.f32 1e-12, %v7112_v20  ;;  %v9301_v20 = vld [vmem:[%s12659_s22 + $0xe8] sm:$0xff]  }
0x22f3   :  { %9653 = vrsqrt.f32 %v7120_v59  ;;  %v9302_v59 = vld [vmem:[%s12659_s22 + $0xa8] sm:$0xff]  }
0x22f5   :  { %v9648_v62 = vpop.eup %9647 }
0x22f6   :  { %v7133_v5 = vmul.f32 %v9648_v62, %v12349_v33  ;;  %v9303_v62 = vld [vmem:[%s12659_s22 + $0xf0] sm:$0xff]  }
0x22f7   :  { %v9650_v26 = vpop.eup %9649 }
0x22f8   :  { %v7134_v13 = vmul.f32 %v9650_v26, %v12351_v47  ;;  %v7147_v29 = vmul.f32 %v8105_v30, %v7133_v5  ;;  %v9305_v5 = vld [vmem:[%s12659_s22 + $0xf8] sm:$0xff]  }
0x22f9   :  { %v9652_v7 = vpop.eup %9651  ;;  %v9306_v26 = vld [vmem:[%s12659_s22 + $0xb8] sm:$0xff]  }
0x22fa   :  { %v7148_v10 = vmul.f32 %v8105_v30, %v7134_v13  ;;  %v12423_v32 = vadd.f32 %v8106_v15, %v7147_v29  ;;  %v7135_v58 = vmul.f32 %v9652_v7, %v12355_v11  ;;  %v8123_v13 = vld [vmem:[%s12658_s21 + $0x2] sm:$0x3] }
0x22fb   :  { %v12496_v29 = vrot.slane %v8123_v13, %v10606_v12  ;;  %v12499_v7 = vrot.slane %v8123_v13, %v10650_v51 }
0x22fc   :  { %v7162_v1 = vadd.f32 %v8106_v15, %v7148_v10  ;;  %v7149_v53 = vmul.f32 %v8105_v30, %v7135_v58 }
0x22fd   :  { %v9654_v44 = vpop.eup %9653 }
0x22fe   :  { %v7169_v36 = vpack.c.bf16 %v7162_v1, %v12423_v32  ;;  %v7136_v28 = vmul.f32 %v9654_v44, %v12361_v37  ;;  %v12429_v56 = vadd.f32 %v8106_v15, %v7149_v53 }
0x2300   :  { %7316 = vmatmul.mubr.bf16.vlgmr.msra.gmra.mrb[180].mxu0 %v7169_v36  ;;  %v7150_v33 = vmul.f32 %v8105_v30, %v7136_v28 }
0x2301   :  { %7325 = vmatprep.mubr.bf16.mxu0 %v12712_v63 }
0x2302   :  { %v7164_v47 = vadd.f32 %v8106_v15, %v7150_v33 }
0x2304   :  { %v7170_v27 = vpack.c.bf16 %v7164_v47, %v12429_v56 }
0x2308   :  { %7326 = vmatmul.mubr.bf16.gmra.mrb[184].mxu0 %v7170_v27 }
0x2309   :  { %7335 = vmatprep.mubr.bf16.mxu0 %v12712_v63 }
0x2325   :  { %v7102_v60 = vpop.xlane.xlu0 %7101 }
0x2326   :  { %v7113_v11 = vmul.f32 0.0078125, %v7102_v60 }
0x2327   :  { %v7104_v14 = vpop.xlane.xlu1 %7103 }
0x2328   :  { %v7121_v50 = vadd.f32 1e-12, %v7113_v11  ;;  %v7114_v18 = vmul.f32 0.0078125, %v7104_v14 }
0x2329   :  { %v7106_v31 = vpop.xlane.xlu0 %7105 }
0x232a   :  { %9655 = vrsqrt.f32 %v7121_v50  ;;  %v7122_v37 = vadd.f32 1e-12, %v7114_v18  ;;  %v7115_v0 = vmul.f32 0.0078125, %v7106_v31 }
0x232b   :  { %v7108_v21 = vpop.xlane.xlu1 %7107 }
0x232c   :  { %9657 = vrsqrt.f32 %v7122_v37  ;;  %v7123_v55 = vadd.f32 1e-12, %v7115_v0  ;;  %v7116_v48 = vmul.f32 0.0078125, %v7108_v21 }
0x232e   :  { %9659 = vrsqrt.f32 %v7123_v55  ;;  %v7124_v22 = vadd.f32 1e-12, %v7116_v48 }
0x2330   :  { %9661 = vrsqrt.f32 %v7124_v22 }
0x2334   :  { %v9656_v25 = vpop.eup %9655 }
0x2335   :  { %v7137_v52 = vmul.f32 %v9656_v25, %v12402_v61 }
0x2336   :  { %v9658_v38 = vpop.eup %9657 }
0x2337   :  { %v7138_v35 = vmul.f32 %v9658_v38, %v12405_v34  ;;  %v7151_v46 = vmul.f32 %v8105_v30, %v7137_v52 }
0x2338   :  { %v9660_v16 = vpop.eup %9659 }
0x2339   :  { %v7152_v42 = vmul.f32 %v8105_v30, %v7138_v35  ;;  %v12435_v54 = vadd.f32 %v8106_v15, %v7151_v46  ;;  %v7139_v8 = vmul.f32 %v9660_v16, %v12410_v49  ;;  %v9292_v49 = vld [vmem:[%s12659_s22 + $0x80] sm:$0xff]  }
0x233a   :  { %v9662_v57 = vpop.eup %9661  ;;  %8452 = vmatpush3.bf16.msra.mxu1 %v9292_v49 }
0x233b   :  { %v7166_v23 = vadd.f32 %v8106_v15, %v7152_v42  ;;  %v7140_v41 = vmul.f32 %v9662_v57, %v12415_v24  ;;  %v7153_v39 = vmul.f32 %v8105_v30, %v7139_v8  ;;  %v9294_v24 = vld [vmem:[%s12659_s22 + $0x88] sm:$0xff]  }
0x233d   :  { %v7171_v9 = vpack.c.bf16 %v7166_v23, %v12435_v54  ;;  %v7154_v17 = vmul.f32 %v8105_v30, %v7140_v41  ;;  %v12441_v34 = vadd.f32 %v8106_v15, %v7153_v39  ;;  %v9304_v30 = vld [vmem:[%s12659_s22 + $0xb0] sm:$0xff]  }
0x233f   :  { %7336 = vmatmul.mubr.bf16.gmra.mrb[188].mxu0 %v7171_v9  ;;  %v7168_v61 = vadd.f32 %v8106_v15, %v7154_v17 }
0x2340   :  { %7345 = vmatprep.mubr.bf16.mxu0 %v12712_v63  ;;  %v9293_v63 = vld [vmem:[%s12659_s22 + $0xc8] sm:$0xff]  }
0x2341   :  { %v7172_v45 = vpack.c.bf16 %v7168_v61, %v12441_v34  ;;  %8453 = vmatprep.subr.bf16.mxu1 %v9293_v63 }
0x2342   :  { %8454 = vmatpush3.bf16.msra.mxu1 %v9294_v24 }
0x2343   :  { %8455 = vmatprep.subr.bf16.mxu1 %v9295_v6 }
0x2346   :  { %8456 = vmatpush3.bf16.msra.mxu1 %v9296_v19 }
0x2347   :  { %7346 = vmatmul.mubr.bf16.gmra.mrb[192].mxu0 %v7172_v45  ;;  %8457 = vmatprep.subr.bf16.mxu1 %v9297_v4 }
0x234a   :  { %8458 = vmatpush3.bf16.msra.mxu1 %v9298_v40 }
0x234b   :  { %8459 = vmatprep.subr.bf16.mxu1 %v9299_v43 }
0x234e   :  { %8460 = vmatpush3.bf16.msra.mxu1 %v9300_v3 }
0x234f   :  { %8461 = vmatprep.subr.bf16.mxu1 %v9301_v20 }
0x2352   :  { %8462 = vmatpush3.bf16.msra.mxu1 %v9302_v59 }
0x2353   :  { %8463 = vmatprep.subr.bf16.mxu1 %v9303_v62 }
0x2356   :  { %8464 = vmatpush3.bf16.msra.mxu1 %v9304_v30 }
0x2357   :  { %8465 = vmatprep.subr.bf16.mxu1 %v9305_v5 }
0x235a   :  { %8466 = vmatpush3.bf16.msra.mxu1 %v9306_v26 }
0x23d3   :  { %v7317_v15 = vpop.f32.mrb[180].mxu0 }
0x23d4   :  { %v12502_v10 = vadd.f32 %v7317_v15, %v12496_v29  ;;  %v7319_v1 = vpop.f32.mrb[181].mxu0 }
0x23d5   :  { %v12505_v58 = vadd.f32 %v7319_v1, %v12499_v7  ;;  %v7321_v44 = vpop.f32.mrb[182].mxu0 }
0x23d6   :  { %v7356_v36 = vmul.f32 %v12502_v10, %v12502_v10  ;;  %v12510_v28 = vadd.f32 %v7321_v44, %v12496_v29  ;;  %v7323_v12 = vpop.f32.mrb[183].mxu0 }
0x23d7   :  { %v7357_v51 = vmul.f32 %v12505_v58, %v12505_v58  ;;  %v12515_v53 = vadd.f32 %v7323_v12, %v12499_v7 }
0x23d8   :  { %v7372_v33 = vmul.f32 %v7356_v36, %v12502_v10  ;;  %v7358_v47 = vmul.f32 %v12510_v28, %v12510_v28 }
0x23d9   :  { %v7373_v27 = vmul.f32 %v7357_v51, %v12505_v58  ;;  %v7359_v60 = vmul.f32 %v12515_v53, %v12515_v53 }
0x23da   :  { %v7388_v11 = vmul.f32 0.044715, %v7372_v33  ;;  %v7374_v14 = vmul.f32 %v7358_v47, %v12510_v28 }
0x23db   :  { %v7389_v50 = vmul.f32 0.044715, %v7373_v27  ;;  %v7375_v18 = vmul.f32 %v7359_v60, %v12515_v53  ;;  %v7327_v31 = vpop.f32.mrb[184].mxu0 }
0x23dc   :  { %v7404_v37 = vadd.f32 %v7388_v11, %v12502_v10  ;;  %v7390_v0 = vmul.f32 0.044715, %v7374_v14  ;;  %v12527_v21 = vadd.f32 %v7327_v31, %v12496_v29  ;;  %v7329_v55 = vpop.f32.mrb[185].mxu0 }
0x23dd   :  { %v7405_v48 = vadd.f32 %v7389_v50, %v12505_v58  ;;  %v7391_v22 = vmul.f32 0.044715, %v7375_v18  ;;  %v12531_v25 = vadd.f32 %v7329_v55, %v12499_v7  ;;  %v7331_v52 = vpop.f32.mrb[186].mxu0 }
0x23de   :  { %v7420_v38 = vmul.f32 0.7978846, %v7404_v37  ;;  %v7406_v35 = vadd.f32 %v7390_v0, %v12510_v28  ;;  %v7360_v46 = vmul.f32 %v12527_v21, %v12527_v21  ;;  %v12537_v16 = vadd.f32 %v7331_v52, %v12496_v29  ;;  %v7333_v42 = vpop.f32.mrb[187].mxu0 }
0x23df   :  { %v7421_v57 = vmul.f32 0.7978846, %v7405_v48  ;;  %v7407_v23 = vadd.f32 %v7391_v22, %v12515_v53  ;;  %v7361_v8 = vmul.f32 %v12531_v25, %v12531_v25  ;;  %v12543_v41 = vadd.f32 %v7333_v42, %v12499_v7 }
0x23e0   :  { %9663 = vtanh.f32 %v7420_v38  ;;  %v7422_v9 = vmul.f32 0.7978846, %v7406_v35  ;;  %v7376_v17 = vmul.f32 %v7360_v46, %v12527_v21  ;;  %v7362_v39 = vmul.f32 %v12537_v16, %v12537_v16 }
0x23e1   :  { %9665 = vtanh.f32 %v7421_v57  ;;  %v7423_v61 = vmul.f32 0.7978846, %v7407_v23  ;;  %v7377_v45 = vmul.f32 %v7361_v8, %v12531_v25  ;;  %v7363_v2 = vmul.f32 %v12543_v41, %v12543_v41 }
0x23e2   :  { %9667 = vtanh.f32 %v7422_v9  ;;  %v7392_v49 = vmul.f32 0.044715, %v7376_v17  ;;  %v7378_v63 = vmul.f32 %v7362_v39, %v12537_v16 }
0x23e3   :  { %9669 = vtanh.f32 %v7423_v61  ;;  %v7393_v24 = vmul.f32 0.044715, %v7377_v45  ;;  %v7379_v6 = vmul.f32 %v7363_v2, %v12543_v41 }
0x23e4   :  { %v7408_v19 = vadd.f32 %v7392_v49, %v12527_v21  ;;  %v7394_v4 = vmul.f32 0.044715, %v7378_v63 }
0x23e5   :  { %v7409_v40 = vadd.f32 %v7393_v24, %v12531_v25  ;;  %v7395_v43 = vmul.f32 0.044715, %v7379_v6 }
0x23e6   :  { %v7424_v3 = vmul.f32 0.7978846, %v7408_v19  ;;  %v7410_v20 = vadd.f32 %v7394_v4, %v12537_v16 }
0x23e7   :  { %v7425_v59 = vmul.f32 0.7978846, %v7409_v40  ;;  %v7411_v62 = vadd.f32 %v7395_v43, %v12543_v41 }
0x23e8   :  { %9671 = vtanh.f32 %v7424_v3  ;;  %v7426_v30 = vmul.f32 0.7978846, %v7410_v20 }
0x23e9   :  { %9673 = vtanh.f32 %v7425_v59  ;;  %v7427_v5 = vmul.f32 0.7978846, %v7411_v62 }
0x23ea   :  { %v9664_v26 = vpop.eup %9663  ;;  %9675 = vtanh.f32 %v7426_v30 }
0x23eb   :  { %v9666_v13 = vpop.eup %9665  ;;  %v7452_v15 = vadd.f32 1.0, %v9664_v26  ;;  %9677 = vtanh.f32 %v7427_v5 }
0x23ec   :  { %v9668_v1 = vpop.eup %9667  ;;  %v7453_v44 = vadd.f32 1.0, %v9666_v13 }
0x23ed   :  { %v9670_v36 = vpop.eup %9669  ;;  %v7468_v12 = vmul.f32 0.5, %v7452_v15  ;;  %v7454_v51 = vadd.f32 1.0, %v9668_v1 }
0x23ee   :  { %v7455_v33 = vadd.f32 1.0, %v9670_v36  ;;  %v7469_v47 = vmul.f32 0.5, %v7453_v44 }
0x23ef   :  { %v7470_v27 = vmul.f32 0.5, %v7454_v51  ;;  %v7484_v11 = vmul.f32 %v7468_v12, %v12502_v10 }
0x23f0   :  { %v7471_v60 = vmul.f32 0.5, %v7455_v33  ;;  %v7485_v18 = vmul.f32 %v7469_v47, %v12505_v58 }
0x23f1   :  { %v7486_v14 = vmul.f32 %v7470_v27, %v12510_v28 }
0x23f2   :  { %v9672_v50 = vpop.eup %9671  ;;  %v7487_v31 = vmul.f32 %v7471_v60, %v12515_v53 }
0x23f3   :  { %v9674_v37 = vpop.eup %9673  ;;  %v7500_v0 = vpack.c.bf16 %v7486_v14, %v7484_v11  ;;  %v7456_v55 = vadd.f32 1.0, %v9672_v50 }
0x23f4   :  { %v9676_v48 = vpop.eup %9675  ;;  %v7501_v22 = vpack.c.bf16 %v7487_v31, %v7485_v18  ;;  %v7457_v52 = vadd.f32 1.0, %v9674_v37 }
0x23f5   :  { %v9678_v38 = vpop.eup %9677  ;;  %v7458_v35 = vadd.f32 1.0, %v9676_v48  ;;  %v7472_v46 = vmul.f32 0.5, %v7456_v55 }
0x23f6   :  { %7677 = vmatprep.mubr.bf16.mxu1 %v7501_v22  ;;  %v7459_v42 = vadd.f32 1.0, %v9678_v38  ;;  %v7473_v57 = vmul.f32 0.5, %v7457_v52 }
0x23f7   :  { %7678 = vmatmul.mubr.bf16.vlgmr.msra.gmra.mrb[180].mxu1 %v7500_v0  ;;  %v7474_v10 = vmul.f32 0.5, %v7458_v35  ;;  %v7488_v23 = vmul.f32 %v7472_v46, %v12527_v21 }
0x23f8   :  { %v7475_v28 = vmul.f32 0.5, %v7459_v42  ;;  %v7489_v53 = vmul.f32 %v7473_v57, %v12531_v25 }
0x23f9   :  { %v7490_v58 = vmul.f32 %v7474_v10, %v12537_v16 }
0x23fa   :  { %v7491_v8 = vmul.f32 %v7475_v28, %v12543_v41 }
0x23fb   :  { %v7502_v9 = vpack.c.bf16 %v7490_v58, %v7488_v23 }
0x23fc   :  { %v7503_v17 = vpack.c.bf16 %v7491_v8, %v7489_v53 }
0x23fe   :  { %7684 = vmatprep.mubr.bf16.mxu1 %v7503_v17 }
0x23ff   :  { %7685 = vmatmul.mubr.bf16.gmra.mrb[184].mxu1 %v7502_v9 }
0x2412   :  { %v7337_v39 = vpop.f32.mrb[188].mxu0 }
0x2413   :  { %v12566_v61 = vadd.f32 %v7337_v39, %v12496_v29  ;;  %v7339_v45 = vpop.f32.mrb[189].mxu0 }
0x2414   :  { %v12569_v2 = vadd.f32 %v7339_v45, %v12499_v7  ;;  %v7341_v49 = vpop.f32.mrb[190].mxu0 }
0x2415   :  { %v7364_v21 = vmul.f32 %v12566_v61, %v12566_v61  ;;  %v12574_v25 = vadd.f32 %v7341_v49, %v12496_v29  ;;  %v7343_v16 = vpop.f32.mrb[191].mxu0 }
0x2416   :  { %v7365_v41 = vmul.f32 %v12569_v2, %v12569_v2  ;;  %v12579_v63 = vadd.f32 %v7343_v16, %v12499_v7 }
0x2417   :  { %v7380_v24 = vmul.f32 %v7364_v21, %v12566_v61  ;;  %v7366_v6 = vmul.f32 %v12574_v25, %v12574_v25 }
0x2418   :  { %v7381_v19 = vmul.f32 %v7365_v41, %v12569_v2  ;;  %v7367_v4 = vmul.f32 %v12579_v63, %v12579_v63 }
0x2419   :  { %v7396_v40 = vmul.f32 0.044715, %v7380_v24  ;;  %v7382_v43 = vmul.f32 %v7366_v6, %v12574_v25 }
0x241a   :  { %v7397_v3 = vmul.f32 0.044715, %v7381_v19  ;;  %v7383_v20 = vmul.f32 %v7367_v4, %v12579_v63  ;;  %v7347_v59 = vpop.f32.mrb[192].mxu0 }
0x241b   :  { %v7412_v62 = vadd.f32 %v7396_v40, %v12566_v61  ;;  %v7398_v30 = vmul.f32 0.044715, %v7382_v43  ;;  %v12591_v5 = vadd.f32 %v7347_v59, %v12496_v29  ;;  %v7349_v26 = vpop.f32.mrb[193].mxu0 }
0x241c   :  { %v7413_v13 = vadd.f32 %v7397_v3, %v12569_v2  ;;  %v7399_v15 = vmul.f32 0.044715, %v7383_v20  ;;  %v12595_v1 = vadd.f32 %v7349_v26, %v12499_v7  ;;  %v7351_v44 = vpop.f32.mrb[194].mxu0 }
0x241d   :  { %v7428_v36 = vmul.f32 0.7978846, %v7412_v62  ;;  %v7414_v12 = vadd.f32 %v7398_v30, %v12574_v25  ;;  %v7368_v51 = vmul.f32 %v12591_v5, %v12591_v5  ;;  %v12601_v33 = vadd.f32 %v7351_v44, %v12496_v29  ;;  %v7353_v47 = vpop.f32.mrb[195].mxu0 }
0x241e   :  { %v7429_v27 = vmul.f32 0.7978846, %v7413_v13  ;;  %v7415_v60 = vadd.f32 %v7399_v15, %v12579_v63  ;;  %v7369_v11 = vmul.f32 %v12595_v1, %v12595_v1  ;;  %v12607_v14 = vadd.f32 %v7353_v47, %v12499_v7 }
0x241f   :  { %9679 = vtanh.f32 %v7428_v36  ;;  %v7430_v50 = vmul.f32 0.7978846, %v7414_v12  ;;  %v7384_v18 = vmul.f32 %v7368_v51, %v12591_v5  ;;  %v7370_v31 = vmul.f32 %v12601_v33, %v12601_v33 }
0x2420   :  { %9681 = vtanh.f32 %v7429_v27  ;;  %v7431_v29 = vmul.f32 0.7978846, %v7415_v60  ;;  %v7385_v37 = vmul.f32 %v7369_v11, %v12595_v1  ;;  %v7371_v0 = vmul.f32 %v12607_v14, %v12607_v14 }
0x2421   :  { %9683 = vtanh.f32 %v7430_v50  ;;  %v7400_v55 = vmul.f32 0.044715, %v7384_v18  ;;  %v7386_v48 = vmul.f32 %v7370_v31, %v12601_v33 }
0x2422   :  { %9685 = vtanh.f32 %v7431_v29  ;;  %v7401_v7 = vmul.f32 0.044715, %v7385_v37  ;;  %v7387_v22 = vmul.f32 %v7371_v0, %v12607_v14 }
0x2423   :  { %v7416_v52 = vadd.f32 %v7400_v55, %v12591_v5  ;;  %v7402_v38 = vmul.f32 0.044715, %v7386_v48 }
0x2424   :  { %v7417_v35 = vadd.f32 %v7401_v7, %v12595_v1  ;;  %v7403_v46 = vmul.f32 0.044715, %v7387_v22 }
0x2425   :  { %v7432_v42 = vmul.f32 0.7978846, %v7416_v52  ;;  %v7418_v57 = vadd.f32 %v7402_v38, %v12601_v33 }
0x2426   :  { %v7433_v10 = vmul.f32 0.7978846, %v7417_v35  ;;  %v7419_v28 = vadd.f32 %v7403_v46, %v12607_v14 }
0x2427   :  { %9687 = vtanh.f32 %v7432_v42  ;;  %v7434_v23 = vmul.f32 0.7978846, %v7418_v57 }
0x2428   :  { %9689 = vtanh.f32 %v7433_v10  ;;  %v7435_v58 = vmul.f32 0.7978846, %v7419_v28 }
0x2429   :  { %v9680_v53 = vpop.eup %9679  ;;  %9691 = vtanh.f32 %v7434_v23 }
0x242a   :  { %v9682_v8 = vpop.eup %9681  ;;  %9693 = vtanh.f32 %v7435_v58  ;;  %v7460_v9 = vadd.f32 1.0, %v9680_v53 }
0x242b   :  { %v9684_v17 = vpop.eup %9683  ;;  %v7461_v39 = vadd.f32 1.0, %v9682_v8 }
0x242c   :  { %v9686_v45 = vpop.eup %9685  ;;  %v7462_v49 = vadd.f32 1.0, %v9684_v17  ;;  %v7476_v21 = vmul.f32 0.5, %v7460_v9 }
0x242d   :  { %v7463_v16 = vadd.f32 1.0, %v9686_v45  ;;  %v7477_v41 = vmul.f32 0.5, %v7461_v39 }
0x242e   :  { %v7478_v24 = vmul.f32 0.5, %v7462_v49  ;;  %v7492_v19 = vmul.f32 %v7476_v21, %v12566_v61 }
0x242f   :  { %v7479_v6 = vmul.f32 0.5, %v7463_v16  ;;  %v7493_v43 = vmul.f32 %v7477_v41, %v12569_v2 }
0x2430   :  { %v7494_v4 = vmul.f32 %v7478_v24, %v12574_v25 }
0x2431   :  { %v9688_v40 = vpop.eup %9687  ;;  %v7495_v3 = vmul.f32 %v7479_v6, %v12579_v63 }
0x2432   :  { %v9690_v20 = vpop.eup %9689  ;;  %v7504_v59 = vpack.c.bf16 %v7494_v4, %v7492_v19  ;;  %v7464_v62 = vadd.f32 1.0, %v9688_v40 }
0x2433   :  { %v9692_v30 = vpop.eup %9691  ;;  %v7505_v26 = vpack.c.bf16 %v7495_v3, %v7493_v43  ;;  %v7465_v13 = vadd.f32 1.0, %v9690_v20 }
0x2434   :  { %v9694_v15 = vpop.eup %9693  ;;  %v7466_v44 = vadd.f32 1.0, %v9692_v30  ;;  %v7480_v36 = vmul.f32 0.5, %v7464_v62 }
0x2435   :  { %7691 = vmatprep.mubr.bf16.mxu1 %v7505_v26  ;;  %v7467_v12 = vadd.f32 1.0, %v9694_v15  ;;  %v7481_v51 = vmul.f32 0.5, %v7465_v13 }
0x2436   :  { %7692 = vmatmul.mubr.bf16.gmra.mrb[188].mxu1 %v7504_v59  ;;  %v7482_v61 = vmul.f32 0.5, %v7466_v44  ;;  %v7496_v47 = vmul.f32 %v7480_v36, %v12591_v5  ;;  %v8172_v5 = vld [vmem:[#allocation19 + $0x1] ss:$0 sm:$0xff] }
0x2437   :  { %v7483_v25 = vmul.f32 0.5, %v7467_v12  ;;  %v7497_v63 = vmul.f32 %v7481_v51, %v12595_v1 }
0x2438   :  { %v7498_v2 = vmul.f32 %v7482_v61, %v12601_v33 }
0x2439   :  { %v7499_v27 = vmul.f32 %v7483_v25, %v12607_v14 }
0x243a   :  { %v7506_v60 = vpack.c.bf16 %v7498_v2, %v7496_v47 }
0x243b   :  { %v7507_v11 = vpack.c.bf16 %v7499_v27, %v7497_v63  ;;  %v8189_v27 = vld [vmem:[#allocation20 + $0x1] ss:$0 sm:$0xff] }
0x243d   :  { %7698 = vmatprep.mubr.bf16.mxu1 %v7507_v11 }
0x243e   :  { %7699 = vmatmul.mubr.bf16.gmra.mrb[192].mxu1 %v7506_v60 }
0x24ca   :  { %v8467_v50 = vpop.f32.mrb[180].mxu1 }
0x24cb   :  { %v8468_v18 = vpop.f32.mrb[181].mxu1 }
0x24cc   :  { %v8469_v31 = vadd.f32 %v8468_v18, %v8467_v50  ;;  %v8470_v29 = vpop.f32.mrb[182].mxu1 }
0x24cd   :  { %v8471_v37 = vpop.f32.mrb[183].mxu1 }
0x24ce   :  { %v7680_v52 = vadd.f32 %v8469_v31, %v8172_v5  ;;  %v8190_v31 = vld [vmem:[#allocation22 + $0x1] ss:$0 sm:$0xff] }
0x24d0   :  { %v7706_v14 = vadd.f32 %v7680_v52, %v12423_v32 }
0x24d2   :  { %v8473_v0 = vpop.f32.mrb[184].mxu1 }
0x24d3   :  { %v8474_v55 = vpop.f32.mrb[185].mxu1 }
0x24d4   :  { %v8475_v48 = vadd.f32 %v8474_v55, %v8473_v0  ;;  %v8476_v7 = vpop.f32.mrb[186].mxu1 }
0x24d5   :  { %v8477_v22 = vpop.f32.mrb[187].mxu1 }
0x24d6   :  { %v7687_v33 = vadd.f32 %v8475_v48, %v8172_v5  ;;  %v8191_v48 = vld [vmem:[#allocation23] ss:$0 sm:$0xff] }
0x24d8   :  { %v7707_v1 = vadd.f32 %v7687_v33, %v12429_v56 }
0x24da   :  { %7716 = vadd.xlane.f32.xlu0 %v7707_v1 }
0x24de   :  { %7714 = vadd.xlane.f32.xlu0 %v7706_v14 }
0x2509   :  { %v8479_v38 = vpop.f32.mrb[188].mxu1 }
0x250a   :  { %v8480_v35 = vpop.f32.mrb[189].mxu1 }
0x250b   :  { %v8481_v46 = vadd.f32 %v8480_v35, %v8479_v38  ;;  %v8482_v42 = vpop.f32.mrb[190].mxu1 }
0x250c   :  { %v8483_v57 = vpop.f32.mrb[191].mxu1 }
0x250d   :  { %v7694_v10 = vadd.f32 %v8481_v46, %v8172_v5 }
0x250f   :  { %v7708_v28 = vadd.f32 %v7694_v10, %v12435_v54 }
0x2511   :  { %v8485_v23 = vpop.f32.mrb[192].mxu1  ;;  %7718 = vadd.xlane.f32.xlu1 %v7708_v28 }
0x2512   :  { %v8486_v58 = vpop.f32.mrb[193].mxu1 }
0x2513   :  { %v8487_v53 = vadd.f32 %v8486_v58, %v8485_v23  ;;  %v8488_v8 = vpop.f32.mrb[194].mxu1  ;;  %v8192_v58 = vld [vmem:[#allocation2] ss:$0 sm:$0xff] }
0x2514   :  { %v8489_v9 = vpop.f32.mrb[195].mxu1 }
0x2515   :  { %v7701_v17 = vadd.f32 %v8487_v53, %v8172_v5 }
0x2517   :  { %v7709_v56 = vadd.f32 %v7701_v17, %v12441_v34 }
0x2519   :  { %7720 = vadd.xlane.f32.xlu1 %v7709_v56 }
0x2567   :  { %v7717_v32 = vpop.xlane.xlu0 %7716 }
0x2568   :  { %v7723_v39 = vmul.f32 0.0078125, %v7717_v32 }
0x256a   :  { %v7727_v45 = vsub.f32 %v7707_v1, %v7723_v39 }
0x256b   :  { %v7715_v49 = vpop.xlane.xlu0 %7714 }
0x256c   :  { %v7722_v21 = vmul.f32 0.0078125, %v7715_v49  ;;  %v7731_v16 = vmul.f32 %v7727_v45, %v7727_v45 }
0x256e   :  { %v7726_v41 = vsub.f32 %v7706_v14, %v7722_v21  ;;  %7736 = vadd.xlane.f32.xlu0 %v7731_v16 }
0x2570   :  { %v7730_v24 = vmul.f32 %v7726_v41, %v7726_v41 }
0x2572   :  { %7734 = vadd.xlane.f32.xlu0 %v7730_v24 }
0x259e   :  { %v7719_v54 = vpop.xlane.xlu1 %7718 }
0x259f   :  { %v7724_v6 = vmul.f32 0.0078125, %v7719_v54 }
0x25a1   :  { %v7728_v19 = vsub.f32 %v7708_v28, %v7724_v6 }
0x25a3   :  { %v7732_v4 = vmul.f32 %v7728_v19, %v7728_v19 }
0x25a5   :  { %7738 = vadd.xlane.f32.xlu1 %v7732_v4 }
0x25a6   :  { %v7721_v40 = vpop.xlane.xlu1 %7720 }
0x25a7   :  { %v7725_v43 = vmul.f32 0.0078125, %v7721_v40 }
0x25a9   :  { %v7729_v3 = vsub.f32 %v7709_v56, %v7725_v43 }
0x25ab   :  { %v7733_v34 = vmul.f32 %v7729_v3, %v7729_v3 }
0x25ad   :  { %7740 = vadd.xlane.f32.xlu1 %v7733_v34 }
0x25fb   :  { %v7737_v20 = vpop.xlane.xlu0 %7736 }
0x25fc   :  { %v7743_v62 = vmul.f32 0.0078125, %v7737_v20 }
0x25fe   :  { %v7747_v26 = vadd.f32 1e-12, %v7743_v62 }
0x25ff   :  { %v7735_v59 = vpop.xlane.xlu0 %7734 }
0x2600   :  { %v7742_v30 = vmul.f32 0.0078125, %v7735_v59  ;;  %9695 = vrsqrt.f32 %v7747_v26 }
0x2602   :  { %v7746_v13 = vadd.f32 1e-12, %v7742_v30 }
0x2604   :  { %9697 = vrsqrt.f32 %v7746_v13 }
0x260a   :  { %v9696_v61 = vpop.eup %9695 }
0x260b   :  { %v7755_v2 = vmul.f32 %v9696_v61, %v7727_v45 }
0x260d   :  { %v7765_v50 = vmul.f32 %v8189_v27, %v7755_v2 }
0x260e   :  { %v9698_v47 = vpop.eup %9697 }
0x260f   :  { %v7754_v60 = vmul.f32 %v9698_v47, %v7726_v41  ;;  %v7775_v0 = vadd.f32 %v8190_v31, %v7765_v50 }
0x2611   :  { %v7764_v29 = vmul.f32 %v8189_v27, %v7754_v60  ;;  %v7786_v52 = vmul.f32 %v8191_v48, %v7775_v0 }
0x2613   :  { %v7774_v5 = vadd.f32 %v8190_v31, %v7764_v29  ;;  %v7793_v46 = vrot.slane %v7786_v52, 7 }
0x2615   :  { %v7785_v14 = vmul.f32 %v8191_v48, %v7774_v5 }
0x2617   :  { %v7795_v42 = vsel %vm7794_vm5, %v7793_v46, %v7785_v14 }
0x2632   :  { %v7739_v15 = vpop.xlane.xlu1 %7738 }
0x2633   :  { %v7744_v44 = vmul.f32 0.0078125, %v7739_v15 }
0x2635   :  { %v7748_v36 = vadd.f32 1e-12, %v7744_v44 }
0x2637   :  { %9699 = vrsqrt.f32 %v7748_v36 }
0x263a   :  { %v7741_v12 = vpop.xlane.xlu1 %7740 }
0x263b   :  { %v7745_v51 = vmul.f32 0.0078125, %v7741_v12 }
0x263d   :  { %v7749_v25 = vadd.f32 1e-12, %v7745_v51 }
0x263f   :  { %9701 = vrsqrt.f32 %v7749_v25 }
0x2641   :  { %v9700_v63 = vpop.eup %9699 }
0x2642   :  { %v7756_v11 = vmul.f32 %v9700_v63, %v7728_v19 }
0x2644   :  { %v7766_v18 = vmul.f32 %v8189_v27, %v7756_v11 }
0x2646   :  { %v7776_v37 = vadd.f32 %v8190_v31, %v7766_v18 }
0x2648   :  { %v7787_v22 = vmul.f32 %v8191_v48, %v7776_v37 }
0x2649   :  { %v9702_v55 = vpop.eup %9701 }
0x264a   :  { %v7757_v7 = vmul.f32 %v9702_v55, %v7729_v3  ;;  %v7796_v38 = vrot.slane %v7787_v22, 6 }
0x264c   :  { %v7767_v33 = vmul.f32 %v8189_v27, %v7757_v7  ;;  %v7798_v10 = vsel %vm7797_vm6, %v7796_v38, %v7795_v42 }
0x264e   :  { %v7777_v1 = vadd.f32 %v8190_v31, %v7767_v33 }
0x2650   :  { %v7788_v35 = vmul.f32 %v8191_v48, %v7777_v1 }
0x2652   :  { %v7799_v57 = vrot.slane %v7788_v35, 5 }
0x2654   :  { %v7801_v28 = vsel %vm7800_vm7, %v7799_v57, %v7798_v10 }
0x2655   :  { %v7803_v23 = vsel %vm383_vm1, %v7801_v28, 0.0 }
0x2656   :  { %7804 = vadd.xlane.f32.xlu0 %v7803_v23 }
0x26e3   :  { %v7805_v53 = vpop.xlane.xlu0 %7804 }
0x26e4   :  { %v7813_v8 = vadd.f32 %v8192_v58, %v7805_v53 }
0x26e6   :  { %7815 = vst.msk [vmem:[%s12665_s28] sm:$0xf] %vm7814_vm8, %v7813_v8 }
0x26e7   :  { %7820 = vsyncpa [#allocation4], 1 }
0x26e8   :  { %7821 = vsyncpa [#allocation6], 1 }
0x26e9   :  { %7822 = vsyncpa [#allocation9], 1 }
0x26ea   :  { %7823 = vsyncpa [#allocation12], 1 }
0x26eb   :  { %7824 = vsyncpa [#allocation15], 1 }
0x26ec   :  { %7825 = vsyncpa [#allocation18], 1 }
0x26ed   :  { %7826 = vsyncpa [#allocation21], 1 }
0x26ee   :  { %7827 = vsyncpa [#allocation24], 1 }

</bundles_post_ra>
